<compile_context>
chip_gen: v7x
topology: tpu7x:2x2x1
jax: 0.10.0
libtpu: 0.0.40
codegen_flags: <defaults>
</compile_context>

<pallas_src>
import functools

import jax
import jax.numpy as jnp
from jax import lax
from jax.experimental import pallas as pl
from jax.experimental.pallas import tpu as pltpu

BN_EPS = 1e-5
ACT_DTYPE = jnp.bfloat16          # MXU input dtype; all epilogue math is f32
TILE_M = 256                      # spatial-row tile for register-resident f32 acc


def _round_up(x, m):
    return (x + m - 1) // m * m


def _cparams():
    return pltpu.CompilerParams(
        dimension_semantics=("parallel",),
        vmem_limit_bytes=48 * 1024 * 1024,
    )


def _window_mask_f32(m0, mt, base, s_pad, wp, h, w):
    """f32 (mt, 1) mask: 1.0 on rows of the merged conv window that are real
    pixels of some image's padded (h+2, wp) grid, 0.0 elsewhere.  Computed
    in-kernel from an iota (no mask input / DMA); floor-based exact integer
    div/mod since all indices are < 2^24."""
    g = (lax.broadcasted_iota(jnp.int32, (mt, 1), 0) + (base + m0)).astype(jnp.float32)
    img = jnp.floor((g + 0.5) * (1.0 / s_pad))
    local = g - img * s_pad
    row = jnp.floor((local + 0.5) * (1.0 / wp))
    col = local - row * wp
    ok = (row >= 1.0) & (row <= float(h)) & (col >= 1.0) & (col <= float(w))
    return jnp.where(ok, 1.0, 0.0).astype(jnp.float32)


# ----------------------------------------------------------------------------
# Pallas kernels
# ----------------------------------------------------------------------------
def _stem_kernel(x_ref, w_ref, sh_ref, o_ref, *, H, W, S_pad, B):
    """3x3 stride-1 pad-1 conv (+ folded BN) + ReLU over a batch-block."""
    Wp = W + 2
    base = Wp + 1
    M_img = (H - 1) * Wp + W
    tail = S_pad - base - M_img
    Mtot = B * S_pad - base - tail
    Cout = w_ref.shape[2]
    # Zero only the outer pad rows; interior border rows are zeroed by the mask.
    o_ref[pl.ds(0, base), :] = jnp.zeros((base, Cout), o_ref.dtype)
    o_ref[pl.ds(base + Mtot, tail), :] = jnp.zeros((tail, Cout), o_ref.dtype)
    sh = sh_ref[...]
    for m0 in range(0, Mtot, TILE_M):
        mt = min(TILE_M, Mtot - m0)
        acc = jnp.zeros((mt, Cout), jnp.float32)
        for t in range(9):
            d = (t // 3 - 1) * Wp + (t % 3 - 1)
            acc = acc + jnp.dot(x_ref[pl.ds(base + d + m0, mt), :], w_ref[t],
                                preferred_element_type=jnp.float32)
        h = jnp.maximum(acc + sh, 0.0)
        h = h * _window_mask_f32(m0, mt, base, S_pad, Wp, H, W)
        o_ref[pl.ds(base + m0, mt), :] = h.astype(o_ref.dtype)


def _block_identity_kernel(x_ref, w1_ref, sh1_ref, w2_ref, sh2_ref, o_ref,
                           mid_ref, *, H, W, S_pad, B):
    """Fused BasicBlock, stride 1, identity shortcut (Cin == Cout)."""
    Wp = W + 2
    base = Wp + 1
    M_img = (H - 1) * Wp + W
    tail = S_pad - base - M_img
    Mtot = B * S_pad - base - tail
    C = w1_ref.shape[2]
    # conv1 (+ folded BN1) + relu -> mid (bf16 VMEM scratch)
    mid_ref[pl.ds(0, base), :] = jnp.zeros((base, C), mid_ref.dtype)
    mid_ref[pl.ds(base + Mtot, tail), :] = jnp.zeros((tail, C), mid_ref.dtype)
    sh1 = sh1_ref[...]
    for m0 in range(0, Mtot, TILE_M):
        mt = min(TILE_M, Mtot - m0)
        acc = jnp.zeros((mt, C), jnp.float32)
        for t in range(9):
            d = (t // 3 - 1) * Wp + (t % 3 - 1)
            acc = acc + jnp.dot(x_ref[pl.ds(base + d + m0, mt), :], w1_ref[t],
                                preferred_element_type=jnp.float32)
        h = jnp.maximum(acc + sh1, 0.0)
        h = h * _window_mask_f32(m0, mt, base, S_pad, Wp, H, W)
        mid_ref[pl.ds(base + m0, mt), :] = h.astype(mid_ref.dtype)
    # conv2 (+ folded BN2) + identity shortcut + relu -> o
    o_ref[pl.ds(0, base), :] = jnp.zeros((base, C), o_ref.dtype)
    o_ref[pl.ds(base + Mtot, tail), :] = jnp.zeros((tail, C), o_ref.dtype)
    sh2 = sh2_ref[...]
    for m0 in range(0, Mtot, TILE_M):
        mt = min(TILE_M, Mtot - m0)
        acc = jnp.zeros((mt, C), jnp.float32)
        for t in range(9):
            d = (t // 3 - 1) * Wp + (t % 3 - 1)
            acc = acc + jnp.dot(mid_ref[pl.ds(base + d + m0, mt), :], w2_ref[t],
                                preferred_element_type=jnp.float32)
        o = acc + sh2 + x_ref[pl.ds(base + m0, mt), :].astype(jnp.float32)
        o = jnp.maximum(o, 0.0)
        o = o * _window_mask_f32(m0, mt, base, S_pad, Wp, H, W)
        o_ref[pl.ds(base + m0, mt), :] = o.astype(o_ref.dtype)


def _block_down_kernel(x4_ref, w1_ref, sh1_ref, w2_ref, sh2_ref,
                       wsc_ref, shsc_ref, o_ref, mid_ref, *, Ho, Wo, So_pad, B):
    """Fused downsampling BasicBlock: stride-2 3x3 conv over 4 space-to-depth
    planes, stride-1 3x3 conv, 1x1 stride-2 projection shortcut; BN folded."""
    Wg = Wo + 2
    base = Wg + 1
    M_img = (Ho - 1) * Wg + Wo
    tail = So_pad - base - M_img
    Mtot = B * So_pad - base - tail
    Cout = w1_ref.shape[2]
    # conv1 (stride 2, via s2d planes) + relu -> mid
    mid_ref[pl.ds(0, base), :] = jnp.zeros((base, Cout), mid_ref.dtype)
    mid_ref[pl.ds(base + Mtot, tail), :] = jnp.zeros((tail, Cout), mid_ref.dtype)
    sh1 = sh1_ref[...]
    for m0 in range(0, Mtot, TILE_M):
        mt = min(TILE_M, Mtot - m0)
        acc = jnp.zeros((mt, Cout), jnp.float32)
        for t in range(9):
            i, j = t // 3, t % 3
            p = 2 * (i % 2) + (j % 2)
            d = (i // 2 - 1) * Wg + (j // 2 - 1)
            acc = acc + jnp.dot(x4_ref[p, pl.ds(base + d + m0, mt), :], w1_ref[t],
                                preferred_element_type=jnp.float32)
        h = jnp.maximum(acc + sh1, 0.0)
        h = h * _window_mask_f32(m0, mt, base, So_pad, Wg, Ho, Wo)
        mid_ref[pl.ds(base + m0, mt), :] = h.astype(mid_ref.dtype)
    # conv2 (stride 1) + projection shortcut (1x1 stride 2 == plane 3) + relu
    o_ref[pl.ds(0, base), :] = jnp.zeros((base, Cout), o_ref.dtype)
    o_ref[pl.ds(base + Mtot, tail), :] = jnp.zeros((tail, Cout), o_ref.dtype)
    sh2 = sh2_ref[...]
    shsc = shsc_ref[...]
    wsc = wsc_ref[...]
    for m0 in range(0, Mtot, TILE_M):
        mt = min(TILE_M, Mtot - m0)
        acc = jnp.zeros((mt, Cout), jnp.float32)
        for t in range(9):
            d = (t // 3 - 1) * Wg + (t % 3 - 1)
            acc = acc + jnp.dot(mid_ref[pl.ds(base + d + m0, mt), :], w2_ref[t],
                                preferred_element_type=jnp.float32)
        sc = jnp.dot(x4_ref[3, pl.ds(m0, mt), :], wsc,
                     preferred_element_type=jnp.float32)
        o = jnp.maximum(acc + sh2 + sc + shsc, 0.0)
        o = o * _window_mask_f32(m0, mt, base, So_pad, Wg, Ho, Wo)
        o_ref[pl.ds(base + m0, mt), :] = o.astype(o_ref.dtype)


def _head_kernel(x_ref, w_ref, b_ref, o_ref, *, Hf, Wf, S_pad, B):
    """F.avg_pool2d(4) + flatten + Linear for a whole batch-block at once."""
    Wp = Wf + 2
    C = x_ref.shape[1]
    Ph, Pw = Hf // 4, Wf // 4
    feats = []
    for bb in range(B):
        cells = []
        for ph in range(Ph):
            for pw in range(Pw):
                acc = jnp.zeros((1, C), jnp.float32)
                for a in range(4):
                    start = bb * S_pad + (4 * ph + 1 + a) * Wp + (4 * pw + 1)
                    acc = acc + jnp.sum(
                        x_ref[pl.ds(start, 4), :].astype(jnp.float32),
                        axis=0, keepdims=True)
                cells.append(acc * (1.0 / 16.0))
        feat = cells[0] if len(cells) == 1 else jnp.concatenate(cells, axis=1)
        feats.append(feat)
    fm = feats[0] if len(feats) == 1 else jnp.concatenate(feats, axis=0)  # [B, K]
    out = jnp.dot(fm.astype(w_ref.dtype), w_ref[...],
                  preferred_element_type=jnp.float32) + b_ref[...]
    o_ref[0] = out


# ----------------------------------------------------------------------------
# pallas_call wrappers
# ----------------------------------------------------------------------------
def stem_conv(x_flat, w_taps, shift, *, H, W, S_pad, B_blk, NB):
    Cin = x_flat.shape[1]
    Cout = w_taps.shape[2]
    kernel = functools.partial(_stem_kernel, H=H, W=W, S_pad=S_pad, B=B_blk)
    return pl.pallas_call(
        kernel,
        grid=(NB,),
        in_specs=[
            pl.BlockSpec((B_blk * S_pad, Cin), lambda n: (n, 0)),
            pl.BlockSpec(w_taps.shape, lambda n: (0, 0, 0)),
            pl.BlockSpec(shift.shape, lambda n: (0, 0)),
        ],
        out_specs=pl.BlockSpec((B_blk * S_pad, Cout), lambda n: (n, 0)),
        out_shape=jax.ShapeDtypeStruct((NB * B_blk * S_pad, Cout), ACT_DTYPE),
        compiler_params=_cparams(),
    )(x_flat, w_taps, shift)


def block_identity(x_flat, kp, *, H, W, S_pad, B_blk, NB):
    C = kp['w1'].shape[2]
    kernel = functools.partial(_block_identity_kernel, H=H, W=W, S_pad=S_pad, B=B_blk)
    return pl.pallas_call(
        kernel,
        grid=(NB,),
        in_specs=[
            pl.BlockSpec((B_blk * S_pad, C), lambda n: (n, 0)),
            pl.BlockSpec(kp['w1'].shape, lambda n: (0, 0, 0)),
            pl.BlockSpec(kp['sh1'].shape, lambda n: (0, 0)),
            pl.BlockSpec(kp['w2'].shape, lambda n: (0, 0, 0)),
            pl.BlockSpec(kp['sh2'].shape, lambda n: (0, 0)),
        ],
        out_specs=pl.BlockSpec((B_blk * S_pad, C), lambda n: (n, 0)),
        out_shape=jax.ShapeDtypeStruct((NB * B_blk * S_pad, C), ACT_DTYPE),
        scratch_shapes=[pltpu.VMEM((B_blk * S_pad, C), ACT_DTYPE)],
        compiler_params=_cparams(),
    )(x_flat, kp['w1'], kp['sh1'], kp['w2'], kp['sh2'])


def block_down(x_flat, kp, *, H, W, S_pad_in, So_pad, B_blk, NB, N_pad):
    Cin = x_flat.shape[1]
    Cout = kp['w1'].shape[2]
    Ho, Wo = H // 2, W // 2
    Wg = Wo + 2
    Sp = (Ho + 1) * Wg
    S = (H + 2) * (W + 2)
    # TODO(synk): space-to-depth is done in the XLA wrapper (extra HBM round trip);
    # ideally the producing kernel would emit this layout directly.
    xp = x_flat.reshape(N_pad, S_pad_in, Cin)[:, :S, :].reshape(N_pad, H + 2, W + 2, Cin)
    xp = jnp.pad(xp, ((0, 0), (0, 0), (0, 2), (0, 0)))
    x4 = xp.reshape(N_pad, (H + 2) // 2, 2, (W + 4) // 2, 2, Cin)
    x4 = x4.transpose(2, 4, 0, 1, 3, 5).reshape(4, N_pad, Sp, Cin)
    x4 = jnp.pad(x4, ((0, 0), (0, 0), (0, So_pad - Sp), (0, 0)))
    x4 = x4.reshape(4, N_pad * So_pad, Cin)

    kernel = functools.partial(_block_down_kernel, Ho=Ho, Wo=Wo, So_pad=So_pad, B=B_blk)
    return pl.pallas_call(
        kernel,
        grid=(NB,),
        in_specs=[
            pl.BlockSpec((4, B_blk * So_pad, Cin), lambda n: (0, n, 0)),
            pl.BlockSpec(kp['w1'].shape, lambda n: (0, 0, 0)),
            pl.BlockSpec(kp['sh1'].shape, lambda n: (0, 0)),
            pl.BlockSpec(kp['w2'].shape, lambda n: (0, 0, 0)),
            pl.BlockSpec(kp['sh2'].shape, lambda n: (0, 0)),
            pl.BlockSpec(kp['wsc'].shape, lambda n: (0, 0)),
            pl.BlockSpec(kp['shsc'].shape, lambda n: (0, 0)),
        ],
        out_specs=pl.BlockSpec((B_blk * So_pad, Cout), lambda n: (n, 0)),
        out_shape=jax.ShapeDtypeStruct((N_pad * So_pad, Cout), ACT_DTYPE),
        scratch_shapes=[pltpu.VMEM((B_blk * So_pad, Cout), ACT_DTYPE)],
        compiler_params=_cparams(),
    )(x4, kp['w1'], kp['sh1'], kp['w2'], kp['sh2'], kp['wsc'], kp['shsc'])


def head(x_flat, w_pad, b_pad, *, Hf, Wf, S_pad, B_blk, NB):
    C = x_flat.shape[1]
    NCp = w_pad.shape[1]
    kernel = functools.partial(_head_kernel, Hf=Hf, Wf=Wf, S_pad=S_pad, B=B_blk)
    return pl.pallas_call(
        kernel,
        grid=(NB,),
        in_specs=[
            pl.BlockSpec((B_blk * S_pad, C), lambda n: (n, 0)),
            pl.BlockSpec(w_pad.shape, lambda n: (0, 0)),
            pl.BlockSpec(b_pad.shape, lambda n: (0, 0)),
        ],
        out_specs=pl.BlockSpec((1, B_blk, NCp), lambda n: (n, 0, 0)),
        out_shape=jax.ShapeDtypeStruct((NB, B_blk, NCp), jnp.float32),
        compiler_params=_cparams(),
    )(x_flat, w_pad, b_pad)


# ----------------------------------------------------------------------------
# Parameter folding (once, outside kernels) + full forward pass
# ----------------------------------------------------------------------------
def _fold_bn(bn):
    g, b, m, v = bn
    scale = g / jnp.sqrt(v + BN_EPS)
    shift = b - m * scale
    return scale, shift


def _pad_shift(shift, cpad):
    return jnp.pad(shift.astype(jnp.float32), (0, cpad - shift.shape[0])).reshape(1, -1)


def _conv_taps_folded(w_oihw, scale, cin_pad, cout_pad):
    """OIHW 3x3 conv weight -> [9, cin_pad, cout_pad] bf16 taps with the BN
    scale folded into the output channels."""
    Cout, Cin, kh, kw = w_oihw.shape
    w = w_oihw * scale.reshape(-1, 1, 1, 1)
    w = jnp.transpose(w, (2, 3, 1, 0)).reshape(kh * kw, Cin, Cout)
    w = jnp.pad(w, ((0, 0), (0, cin_pad - Cin), (0, cout_pad - Cout)))
    return w.astype(ACT_DTYPE)


def resnet_forward(x_nchw, params, layer_cfg):
    N, Cin0, H, W = x_nchw.shape
    B_blk = N if N < 8 else 8
    N_pad = _round_up(N, B_blk)
    NB = N_pad // B_blk

    Cp_in = _round_up(Cin0, 128)
    Wp = W + 2
    S = (H + 2) * Wp
    S_pad = _round_up(S, 8)

    # NCHW -> padded-flat, lane-dense, channels-last bf16
    x = jnp.transpose(x_nchw, (0, 2, 3, 1)).astype(ACT_DTYPE)
    x = jnp.pad(x, ((0, N_pad - N), (1, 1), (1, 1), (0, Cp_in - Cin0)))
    x = x.reshape(N_pad, S, Cp_in)
    x = jnp.pad(x, ((0, 0), (0, S_pad - S), (0, 0))).reshape(N_pad * S_pad, Cp_in)

    # Stem: conv1 + bn1 (folded) + relu
    sc_stem, sh_stem = _fold_bn(params['bn1'])
    Cp64 = _round_up(64, 128)
    w_stem = _conv_taps_folded(params['conv1_w'], sc_stem, Cp_in, Cp64)
    out = stem_conv(x, w_stem, _pad_shift(sh_stem, Cp64),
                    H=H, W=W, S_pad=S_pad, B_blk=B_blk, NB=NB)

    # Residual stages: one fused pallas_call per BasicBlock
    in_planes, curH, curW, curC_pad, cur_S_pad = 64, H, W, Cp64, S_pad
    for (planes, stride), blocks in zip(layer_cfg, params['layers']):
        for bi, bp in enumerate(blocks):
            s = stride if bi == 0 else 1
            Cout_pad = _round_up(planes, 128)
            sc1, sh1 = _fold_bn(bp['bn1'])
            sc2, sh2 = _fold_bn(bp['bn2'])
            kp = dict(
                w1=_conv_taps_folded(bp['conv1_w'], sc1, curC_pad, Cout_pad),
                sh1=_pad_shift(sh1, Cout_pad),
                w2=_conv_taps_folded(bp['conv2_w'], sc2, Cout_pad, Cout_pad),
                sh2=_pad_shift(sh2, Cout_pad),
            )
            if s != 1 or in_planes != planes:
                # TODO(synk): projection shortcut only implemented for the
                # stride-2 downsampling blocks used by this architecture.
                assert s == 2, "stride-1 projection shortcut not supported"
                ssc, shsc = _fold_bn(bp['sc_bn'])
                wsc = jnp.transpose(bp['sc_w'][:, :, 0, 0] * ssc[:, None], (1, 0))
                wsc = jnp.pad(wsc, ((0, curC_pad - in_planes),
                                    (0, Cout_pad - planes)))
                kp['wsc'] = wsc.astype(ACT_DTYPE)
                kp['shsc'] = _pad_shift(shsc, Cout_pad)
                Ho, Wo = curH // 2, curW // 2
                So_pad = _round_up((Ho + 2) * (Wo + 2), 8)
                out = block_down(out, kp, H=curH, W=curW, S_pad_in=cur_S_pad,
                                 So_pad=So_pad, B_blk=B_blk, NB=NB, N_pad=N_pad)
                curH, curW, cur_S_pad = Ho, Wo, So_pad
            else:
                out = block_identity(out, kp, H=curH, W=curW,
                                     S_pad=cur_S_pad, B_blk=B_blk, NB=NB)
            in_planes = planes
            curC_pad = Cout_pad

    # Head: avg_pool2d(4) + flatten (NCHW order via weight permutation) + Linear
    C = in_planes
    Ph, Pw = curH // 4, curW // 4
    lw, lb = params['linear_w'], params['linear_b']
    ncls = lw.shape[0]
    ncp = _round_up(ncls, 128)
    w_perm = lw.reshape(ncls, C, Ph, Pw).transpose(2, 3, 1, 0)      # (Ph,Pw,C,ncls)
    w_perm = jnp.pad(w_perm, ((0, 0), (0, 0), (0, curC_pad - C), (0, ncp - ncls)))
    w_pad = w_perm.reshape(Ph * Pw * curC_pad, ncp).astype(ACT_DTYPE)
    b_pad = jnp.pad(lb.astype(jnp.float32), (0, ncp - ncls)).reshape(1, ncp)
    logits = head(out, w_pad, b_pad, Hf=curH, Wf=curW,
                  S_pad=cur_S_pad, B_blk=B_blk, NB=NB)
    return logits.reshape(NB * B_blk, ncp)[:N, :ncls]


# ----------------------------------------------------------------------------
# Pure-JAX reference (lax.conv) for the correctness check
# ----------------------------------------------------------------------------
def resnet_ref(x, params, layer_cfg):
    def conv(t, w, stride, pad):
        return lax.conv_general_dilated(t, w, (stride, stride),
                                        [(pad, pad), (pad, pad)],
                                        dimension_numbers=('NCHW', 'OIHW', 'NCHW'))

    def bn(t, p):
        g, b, m, v = p
        s = g / jnp.sqrt(v + BN_EPS)
        return t * s.reshape(1, -1, 1, 1) + (b - m * s).reshape(1, -1, 1, 1)

    relu = lambda t: jnp.maximum(t, 0.0)
    out = relu(bn(conv(x, params['conv1_w'], 1, 1), params['bn1']))
    in_planes = 64
    for (planes, stride), blocks in zip(layer_cfg, params['layers']):
        for bi, bp in enumerate(blocks):
            s = stride if bi == 0 else 1
            o = relu(bn(conv(out, bp['conv1_w'], s, 1), bp['bn1']))
            o = bn(conv(o, bp['conv2_w'], 1, 1), bp['bn2'])
            sc = bn(conv(out, bp['sc_w'], s, 0), bp['sc_bn']) \
                if (s != 1 or in_planes != planes) else out
            out = relu(o + sc)
            in_planes = planes
    N, C, H, W = out.shape
    out = out.reshape(N, C, H // 4, 4, W // 4, 4).mean(axis=(3, 5)).reshape(N, -1)
    return out @ params['linear_w'].T + params['linear_b']


# ----------------------------------------------------------------------------
# Deterministic parameter initialization
# ----------------------------------------------------------------------------
def make_conv_w(key, cout, cin, k):
    return jax.random.normal(key, (cout, cin, k, k), jnp.float32) / ((cin * k * k) ** 0.5)


def make_bn(key, c):
    k1, k2, k3, k4 = jax.random.split(key, 4)
    gamma = jax.random.uniform(k1, (c,), jnp.float32, 0.5, 1.5)
    beta = jax.random.normal(k2, (c,), jnp.float32) * 0.1
    mean = jax.random.normal(k3, (c,), jnp.float32) * 0.1
    var = jax.random.uniform(k4, (c,), jnp.float32, 0.5, 1.5)
    return (gamma, beta, mean, var)


def make_block_params(key, in_planes, planes, stride):
    ks = jax.random.split(key, 6)
    p = dict(conv1_w=make_conv_w(ks[0], planes, in_planes, 3),
             bn1=make_bn(ks[1], planes),
             conv2_w=make_conv_w(ks[2], planes, planes, 3),
             bn2=make_bn(ks[3], planes))
    if stride != 1 or in_planes != planes:
        p['sc_w'] = make_conv_w(ks[4], planes, in_planes, 1)
        p['sc_bn'] = make_bn(ks[5], planes)
    return p


def make_params(key, num_blocks, num_classes=10):
    cfg_all = [(64, 1), (128, 2), (256, 2), (512, 2)]
    layer_cfg = [cfg_all[i] for i, n in enumerate(num_blocks) if n > 0]
    keys = jax.random.split(key, 3 + len(layer_cfg))
    params = dict(conv1_w=make_conv_w(keys[0], 64, 3, 3), bn1=make_bn(keys[1], 64))
    in_planes, layers = 64, []
    for li, ((planes, stride), nb) in enumerate(
            zip(layer_cfg, [n for n in num_blocks if n > 0])):
        bkeys = jax.random.split(keys[3 + li], nb)
        blocks = []
        for bi in range(nb):
            s = stride if bi == 0 else 1
            blocks.append(make_block_params(bkeys[bi], in_planes, planes, s))
            in_planes = planes
        layers.append(blocks)
    params['layers'] = layers
    final_channels = layer_cfg[-1][0] if layer_cfg else 64
    kw, kb = jax.random.split(keys[2])
    params['linear_w'] = jax.random.normal(kw, (num_classes, final_channels),
                                           jnp.float32) / (final_channels ** 0.5)
    params['linear_b'] = jax.random.normal(kb, (num_classes,), jnp.float32) * 0.1
    return params, layer_cfg


# ----------------------------------------------------------------------------
if __name__ == "__main__":
    key = jax.random.PRNGKey(0)
    k_param, k_x = jax.random.split(key)

    NUM_BLOCKS = [1, 1]                  # layer1: 64 / stride 1, layer2: 128 / stride 2
    params, layer_cfg = make_params(k_param, NUM_BLOCKS, num_classes=10)
    layer_cfg = tuple(layer_cfg)

    # 8x8 input -> 4x4 after the stride-2 stage -> avg_pool2d(4) -> [N, 128] -> Linear
    x = jax.random.normal(k_x, (2, 3, 8, 8), jnp.float32)

    fwd = jax.jit(resnet_forward, static_argnums=2)
    out = jax.block_until_ready(fwd(x, params, layer_cfg))
    assert out.shape == (2, 10), out.shape

    ref = jax.block_until_ready(resnet_ref(x, params, layer_cfg))
    max_err = float(jnp.max(jnp.abs(out - ref)))
    # bf16 MXU inputs (f32 accumulation / epilogue) -> slightly looser tolerance.
    assert jnp.allclose(out, ref, rtol=5e-2, atol=1e-1), f"max abs diff {max_err}"

    print("KERNEL_OK")
</pallas_src>

<mosaic_0001>
module attributes {stable_mosaic.version = 11 : i64} {
  func.func @_stem_kernel(%arg0: i32, %arg1: memref<208x128xbf16, #tpu.memory_space<vmem>>, %arg2: memref<9x128x128xbf16, #tpu.memory_space<vmem>>, %arg3: memref<1x128xf32, #tpu.memory_space<vmem>>, %arg4: memref<208x128xbf16, #tpu.memory_space<vmem>>) attributes {dimension_semantics = [#tpu.dimension_semantics<parallel>], iteration_bounds = array<i64: 1>, scalar_prefetch = 0 : i64, scratch_operands = 0 : i64, tpu.core_type = #tpu.core_type<tc>, window_params = [{transform_indices = @transform_0, window_bounds = array<i64: 208, 128>}, {pipeline_mode = #tpu.pipeline_mode<synchronous>, transform_indices = @transform_1, window_bounds = array<i64: 9, 128, 128>}, {pipeline_mode = #tpu.pipeline_mode<synchronous>, transform_indices = @transform_2, window_bounds = array<i64: 1, 128>}, {transform_indices = @transform_3, window_bounds = array<i64: 208, 128>}]} {
    %cst = arith.constant 0.000000e+00 : bf16
    %0 = vector.broadcast %cst : bf16 to vector<11x128xbf16>
    %c0 = arith.constant 0 : index
    %c0_0 = arith.constant 0 : index
    %1 = vector.load %arg4[%c0, %c0_0] : memref<208x128xbf16, #tpu.memory_space<vmem>>, vector<11x128xbf16>
    tpu.vector_store %arg4[%c0, %c0_0], %0 {strides = array<i32>} : memref<208x128xbf16, #tpu.memory_space<vmem>>, vector<11x128xbf16>,
    %cst_1 = arith.constant 0.000000e+00 : bf16
    %2 = vector.broadcast %cst_1 : bf16 to vector<15x128xbf16>
    %c193 = arith.constant 193 : index
    %c0_2 = arith.constant 0 : index
    %3 = vector.load %arg4[%c193, %c0_2] : memref<208x128xbf16, #tpu.memory_space<vmem>>, vector<15x128xbf16>
    tpu.vector_store %arg4[%c193, %c0_2], %2 {strides = array<i32>} : memref<208x128xbf16, #tpu.memory_space<vmem>>, vector<15x128xbf16>,
    %c0_3 = arith.constant 0 : index
    %c0_4 = arith.constant 0 : index
    %4 = vector.load %arg3[%c0_3, %c0_4] : memref<1x128xf32, #tpu.memory_space<vmem>>, vector<1x128xf32>
    %cst_5 = arith.constant 0.000000e+00 : f32
    %5 = vector.broadcast %cst_5 : f32 to vector<182x128xf32>
    %c0_6 = arith.constant 0 : index
    %c0_7 = arith.constant 0 : index
    %6 = vector.load %arg1[%c0_6, %c0_7] : memref<208x128xbf16, #tpu.memory_space<vmem>>, vector<182x128xbf16>
    %c0_8 = arith.constant 0 : index
    %c0_9 = arith.constant 0 : index
    %c0_10 = arith.constant 0 : index
    %7 = vector.load %arg2[%c0_8, %c0_9, %c0_10] : memref<9x128x128xbf16, #tpu.memory_space<vmem>>, vector<1x128x128xbf16>
    %8 = vector.shape_cast %7 : vector<1x128x128xbf16> to vector<128x128xbf16>
    %cst_11 = arith.constant dense<0.000000e+00> : vector<182x128xf32>
    %9 = tpu.matmul %6, %8, %cst_11 {dimension_numbers = #tpu.dot_dimension_numbers<[1], [0], [0], [1], [0, 0, 1, 1], [], []>} : vector<182x128xbf16>, vector<128x128xbf16>, vector<182x128xf32> -> vector<182x128xf32>
    %10 = arith.addf %5, %9 : vector<182x128xf32>
    %c1 = arith.constant 1 : index
    %c0_12 = arith.constant 0 : index
    %11 = vector.load %arg1[%c1, %c0_12] : memref<208x128xbf16, #tpu.memory_space<vmem>>, vector<182x128xbf16>
    %c1_13 = arith.constant 1 : index
    %c0_14 = arith.constant 0 : index
    %c0_15 = arith.constant 0 : index
    %12 = vector.load %arg2[%c1_13, %c0_14, %c0_15] : memref<9x128x128xbf16, #tpu.memory_space<vmem>>, vector<1x128x128xbf16>
    %13 = vector.shape_cast %12 : vector<1x128x128xbf16> to vector<128x128xbf16>
    %cst_16 = arith.constant dense<0.000000e+00> : vector<182x128xf32>
    %14 = tpu.matmul %11, %13, %cst_16 {dimension_numbers = #tpu.dot_dimension_numbers<[1], [0], [0], [1], [0, 0, 1, 1], [], []>} : vector<182x128xbf16>, vector<128x128xbf16>, vector<182x128xf32> -> vector<182x128xf32>
    %15 = arith.addf %10, %14 : vector<182x128xf32>
    %c2 = arith.constant 2 : index
    %c0_17 = arith.constant 0 : index
    %16 = vector.load %arg1[%c2, %c0_17] : memref<208x128xbf16, #tpu.memory_space<vmem>>, vector<182x128xbf16>
    %c2_18 = arith.constant 2 : index
    %c0_19 = arith.constant 0 : index
    %c0_20 = arith.constant 0 : index
    %17 = vector.load %arg2[%c2_18, %c0_19, %c0_20] : memref<9x128x128xbf16, #tpu.memory_space<vmem>>, vector<1x128x128xbf16>
    %18 = vector.shape_cast %17 : vector<1x128x128xbf16> to vector<128x128xbf16>
    %cst_21 = arith.constant dense<0.000000e+00> : vector<182x128xf32>
    %19 = tpu.matmul %16, %18, %cst_21 {dimension_numbers = #tpu.dot_dimension_numbers<[1], [0], [0], [1], [0, 0, 1, 1], [], []>} : vector<182x128xbf16>, vector<128x128xbf16>, vector<182x128xf32> -> vector<182x128xf32>
    %20 = arith.addf %15, %19 : vector<182x128xf32>
    %c10 = arith.constant 10 : index
    %c0_22 = arith.constant 0 : index
    %21 = vector.load %arg1[%c10, %c0_22] : memref<208x128xbf16, #tpu.memory_space<vmem>>, vector<182x128xbf16>
    %c3 = arith.constant 3 : index
    %c0_23 = arith.constant 0 : index
    %c0_24 = arith.constant 0 : index
    %22 = vector.load %arg2[%c3, %c0_23, %c0_24] : memref<9x128x128xbf16, #tpu.memory_space<vmem>>, vector<1x128x128xbf16>
    %23 = vector.shape_cast %22 : vector<1x128x128xbf16> to vector<128x128xbf16>
    %cst_25 = arith.constant dense<0.000000e+00> : vector<182x128xf32>
    %24 = tpu.matmul %21, %23, %cst_25 {dimension_numbers = #tpu.dot_dimension_numbers<[1], [0], [0], [1], [0, 0, 1, 1], [], []>} : vector<182x128xbf16>, vector<128x128xbf16>, vector<182x128xf32> -> vector<182x128xf32>
    %25 = arith.addf %20, %24 : vector<182x128xf32>
    %c11 = arith.constant 11 : index
    %c0_26 = arith.constant 0 : index
    %26 = vector.load %arg1[%c11, %c0_26] : memref<208x128xbf16, #tpu.memory_space<vmem>>, vector<182x128xbf16>
    %c4 = arith.constant 4 : index
    %c0_27 = arith.constant 0 : index
    %c0_28 = arith.constant 0 : index
    %27 = vector.load %arg2[%c4, %c0_27, %c0_28] : memref<9x128x128xbf16, #tpu.memory_space<vmem>>, vector<1x128x128xbf16>
    %28 = vector.shape_cast %27 : vector<1x128x128xbf16> to vector<128x128xbf16>
    %cst_29 = arith.constant dense<0.000000e+00> : vector<182x128xf32>
    %29 = tpu.matmul %26, %28, %cst_29 {dimension_numbers = #tpu.dot_dimension_numbers<[1], [0], [0], [1], [0, 0, 1, 1], [], []>} : vector<182x128xbf16>, vector<128x128xbf16>, vector<182x128xf32> -> vector<182x128xf32>
    %30 = arith.addf %25, %29 : vector<182x128xf32>
    %c12 = arith.constant 12 : index
    %c0_30 = arith.constant 0 : index
    %31 = vector.load %arg1[%c12, %c0_30] : memref<208x128xbf16, #tpu.memory_space<vmem>>, vector<182x128xbf16>
    %c5 = arith.constant 5 : index
    %c0_31 = arith.constant 0 : index
    %c0_32 = arith.constant 0 : index
    %32 = vector.load %arg2[%c5, %c0_31, %c0_32] : memref<9x128x128xbf16, #tpu.memory_space<vmem>>, vector<1x128x128xbf16>
    %33 = vector.shape_cast %32 : vector<1x128x128xbf16> to vector<128x128xbf16>
    %cst_33 = arith.constant dense<0.000000e+00> : vector<182x128xf32>
    %34 = tpu.matmul %31, %33, %cst_33 {dimension_numbers = #tpu.dot_dimension_numbers<[1], [0], [0], [1], [0, 0, 1, 1], [], []>} : vector<182x128xbf16>, vector<128x128xbf16>, vector<182x128xf32> -> vector<182x128xf32>
    %35 = arith.addf %30, %34 : vector<182x128xf32>
    %c20 = arith.constant 20 : index
    %c0_34 = arith.constant 0 : index
    %36 = vector.load %arg1[%c20, %c0_34] : memref<208x128xbf16, #tpu.memory_space<vmem>>, vector<182x128xbf16>
    %c6 = arith.constant 6 : index
    %c0_35 = arith.constant 0 : index
    %c0_36 = arith.constant 0 : index
    %37 = vector.load %arg2[%c6, %c0_35, %c0_36] : memref<9x128x128xbf16, #tpu.memory_space<vmem>>, vector<1x128x128xbf16>
    %38 = vector.shape_cast %37 : vector<1x128x128xbf16> to vector<128x128xbf16>
    %cst_37 = arith.constant dense<0.000000e+00> : vector<182x128xf32>
    %39 = tpu.matmul %36, %38, %cst_37 {dimension_numbers = #tpu.dot_dimension_numbers<[1], [0], [0], [1], [0, 0, 1, 1], [], []>} : vector<182x128xbf16>, vector<128x128xbf16>, vector<182x128xf32> -> vector<182x128xf32>
    %40 = arith.addf %35, %39 : vector<182x128xf32>
    %c21 = arith.constant 21 : index
    %c0_38 = arith.constant 0 : index
    %41 = vector.load %arg1[%c21, %c0_38] : memref<208x128xbf16, #tpu.memory_space<vmem>>, vector<182x128xbf16>
    %c7 = arith.constant 7 : index
    %c0_39 = arith.constant 0 : index
    %c0_40 = arith.constant 0 : index
    %42 = vector.load %arg2[%c7, %c0_39, %c0_40] : memref<9x128x128xbf16, #tpu.memory_space<vmem>>, vector<1x128x128xbf16>
    %43 = vector.shape_cast %42 : vector<1x128x128xbf16> to vector<128x128xbf16>
    %cst_41 = arith.constant dense<0.000000e+00> : vector<182x128xf32>
    %44 = tpu.matmul %41, %43, %cst_41 {dimension_numbers = #tpu.dot_dimension_numbers<[1], [0], [0], [1], [0, 0, 1, 1], [], []>} : vector<182x128xbf16>, vector<128x128xbf16>, vector<182x128xf32> -> vector<182x128xf32>
    %45 = arith.addf %40, %44 : vector<182x128xf32>
    %c22 = arith.constant 22 : index
    %c0_42 = arith.constant 0 : index
    %46 = vector.load %arg1[%c22, %c0_42] : memref<208x128xbf16, #tpu.memory_space<vmem>>, vector<182x128xbf16>
    %c8 = arith.constant 8 : index
    %c0_43 = arith.constant 0 : index
    %c0_44 = arith.constant 0 : index
    %47 = vector.load %arg2[%c8, %c0_43, %c0_44] : memref<9x128x128xbf16, #tpu.memory_space<vmem>>, vector<1x128x128xbf16>
    %48 = vector.shape_cast %47 : vector<1x128x128xbf16> to vector<128x128xbf16>
    %cst_45 = arith.constant dense<0.000000e+00> : vector<182x128xf32>
    %49 = tpu.matmul %46, %48, %cst_45 {dimension_numbers = #tpu.dot_dimension_numbers<[1], [0], [0], [1], [0, 0, 1, 1], [], []>} : vector<182x128xbf16>, vector<128x128xbf16>, vector<182x128xf32> -> vector<182x128xf32>
    %50 = arith.addf %45, %49 : vector<182x128xf32>
    %51 = vector.broadcast %4 : vector<1x128xf32> to vector<182x128xf32>
    %52 = arith.addf %50, %51 : vector<182x128xf32>
    %cst_46 = arith.constant 0.000000e+00 : f32
    %53 = vector.broadcast %cst_46 : f32 to vector<182x128xf32>
    %54 = arith.maximumf %52, %53 : vector<182x128xf32>
    %55 = tpu.iota {dimensions = array<i32: 0>} : vector<182x1xi32>
    %c11_i32 = arith.constant 11 : i32
    %56 = vector.broadcast %c11_i32 : i32 to vector<182x1xi32>
    %57 = arith.addi %55, %56 : vector<182x1xi32>
    %58 = arith.sitofp %57 : vector<182x1xi32> to vector<182x1xf32>
    %cst_47 = arith.constant 5.000000e-01 : f32
    %59 = vector.broadcast %cst_47 : f32 to vector<182x1xf32>
    %60 = arith.addf %58, %59 : vector<182x1xf32>
    %cst_48 = arith.constant 0.00961538497 : f32
    %61 = vector.broadcast %cst_48 : f32 to vector<182x1xf32>
    %62 = arith.mulf %60, %61 : vector<182x1xf32>
    %63 = math.floor %62 : vector<182x1xf32>
    %cst_49 = arith.constant 1.040000e+02 : f32
    %64 = vector.broadcast %cst_49 : f32 to vector<182x1xf32>
    %65 = arith.mulf %63, %64 : vector<182x1xf32>
    %66 = arith.subf %58, %65 : vector<182x1xf32>
    %cst_50 = arith.constant 5.000000e-01 : f32
    %67 = vector.broadcast %cst_50 : f32 to vector<182x1xf32>
    %68 = arith.addf %66, %67 : vector<182x1xf32>
    %cst_51 = arith.constant 1.000000e-01 : f32
    %69 = vector.broadcast %cst_51 : f32 to vector<182x1xf32>
    %70 = arith.mulf %68, %69 : vector<182x1xf32>
    %71 = math.floor %70 : vector<182x1xf32>
    %cst_52 = arith.constant 1.000000e+01 : f32
    %72 = vector.broadcast %cst_52 : f32 to vector<182x1xf32>
    %73 = arith.mulf %71, %72 : vector<182x1xf32>
    %74 = arith.subf %66, %73 : vector<182x1xf32>
    %cst_53 = arith.constant 1.000000e+00 : f32
    %75 = vector.broadcast %cst_53 : f32 to vector<182x1xf32>
    %76 = arith.cmpf oge, %71, %75 : vector<182x1xf32>
    %cst_54 = arith.constant 8.000000e+00 : f32
    %77 = vector.broadcast %cst_54 : f32 to vector<182x1xf32>
    %78 = arith.cmpf ole, %71, %77 : vector<182x1xf32>
    %79 = arith.andi %76, %78 : vector<182x1xi1>
    %cst_55 = arith.constant 1.000000e+00 : f32
    %80 = vector.broadcast %cst_55 : f32 to vector<182x1xf32>
    %81 = arith.cmpf oge, %74, %80 : vector<182x1xf32>
    %82 = arith.andi %79, %81 : vector<182x1xi1>
    %cst_56 = arith.constant 8.000000e+00 : f32
    %83 = vector.broadcast %cst_56 : f32 to vector<182x1xf32>
    %84 = arith.cmpf ole, %74, %83 : vector<182x1xf32>
    %85 = arith.andi %82, %84 : vector<182x1xi1>
    %cst_57 = arith.constant 1.000000e+00 : f32
    %cst_58 = arith.constant 0.000000e+00 : f32
    %86 = vector.broadcast %cst_57 : f32 to vector<182x1xf32>
    %87 = vector.broadcast %cst_58 : f32 to vector<182x1xf32>
    %88 = arith.select %85, %86, %87 : vector<182x1xi1>, vector<182x1xf32>
    %89 = vector.broadcast %88 : vector<182x1xf32> to vector<182x128xf32>
    %90 = arith.mulf %54, %89 : vector<182x128xf32>
    %91 = arith.truncf %90 : vector<182x128xf32> to vector<182x128xbf16>
    %c11_59 = arith.constant 11 : index
    %c0_60 = arith.constant 0 : index
    %92 = vector.load %arg4[%c11_59, %c0_60] : memref<208x128xbf16, #tpu.memory_space<vmem>>, vector<182x128xbf16>
    tpu.vector_store %arg4[%c11_59, %c0_60], %91 {strides = array<i32>} : memref<208x128xbf16, #tpu.memory_space<vmem>>, vector<182x128xbf16>,
    return
  }
  func.func @transform_0(%arg0: i32) -> (i32, i32) {
    %c0_i32 = arith.constant 0 : i32
    %c0_i32_0 = arith.constant 0 : i32
    return %arg0, %c0_i32 : i32, i32
  }
  func.func @transform_1(%arg0: i32) -> (i32, i32, i32) {
    %c0_i32 = arith.constant 0 : i32
    %c0_i32_0 = arith.constant 0 : i32
    %c0_i32_1 = arith.constant 0 : i32
    %c0_i32_2 = arith.constant 0 : i32
    return %c0_i32, %c0_i32_0, %c0_i32_1 : i32, i32, i32
  }
  func.func @transform_2(%arg0: i32) -> (i32, i32) {
    %c0_i32 = arith.constant 0 : i32
    %c0_i32_0 = arith.constant 0 : i32
    %c0_i32_1 = arith.constant 0 : i32
    return %c0_i32, %c0_i32_0 : i32, i32
  }
  func.func @transform_3(%arg0: i32) -> (i32, i32) {
    %c0_i32 = arith.constant 0 : i32
    %c0_i32_0 = arith.constant 0 : i32
    return %arg0, %c0_i32 : i32, i32
  }
}

module attributes {stable_mosaic.version = 11 : i64} {
  func.func @_block_identity_kernel(%arg0: i32, %arg1: memref<208x128xbf16, #tpu.memory_space<vmem>>, %arg2: memref<9x128x128xbf16, #tpu.memory_space<vmem>>, %arg3: memref<1x128xf32, #tpu.memory_space<vmem>>, %arg4: memref<9x128x128xbf16, #tpu.memory_space<vmem>>, %arg5: memref<1x128xf32, #tpu.memory_space<vmem>>, %arg6: memref<208x128xbf16, #tpu.memory_space<vmem>>, %arg7: memref<208x128xbf16, #tpu.memory_space<vmem>>) attributes {dimension_semantics = [#tpu.dimension_semantics<parallel>], iteration_bounds = array<i64: 1>, scalar_prefetch = 0 : i64, scratch_operands = 1 : i64, tpu.core_type = #tpu.core_type<tc>, window_params = [{transform_indices = @transform_0, window_bounds = array<i64: 208, 128>}, {pipeline_mode = #tpu.pipeline_mode<synchronous>, transform_indices = @transform_1, window_bounds = array<i64: 9, 128, 128>}, {pipeline_mode = #tpu.pipeline_mode<synchronous>, transform_indices = @transform_2, window_bounds = array<i64: 1, 128>}, {pipeline_mode = #tpu.pipeline_mode<synchronous>, transform_indices = @transform_3, window_bounds = array<i64: 9, 128, 128>}, {pipeline_mode = #tpu.pipeline_mode<synchronous>, transform_indices = @transform_4, window_bounds = array<i64: 1, 128>}, {transform_indices = @transform_5, window_bounds = array<i64: 208, 128>}]} {
    %cst = arith.constant 0.000000e+00 : bf16
    %0 = vector.broadcast %cst : bf16 to vector<11x128xbf16>
    %c0 = arith.constant 0 : index
    %c0_0 = arith.constant 0 : index
    %1 = vector.load %arg7[%c0, %c0_0] : memref<208x128xbf16, #tpu.memory_space<vmem>>, vector<11x128xbf16>
    tpu.vector_store %arg7[%c0, %c0_0], %0 {strides = array<i32>} : memref<208x128xbf16, #tpu.memory_space<vmem>>, vector<11x128xbf16>,
    %cst_1 = arith.constant 0.000000e+00 : bf16
    %2 = vector.broadcast %cst_1 : bf16 to vector<15x128xbf16>
    %c193 = arith.constant 193 : index
    %c0_2 = arith.constant 0 : index
    %3 = vector.load %arg7[%c193, %c0_2] : memref<208x128xbf16, #tpu.memory_space<vmem>>, vector<15x128xbf16>
    tpu.vector_store %arg7[%c193, %c0_2], %2 {strides = array<i32>} : memref<208x128xbf16, #tpu.memory_space<vmem>>, vector<15x128xbf16>,
    %c0_3 = arith.constant 0 : index
    %c0_4 = arith.constant 0 : index
    %4 = vector.load %arg3[%c0_3, %c0_4] : memref<1x128xf32, #tpu.memory_space<vmem>>, vector<1x128xf32>
    %cst_5 = arith.constant 0.000000e+00 : f32
    %5 = vector.broadcast %cst_5 : f32 to vector<182x128xf32>
    %c0_6 = arith.constant 0 : index
    %c0_7 = arith.constant 0 : index
    %6 = vector.load %arg1[%c0_6, %c0_7] : memref<208x128xbf16, #tpu.memory_space<vmem>>, vector<182x128xbf16>
    %c0_8 = arith.constant 0 : index
    %c0_9 = arith.constant 0 : index
    %c0_10 = arith.constant 0 : index
    %7 = vector.load %arg2[%c0_8, %c0_9, %c0_10] : memref<9x128x128xbf16, #tpu.memory_space<vmem>>, vector<1x128x128xbf16>
    %8 = vector.shape_cast %7 : vector<1x128x128xbf16> to vector<128x128xbf16>
    %cst_11 = arith.constant dense<0.000000e+00> : vector<182x128xf32>
    %9 = tpu.matmul %6, %8, %cst_11 {dimension_numbers = #tpu.dot_dimension_numbers<[1], [0], [0], [1], [0, 0, 1, 1], [], []>} : vector<182x128xbf16>, vector<128x128xbf16>, vector<182x128xf32> -> vector<182x128xf32>
    %10 = arith.addf %5, %9 : vector<182x128xf32>
    %c1 = arith.constant 1 : index
    %c0_12 = arith.constant 0 : index
    %11 = vector.load %arg1[%c1, %c0_12] : memref<208x128xbf16, #tpu.memory_space<vmem>>, vector<182x128xbf16>
    %c1_13 = arith.constant 1 : index
    %c0_14 = arith.constant 0 : index
    %c0_15 = arith.constant 0 : index
    %12 = vector.load %arg2[%c1_13, %c0_14, %c0_15] : memref<9x128x128xbf16, #tpu.memory_space<vmem>>, vector<1x128x128xbf16>
    %13 = vector.shape_cast %12 : vector<1x128x128xbf16> to vector<128x128xbf16>
    %cst_16 = arith.constant dense<0.000000e+00> : vector<182x128xf32>
    %14 = tpu.matmul %11, %13, %cst_16 {dimension_numbers = #tpu.dot_dimension_numbers<[1], [0], [0], [1], [0, 0, 1, 1], [], []>} : vector<182x128xbf16>, vector<128x128xbf16>, vector<182x128xf32> -> vector<182x128xf32>
    %15 = arith.addf %10, %14 : vector<182x128xf32>
    %c2 = arith.constant 2 : index
    %c0_17 = arith.constant 0 : index
    %16 = vector.load %arg1[%c2, %c0_17] : memref<208x128xbf16, #tpu.memory_space<vmem>>, vector<182x128xbf16>
    %c2_18 = arith.constant 2 : index
    %c0_19 = arith.constant 0 : index
    %c0_20 = arith.constant 0 : index
    %17 = vector.load %arg2[%c2_18, %c0_19, %c0_20] : memref<9x128x128xbf16, #tpu.memory_space<vmem>>, vector<1x128x128xbf16>
    %18 = vector.shape_cast %17 : vector<1x128x128xbf16> to vector<128x128xbf16>
    %cst_21 = arith.constant dense<0.000000e+00> : vector<182x128xf32>
    %19 = tpu.matmul %16, %18, %cst_21 {dimension_numbers = #tpu.dot_dimension_numbers<[1], [0], [0], [1], [0, 0, 1, 1], [], []>} : vector<182x128xbf16>, vector<128x128xbf16>, vector<182x128xf32> -> vector<182x128xf32>
    %20 = arith.addf %15, %19 : vector<182x128xf32>
    %c10 = arith.constant 10 : index
    %c0_22 = arith.constant 0 : index
    %21 = vector.load %arg1[%c10, %c0_22] : memref<208x128xbf16, #tpu.memory_space<vmem>>, vector<182x128xbf16>
    %c3 = arith.constant 3 : index
    %c0_23 = arith.constant 0 : index
    %c0_24 = arith.constant 0 : index
    %22 = vector.load %arg2[%c3, %c0_23, %c0_24] : memref<9x128x128xbf16, #tpu.memory_space<vmem>>, vector<1x128x128xbf16>
    %23 = vector.shape_cast %22 : vector<1x128x128xbf16> to vector<128x128xbf16>
    %cst_25 = arith.constant dense<0.000000e+00> : vector<182x128xf32>
    %24 = tpu.matmul %21, %23, %cst_25 {dimension_numbers = #tpu.dot_dimension_numbers<[1], [0], [0], [1], [0, 0, 1, 1], [], []>} : vector<182x128xbf16>, vector<128x128xbf16>, vector<182x128xf32> -> vector<182x128xf32>
    %25 = arith.addf %20, %24 : vector<182x128xf32>
    %c11 = arith.constant 11 : index
    %c0_26 = arith.constant 0 : index
    %26 = vector.load %arg1[%c11, %c0_26] : memref<208x128xbf16, #tpu.memory_space<vmem>>, vector<182x128xbf16>
    %c4 = arith.constant 4 : index
    %c0_27 = arith.constant 0 : index
    %c0_28 = arith.constant 0 : index
    %27 = vector.load %arg2[%c4, %c0_27, %c0_28] : memref<9x128x128xbf16, #tpu.memory_space<vmem>>, vector<1x128x128xbf16>
    %28 = vector.shape_cast %27 : vector<1x128x128xbf16> to vector<128x128xbf16>
    %cst_29 = arith.constant dense<0.000000e+00> : vector<182x128xf32>
    %29 = tpu.matmul %26, %28, %cst_29 {dimension_numbers = #tpu.dot_dimension_numbers<[1], [0], [0], [1], [0, 0, 1, 1], [], []>} : vector<182x128xbf16>, vector<128x128xbf16>, vector<182x128xf32> -> vector<182x128xf32>
    %30 = arith.addf %25, %29 : vector<182x128xf32>
    %c12 = arith.constant 12 : index
    %c0_30 = arith.constant 0 : index
    %31 = vector.load %arg1[%c12, %c0_30] : memref<208x128xbf16, #tpu.memory_space<vmem>>, vector<182x128xbf16>
    %c5 = arith.constant 5 : index
    %c0_31 = arith.constant 0 : index
    %c0_32 = arith.constant 0 : index
    %32 = vector.load %arg2[%c5, %c0_31, %c0_32] : memref<9x128x128xbf16, #tpu.memory_space<vmem>>, vector<1x128x128xbf16>
    %33 = vector.shape_cast %32 : vector<1x128x128xbf16> to vector<128x128xbf16>
    %cst_33 = arith.constant dense<0.000000e+00> : vector<182x128xf32>
    %34 = tpu.matmul %31, %33, %cst_33 {dimension_numbers = #tpu.dot_dimension_numbers<[1], [0], [0], [1], [0, 0, 1, 1], [], []>} : vector<182x128xbf16>, vector<128x128xbf16>, vector<182x128xf32> -> vector<182x128xf32>
    %35 = arith.addf %30, %34 : vector<182x128xf32>
    %c20 = arith.constant 20 : index
    %c0_34 = arith.constant 0 : index
    %36 = vector.load %arg1[%c20, %c0_34] : memref<208x128xbf16, #tpu.memory_space<vmem>>, vector<182x128xbf16>
    %c6 = arith.constant 6 : index
    %c0_35 = arith.constant 0 : index
    %c0_36 = arith.constant 0 : index
    %37 = vector.load %arg2[%c6, %c0_35, %c0_36] : memref<9x128x128xbf16, #tpu.memory_space<vmem>>, vector<1x128x128xbf16>
    %38 = vector.shape_cast %37 : vector<1x128x128xbf16> to vector<128x128xbf16>
    %cst_37 = arith.constant dense<0.000000e+00> : vector<182x128xf32>
    %39 = tpu.matmul %36, %38, %cst_37 {dimension_numbers = #tpu.dot_dimension_numbers<[1], [0], [0], [1], [0, 0, 1, 1], [], []>} : vector<182x128xbf16>, vector<128x128xbf16>, vector<182x128xf32> -> vector<182x128xf32>
    %40 = arith.addf %35, %39 : vector<182x128xf32>
    %c21 = arith.constant 21 : index
    %c0_38 = arith.constant 0 : index
    %41 = vector.load %arg1[%c21, %c0_38] : memref<208x128xbf16, #tpu.memory_space<vmem>>, vector<182x128xbf16>
    %c7 = arith.constant 7 : index
    %c0_39 = arith.constant 0 : index
    %c0_40 = arith.constant 0 : index
    %42 = vector.load %arg2[%c7, %c0_39, %c0_40] : memref<9x128x128xbf16, #tpu.memory_space<vmem>>, vector<1x128x128xbf16>
    %43 = vector.shape_cast %42 : vector<1x128x128xbf16> to vector<128x128xbf16>
    %cst_41 = arith.constant dense<0.000000e+00> : vector<182x128xf32>
    %44 = tpu.matmul %41, %43, %cst_41 {dimension_numbers = #tpu.dot_dimension_numbers<[1], [0], [0], [1], [0, 0, 1, 1], [], []>} : vector<182x128xbf16>, vector<128x128xbf16>, vector<182x128xf32> -> vector<182x128xf32>
    %45 = arith.addf %40, %44 : vector<182x128xf32>
    %c22 = arith.constant 22 : index
    %c0_42 = arith.constant 0 : index
    %46 = vector.load %arg1[%c22, %c0_42] : memref<208x128xbf16, #tpu.memory_space<vmem>>, vector<182x128xbf16>
    %c8 = arith.constant 8 : index
    %c0_43 = arith.constant 0 : index
    %c0_44 = arith.constant 0 : index
    %47 = vector.load %arg2[%c8, %c0_43, %c0_44] : memref<9x128x128xbf16, #tpu.memory_space<vmem>>, vector<1x128x128xbf16>
    %48 = vector.shape_cast %47 : vector<1x128x128xbf16> to vector<128x128xbf16>
    %cst_45 = arith.constant dense<0.000000e+00> : vector<182x128xf32>
    %49 = tpu.matmul %46, %48, %cst_45 {dimension_numbers = #tpu.dot_dimension_numbers<[1], [0], [0], [1], [0, 0, 1, 1], [], []>} : vector<182x128xbf16>, vector<128x128xbf16>, vector<182x128xf32> -> vector<182x128xf32>
    %50 = arith.addf %45, %49 : vector<182x128xf32>
    %51 = vector.broadcast %4 : vector<1x128xf32> to vector<182x128xf32>
    %52 = arith.addf %50, %51 : vector<182x128xf32>
    %cst_46 = arith.constant 0.000000e+00 : f32
    %53 = vector.broadcast %cst_46 : f32 to vector<182x128xf32>
    %54 = arith.maximumf %52, %53 : vector<182x128xf32>
    %55 = tpu.iota {dimensions = array<i32: 0>} : vector<182x1xi32>
    %c11_i32 = arith.constant 11 : i32
    %56 = vector.broadcast %c11_i32 : i32 to vector<182x1xi32>
    %57 = arith.addi %55, %56 : vector<182x1xi32>
    %58 = arith.sitofp %57 : vector<182x1xi32> to vector<182x1xf32>
    %cst_47 = arith.constant 5.000000e-01 : f32
    %59 = vector.broadcast %cst_47 : f32 to vector<182x1xf32>
    %60 = arith.addf %58, %59 : vector<182x1xf32>
    %cst_48 = arith.constant 0.00961538497 : f32
    %61 = vector.broadcast %cst_48 : f32 to vector<182x1xf32>
    %62 = arith.mulf %60, %61 : vector<182x1xf32>
    %63 = math.floor %62 : vector<182x1xf32>
    %cst_49 = arith.constant 1.040000e+02 : f32
    %64 = vector.broadcast %cst_49 : f32 to vector<182x1xf32>
    %65 = arith.mulf %63, %64 : vector<182x1xf32>
    %66 = arith.subf %58, %65 : vector<182x1xf32>
    %cst_50 = arith.constant 5.000000e-01 : f32
    %67 = vector.broadcast %cst_50 : f32 to vector<182x1xf32>
    %68 = arith.addf %66, %67 : vector<182x1xf32>
    %cst_51 = arith.constant 1.000000e-01 : f32
    %69 = vector.broadcast %cst_51 : f32 to vector<182x1xf32>
    %70 = arith.mulf %68, %69 : vector<182x1xf32>
    %71 = math.floor %70 : vector<182x1xf32>
    %cst_52 = arith.constant 1.000000e+01 : f32
    %72 = vector.broadcast %cst_52 : f32 to vector<182x1xf32>
    %73 = arith.mulf %71, %72 : vector<182x1xf32>
    %74 = arith.subf %66, %73 : vector<182x1xf32>
    %cst_53 = arith.constant 1.000000e+00 : f32
    %75 = vector.broadcast %cst_53 : f32 to vector<182x1xf32>
    %76 = arith.cmpf oge, %71, %75 : vector<182x1xf32>
    %cst_54 = arith.constant 8.000000e+00 : f32
    %77 = vector.broadcast %cst_54 : f32 to vector<182x1xf32>
    %78 = arith.cmpf ole, %71, %77 : vector<182x1xf32>
    %79 = arith.andi %76, %78 : vector<182x1xi1>
    %cst_55 = arith.constant 1.000000e+00 : f32
    %80 = vector.broadcast %cst_55 : f32 to vector<182x1xf32>
    %81 = arith.cmpf oge, %74, %80 : vector<182x1xf32>
    %82 = arith.andi %79, %81 : vector<182x1xi1>
    %cst_56 = arith.constant 8.000000e+00 : f32
    %83 = vector.broadcast %cst_56 : f32 to vector<182x1xf32>
    %84 = arith.cmpf ole, %74, %83 : vector<182x1xf32>
    %85 = arith.andi %82, %84 : vector<182x1xi1>
    %cst_57 = arith.constant 1.000000e+00 : f32
    %cst_58 = arith.constant 0.000000e+00 : f32
    %86 = vector.broadcast %cst_57 : f32 to vector<182x1xf32>
    %87 = vector.broadcast %cst_58 : f32 to vector<182x1xf32>
    %88 = arith.select %85, %86, %87 : vector<182x1xi1>, vector<182x1xf32>
    %89 = vector.broadcast %88 : vector<182x1xf32> to vector<182x128xf32>
    %90 = arith.mulf %54, %89 : vector<182x128xf32>
    %91 = arith.truncf %90 : vector<182x128xf32> to vector<182x128xbf16>
    %c11_59 = arith.constant 11 : index
    %c0_60 = arith.constant 0 : index
    %92 = vector.load %arg7[%c11_59, %c0_60] : memref<208x128xbf16, #tpu.memory_space<vmem>>, vector<182x128xbf16>
    tpu.vector_store %arg7[%c11_59, %c0_60], %91 {strides = array<i32>} : memref<208x128xbf16, #tpu.memory_space<vmem>>, vector<182x128xbf16>,
    %cst_61 = arith.constant 0.000000e+00 : bf16
    %93 = vector.broadcast %cst_61 : bf16 to vector<11x128xbf16>
    %c0_62 = arith.constant 0 : index
    %c0_63 = arith.constant 0 : index
    %94 = vector.load %arg6[%c0_62, %c0_63] : memref<208x128xbf16, #tpu.memory_space<vmem>>, vector<11x128xbf16>
    tpu.vector_store %arg6[%c0_62, %c0_63], %93 {strides = array<i32>} : memref<208x128xbf16, #tpu.memory_space<vmem>>, vector<11x128xbf16>,
    %cst_64 = arith.constant 0.000000e+00 : bf16
    %95 = vector.broadcast %cst_64 : bf16 to vector<15x128xbf16>
    %c193_65 = arith.constant 193 : index
    %c0_66 = arith.constant 0 : index
    %96 = vector.load %arg6[%c193_65, %c0_66] : memref<208x128xbf16, #tpu.memory_space<vmem>>, vector<15x128xbf16>
    tpu.vector_store %arg6[%c193_65, %c0_66], %95 {strides = array<i32>} : memref<208x128xbf16, #tpu.memory_space<vmem>>, vector<15x128xbf16>,
    %c0_67 = arith.constant 0 : index
    %c0_68 = arith.constant 0 : index
    %97 = vector.load %arg5[%c0_67, %c0_68] : memref<1x128xf32, #tpu.memory_space<vmem>>, vector<1x128xf32>
    %cst_69 = arith.constant 0.000000e+00 : f32
    %98 = vector.broadcast %cst_69 : f32 to vector<182x128xf32>
    %c0_70 = arith.constant 0 : index
    %c0_71 = arith.constant 0 : index
    %99 = vector.load %arg7[%c0_70, %c0_71] : memref<208x128xbf16, #tpu.memory_space<vmem>>, vector<182x128xbf16>
    %c0_72 = arith.constant 0 : index
    %c0_73 = arith.constant 0 : index
    %c0_74 = arith.constant 0 : index
    %100 = vector.load %arg4[%c0_72, %c0_73, %c0_74] : memref<9x128x128xbf16, #tpu.memory_space<vmem>>, vector<1x128x128xbf16>
    %101 = vector.shape_cast %100 : vector<1x128x128xbf16> to vector<128x128xbf16>
    %cst_75 = arith.constant dense<0.000000e+00> : vector<182x128xf32>
    %102 = tpu.matmul %99, %101, %cst_75 {dimension_numbers = #tpu.dot_dimension_numbers<[1], [0], [0], [1], [0, 0, 1, 1], [], []>} : vector<182x128xbf16>, vector<128x128xbf16>, vector<182x128xf32> -> vector<182x128xf32>
    %103 = arith.addf %98, %102 : vector<182x128xf32>
    %c1_76 = arith.constant 1 : index
    %c0_77 = arith.constant 0 : index
    %104 = vector.load %arg7[%c1_76, %c0_77] : memref<208x128xbf16, #tpu.memory_space<vmem>>, vector<182x128xbf16>
    %c1_78 = arith.constant 1 : index
    %c0_79 = arith.constant 0 : index
    %c0_80 = arith.constant 0 : index
    %105 = vector.load %arg4[%c1_78, %c0_79, %c0_80] : memref<9x128x128xbf16, #tpu.memory_space<vmem>>, vector<1x128x128xbf16>
    %106 = vector.shape_cast %105 : vector<1x128x128xbf16> to vector<128x128xbf16>
    %cst_81 = arith.constant dense<0.000000e+00> : vector<182x128xf32>
    %107 = tpu.matmul %104, %106, %cst_81 {dimension_numbers = #tpu.dot_dimension_numbers<[1], [0], [0], [1], [0, 0, 1, 1], [], []>} : vector<182x128xbf16>, vector<128x128xbf16>, vector<182x128xf32> -> vector<182x128xf32>
    %108 = arith.addf %103, %107 : vector<182x128xf32>
    %c2_82 = arith.constant 2 : index
    %c0_83 = arith.constant 0 : index
    %109 = vector.load %arg7[%c2_82, %c0_83] : memref<208x128xbf16, #tpu.memory_space<vmem>>, vector<182x128xbf16>
    %c2_84 = arith.constant 2 : index
    %c0_85 = arith.constant 0 : index
    %c0_86 = arith.constant 0 : index
    %110 = vector.load %arg4[%c2_84, %c0_85, %c0_86] : memref<9x128x128xbf16, #tpu.memory_space<vmem>>, vector<1x128x128xbf16>
    %111 = vector.shape_cast %110 : vector<1x128x128xbf16> to vector<128x128xbf16>
    %cst_87 = arith.constant dense<0.000000e+00> : vector<182x128xf32>
    %112 = tpu.matmul %109, %111, %cst_87 {dimension_numbers = #tpu.dot_dimension_numbers<[1], [0], [0], [1], [0, 0, 1, 1], [], []>} : vector<182x128xbf16>, vector<128x128xbf16>, vector<182x128xf32> -> vector<182x128xf32>
    %113 = arith.addf %108, %112 : vector<182x128xf32>
    %c10_88 = arith.constant 10 : index
    %c0_89 = arith.constant 0 : index
    %114 = vector.load %arg7[%c10_88, %c0_89] : memref<208x128xbf16, #tpu.memory_space<vmem>>, vector<182x128xbf16>
    %c3_90 = arith.constant 3 : index
    %c0_91 = arith.constant 0 : index
    %c0_92 = arith.constant 0 : index
    %115 = vector.load %arg4[%c3_90, %c0_91, %c0_92] : memref<9x128x128xbf16, #tpu.memory_space<vmem>>, vector<1x128x128xbf16>
    %116 = vector.shape_cast %115 : vector<1x128x128xbf16> to vector<128x128xbf16>
    %cst_93 = arith.constant dense<0.000000e+00> : vector<182x128xf32>
    %117 = tpu.matmul %114, %116, %cst_93 {dimension_numbers = #tpu.dot_dimension_numbers<[1], [0], [0], [1], [0, 0, 1, 1], [], []>} : vector<182x128xbf16>, vector<128x128xbf16>, vector<182x128xf32> -> vector<182x128xf32>
    %118 = arith.addf %113, %117 : vector<182x128xf32>
    %c11_94 = arith.constant 11 : index
    %c0_95 = arith.constant 0 : index
    %119 = vector.load %arg7[%c11_94, %c0_95] : memref<208x128xbf16, #tpu.memory_space<vmem>>, vector<182x128xbf16>
    %c4_96 = arith.constant 4 : index
    %c0_97 = arith.constant 0 : index
    %c0_98 = arith.constant 0 : index
    %120 = vector.load %arg4[%c4_96, %c0_97, %c0_98] : memref<9x128x128xbf16, #tpu.memory_space<vmem>>, vector<1x128x128xbf16>
    %121 = vector.shape_cast %120 : vector<1x128x128xbf16> to vector<128x128xbf16>
    %cst_99 = arith.constant dense<0.000000e+00> : vector<182x128xf32>
    %122 = tpu.matmul %119, %121, %cst_99 {dimension_numbers = #tpu.dot_dimension_numbers<[1], [0], [0], [1], [0, 0, 1, 1], [], []>} : vector<182x128xbf16>, vector<128x128xbf16>, vector<182x128xf32> -> vector<182x128xf32>
    %123 = arith.addf %118, %122 : vector<182x128xf32>
    %c12_100 = arith.constant 12 : index
    %c0_101 = arith.constant 0 : index
    %124 = vector.load %arg7[%c12_100, %c0_101] : memref<208x128xbf16, #tpu.memory_space<vmem>>, vector<182x128xbf16>
    %c5_102 = arith.constant 5 : index
    %c0_103 = arith.constant 0 : index
    %c0_104 = arith.constant 0 : index
    %125 = vector.load %arg4[%c5_102, %c0_103, %c0_104] : memref<9x128x128xbf16, #tpu.memory_space<vmem>>, vector<1x128x128xbf16>
    %126 = vector.shape_cast %125 : vector<1x128x128xbf16> to vector<128x128xbf16>
    %cst_105 = arith.constant dense<0.000000e+00> : vector<182x128xf32>
    %127 = tpu.matmul %124, %126, %cst_105 {dimension_numbers = #tpu.dot_dimension_numbers<[1], [0], [0], [1], [0, 0, 1, 1], [], []>} : vector<182x128xbf16>, vector<128x128xbf16>, vector<182x128xf32> -> vector<182x128xf32>
    %128 = arith.addf %123, %127 : vector<182x128xf32>
    %c20_106 = arith.constant 20 : index
    %c0_107 = arith.constant 0 : index
    %129 = vector.load %arg7[%c20_106, %c0_107] : memref<208x128xbf16, #tpu.memory_space<vmem>>, vector<182x128xbf16>
    %c6_108 = arith.constant 6 : index
    %c0_109 = arith.constant 0 : index
    %c0_110 = arith.constant 0 : index
    %130 = vector.load %arg4[%c6_108, %c0_109, %c0_110] : memref<9x128x128xbf16, #tpu.memory_space<vmem>>, vector<1x128x128xbf16>
    %131 = vector.shape_cast %130 : vector<1x128x128xbf16> to vector<128x128xbf16>
    %cst_111 = arith.constant dense<0.000000e+00> : vector<182x128xf32>
    %132 = tpu.matmul %129, %131, %cst_111 {dimension_numbers = #tpu.dot_dimension_numbers<[1], [0], [0], [1], [0, 0, 1, 1], [], []>} : vector<182x128xbf16>, vector<128x128xbf16>, vector<182x128xf32> -> vector<182x128xf32>
    %133 = arith.addf %128, %132 : vector<182x128xf32>
    %c21_112 = arith.constant 21 : index
    %c0_113 = arith.constant 0 : index
    %134 = vector.load %arg7[%c21_112, %c0_113] : memref<208x128xbf16, #tpu.memory_space<vmem>>, vector<182x128xbf16>
    %c7_114 = arith.constant 7 : index
    %c0_115 = arith.constant 0 : index
    %c0_116 = arith.constant 0 : index
    %135 = vector.load %arg4[%c7_114, %c0_115, %c0_116] : memref<9x128x128xbf16, #tpu.memory_space<vmem>>, vector<1x128x128xbf16>
    %136 = vector.shape_cast %135 : vector<1x128x128xbf16> to vector<128x128xbf16>
    %cst_117 = arith.constant dense<0.000000e+00> : vector<182x128xf32>
    %137 = tpu.matmul %134, %136, %cst_117 {dimension_numbers = #tpu.dot_dimension_numbers<[1], [0], [0], [1], [0, 0, 1, 1], [], []>} : vector<182x128xbf16>, vector<128x128xbf16>, vector<182x128xf32> -> vector<182x128xf32>
    %138 = arith.addf %133, %137 : vector<182x128xf32>
    %c22_118 = arith.constant 22 : index
    %c0_119 = arith.constant 0 : index
    %139 = vector.load %arg7[%c22_118, %c0_119] : memref<208x128xbf16, #tpu.memory_space<vmem>>, vector<182x128xbf16>
    %c8_120 = arith.constant 8 : index
    %c0_121 = arith.constant 0 : index
    %c0_122 = arith.constant 0 : index
    %140 = vector.load %arg4[%c8_120, %c0_121, %c0_122] : memref<9x128x128xbf16, #tpu.memory_space<vmem>>, vector<1x128x128xbf16>
    %141 = vector.shape_cast %140 : vector<1x128x128xbf16> to vector<128x128xbf16>
    %cst_123 = arith.constant dense<0.000000e+00> : vector<182x128xf32>
    %142 = tpu.matmul %139, %141, %cst_123 {dimension_numbers = #tpu.dot_dimension_numbers<[1], [0], [0], [1], [0, 0, 1, 1], [], []>} : vector<182x128xbf16>, vector<128x128xbf16>, vector<182x128xf32> -> vector<182x128xf32>
    %143 = arith.addf %138, %142 : vector<182x128xf32>
    %144 = vector.broadcast %97 : vector<1x128xf32> to vector<182x128xf32>
    %145 = arith.addf %143, %144 : vector<182x128xf32>
    %c11_124 = arith.constant 11 : index
    %c0_125 = arith.constant 0 : index
    %146 = vector.load %arg1[%c11_124, %c0_125] : memref<208x128xbf16, #tpu.memory_space<vmem>>, vector<182x128xbf16>
    %147 = arith.extf %146 : vector<182x128xbf16> to vector<182x128xf32>
    %148 = arith.addf %145, %147 : vector<182x128xf32>
    %cst_126 = arith.constant 0.000000e+00 : f32
    %149 = vector.broadcast %cst_126 : f32 to vector<182x128xf32>
    %150 = arith.maximumf %148, %149 : vector<182x128xf32>
    %151 = tpu.iota {dimensions = array<i32: 0>} : vector<182x1xi32>
    %c11_i32_127 = arith.constant 11 : i32
    %152 = vector.broadcast %c11_i32_127 : i32 to vector<182x1xi32>
    %153 = arith.addi %151, %152 : vector<182x1xi32>
    %154 = arith.sitofp %153 : vector<182x1xi32> to vector<182x1xf32>
    %cst_128 = arith.constant 5.000000e-01 : f32
    %155 = vector.broadcast %cst_128 : f32 to vector<182x1xf32>
    %156 = arith.addf %154, %155 : vector<182x1xf32>
    %cst_129 = arith.constant 0.00961538497 : f32
    %157 = vector.broadcast %cst_129 : f32 to vector<182x1xf32>
    %158 = arith.mulf %156, %157 : vector<182x1xf32>
    %159 = math.floor %158 : vector<182x1xf32>
    %cst_130 = arith.constant 1.040000e+02 : f32
    %160 = vector.broadcast %cst_130 : f32 to vector<182x1xf32>
    %161 = arith.mulf %159, %160 : vector<182x1xf32>
    %162 = arith.subf %154, %161 : vector<182x1xf32>
    %cst_131 = arith.constant 5.000000e-01 : f32
    %163 = vector.broadcast %cst_131 : f32 to vector<182x1xf32>
    %164 = arith.addf %162, %163 : vector<182x1xf32>
    %cst_132 = arith.constant 1.000000e-01 : f32
    %165 = vector.broadcast %cst_132 : f32 to vector<182x1xf32>
    %166 = arith.mulf %164, %165 : vector<182x1xf32>
    %167 = math.floor %166 : vector<182x1xf32>
    %cst_133 = arith.constant 1.000000e+01 : f32
    %168 = vector.broadcast %cst_133 : f32 to vector<182x1xf32>
    %169 = arith.mulf %167, %168 : vector<182x1xf32>
    %170 = arith.subf %162, %169 : vector<182x1xf32>
    %cst_134 = arith.constant 1.000000e+00 : f32
    %171 = vector.broadcast %cst_134 : f32 to vector<182x1xf32>
    %172 = arith.cmpf oge, %167, %171 : vector<182x1xf32>
    %cst_135 = arith.constant 8.000000e+00 : f32
    %173 = vector.broadcast %cst_135 : f32 to vector<182x1xf32>
    %174 = arith.cmpf ole, %167, %173 : vector<182x1xf32>
    %175 = arith.andi %172, %174 : vector<182x1xi1>
    %cst_136 = arith.constant 1.000000e+00 : f32
    %176 = vector.broadcast %cst_136 : f32 to vector<182x1xf32>
    %177 = arith.cmpf oge, %170, %176 : vector<182x1xf32>
    %178 = arith.andi %175, %177 : vector<182x1xi1>
    %cst_137 = arith.constant 8.000000e+00 : f32
    %179 = vector.broadcast %cst_137 : f32 to vector<182x1xf32>
    %180 = arith.cmpf ole, %170, %179 : vector<182x1xf32>
    %181 = arith.andi %178, %180 : vector<182x1xi1>
    %cst_138 = arith.constant 1.000000e+00 : f32
    %cst_139 = arith.constant 0.000000e+00 : f32
    %182 = vector.broadcast %cst_138 : f32 to vector<182x1xf32>
    %183 = vector.broadcast %cst_139 : f32 to vector<182x1xf32>
    %184 = arith.select %181, %182, %183 : vector<182x1xi1>, vector<182x1xf32>
    %185 = vector.broadcast %184 : vector<182x1xf32> to vector<182x128xf32>
    %186 = arith.mulf %150, %185 : vector<182x128xf32>
    %187 = arith.truncf %186 : vector<182x128xf32> to vector<182x128xbf16>
    %c11_140 = arith.constant 11 : index
    %c0_141 = arith.constant 0 : index
    %188 = vector.load %arg6[%c11_140, %c0_141] : memref<208x128xbf16, #tpu.memory_space<vmem>>, vector<182x128xbf16>
    tpu.vector_store %arg6[%c11_140, %c0_141], %187 {strides = array<i32>} : memref<208x128xbf16, #tpu.memory_space<vmem>>, vector<182x128xbf16>,
    return
  }
  func.func @transform_0(%arg0: i32) -> (i32, i32) {
    %c0_i32 = arith.constant 0 : i32
    %c0_i32_0 = arith.constant 0 : i32
    return %arg0, %c0_i32 : i32, i32
  }
  func.func @transform_1(%arg0: i32) -> (i32, i32, i32) {
    %c0_i32 = arith.constant 0 : i32
    %c0_i32_0 = arith.constant 0 : i32
    %c0_i32_1 = arith.constant 0 : i32
    %c0_i32_2 = arith.constant 0 : i32
    return %c0_i32, %c0_i32_0, %c0_i32_1 : i32, i32, i32
  }
  func.func @transform_2(%arg0: i32) -> (i32, i32) {
    %c0_i32 = arith.constant 0 : i32
    %c0_i32_0 = arith.constant 0 : i32
    %c0_i32_1 = arith.constant 0 : i32
    return %c0_i32, %c0_i32_0 : i32, i32
  }
  func.func @transform_3(%arg0: i32) -> (i32, i32, i32) {
    %c0_i32 = arith.constant 0 : i32
    %c0_i32_0 = arith.constant 0 : i32
    %c0_i32_1 = arith.constant 0 : i32
    %c0_i32_2 = arith.constant 0 : i32
    return %c0_i32, %c0_i32_0, %c0_i32_1 : i32, i32, i32
  }
  func.func @transform_4(%arg0: i32) -> (i32, i32) {
    %c0_i32 = arith.constant 0 : i32
    %c0_i32_0 = arith.constant 0 : i32
    %c0_i32_1 = arith.constant 0 : i32
    return %c0_i32, %c0_i32_0 : i32, i32
  }
  func.func @transform_5(%arg0: i32) -> (i32, i32) {
    %c0_i32 = arith.constant 0 : i32
    %c0_i32_0 = arith.constant 0 : i32
    return %arg0, %c0_i32 : i32, i32
  }
}

module attributes {stable_mosaic.version = 11 : i64} {
  func.func @_block_down_kernel(%arg0: i32, %arg1: memref<4x80x128xbf16, #tpu.memory_space<vmem>>, %arg2: memref<9x128x128xbf16, #tpu.memory_space<vmem>>, %arg3: memref<1x128xf32, #tpu.memory_space<vmem>>, %arg4: memref<9x128x128xbf16, #tpu.memory_space<vmem>>, %arg5: memref<1x128xf32, #tpu.memory_space<vmem>>, %arg6: memref<128x128xbf16, #tpu.memory_space<vmem>>, %arg7: memref<1x128xf32, #tpu.memory_space<vmem>>, %arg8: memref<80x128xbf16, #tpu.memory_space<vmem>>, %arg9: memref<80x128xbf16, #tpu.memory_space<vmem>>) attributes {dimension_semantics = [#tpu.dimension_semantics<parallel>], iteration_bounds = array<i64: 1>, scalar_prefetch = 0 : i64, scratch_operands = 1 : i64, tpu.core_type = #tpu.core_type<tc>, window_params = [{transform_indices = @transform_0, window_bounds = array<i64: 4, 80, 128>}, {pipeline_mode = #tpu.pipeline_mode<synchronous>, transform_indices = @transform_1, window_bounds = array<i64: 9, 128, 128>}, {pipeline_mode = #tpu.pipeline_mode<synchronous>, transform_indices = @transform_2, window_bounds = array<i64: 1, 128>}, {pipeline_mode = #tpu.pipeline_mode<synchronous>, transform_indices = @transform_3, window_bounds = array<i64: 9, 128, 128>}, {pipeline_mode = #tpu.pipeline_mode<synchronous>, transform_indices = @transform_4, window_bounds = array<i64: 1, 128>}, {pipeline_mode = #tpu.pipeline_mode<synchronous>, transform_indices = @transform_5, window_bounds = array<i64: 128, 128>}, {pipeline_mode = #tpu.pipeline_mode<synchronous>, transform_indices = @transform_6, window_bounds = array<i64: 1, 128>}, {transform_indices = @transform_7, window_bounds = array<i64: 80, 128>}]} {
    %cst = arith.constant 0.000000e+00 : bf16
    %0 = vector.broadcast %cst : bf16 to vector<7x128xbf16>
    %c0 = arith.constant 0 : index
    %c0_0 = arith.constant 0 : index
    %1 = vector.load %arg9[%c0, %c0_0] : memref<80x128xbf16, #tpu.memory_space<vmem>>, vector<7x128xbf16>
    tpu.vector_store %arg9[%c0, %c0_0], %0 {strides = array<i32>} : memref<80x128xbf16, #tpu.memory_space<vmem>>, vector<7x128xbf16>,
    %cst_1 = arith.constant 0.000000e+00 : bf16
    %2 = vector.broadcast %cst_1 : bf16 to vector<11x128xbf16>
    %c69 = arith.constant 69 : index
    %c0_2 = arith.constant 0 : index
    %3 = vector.load %arg9[%c69, %c0_2] : memref<80x128xbf16, #tpu.memory_space<vmem>>, vector<11x128xbf16>
    tpu.vector_store %arg9[%c69, %c0_2], %2 {strides = array<i32>} : memref<80x128xbf16, #tpu.memory_space<vmem>>, vector<11x128xbf16>,
    %c0_3 = arith.constant 0 : index
    %c0_4 = arith.constant 0 : index
    %4 = vector.load %arg3[%c0_3, %c0_4] : memref<1x128xf32, #tpu.memory_space<vmem>>, vector<1x128xf32>
    %cst_5 = arith.constant 0.000000e+00 : f32
    %5 = vector.broadcast %cst_5 : f32 to vector<62x128xf32>
    %c0_6 = arith.constant 0 : index
    %c0_7 = arith.constant 0 : index
    %c0_8 = arith.constant 0 : index
    %6 = vector.load %arg1[%c0_6, %c0_7, %c0_8] : memref<4x80x128xbf16, #tpu.memory_space<vmem>>, vector<1x62x128xbf16>
    %7 = vector.shape_cast %6 : vector<1x62x128xbf16> to vector<62x128xbf16>
    %c0_9 = arith.constant 0 : index
    %c0_10 = arith.constant 0 : index
    %c0_11 = arith.constant 0 : index
    %8 = vector.load %arg2[%c0_9, %c0_10, %c0_11] : memref<9x128x128xbf16, #tpu.memory_space<vmem>>, vector<1x128x128xbf16>
    %9 = vector.shape_cast %8 : vector<1x128x128xbf16> to vector<128x128xbf16>
    %cst_12 = arith.constant dense<0.000000e+00> : vector<62x128xf32>
    %10 = tpu.matmul %7, %9, %cst_12 {dimension_numbers = #tpu.dot_dimension_numbers<[1], [0], [0], [1], [0, 0, 1, 1], [], []>} : vector<62x128xbf16>, vector<128x128xbf16>, vector<62x128xf32> -> vector<62x128xf32>
    %11 = arith.addf %5, %10 : vector<62x128xf32>
    %c1 = arith.constant 1 : index
    %c0_13 = arith.constant 0 : index
    %c0_14 = arith.constant 0 : index
    %12 = vector.load %arg1[%c1, %c0_13, %c0_14] : memref<4x80x128xbf16, #tpu.memory_space<vmem>>, vector<1x62x128xbf16>
    %13 = vector.shape_cast %12 : vector<1x62x128xbf16> to vector<62x128xbf16>
    %c1_15 = arith.constant 1 : index
    %c0_16 = arith.constant 0 : index
    %c0_17 = arith.constant 0 : index
    %14 = vector.load %arg2[%c1_15, %c0_16, %c0_17] : memref<9x128x128xbf16, #tpu.memory_space<vmem>>, vector<1x128x128xbf16>
    %15 = vector.shape_cast %14 : vector<1x128x128xbf16> to vector<128x128xbf16>
    %cst_18 = arith.constant dense<0.000000e+00> : vector<62x128xf32>
    %16 = tpu.matmul %13, %15, %cst_18 {dimension_numbers = #tpu.dot_dimension_numbers<[1], [0], [0], [1], [0, 0, 1, 1], [], []>} : vector<62x128xbf16>, vector<128x128xbf16>, vector<62x128xf32> -> vector<62x128xf32>
    %17 = arith.addf %11, %16 : vector<62x128xf32>
    %c0_19 = arith.constant 0 : index
    %c1_20 = arith.constant 1 : index
    %c0_21 = arith.constant 0 : index
    %18 = vector.load %arg1[%c0_19, %c1_20, %c0_21] : memref<4x80x128xbf16, #tpu.memory_space<vmem>>, vector<1x62x128xbf16>
    %19 = vector.shape_cast %18 : vector<1x62x128xbf16> to vector<62x128xbf16>
    %c2 = arith.constant 2 : index
    %c0_22 = arith.constant 0 : index
    %c0_23 = arith.constant 0 : index
    %20 = vector.load %arg2[%c2, %c0_22, %c0_23] : memref<9x128x128xbf16, #tpu.memory_space<vmem>>, vector<1x128x128xbf16>
    %21 = vector.shape_cast %20 : vector<1x128x128xbf16> to vector<128x128xbf16>
    %cst_24 = arith.constant dense<0.000000e+00> : vector<62x128xf32>
    %22 = tpu.matmul %19, %21, %cst_24 {dimension_numbers = #tpu.dot_dimension_numbers<[1], [0], [0], [1], [0, 0, 1, 1], [], []>} : vector<62x128xbf16>, vector<128x128xbf16>, vector<62x128xf32> -> vector<62x128xf32>
    %23 = arith.addf %17, %22 : vector<62x128xf32>
    %c2_25 = arith.constant 2 : index
    %c0_26 = arith.constant 0 : index
    %c0_27 = arith.constant 0 : index
    %24 = vector.load %arg1[%c2_25, %c0_26, %c0_27] : memref<4x80x128xbf16, #tpu.memory_space<vmem>>, vector<1x62x128xbf16>
    %25 = vector.shape_cast %24 : vector<1x62x128xbf16> to vector<62x128xbf16>
    %c3 = arith.constant 3 : index
    %c0_28 = arith.constant 0 : index
    %c0_29 = arith.constant 0 : index
    %26 = vector.load %arg2[%c3, %c0_28, %c0_29] : memref<9x128x128xbf16, #tpu.memory_space<vmem>>, vector<1x128x128xbf16>
    %27 = vector.shape_cast %26 : vector<1x128x128xbf16> to vector<128x128xbf16>
    %cst_30 = arith.constant dense<0.000000e+00> : vector<62x128xf32>
    %28 = tpu.matmul %25, %27, %cst_30 {dimension_numbers = #tpu.dot_dimension_numbers<[1], [0], [0], [1], [0, 0, 1, 1], [], []>} : vector<62x128xbf16>, vector<128x128xbf16>, vector<62x128xf32> -> vector<62x128xf32>
    %29 = arith.addf %23, %28 : vector<62x128xf32>
    %c3_31 = arith.constant 3 : index
    %c0_32 = arith.constant 0 : index
    %c0_33 = arith.constant 0 : index
    %30 = vector.load %arg1[%c3_31, %c0_32, %c0_33] : memref<4x80x128xbf16, #tpu.memory_space<vmem>>, vector<1x62x128xbf16>
    %31 = vector.shape_cast %30 : vector<1x62x128xbf16> to vector<62x128xbf16>
    %c4 = arith.constant 4 : index
    %c0_34 = arith.constant 0 : index
    %c0_35 = arith.constant 0 : index
    %32 = vector.load %arg2[%c4, %c0_34, %c0_35] : memref<9x128x128xbf16, #tpu.memory_space<vmem>>, vector<1x128x128xbf16>
    %33 = vector.shape_cast %32 : vector<1x128x128xbf16> to vector<128x128xbf16>
    %cst_36 = arith.constant dense<0.000000e+00> : vector<62x128xf32>
    %34 = tpu.matmul %31, %33, %cst_36 {dimension_numbers = #tpu.dot_dimension_numbers<[1], [0], [0], [1], [0, 0, 1, 1], [], []>} : vector<62x128xbf16>, vector<128x128xbf16>, vector<62x128xf32> -> vector<62x128xf32>
    %35 = arith.addf %29, %34 : vector<62x128xf32>
    %c2_37 = arith.constant 2 : index
    %c1_38 = arith.constant 1 : index
    %c0_39 = arith.constant 0 : index
    %36 = vector.load %arg1[%c2_37, %c1_38, %c0_39] : memref<4x80x128xbf16, #tpu.memory_space<vmem>>, vector<1x62x128xbf16>
    %37 = vector.shape_cast %36 : vector<1x62x128xbf16> to vector<62x128xbf16>
    %c5 = arith.constant 5 : index
    %c0_40 = arith.constant 0 : index
    %c0_41 = arith.constant 0 : index
    %38 = vector.load %arg2[%c5, %c0_40, %c0_41] : memref<9x128x128xbf16, #tpu.memory_space<vmem>>, vector<1x128x128xbf16>
    %39 = vector.shape_cast %38 : vector<1x128x128xbf16> to vector<128x128xbf16>
    %cst_42 = arith.constant dense<0.000000e+00> : vector<62x128xf32>
    %40 = tpu.matmul %37, %39, %cst_42 {dimension_numbers = #tpu.dot_dimension_numbers<[1], [0], [0], [1], [0, 0, 1, 1], [], []>} : vector<62x128xbf16>, vector<128x128xbf16>, vector<62x128xf32> -> vector<62x128xf32>
    %41 = arith.addf %35, %40 : vector<62x128xf32>
    %c0_43 = arith.constant 0 : index
    %c6 = arith.constant 6 : index
    %c0_44 = arith.constant 0 : index
    %42 = vector.load %arg1[%c0_43, %c6, %c0_44] : memref<4x80x128xbf16, #tpu.memory_space<vmem>>, vector<1x62x128xbf16>
    %43 = vector.shape_cast %42 : vector<1x62x128xbf16> to vector<62x128xbf16>
    %c6_45 = arith.constant 6 : index
    %c0_46 = arith.constant 0 : index
    %c0_47 = arith.constant 0 : index
    %44 = vector.load %arg2[%c6_45, %c0_46, %c0_47] : memref<9x128x128xbf16, #tpu.memory_space<vmem>>, vector<1x128x128xbf16>
    %45 = vector.shape_cast %44 : vector<1x128x128xbf16> to vector<128x128xbf16>
    %cst_48 = arith.constant dense<0.000000e+00> : vector<62x128xf32>
    %46 = tpu.matmul %43, %45, %cst_48 {dimension_numbers = #tpu.dot_dimension_numbers<[1], [0], [0], [1], [0, 0, 1, 1], [], []>} : vector<62x128xbf16>, vector<128x128xbf16>, vector<62x128xf32> -> vector<62x128xf32>
    %47 = arith.addf %41, %46 : vector<62x128xf32>
    %c1_49 = arith.constant 1 : index
    %c6_50 = arith.constant 6 : index
    %c0_51 = arith.constant 0 : index
    %48 = vector.load %arg1[%c1_49, %c6_50, %c0_51] : memref<4x80x128xbf16, #tpu.memory_space<vmem>>, vector<1x62x128xbf16>
    %49 = vector.shape_cast %48 : vector<1x62x128xbf16> to vector<62x128xbf16>
    %c7 = arith.constant 7 : index
    %c0_52 = arith.constant 0 : index
    %c0_53 = arith.constant 0 : index
    %50 = vector.load %arg2[%c7, %c0_52, %c0_53] : memref<9x128x128xbf16, #tpu.memory_space<vmem>>, vector<1x128x128xbf16>
    %51 = vector.shape_cast %50 : vector<1x128x128xbf16> to vector<128x128xbf16>
    %cst_54 = arith.constant dense<0.000000e+00> : vector<62x128xf32>
    %52 = tpu.matmul %49, %51, %cst_54 {dimension_numbers = #tpu.dot_dimension_numbers<[1], [0], [0], [1], [0, 0, 1, 1], [], []>} : vector<62x128xbf16>, vector<128x128xbf16>, vector<62x128xf32> -> vector<62x128xf32>
    %53 = arith.addf %47, %52 : vector<62x128xf32>
    %c0_55 = arith.constant 0 : index
    %c7_56 = arith.constant 7 : index
    %c0_57 = arith.constant 0 : index
    %54 = vector.load %arg1[%c0_55, %c7_56, %c0_57] : memref<4x80x128xbf16, #tpu.memory_space<vmem>>, vector<1x62x128xbf16>
    %55 = vector.shape_cast %54 : vector<1x62x128xbf16> to vector<62x128xbf16>
    %c8 = arith.constant 8 : index
    %c0_58 = arith.constant 0 : index
    %c0_59 = arith.constant 0 : index
    %56 = vector.load %arg2[%c8, %c0_58, %c0_59] : memref<9x128x128xbf16, #tpu.memory_space<vmem>>, vector<1x128x128xbf16>
    %57 = vector.shape_cast %56 : vector<1x128x128xbf16> to vector<128x128xbf16>
    %cst_60 = arith.constant dense<0.000000e+00> : vector<62x128xf32>
    %58 = tpu.matmul %55, %57, %cst_60 {dimension_numbers = #tpu.dot_dimension_numbers<[1], [0], [0], [1], [0, 0, 1, 1], [], []>} : vector<62x128xbf16>, vector<128x128xbf16>, vector<62x128xf32> -> vector<62x128xf32>
    %59 = arith.addf %53, %58 : vector<62x128xf32>
    %60 = vector.broadcast %4 : vector<1x128xf32> to vector<62x128xf32>
    %61 = arith.addf %59, %60 : vector<62x128xf32>
    %cst_61 = arith.constant 0.000000e+00 : f32
    %62 = vector.broadcast %cst_61 : f32 to vector<62x128xf32>
    %63 = arith.maximumf %61, %62 : vector<62x128xf32>
    %64 = tpu.iota {dimensions = array<i32: 0>} : vector<62x1xi32>
    %c7_i32 = arith.constant 7 : i32
    %65 = vector.broadcast %c7_i32 : i32 to vector<62x1xi32>
    %66 = arith.addi %64, %65 : vector<62x1xi32>
    %67 = arith.sitofp %66 : vector<62x1xi32> to vector<62x1xf32>
    %cst_62 = arith.constant 5.000000e-01 : f32
    %68 = vector.broadcast %cst_62 : f32 to vector<62x1xf32>
    %69 = arith.addf %67, %68 : vector<62x1xf32>
    %cst_63 = arith.constant 2.500000e-02 : f32
    %70 = vector.broadcast %cst_63 : f32 to vector<62x1xf32>
    %71 = arith.mulf %69, %70 : vector<62x1xf32>
    %72 = math.floor %71 : vector<62x1xf32>
    %cst_64 = arith.constant 4.000000e+01 : f32
    %73 = vector.broadcast %cst_64 : f32 to vector<62x1xf32>
    %74 = arith.mulf %72, %73 : vector<62x1xf32>
    %75 = arith.subf %67, %74 : vector<62x1xf32>
    %cst_65 = arith.constant 5.000000e-01 : f32
    %76 = vector.broadcast %cst_65 : f32 to vector<62x1xf32>
    %77 = arith.addf %75, %76 : vector<62x1xf32>
    %cst_66 = arith.constant 0.166666672 : f32
    %78 = vector.broadcast %cst_66 : f32 to vector<62x1xf32>
    %79 = arith.mulf %77, %78 : vector<62x1xf32>
    %80 = math.floor %79 : vector<62x1xf32>
    %cst_67 = arith.constant 6.000000e+00 : f32
    %81 = vector.broadcast %cst_67 : f32 to vector<62x1xf32>
    %82 = arith.mulf %80, %81 : vector<62x1xf32>
    %83 = arith.subf %75, %82 : vector<62x1xf32>
    %cst_68 = arith.constant 1.000000e+00 : f32
    %84 = vector.broadcast %cst_68 : f32 to vector<62x1xf32>
    %85 = arith.cmpf oge, %80, %84 : vector<62x1xf32>
    %cst_69 = arith.constant 4.000000e+00 : f32
    %86 = vector.broadcast %cst_69 : f32 to vector<62x1xf32>
    %87 = arith.cmpf ole, %80, %86 : vector<62x1xf32>
    %88 = arith.andi %85, %87 : vector<62x1xi1>
    %cst_70 = arith.constant 1.000000e+00 : f32
    %89 = vector.broadcast %cst_70 : f32 to vector<62x1xf32>
    %90 = arith.cmpf oge, %83, %89 : vector<62x1xf32>
    %91 = arith.andi %88, %90 : vector<62x1xi1>
    %cst_71 = arith.constant 4.000000e+00 : f32
    %92 = vector.broadcast %cst_71 : f32 to vector<62x1xf32>
    %93 = arith.cmpf ole, %83, %92 : vector<62x1xf32>
    %94 = arith.andi %91, %93 : vector<62x1xi1>
    %cst_72 = arith.constant 1.000000e+00 : f32
    %cst_73 = arith.constant 0.000000e+00 : f32
    %95 = vector.broadcast %cst_72 : f32 to vector<62x1xf32>
    %96 = vector.broadcast %cst_73 : f32 to vector<62x1xf32>
    %97 = arith.select %94, %95, %96 : vector<62x1xi1>, vector<62x1xf32>
    %98 = vector.broadcast %97 : vector<62x1xf32> to vector<62x128xf32>
    %99 = arith.mulf %63, %98 : vector<62x128xf32>
    %100 = arith.truncf %99 : vector<62x128xf32> to vector<62x128xbf16>
    %c7_74 = arith.constant 7 : index
    %c0_75 = arith.constant 0 : index
    %101 = vector.load %arg9[%c7_74, %c0_75] : memref<80x128xbf16, #tpu.memory_space<vmem>>, vector<62x128xbf16>
    tpu.vector_store %arg9[%c7_74, %c0_75], %100 {strides = array<i32>} : memref<80x128xbf16, #tpu.memory_space<vmem>>, vector<62x128xbf16>,
    %cst_76 = arith.constant 0.000000e+00 : bf16
    %102 = vector.broadcast %cst_76 : bf16 to vector<7x128xbf16>
    %c0_77 = arith.constant 0 : index
    %c0_78 = arith.constant 0 : index
    %103 = vector.load %arg8[%c0_77, %c0_78] : memref<80x128xbf16, #tpu.memory_space<vmem>>, vector<7x128xbf16>
    tpu.vector_store %arg8[%c0_77, %c0_78], %102 {strides = array<i32>} : memref<80x128xbf16, #tpu.memory_space<vmem>>, vector<7x128xbf16>,
    %cst_79 = arith.constant 0.000000e+00 : bf16
    %104 = vector.broadcast %cst_79 : bf16 to vector<11x128xbf16>
    %c69_80 = arith.constant 69 : index
    %c0_81 = arith.constant 0 : index
    %105 = vector.load %arg8[%c69_80, %c0_81] : memref<80x128xbf16, #tpu.memory_space<vmem>>, vector<11x128xbf16>
    tpu.vector_store %arg8[%c69_80, %c0_81], %104 {strides = array<i32>} : memref<80x128xbf16, #tpu.memory_space<vmem>>, vector<11x128xbf16>,
    %c0_82 = arith.constant 0 : index
    %c0_83 = arith.constant 0 : index
    %106 = vector.load %arg5[%c0_82, %c0_83] : memref<1x128xf32, #tpu.memory_space<vmem>>, vector<1x128xf32>
    %c0_84 = arith.constant 0 : index
    %c0_85 = arith.constant 0 : index
    %107 = vector.load %arg7[%c0_84, %c0_85] : memref<1x128xf32, #tpu.memory_space<vmem>>, vector<1x128xf32>
    %c0_86 = arith.constant 0 : index
    %c0_87 = arith.constant 0 : index
    %108 = vector.load %arg6[%c0_86, %c0_87] : memref<128x128xbf16, #tpu.memory_space<vmem>>, vector<128x128xbf16>
    %cst_88 = arith.constant 0.000000e+00 : f32
    %109 = vector.broadcast %cst_88 : f32 to vector<62x128xf32>
    %c0_89 = arith.constant 0 : index
    %c0_90 = arith.constant 0 : index
    %110 = vector.load %arg9[%c0_89, %c0_90] : memref<80x128xbf16, #tpu.memory_space<vmem>>, vector<62x128xbf16>
    %c0_91 = arith.constant 0 : index
    %c0_92 = arith.constant 0 : index
    %c0_93 = arith.constant 0 : index
    %111 = vector.load %arg4[%c0_91, %c0_92, %c0_93] : memref<9x128x128xbf16, #tpu.memory_space<vmem>>, vector<1x128x128xbf16>
    %112 = vector.shape_cast %111 : vector<1x128x128xbf16> to vector<128x128xbf16>
    %cst_94 = arith.constant dense<0.000000e+00> : vector<62x128xf32>
    %113 = tpu.matmul %110, %112, %cst_94 {dimension_numbers = #tpu.dot_dimension_numbers<[1], [0], [0], [1], [0, 0, 1, 1], [], []>} : vector<62x128xbf16>, vector<128x128xbf16>, vector<62x128xf32> -> vector<62x128xf32>
    %114 = arith.addf %109, %113 : vector<62x128xf32>
    %c1_95 = arith.constant 1 : index
    %c0_96 = arith.constant 0 : index
    %115 = vector.load %arg9[%c1_95, %c0_96] : memref<80x128xbf16, #tpu.memory_space<vmem>>, vector<62x128xbf16>
    %c1_97 = arith.constant 1 : index
    %c0_98 = arith.constant 0 : index
    %c0_99 = arith.constant 0 : index
    %116 = vector.load %arg4[%c1_97, %c0_98, %c0_99] : memref<9x128x128xbf16, #tpu.memory_space<vmem>>, vector<1x128x128xbf16>
    %117 = vector.shape_cast %116 : vector<1x128x128xbf16> to vector<128x128xbf16>
    %cst_100 = arith.constant dense<0.000000e+00> : vector<62x128xf32>
    %118 = tpu.matmul %115, %117, %cst_100 {dimension_numbers = #tpu.dot_dimension_numbers<[1], [0], [0], [1], [0, 0, 1, 1], [], []>} : vector<62x128xbf16>, vector<128x128xbf16>, vector<62x128xf32> -> vector<62x128xf32>
    %119 = arith.addf %114, %118 : vector<62x128xf32>
    %c2_101 = arith.constant 2 : index
    %c0_102 = arith.constant 0 : index
    %120 = vector.load %arg9[%c2_101, %c0_102] : memref<80x128xbf16, #tpu.memory_space<vmem>>, vector<62x128xbf16>
    %c2_103 = arith.constant 2 : index
    %c0_104 = arith.constant 0 : index
    %c0_105 = arith.constant 0 : index
    %121 = vector.load %arg4[%c2_103, %c0_104, %c0_105] : memref<9x128x128xbf16, #tpu.memory_space<vmem>>, vector<1x128x128xbf16>
    %122 = vector.shape_cast %121 : vector<1x128x128xbf16> to vector<128x128xbf16>
    %cst_106 = arith.constant dense<0.000000e+00> : vector<62x128xf32>
    %123 = tpu.matmul %120, %122, %cst_106 {dimension_numbers = #tpu.dot_dimension_numbers<[1], [0], [0], [1], [0, 0, 1, 1], [], []>} : vector<62x128xbf16>, vector<128x128xbf16>, vector<62x128xf32> -> vector<62x128xf32>
    %124 = arith.addf %119, %123 : vector<62x128xf32>
    %c6_107 = arith.constant 6 : index
    %c0_108 = arith.constant 0 : index
    %125 = vector.load %arg9[%c6_107, %c0_108] : memref<80x128xbf16, #tpu.memory_space<vmem>>, vector<62x128xbf16>
    %c3_109 = arith.constant 3 : index
    %c0_110 = arith.constant 0 : index
    %c0_111 = arith.constant 0 : index
    %126 = vector.load %arg4[%c3_109, %c0_110, %c0_111] : memref<9x128x128xbf16, #tpu.memory_space<vmem>>, vector<1x128x128xbf16>
    %127 = vector.shape_cast %126 : vector<1x128x128xbf16> to vector<128x128xbf16>
    %cst_112 = arith.constant dense<0.000000e+00> : vector<62x128xf32>
    %128 = tpu.matmul %125, %127, %cst_112 {dimension_numbers = #tpu.dot_dimension_numbers<[1], [0], [0], [1], [0, 0, 1, 1], [], []>} : vector<62x128xbf16>, vector<128x128xbf16>, vector<62x128xf32> -> vector<62x128xf32>
    %129 = arith.addf %124, %128 : vector<62x128xf32>
    %c7_113 = arith.constant 7 : index
    %c0_114 = arith.constant 0 : index
    %130 = vector.load %arg9[%c7_113, %c0_114] : memref<80x128xbf16, #tpu.memory_space<vmem>>, vector<62x128xbf16>
    %c4_115 = arith.constant 4 : index
    %c0_116 = arith.constant 0 : index
    %c0_117 = arith.constant 0 : index
    %131 = vector.load %arg4[%c4_115, %c0_116, %c0_117] : memref<9x128x128xbf16, #tpu.memory_space<vmem>>, vector<1x128x128xbf16>
    %132 = vector.shape_cast %131 : vector<1x128x128xbf16> to vector<128x128xbf16>
    %cst_118 = arith.constant dense<0.000000e+00> : vector<62x128xf32>
    %133 = tpu.matmul %130, %132, %cst_118 {dimension_numbers = #tpu.dot_dimension_numbers<[1], [0], [0], [1], [0, 0, 1, 1], [], []>} : vector<62x128xbf16>, vector<128x128xbf16>, vector<62x128xf32> -> vector<62x128xf32>
    %134 = arith.addf %129, %133 : vector<62x128xf32>
    %c8_119 = arith.constant 8 : index
    %c0_120 = arith.constant 0 : index
    %135 = vector.load %arg9[%c8_119, %c0_120] : memref<80x128xbf16, #tpu.memory_space<vmem>>, vector<62x128xbf16>
    %c5_121 = arith.constant 5 : index
    %c0_122 = arith.constant 0 : index
    %c0_123 = arith.constant 0 : index
    %136 = vector.load %arg4[%c5_121, %c0_122, %c0_123] : memref<9x128x128xbf16, #tpu.memory_space<vmem>>, vector<1x128x128xbf16>
    %137 = vector.shape_cast %136 : vector<1x128x128xbf16> to vector<128x128xbf16>
    %cst_124 = arith.constant dense<0.000000e+00> : vector<62x128xf32>
    %138 = tpu.matmul %135, %137, %cst_124 {dimension_numbers = #tpu.dot_dimension_numbers<[1], [0], [0], [1], [0, 0, 1, 1], [], []>} : vector<62x128xbf16>, vector<128x128xbf16>, vector<62x128xf32> -> vector<62x128xf32>
    %139 = arith.addf %134, %138 : vector<62x128xf32>
    %c12 = arith.constant 12 : index
    %c0_125 = arith.constant 0 : index
    %140 = vector.load %arg9[%c12, %c0_125] : memref<80x128xbf16, #tpu.memory_space<vmem>>, vector<62x128xbf16>
    %c6_126 = arith.constant 6 : index
    %c0_127 = arith.constant 0 : index
    %c0_128 = arith.constant 0 : index
    %141 = vector.load %arg4[%c6_126, %c0_127, %c0_128] : memref<9x128x128xbf16, #tpu.memory_space<vmem>>, vector<1x128x128xbf16>
    %142 = vector.shape_cast %141 : vector<1x128x128xbf16> to vector<128x128xbf16>
    %cst_129 = arith.constant dense<0.000000e+00> : vector<62x128xf32>
    %143 = tpu.matmul %140, %142, %cst_129 {dimension_numbers = #tpu.dot_dimension_numbers<[1], [0], [0], [1], [0, 0, 1, 1], [], []>} : vector<62x128xbf16>, vector<128x128xbf16>, vector<62x128xf32> -> vector<62x128xf32>
    %144 = arith.addf %139, %143 : vector<62x128xf32>
    %c13 = arith.constant 13 : index
    %c0_130 = arith.constant 0 : index
    %145 = vector.load %arg9[%c13, %c0_130] : memref<80x128xbf16, #tpu.memory_space<vmem>>, vector<62x128xbf16>
    %c7_131 = arith.constant 7 : index
    %c0_132 = arith.constant 0 : index
    %c0_133 = arith.constant 0 : index
    %146 = vector.load %arg4[%c7_131, %c0_132, %c0_133] : memref<9x128x128xbf16, #tpu.memory_space<vmem>>, vector<1x128x128xbf16>
    %147 = vector.shape_cast %146 : vector<1x128x128xbf16> to vector<128x128xbf16>
    %cst_134 = arith.constant dense<0.000000e+00> : vector<62x128xf32>
    %148 = tpu.matmul %145, %147, %cst_134 {dimension_numbers = #tpu.dot_dimension_numbers<[1], [0], [0], [1], [0, 0, 1, 1], [], []>} : vector<62x128xbf16>, vector<128x128xbf16>, vector<62x128xf32> -> vector<62x128xf32>
    %149 = arith.addf %144, %148 : vector<62x128xf32>
    %c14 = arith.constant 14 : index
    %c0_135 = arith.constant 0 : index
    %150 = vector.load %arg9[%c14, %c0_135] : memref<80x128xbf16, #tpu.memory_space<vmem>>, vector<62x128xbf16>
    %c8_136 = arith.constant 8 : index
    %c0_137 = arith.constant 0 : index
    %c0_138 = arith.constant 0 : index
    %151 = vector.load %arg4[%c8_136, %c0_137, %c0_138] : memref<9x128x128xbf16, #tpu.memory_space<vmem>>, vector<1x128x128xbf16>
    %152 = vector.shape_cast %151 : vector<1x128x128xbf16> to vector<128x128xbf16>
    %cst_139 = arith.constant dense<0.000000e+00> : vector<62x128xf32>
    %153 = tpu.matmul %150, %152, %cst_139 {dimension_numbers = #tpu.dot_dimension_numbers<[1], [0], [0], [1], [0, 0, 1, 1], [], []>} : vector<62x128xbf16>, vector<128x128xbf16>, vector<62x128xf32> -> vector<62x128xf32>
    %154 = arith.addf %149, %153 : vector<62x128xf32>
    %c3_140 = arith.constant 3 : index
    %c0_141 = arith.constant 0 : index
    %c0_142 = arith.constant 0 : index
    %155 = vector.load %arg1[%c3_140, %c0_141, %c0_142] : memref<4x80x128xbf16, #tpu.memory_space<vmem>>, vector<1x62x128xbf16>
    %156 = vector.shape_cast %155 : vector<1x62x128xbf16> to vector<62x128xbf16>
    %cst_143 = arith.constant dense<0.000000e+00> : vector<62x128xf32>
    %157 = tpu.matmul %156, %108, %cst_143 {dimension_numbers = #tpu.dot_dimension_numbers<[1], [0], [0], [1], [0, 0, 1, 1], [], []>} : vector<62x128xbf16>, vector<128x128xbf16>, vector<62x128xf32> -> vector<62x128xf32>
    %158 = vector.broadcast %106 : vector<1x128xf32> to vector<62x128xf32>
    %159 = arith.addf %154, %158 : vector<62x128xf32>
    %160 = arith.addf %159, %157 : vector<62x128xf32>
    %161 = vector.broadcast %107 : vector<1x128xf32> to vector<62x128xf32>
    %162 = arith.addf %160, %161 : vector<62x128xf32>
    %cst_144 = arith.constant 0.000000e+00 : f32
    %163 = vector.broadcast %cst_144 : f32 to vector<62x128xf32>
    %164 = arith.maximumf %162, %163 : vector<62x128xf32>
    %165 = tpu.iota {dimensions = array<i32: 0>} : vector<62x1xi32>
    %c7_i32_145 = arith.constant 7 : i32
    %166 = vector.broadcast %c7_i32_145 : i32 to vector<62x1xi32>
    %167 = arith.addi %165, %166 : vector<62x1xi32>
    %168 = arith.sitofp %167 : vector<62x1xi32> to vector<62x1xf32>
    %cst_146 = arith.constant 5.000000e-01 : f32
    %169 = vector.broadcast %cst_146 : f32 to vector<62x1xf32>
    %170 = arith.addf %168, %169 : vector<62x1xf32>
    %cst_147 = arith.constant 2.500000e-02 : f32
    %171 = vector.broadcast %cst_147 : f32 to vector<62x1xf32>
    %172 = arith.mulf %170, %171 : vector<62x1xf32>
    %173 = math.floor %172 : vector<62x1xf32>
    %cst_148 = arith.constant 4.000000e+01 : f32
    %174 = vector.broadcast %cst_148 : f32 to vector<62x1xf32>
    %175 = arith.mulf %173, %174 : vector<62x1xf32>
    %176 = arith.subf %168, %175 : vector<62x1xf32>
    %cst_149 = arith.constant 5.000000e-01 : f32
    %177 = vector.broadcast %cst_149 : f32 to vector<62x1xf32>
    %178 = arith.addf %176, %177 : vector<62x1xf32>
    %cst_150 = arith.constant 0.166666672 : f32
    %179 = vector.broadcast %cst_150 : f32 to vector<62x1xf32>
    %180 = arith.mulf %178, %179 : vector<62x1xf32>
    %181 = math.floor %180 : vector<62x1xf32>
    %cst_151 = arith.constant 6.000000e+00 : f32
    %182 = vector.broadcast %cst_151 : f32 to vector<62x1xf32>
    %183 = arith.mulf %181, %182 : vector<62x1xf32>
    %184 = arith.subf %176, %183 : vector<62x1xf32>
    %cst_152 = arith.constant 1.000000e+00 : f32
    %185 = vector.broadcast %cst_152 : f32 to vector<62x1xf32>
    %186 = arith.cmpf oge, %181, %185 : vector<62x1xf32>
    %cst_153 = arith.constant 4.000000e+00 : f32
    %187 = vector.broadcast %cst_153 : f32 to vector<62x1xf32>
    %188 = arith.cmpf ole, %181, %187 : vector<62x1xf32>
    %189 = arith.andi %186, %188 : vector<62x1xi1>
    %cst_154 = arith.constant 1.000000e+00 : f32
    %190 = vector.broadcast %cst_154 : f32 to vector<62x1xf32>
    %191 = arith.cmpf oge, %184, %190 : vector<62x1xf32>
    %192 = arith.andi %189, %191 : vector<62x1xi1>
    %cst_155 = arith.constant 4.000000e+00 : f32
    %193 = vector.broadcast %cst_155 : f32 to vector<62x1xf32>
    %194 = arith.cmpf ole, %184, %193 : vector<62x1xf32>
    %195 = arith.andi %192, %194 : vector<62x1xi1>
    %cst_156 = arith.constant 1.000000e+00 : f32
    %cst_157 = arith.constant 0.000000e+00 : f32
    %196 = vector.broadcast %cst_156 : f32 to vector<62x1xf32>
    %197 = vector.broadcast %cst_157 : f32 to vector<62x1xf32>
    %198 = arith.select %195, %196, %197 : vector<62x1xi1>, vector<62x1xf32>
    %199 = vector.broadcast %198 : vector<62x1xf32> to vector<62x128xf32>
    %200 = arith.mulf %164, %199 : vector<62x128xf32>
    %201 = arith.truncf %200 : vector<62x128xf32> to vector<62x128xbf16>
    %c7_158 = arith.constant 7 : index
    %c0_159 = arith.constant 0 : index
    %202 = vector.load %arg8[%c7_158, %c0_159] : memref<80x128xbf16, #tpu.memory_space<vmem>>, vector<62x128xbf16>
    tpu.vector_store %arg8[%c7_158, %c0_159], %201 {strides = array<i32>} : memref<80x128xbf16, #tpu.memory_space<vmem>>, vector<62x128xbf16>,
    return
  }
  func.func @transform_0(%arg0: i32) -> (i32, i32, i32) {
    %c0_i32 = arith.constant 0 : i32
    %c0_i32_0 = arith.constant 0 : i32
    %c0_i32_1 = arith.constant 0 : i32
    return %c0_i32, %arg0, %c0_i32_0 : i32, i32, i32
  }
  func.func @transform_1(%arg0: i32) -> (i32, i32, i32) {
    %c0_i32 = arith.constant 0 : i32
    %c0_i32_0 = arith.constant 0 : i32
    %c0_i32_1 = arith.constant 0 : i32
    %c0_i32_2 = arith.constant 0 : i32
    return %c0_i32, %c0_i32_0, %c0_i32_1 : i32, i32, i32
  }
  func.func @transform_2(%arg0: i32) -> (i32, i32) {
    %c0_i32 = arith.constant 0 : i32
    %c0_i32_0 = arith.constant 0 : i32
    %c0_i32_1 = arith.constant 0 : i32
    return %c0_i32, %c0_i32_0 : i32, i32
  }
  func.func @transform_3(%arg0: i32) -> (i32, i32, i32) {
    %c0_i32 = arith.constant 0 : i32
    %c0_i32_0 = arith.constant 0 : i32
    %c0_i32_1 = arith.constant 0 : i32
    %c0_i32_2 = arith.constant 0 : i32
    return %c0_i32, %c0_i32_0, %c0_i32_1 : i32, i32, i32
  }
  func.func @transform_4(%arg0: i32) -> (i32, i32) {
    %c0_i32 = arith.constant 0 : i32
    %c0_i32_0 = arith.constant 0 : i32
    %c0_i32_1 = arith.constant 0 : i32
    return %c0_i32, %c0_i32_0 : i32, i32
  }
  func.func @transform_5(%arg0: i32) -> (i32, i32) {
    %c0_i32 = arith.constant 0 : i32
    %c0_i32_0 = arith.constant 0 : i32
    %c0_i32_1 = arith.constant 0 : i32
    return %c0_i32, %c0_i32_0 : i32, i32
  }
  func.func @transform_6(%arg0: i32) -> (i32, i32) {
    %c0_i32 = arith.constant 0 : i32
    %c0_i32_0 = arith.constant 0 : i32
    %c0_i32_1 = arith.constant 0 : i32
    return %c0_i32, %c0_i32_0 : i32, i32
  }
  func.func @transform_7(%arg0: i32) -> (i32, i32) {
    %c0_i32 = arith.constant 0 : i32
    %c0_i32_0 = arith.constant 0 : i32
    return %arg0, %c0_i32 : i32, i32
  }
}

module attributes {stable_mosaic.version = 11 : i64} {
  func.func @_head_kernel(%arg0: i32, %arg1: memref<80x128xbf16, #tpu.memory_space<vmem>>, %arg2: memref<128x128xbf16, #tpu.memory_space<vmem>>, %arg3: memref<1x128xf32, #tpu.memory_space<vmem>>, %arg4: memref<1x2x128xf32, #tpu.memory_space<vmem>>) attributes {dimension_semantics = [#tpu.dimension_semantics<parallel>], iteration_bounds = array<i64: 1>, scalar_prefetch = 0 : i64, scratch_operands = 0 : i64, tpu.core_type = #tpu.core_type<tc>, window_params = [{transform_indices = @transform_0, window_bounds = array<i64: 80, 128>}, {pipeline_mode = #tpu.pipeline_mode<synchronous>, transform_indices = @transform_1, window_bounds = array<i64: 128, 128>}, {pipeline_mode = #tpu.pipeline_mode<synchronous>, transform_indices = @transform_2, window_bounds = array<i64: 1, 128>}, {transform_indices = @transform_3, window_bounds = array<i64: 1, 2, 128>}]} {
    %cst = arith.constant 0.000000e+00 : f32
    %0 = vector.broadcast %cst : f32 to vector<1x128xf32>
    %c7 = arith.constant 7 : index
    %c0 = arith.constant 0 : index
    %1 = vector.load %arg1[%c7, %c0] : memref<80x128xbf16, #tpu.memory_space<vmem>>, vector<4x128xbf16>
    %2 = arith.extf %1 : vector<4x128xbf16> to vector<4x128xf32>
    %cst_0 = arith.constant dense<0.000000e+00> : vector<128xf32>
    %3 = vector.multi_reduction <add>, %2, %cst_0 [0] : vector<4x128xf32> to vector<128xf32>
    %4 = vector.shape_cast %3 : vector<128xf32> to vector<1x128xf32>
    %5 = arith.addf %0, %4 : vector<1x128xf32>
    %c13 = arith.constant 13 : index
    %c0_1 = arith.constant 0 : index
    %6 = vector.load %arg1[%c13, %c0_1] : memref<80x128xbf16, #tpu.memory_space<vmem>>, vector<4x128xbf16>
    %7 = arith.extf %6 : vector<4x128xbf16> to vector<4x128xf32>
    %cst_2 = arith.constant dense<0.000000e+00> : vector<128xf32>
    %8 = vector.multi_reduction <add>, %7, %cst_2 [0] : vector<4x128xf32> to vector<128xf32>
    %9 = vector.shape_cast %8 : vector<128xf32> to vector<1x128xf32>
    %10 = arith.addf %5, %9 : vector<1x128xf32>
    %c19 = arith.constant 19 : index
    %c0_3 = arith.constant 0 : index
    %11 = vector.load %arg1[%c19, %c0_3] : memref<80x128xbf16, #tpu.memory_space<vmem>>, vector<4x128xbf16>
    %12 = arith.extf %11 : vector<4x128xbf16> to vector<4x128xf32>
    %cst_4 = arith.constant dense<0.000000e+00> : vector<128xf32>
    %13 = vector.multi_reduction <add>, %12, %cst_4 [0] : vector<4x128xf32> to vector<128xf32>
    %14 = vector.shape_cast %13 : vector<128xf32> to vector<1x128xf32>
    %15 = arith.addf %10, %14 : vector<1x128xf32>
    %c25 = arith.constant 25 : index
    %c0_5 = arith.constant 0 : index
    %16 = vector.load %arg1[%c25, %c0_5] : memref<80x128xbf16, #tpu.memory_space<vmem>>, vector<4x128xbf16>
    %17 = arith.extf %16 : vector<4x128xbf16> to vector<4x128xf32>
    %cst_6 = arith.constant dense<0.000000e+00> : vector<128xf32>
    %18 = vector.multi_reduction <add>, %17, %cst_6 [0] : vector<4x128xf32> to vector<128xf32>
    %19 = vector.shape_cast %18 : vector<128xf32> to vector<1x128xf32>
    %20 = arith.addf %15, %19 : vector<1x128xf32>
    %cst_7 = arith.constant 6.250000e-02 : f32
    %21 = vector.broadcast %cst_7 : f32 to vector<1x128xf32>
    %22 = arith.mulf %20, %21 : vector<1x128xf32>
    %cst_8 = arith.constant 0.000000e+00 : f32
    %23 = vector.broadcast %cst_8 : f32 to vector<1x128xf32>
    %c47 = arith.constant 47 : index
    %c0_9 = arith.constant 0 : index
    %24 = vector.load %arg1[%c47, %c0_9] : memref<80x128xbf16, #tpu.memory_space<vmem>>, vector<4x128xbf16>
    %25 = arith.extf %24 : vector<4x128xbf16> to vector<4x128xf32>
    %cst_10 = arith.constant dense<0.000000e+00> : vector<128xf32>
    %26 = vector.multi_reduction <add>, %25, %cst_10 [0] : vector<4x128xf32> to vector<128xf32>
    %27 = vector.shape_cast %26 : vector<128xf32> to vector<1x128xf32>
    %28 = arith.addf %23, %27 : vector<1x128xf32>
    %c53 = arith.constant 53 : index
    %c0_11 = arith.constant 0 : index
    %29 = vector.load %arg1[%c53, %c0_11] : memref<80x128xbf16, #tpu.memory_space<vmem>>, vector<4x128xbf16>
    %30 = arith.extf %29 : vector<4x128xbf16> to vector<4x128xf32>
    %cst_12 = arith.constant dense<0.000000e+00> : vector<128xf32>
    %31 = vector.multi_reduction <add>, %30, %cst_12 [0] : vector<4x128xf32> to vector<128xf32>
    %32 = vector.shape_cast %31 : vector<128xf32> to vector<1x128xf32>
    %33 = arith.addf %28, %32 : vector<1x128xf32>
    %c59 = arith.constant 59 : index
    %c0_13 = arith.constant 0 : index
    %34 = vector.load %arg1[%c59, %c0_13] : memref<80x128xbf16, #tpu.memory_space<vmem>>, vector<4x128xbf16>
    %35 = arith.extf %34 : vector<4x128xbf16> to vector<4x128xf32>
    %cst_14 = arith.constant dense<0.000000e+00> : vector<128xf32>
    %36 = vector.multi_reduction <add>, %35, %cst_14 [0] : vector<4x128xf32> to vector<128xf32>
    %37 = vector.shape_cast %36 : vector<128xf32> to vector<1x128xf32>
    %38 = arith.addf %33, %37 : vector<1x128xf32>
    %c65 = arith.constant 65 : index
    %c0_15 = arith.constant 0 : index
    %39 = vector.load %arg1[%c65, %c0_15] : memref<80x128xbf16, #tpu.memory_space<vmem>>, vector<4x128xbf16>
    %40 = arith.extf %39 : vector<4x128xbf16> to vector<4x128xf32>
    %cst_16 = arith.constant dense<0.000000e+00> : vector<128xf32>
    %41 = vector.multi_reduction <add>, %40, %cst_16 [0] : vector<4x128xf32> to vector<128xf32>
    %42 = vector.shape_cast %41 : vector<128xf32> to vector<1x128xf32>
    %43 = arith.addf %38, %42 : vector<1x128xf32>
    %cst_17 = arith.constant 6.250000e-02 : f32
    %44 = vector.broadcast %cst_17 : f32 to vector<1x128xf32>
    %45 = arith.mulf %43, %44 : vector<1x128xf32>
    %46 = tpu.concatenate %22, %45 in 0 : vector<1x128xf32>, vector<1x128xf32> -> vector<2x128xf32>
    %47 = arith.truncf %46 : vector<2x128xf32> to vector<2x128xbf16>
    %c0_18 = arith.constant 0 : index
    %c0_19 = arith.constant 0 : index
    %48 = vector.load %arg2[%c0_18, %c0_19] : memref<128x128xbf16, #tpu.memory_space<vmem>>, vector<128x128xbf16>
    %cst_20 = arith.constant dense<0.000000e+00> : vector<2x128xf32>
    %49 = tpu.matmul %47, %48, %cst_20 {dimension_numbers = #tpu.dot_dimension_numbers<[1], [0], [0], [1], [0, 0, 1, 1], [], []>} : vector<2x128xbf16>, vector<128x128xbf16>, vector<2x128xf32> -> vector<2x128xf32>
    %c0_21 = arith.constant 0 : index
    %c0_22 = arith.constant 0 : index
    %50 = vector.load %arg3[%c0_21, %c0_22] : memref<1x128xf32, #tpu.memory_space<vmem>>, vector<1x128xf32>
    %51 = vector.broadcast %50 : vector<1x128xf32> to vector<2x128xf32>
    %52 = arith.addf %49, %51 : vector<2x128xf32>
    %c0_23 = arith.constant 0 : index
    %c0_24 = arith.constant 0 : index
    %c0_25 = arith.constant 0 : index
    %53 = vector.load %arg4[%c0_23, %c0_24, %c0_25] : memref<1x2x128xf32, #tpu.memory_space<vmem>>, vector<1x2x128xf32>
    %54 = vector.shape_cast %53 : vector<1x2x128xf32> to vector<2x128xf32>
    %55 = vector.shape_cast %52 : vector<2x128xf32> to vector<1x2x128xf32>
    tpu.vector_store %arg4[%c0_23, %c0_24, %c0_25], %55 {strides = array<i32>} : memref<1x2x128xf32, #tpu.memory_space<vmem>>, vector<1x2x128xf32>,
    return
  }
  func.func @transform_0(%arg0: i32) -> (i32, i32) {
    %c0_i32 = arith.constant 0 : i32
    %c0_i32_0 = arith.constant 0 : i32
    return %arg0, %c0_i32 : i32, i32
  }
  func.func @transform_1(%arg0: i32) -> (i32, i32) {
    %c0_i32 = arith.constant 0 : i32
    %c0_i32_0 = arith.constant 0 : i32
    %c0_i32_1 = arith.constant 0 : i32
    return %c0_i32, %c0_i32_0 : i32, i32
  }
  func.func @transform_2(%arg0: i32) -> (i32, i32) {
    %c0_i32 = arith.constant 0 : i32
    %c0_i32_0 = arith.constant 0 : i32
    %c0_i32_1 = arith.constant 0 : i32
    return %c0_i32, %c0_i32_0 : i32, i32
  }
  func.func @transform_3(%arg0: i32) -> (i32, i32, i32) {
    %c0_i32 = arith.constant 0 : i32
    %c0_i32_0 = arith.constant 0 : i32
    %c0_i32_1 = arith.constant 0 : i32
    return %arg0, %c0_i32, %c0_i32_0 : i32, i32, i32
  }
}

</mosaic_0001>

<bundles_post_ra>
// kernel: resnet_forward.4
= control target key start
LH: loop header
LB: loop body
LE: loop exit
PB: predicated region body
PF: predicated region fallthrough
CT: control target
= control target key end

     0   :  { %vm145_vm0 = vsmask.f32 7424  ;;  %vm1309_vm1 = vsmask.f32 6400  ;;  %vm1649_vm2 = vcmask 1045504   ;;  %vm641_vm3 = vcmask 1046528   ;;  %s7157_s1 = inlined_call_operand.vmem [shape: bf16[9,128,128], index: 1, kind: input, shape index: {}]   ;;  %s7158_s0 = inlined_call_operand.vmem [shape: bf16[208,128], index: 0, kind: input, shape index: {}]   ;;  %s7159_s3 = inlined_call_operand.vmem [shape: bf16[208,128], index: 3, kind: output, shape index: {}]   ;;  %s7160_s2 = inlined_call_operand.vmem [shape: f32[1,128], index: 2, kind: input, shape index: {}]  }
   0x1   :  { %v4755_v0 = vld [vmem:[%s7157_s1 + $0x40] sm:$0xff]   ;;  %v4757_v2 = vld [vmem:[%s7157_s1 + $0x48] sm:$0xff]   ;;  %v4759_v4 = vld [vmem:[%s7157_s1 + $0x50] sm:$0xff]   ;;  %vm2580_vm4 = vcmask 1044480   ;;  %vm2240_vm5 = vsmask.f32 5376 }
   0x2   :  { %v4756_v1 = vld [vmem:[%s7157_s1 + $0x100] sm:$0xff]   ;;  %4217 = vmatprep.subr.bf16.mxu1 %v4755_v0  ;;  %v4758_v3 = vld [vmem:[%s7157_s1 + $0x108] sm:$0xff]   ;;  %v4760_v5 = vld [vmem:[%s7157_s1 + $0x110] sm:$0xff]   ;;  %vm16_vm6 = vcmask 1041408   ;;  %vm7170_vm7 = vsmask.f32 1280 }
   0x3   :  { %4377 = vmatprep.subr.bf16.mxu0 %v4756_v1  ;;  %4218 = vmatpush3.bf16.msra.mxu1 %v4755_v0  ;;  %v4761_v6 = vld [vmem:[%s7157_s1 + $0x58] sm:$0xff]   ;;  %v4763_v8 = vld [vmem:[%s7157_s1 + $0x60] sm:$0xff]   ;;  %v4765_v10 = vld [vmem:[%s7157_s1 + $0x68] sm:$0xff]   ;;  %vm22_vm9 = vcmask 1043456   ;;  %vm23_vm10 = vsmask.f32 7938 }
   0x4   :  { %4378 = vmatpush3.bf16.msra.mxu0 %v4756_v1  ;;  %4219 = vmatprep.subr.bf16.mxu1 %v4757_v2  ;;  %v4762_v7 = vld [vmem:[%s7157_s1 + $0x118] sm:$0xff]   ;;  %v4764_v9 = vld [vmem:[%s7157_s1 + $0x120] sm:$0xff]   ;;  %v4766_v11 = vld [vmem:[%s7157_s1 + $0x128] sm:$0xff]  }
   0x5   :  { %4379 = vmatprep.subr.bf16.mxu0 %v4758_v3  ;;  %v30_v12 = vld [vmem:[%s7158_s0] sm:$0xf]  ;;  %v4944_v13 = vld [vmem:[%s7158_s0 + $0x4] sm:$0xf]  ;;  %v4952_v15 = vld [vmem:[%s7158_s0 + $0x8] sm:$0xff]  }
   0x6   :  { %v4947_v14 = vcombine.low %v30_v12, %v4944_v13  ;;  %v1208_v16 = vld [vmem:[%s7158_s0 + $0x4] sm:$0xe]  ;;  %v4767_v17 = vld [vmem:[%s7157_s1 + $0x70] sm:$0xff]   ;;  %v4963_v18 = vld [vmem:[%s7158_s0 + $0x8] sm:$0xf]  ;;  %v154_v22 = vshll.u32 %v4952_v15, 16 }
   0x7   :  { %4220 = vmatpush3.bf16.msra.mxu1 %v4757_v2  ;;  %v4768_v19 = vld [vmem:[%s7157_s1 + $0x130] sm:$0xff]   ;;  %v3859_v23 = vcombine.low %v1208_v16, %v4963_v18  ;;  %v158_v32 = vshrl.u32 %v4952_v15, 16  ;;  %v4769_v38 = vld [vmem:[%s7157_s1 + $0x78] sm:$0xff]   ;;  %v4776_v47 = vld [vmem:[%s7157_s1] sm:$0xff]  }
   0x8   :  { %4380 = vmatpush3.bf16.msra.mxu0 %v4758_v3  ;;  %4221 = vmatprep.subr.bf16.mxu1 %v4759_v4  ;;  %v147_v20 = vshrl.u32 %v4947_v14, 16  ;;  %v149_v21 = vshll.u32 %v4947_v14, 16  ;;  %v4975_v24 = vld [vmem:[%s7158_s0 + $0xc] sm:$0xff]   ;;  %v156_v27 = vrot.slane %v154_v22, 1  ;;  %v4989_v37 = vld [vmem:[%s7158_s0 + $0x14] sm:$0xff]   ;;  %v4778_v52 = vld [vmem:[%s7157_s1 + $0x140] sm:$0xff]  }
   0x9   :  { %4381 = vmatprep.subr.bf16.mxu0 %v4760_v5  ;;  %v4980_v25 = vld [vmem:[%s7158_s0 + $0x10] sm:$0xff]   ;;  %v1311_v28 = vshrl.u32 %v3859_v23, 16  ;;  %v1314_v29 = vshll.u32 %v3859_v23, 16  ;;  %v1319_v30 = vshrl.u32 %v4975_v24, 16  ;;  %v1322_v31 = vshll.u32 %v4975_v24, 16  ;;  %v4770_v39 = vld [vmem:[%s7157_s1 + $0x138] sm:$0xff]   ;;  %vm18_vm8 = vmand %vm16_vm6, %vm7170_vm7 }
   0xa   :  { %v151_v26 = vrot.slane %v149_v21, 1  ;;  %v162_v36 = vshll.u32 %v4980_v25, 16  ;;  %v1328_v44 = vshrl.u32 %v4989_v37, 16  ;;  %v1331_v45 = vshll.u32 %v4989_v37, 16  ;;  %v5009_v53 = vld [vmem:[%s7158_s0 + $0x18] sm:$0xff]   ;;  %v5022_v59 = vld [vmem:[%s7158_s0 + $0x20] sm:$0xff]   ;;  %vm24_vm11 = vmand %vm22_vm9, %vm23_vm10 }
   0xb   :  { %4222 = vmatpush3.bf16.msra.mxu1 %v4759_v4  ;;  %v1313_v34 = vrot.slane %v1311_v28, 1  ;;  %v1316_v35 = vrot.slane %v1314_v29, 2  ;;  %v1321_v40 = vrot.slane %v1319_v30, 1  ;;  %v1324_v41 = vrot.slane %v1322_v31, 2  ;;  %v5016_v56 = vld [vmem:[%s7158_s0 + $0x1c] sm:$0xff]   ;;  %v4779_v60 = vld [vmem:[%s7157_s1 + $0x8] sm:$0xff]  }
   0xc   :  { %4382 = vmatpush3.bf16.msra.mxu0 %v4760_v5  ;;  %4223 = vmatprep.subr.bf16.mxu1 %v4761_v6  ;;  %v152_v33 = vor.u32 %v151_v26, %v147_v20  ;;  %v160_v48 = vor.u32 %v158_v32, %v156_v27  ;;  %v164_v49 = vrot.slane %v162_v36, 1  ;;  %v1330_v50 = vrot.slane %v1328_v44, 1  ;;  %v5033_v1 = vld [vmem:[%s7158_s0 + $0x24] sm:$0xff]   ;;  %v4785_v20 = vld [vmem:[%s7157_s1 + $0x10] sm:$0xff]  }
   0xd   :  { %4383 = vmatprep.subr.bf16.mxu0 %v4762_v7  ;;  %v1317_v43 = vor.u32 %v1316_v35, %v1313_v34  ;;  %v1325_v46 = vor.u32 %v1324_v41, %v1321_v40  ;;  %v1333_v51 = vrot.slane %v1331_v45, 2  ;;  %v166_v55 = vshrl.u32 %v4980_v25, 16  ;;  %v5050_v21 = vld [vmem:[%s7158_s0 + $0x28] sm:$0xff]   ;;  %v4786_v23 = vld [vmem:[%s7157_s1 + $0x150] sm:$0xff]  }
   0xe   :  { %v157_v42 = vsel %vm145_vm0, %v152_v33, %v156_v27  ;;  %v170_v58 = vshll.u32 %v5009_v53, 16  ;;  %v1337_v62 = vshrl.u32 %v5016_v56, 16  ;;  %v1340_v63 = vshll.u32 %v5016_v56, 16  ;;  %v5059_v27 = vld [vmem:[%s7158_s0 + $0x2c] sm:$0xff]  }
   0xf   :  { %4224 = vmatpush3.bf16.msra.mxu1 %v4761_v6  ;;  %4233 = vmatprep.mubr.bf16.mxu1 %v157_v42  ;;  %v1326_v54 = vsel %vm1309_vm1, %v1317_v43, %v1325_v46  ;;  %v1334_v57 = vor.u32 %v1333_v51, %v1330_v50  ;;  %v168_v61 = vor.u32 %v166_v55, %v164_v49  ;;  %v174_v0 = vshrl.u32 %v5009_v53, 16  ;;  %v5066_v31 = vld [vmem:[%s7158_s0 + $0x30] sm:$0xff]   ;;  %v5091_v51 = vld [vmem:[%s7158_s0 + $0x38] sm:$0xff]  }
  0x10   :  { %4384 = vmatpush3.bf16.msra.mxu0 %v4762_v7  ;;  %4225 = vmatprep.subr.bf16.mxu1 %v4763_v8  ;;  %v165_v2 = vsel %vm145_vm0, %v160_v48, %v164_v49  ;;  %v172_v4 = vrot.slane %v170_v58, 1  ;;  %v178_v5 = vshll.u32 %v5022_v59, 16  ;;  %v1339_v6 = vrot.slane %v1337_v62, 1  ;;  %v5099_v62 = vld [vmem:[%s7158_s0 + $0x3c] sm:$0xff]  }
  0x11   :  { %4385 = vmatprep.subr.bf16.mxu0 %v4764_v9  ;;  %4393 = vmatprep.mubr.bf16.mxu0 %v1326_v54  ;;  %v1335_v3 = vsel %vm1309_vm1, %v1325_v46, %v1334_v57  ;;  %v1342_v7 = vrot.slane %v1340_v63, 2  ;;  %v182_v26 = vshrl.u32 %v5022_v59, 16  ;;  %v186_v30 = vshll.u32 %v5050_v21, 16  ;;  %v4791_v46 = vld [vmem:[%s7157_s1 + $0x18] sm:$0xff]  }
  0x12   :  { %v173_v12 = vsel %vm145_vm0, %v168_v61, %v172_v4  ;;  %v176_v22 = vor.u32 %v174_v0, %v172_v4  ;;  %v1355_v33 = vshrl.u32 %v5059_v27, 16  ;;  %v1358_v34 = vshll.u32 %v5059_v27, 16 }
  0x13   :  { %4226 = vmatpush3.bf16.msra.mxu1 %v4763_v8  ;;  %v1346_v8 = vshrl.u32 %v5033_v1, 16  ;;  %v1343_v16 = vor.u32 %v1342_v7, %v1339_v6  ;;  %v188_v35 = vrot.slane %v186_v30, 1  ;;  %v190_v36 = vshrl.u32 %v5050_v21, 16  ;;  %v4796_v6 = vld [vmem:[%s7157_s1 + $0x20] sm:$0xff]  }
  0x14   :  { %4386 = vmatpush3.bf16.msra.mxu0 %v4764_v9  ;;  %4227 = vmatprep.subr.bf16.mxu1 %v4765_v10  ;;  %v1349_v9 = vshll.u32 %v5033_v1, 16  ;;  %v1357_v41 = vrot.slane %v1355_v33, 1  ;;  %v1360_v42 = vrot.slane %v1358_v34, 2  ;;  %v198_v54 = vshrl.u32 %v5066_v31, 16  ;;  %v5115_v7 = vld [vmem:[%s7158_s0 + $0x44] sm:$0xff]  }
  0x15   :  { %4387 = vmatprep.subr.bf16.mxu0 %v4766_v11  ;;  %v1344_v28 = vsel %vm1309_vm1, %v1334_v57, %v1343_v16  ;;  %v192_v57 = vor.u32 %v190_v36, %v188_v35  ;;  %v206_v63 = vshrl.u32 %v5091_v51, 16  ;;  %v1373_v4 = vshrl.u32 %v5099_v62, 16  ;;  %v5137_v36 = vld [vmem:[%s7158_s0 + $0x48] sm:$0xff]  }
  0x16   :  { %v1361_v49 = vor.u32 %v1360_v42, %v1357_v41  ;;  %v218_v41 = vshll.u32 %v5137_v36, 16  ;;  %v5148_v42 = vld [vmem:[%s7158_s0 + $0x50] sm:$0xff]  }
  0x17   :  { %4228 = vmatpush3.bf16.msra.mxu1 %v4765_v10  ;;  %v4780_v10 = vld [vmem:[%s7157_s1 + $0x148] sm:$0xff]  }
  0x18   :  { %4388 = vmatpush3.bf16.msra.mxu0 %v4766_v11  ;;  %4229 = vmatprep.subr.bf16.mxu1 %v4767_v17  ;;  %v180_v11 = vrot.slane %v178_v5, 1  ;;  %v1376_v5 = vshll.u32 %v5099_v62, 16 }
  0x19   :  { %4389 = vmatprep.subr.bf16.mxu0 %v4768_v19 }
  0x1a   :  { %v184_v32 = vor.u32 %v182_v26, %v180_v11  ;;  %v181_v40 = vsel %vm145_vm0, %v176_v22, %v180_v11 }
  0x1b   :  { %4230 = vmatpush3.bf16.msra.mxu1 %v4767_v17  ;;  %v1348_v17 = vrot.slane %v1346_v8, 1 }
  0x1c   :  { %4390 = vmatpush3.bf16.msra.mxu0 %v4768_v19  ;;  %4231 = vmatprep.subr.bf16.mxu1 %v4769_v38  ;;  %v1351_v19 = vrot.slane %v1349_v9, 2  ;;  %v189_v48 = vsel %vm145_vm0, %v184_v32, %v188_v35  ;;  %v4800_v32 = vld [vmem:[%s7157_s1 + $0x168] sm:$0xff]  }
  0x1d   :  { %4391 = vmatprep.subr.bf16.mxu0 %v4770_v39 }
  0x1e   :  { %v1352_v29 = vor.u32 %v1351_v19, %v1348_v17  ;;  %v1378_v17 = vrot.slane %v1376_v5, 2  ;;  %v1382_v19 = vshrl.u32 %v5115_v7, 16 }
  0x1f   :  { %4232 = vmatpush3.bf16.msra.mxu1 %v4769_v38  ;;  %v194_v38 = vshll.u32 %v5066_v31, 16 }
  0x20   :  { %4392 = vmatpush3.bf16.msra.mxu0 %v4770_v39  ;;  %4257 = vmatprep.subr.bf16.mxu1 %v4776_v47  ;;  %v5075_v39 = vld [vmem:[%s7158_s0 + $0x34] sm:$0xff]   ;;  %v1353_v43 = vsel %vm1309_vm1, %v1343_v16, %v1352_v29  ;;  %v1362_v55 = vsel %vm1309_vm1, %v1352_v29, %v1361_v49  ;;  %v1375_v16 = vrot.slane %v1373_v4, 1 }
  0x21   :  { %4417 = vmatprep.subr.bf16.mxu0 %v4778_v52  ;;  %v196_v44 = vrot.slane %v194_v38, 1  ;;  %v1364_v45 = vshrl.u32 %v5075_v39, 16  ;;  %v1367_v50 = vshll.u32 %v5075_v39, 16  ;;  %v5142_v38 = vld [vmem:[%s7158_s0 + $0x4c] sm:$0xff]  }
  0x22   :  { %4234 = vmatmul.mubr.bf16.vlgmr.msra.gmra.mrb[0].mxu1 %v165_v2  ;;  %v1379_v26 = vor.u32 %v1378_v17, %v1375_v16  ;;  %v4809_v17 = vld [vmem:[%s7157_s1 + $0x38] sm:$0xff]  }
  0x23   :  { %4394 = vmatmul.mubr.bf16.vlgmr.msra.gmra.mrb[0].mxu0 %v1335_v3  ;;  %4258 = vmatpush3.bf16.msra.mxu1 %v4776_v47  ;;  %v4792_v47 = vld [vmem:[%s7157_s1 + $0x158] sm:$0xff]   ;;  %v1369_v58 = vrot.slane %v1367_v50, 2  ;;  %v200_v61 = vor.u32 %v198_v54, %v196_v44  ;;  %v5105_v3 = vld [vmem:[%s7158_s0 + $0x40] sm:$0xff]   ;;  %v197_v8 = vsel %vm145_vm0, %v192_v57, %v196_v44  ;;  %v226_v50 = vshll.u32 %v5148_v42, 16 }
  0x24   :  { %4418 = vmatpush3.bf16.msra.mxu0 %v4778_v52  ;;  %4259 = vmatprep.subr.bf16.mxu1 %v4779_v60  ;;  %v1366_v52 = vrot.slane %v1364_v45, 1  ;;  %v210_v11 = vshll.u32 %v5105_v3, 16  ;;  %v214_v33 = vshrl.u32 %v5105_v3, 16  ;;  %v5154_v44 = vld [vmem:[%s7158_s0 + $0x54] sm:$0xff]  }
  0x25   :  { %4419 = vmatprep.subr.bf16.mxu0 %v4780_v10  ;;  %4237 = vmatprep.mubr.bf16.mxu1 %v173_v12  ;;  %v4798_v12 = vld [vmem:[%s7157_s1 + $0x160] sm:$0xff]   ;;  %v1403_v54 = vshll.u32 %v5154_v44, 16 }
  0x26   :  { %4397 = vmatprep.mubr.bf16.mxu0 %v1344_v28  ;;  %v1370_v0 = vor.u32 %v1369_v58, %v1366_v52  ;;  %v212_v22 = vrot.slane %v210_v11, 1  ;;  %v1384_v28 = vrot.slane %v1382_v19, 1  ;;  %v1400_v52 = vshrl.u32 %v5154_v44, 16  ;;  %v4805_v58 = vld [vmem:[%s7157_s1 + $0x30] sm:$0xff]  }
  0x27   :  { %4260 = vmatpush3.bf16.msra.mxu1 %v4779_v60  ;;  %v202_v60 = vshll.u32 %v5091_v51, 16  ;;  %v1405_v5 = vrot.slane %v1403_v54, 2  ;;  %v647_v54 = vrot.slane %v5009_v53, 1 }
  0x28   :  { %4420 = vmatpush3.bf16.msra.mxu0 %v4780_v10  ;;  %4261 = vmatprep.subr.bf16.mxu1 %v4785_v20  ;;  %v1371_v9 = vsel %vm1309_vm1, %v1361_v49, %v1370_v0  ;;  %v1380_v34 = vsel %vm1309_vm1, %v1370_v0, %v1379_v26  ;;  %v220_v49 = vrot.slane %v218_v41, 1  ;;  %v1402_v0 = vrot.slane %v1400_v52, 1 }
  0x29   :  { %4421 = vmatprep.subr.bf16.mxu0 %v4786_v23  ;;  %v204_v2 = vrot.slane %v202_v60, 1  ;;  %v4806_v60 = vld [vmem:[%s7157_s1 + $0x170] sm:$0xff]   ;;  %v645_v52 = vrot.slane %v4980_v25, 1 }
  0x2a   :  { %4238 = vmatmul.mubr.bf16.gmra.mrb[4].mxu1 %v181_v40  ;;  %v216_v40 = vor.u32 %v214_v33, %v212_v22  ;;  %v1406_v11 = vor.u32 %v1405_v5, %v1402_v0  ;;  %v651_v0 = vrot.slane %v5050_v21, 1  ;;  %v1657_v5 = vrot.slane %v5033_v1, 2 }
  0x2b   :  { %4398 = vmatmul.mubr.bf16.gmra.mrb[4].mxu0 %v1353_v43  ;;  %4262 = vmatpush3.bf16.msra.mxu1 %v4785_v20  ;;  %v205_v10 = vsel %vm145_vm0, %v200_v61, %v204_v2  ;;  %v1385_v20 = vshll.u32 %v5115_v7, 16  ;;  %v208_v30 = vor.u32 %v206_v63, %v204_v2  ;;  %v222_v43 = vshrl.u32 %v5137_v36, 16 }
  0x2c   :  { %4422 = vmatpush3.bf16.msra.mxu0 %v4786_v23  ;;  %4241 = vmatprep.mubr.bf16.mxu1 %v189_v48  ;;  %v4799_v23 = vld [vmem:[%s7157_s1 + $0x28] sm:$0xff]   ;;  %v1394_v48 = vshll.u32 %v5142_v38, 16  ;;  %v221_v61 = vsel %vm145_vm0, %v216_v40, %v220_v49  ;;  %v228_v63 = vrot.slane %v226_v50, 1  ;;  %v4813_v40 = vld [vmem:[%s7157_s1 + $0x180] sm:$0xff]   ;;  %v1653_v50 = vrot.slane %v4989_v37, 2 }
  0x2d   :  { %4401 = vmatprep.mubr.bf16.mxu0 %v1362_v55  ;;  %4263 = vmatprep.subr.bf16.mxu1 %v4791_v46  ;;  %v1387_v29 = vrot.slane %v1385_v20, 2  ;;  %v213_v45 = vsel %vm145_vm0, %v208_v30, %v212_v22  ;;  %v224_v4 = vor.u32 %v222_v43, %v220_v49  ;;  %v4810_v22 = vld [vmem:[%s7157_s1 + $0x178] sm:$0xff]   ;;  %v643_v49 = vrot.slane %v4952_v15, 1  ;;  %v620_v37 = vld [vmem:[%s7158_s0] sm:$0xe] }
  0x2e   :  { %4423 = vmatprep.subr.bf16.mxu0 %v4792_v47  ;;  %v1396_v57 = vrot.slane %v1394_v48, 2  ;;  %v1659_v1 = vrot.slane %v5059_v27, 2 }
  0x2f   :  { %4264 = vmatpush3.bf16.msra.mxu1 %v4791_v46  ;;  %v1388_v35 = vor.u32 %v1387_v29, %v1384_v28  ;;  %v1628_v28 = vld [vmem:[%s7158_s0 + $0x4] sm:$0xc] }
  0x30   :  { %4424 = vmatpush3.bf16.msra.mxu0 %v4792_v47  ;;  %4265 = vmatprep.subr.bf16.mxu1 %v4796_v6  ;;  %v1391_v47 = vshrl.u32 %v5142_v38, 16  ;;  %v4812_v29 = vld [vmem:[%s7157_s1 + $0x80] sm:$0xff]   ;;  %v1660_v27 = vsel %vm1649_vm2, %v1657_v5, %v1659_v1 }
  0x31   :  { %4425 = vmatprep.subr.bf16.mxu0 %v4798_v12  ;;  %v1389_v46 = vsel %vm1309_vm1, %v1379_v26, %v1388_v35 }
  0x32   :  { %4242 = vmatmul.mubr.bf16.gmra.mrb[8].mxu1 %v197_v8  ;;  %v1393_v55 = vrot.slane %v1391_v47, 1  ;;  %v230_v8 = vshrl.u32 %v5148_v42, 16  ;;  %v1651_v47 = vrot.slane %v4975_v24, 2  ;;  %v1655_v24 = vrot.slane %v5016_v56, 2  ;;  %v4815_v56 = vld [vmem:[%s7157_s1 + $0x188] sm:$0xff]  }
  0x33   :  { %4402 = vmatmul.mubr.bf16.gmra.mrb[8].mxu0 %v1371_v9  ;;  %4245 = vmatprep.mubr.bf16.mxu1 %v205_v10  ;;  %v5179_v9 = vld [vmem:[%s7158_s0 + $0x5c] sm:$0x1f]  }
  0x34   :  { %4266 = vmatpush3.bf16.msra.mxu1 %v4796_v6  ;;  %4426 = vmatpush3.bf16.msra.mxu0 %v4798_v12  ;;  %v1397_v2 = vor.u32 %v1396_v57, %v1393_v55  ;;  %v5173_v6 = vld [vmem:[%s7158_s0 + $0x58] ss:$0 sps:$4 sm:$0xff]   ;;  %v232_v12 = vor.u32 %v230_v8, %v228_v63  ;;  %v1409_v19 = vshrl.u32 %v5179_v9, 16  ;;  %v1412_v20 = vshll.u32 %v5179_v9, 16 }
  0x35   :  { %4405 = vmatprep.mubr.bf16.mxu0 %v1380_v34  ;;  %4267 = vmatprep.subr.bf16.mxu1 %v4799_v23  ;;  %v234_v16 = vshll.u32 %v5173_v6, 16  ;;  %v238_v43 = vshrl.u32 %v5173_v6, 16  ;;  %v5215_v55 = vsel %vm641_vm3, %v643_v49, %v645_v52  ;;  %v5218_v57 = vsel %vm641_vm3, %v645_v52, %v647_v54 }
  0x36   :  { %4427 = vmatprep.subr.bf16.mxu0 %v4800_v32  ;;  %v1398_v10 = vsel %vm1309_vm1, %v1388_v35, %v1397_v2  ;;  %v1407_v30 = vsel %vm1309_vm1, %v1397_v2, %v1406_v11  ;;  %v1414_v33 = vrot.slane %v1412_v20, 2  ;;  %v3895_v35 = vcombine.low %v1628_v28, %v4963_v18  ;;  %v4819_v20 = vld [vmem:[%s7157_s1 + $0x198] sm:$0xff]  }
  0x37   :  { %v236_v26 = vrot.slane %v234_v16, 1  ;;  %v1656_v2 = vsel %vm1649_vm2, %v1653_v50, %v1655_v24  ;;  %v655_v16 = vrot.slane %v5091_v51, 1 }
  0x38   :  { %4268 = vmatpush3.bf16.msra.mxu1 %v4799_v23  ;;  %4428 = vmatpush3.bf16.msra.mxu0 %v4800_v32  ;;  %v229_v23 = vsel %vm145_vm0, %v224_v4, %v228_v63  ;;  %v1411_v32 = vrot.slane %v1409_v19, 1  ;;  %v657_v19 = vrot.slane %v5105_v3, 1 }
  0x39   :  { %4269 = vmatprep.subr.bf16.mxu1 %v4805_v58  ;;  %4429 = vmatprep.subr.bf16.mxu0 %v4806_v60  ;;  %v237_v34 = vsel %vm145_vm0, %v232_v12, %v236_v26  ;;  %v240_v48 = vor.u32 %v238_v43, %v236_v26  ;;  %v1658_v12 = vsel %vm1649_vm2, %v1655_v24, %v1657_v5  ;;  %v1663_v26 = vrot.slane %v5099_v62, 2  ;;  %v5385_v5 = vld [vmem:[%s7158_s0 + $0x30] sm:$0xff]  }
  0x3a   :  { %4246 = vmatmul.mubr.bf16.gmra.mrb[12].mxu1 %v213_v45  ;;  %v1415_v41 = vor.u32 %v1414_v33, %v1411_v32  ;;  %v5274_v28 = vsel %vm641_vm3, %v655_v16, %v657_v19  ;;  %v661_v62 = vrot.slane %v5148_v42, 1  ;;  %v663_v33 = vrot.slane %v5173_v6, 1 }
  0x3b   :  { %4406 = vmatmul.mubr.bf16.gmra.mrb[12].mxu0 %v1389_v46  ;;  %4249 = vmatprep.mubr.bf16.mxu1 %v221_v61  ;;  %v1650_v46 = vrot.slane %v3895_v35, 2  ;;  %v3798_v61 = vcombine.low %v620_v37, %v4944_v13  ;;  %v4816_v13 = vld [vmem:[%s7157_s1 + $0x90] sm:$0xff]   ;;  %v4822_v35 = vld [vmem:[%s7157_s1 + $0xa8] sm:$0xff]   ;;  %v1665_v43 = vrot.slane %v5115_v7, 2  ;;  %v4827_v7 = vld [vmem:[%s7157_s1 + $0xb8] sm:$0xff]   ;;  %v2289_v6 = vshll.u32 %v5385_v5, 16 }
  0x3c   :  { %4270 = vmatpush3.bf16.msra.mxu1 %v4805_v58  ;;  %4430 = vmatpush3.bf16.msra.mxu0 %v4806_v60  ;;  %v1416_v45 = vsel %vm1309_vm1, %v1406_v11, %v1415_v41  ;;  %v4814_v58 = vld [vmem:[%s7157_s1 + $0x88] sm:$0xff]   ;;  %v649_v60 = vrot.slane %v5022_v59, 1  ;;  %v653_v11 = vrot.slane %v5066_v31, 1  ;;  %v5358_v37 = vld [vmem:[%s7158_s0 + $0x18] sm:$0xff]  }
  0x3d   :  { %4409 = vmatprep.mubr.bf16.mxu0 %v1398_v10  ;;  %4271 = vmatprep.subr.bf16.mxu1 %v4809_v17  ;;  %v1652_v18 = vsel %vm1649_vm2, %v1650_v46, %v1651_v47  ;;  %v642_v4 = vrot.slane %v3798_v61, 1  ;;  %v4825_v46 = vld [vmem:[%s7157_s1 + $0x1b0] sm:$0xff]  }
  0x3e   :  { %4431 = vmatprep.subr.bf16.mxu0 %v4810_v22  ;;  %v5234_v63 = vsel %vm641_vm3, %v647_v54, %v649_v60  ;;  %v5246_v8 = vsel %vm641_vm3, %v649_v60, %v651_v0  ;;  %v5346_v54 = vld [vmem:[%s7158_s0 + $0x10] sm:$0xff]   ;;  %v1988_v60 = vrot.slane %v5358_v37, 2 }
  0x3f   :  { %v5250_v10 = vsel %vm641_vm3, %v642_v4, %v643_v49  ;;  %v1671_v49 = vrot.slane %v5179_v9, 2  ;;  %v4836_v4 = vld [vmem:[%s7157_s1 + $0x1c8] sm:$0xff]  }
  0x40   :  { %4272 = vmatpush3.bf16.msra.mxu1 %v4809_v17  ;;  %4432 = vmatpush3.bf16.msra.mxu0 %v4810_v22  ;;  %v5260_v17 = vsel %vm641_vm3, %v651_v0, %v653_v11  ;;  %v5269_v22 = vsel %vm641_vm3, %v653_v11, %v655_v16  ;;  %v4835_v0 = vld [vmem:[%s7157_s1 + $0xc8] sm:$0xff]   ;;  %v1994_v11 = vrot.slane %v5385_v5, 2 }
  0x41   :  { %4297 = vmatprep.subr.bf16.mxu1 %v4812_v29  ;;  %4457 = vmatprep.subr.bf16.mxu0 %v4813_v40  ;;  %v2559_v16 = vld [vmem:[%s7158_s0 + $0x8] sm:$0x8] }
  0x42   :  { %4250 = vmatmul.mubr.bf16.gmra.mrb[16].mxu1 %v229_v23  ;;  %v1661_v23 = vrot.slane %v5075_v39, 2  ;;  %v4821_v39 = vld [vmem:[%s7157_s1 + $0x1a0] sm:$0xff]  }
  0x43   :  { %4410 = vmatmul.mubr.bf16.gmra.mrb[16].mxu0 %v1407_v30  ;;  %4253 = vmatprep.mubr.bf16.mxu1 %v237_v34 }
  0x44   :  { %4413 = vmatprep.mubr.bf16.mxu0 %v1416_v45  ;;  %v1662_v32 = vsel %vm1649_vm2, %v1659_v1, %v1661_v23  ;;  %v1664_v34 = vsel %vm1649_vm2, %v1661_v23, %v1663_v26  ;;  %v4824_v45 = vld [vmem:[%s7157_s1 + $0xb0] sm:$0xff]   ;;  %v5399_v1 = vld [vmem:[%s7158_s0 + $0x38] sm:$0xff]  }
  0x45   :  { %v5421_v23 = vld [vmem:[%s7158_s0 + $0x50] sm:$0xff]  }
  0x4a   :  { %4254 = vmatmul.mubr.bf16.gmra.mrb[20].mxu1 %v240_v48  ;;  %v1669_v48 = vrot.slane %v5154_v44, 2  ;;  %v4834_v44 = vld [vmem:[%s7157_s1 + $0x1c0] sm:$0xff]  }
  0x4b   :  { %4414 = vmatmul.mubr.bf16.gmra.mrb[20].mxu0 %v1415_v41  ;;  %4273 = vmatprep.mubr.bf16.mxu1 %v4947_v14  ;;  %v1654_v14 = vsel %vm1649_vm2, %v1651_v47, %v1653_v50  ;;  %v5304_v41 = vsel %vm641_vm3, %v661_v62, %v663_v33  ;;  %v1666_v47 = vsel %vm1649_vm2, %v1663_v26, %v1665_v43 }
  0x4c   :  { %4433 = vmatprep.mubr.bf16.mxu0 %v1652_v18  ;;  %v1884_v18 = vld [vmem:[%s7158_s0 + $0x8] sm:$0xc]  ;;  %v1672_v52 = vsel %vm1649_vm2, %v1669_v48, %v1671_v49 }
  0x52   :  { %4274 = vmatmul.mubr.bf16.vlgmr.msra.gmra.mrb[0].mxu1 %v4952_v15  ;;  %v4817_v15 = vld [vmem:[%s7157_s1 + $0x190] sm:$0xff]  }
  0x53   :  { %4434 = vmatmul.mubr.bf16.vlgmr.msra.gmra.mrb[0].mxu0 %v1654_v14  ;;  %4298 = vmatpush3.bf16.msra.mxu1 %v4812_v29  ;;  %v659_v29 = vrot.slane %v5137_v36, 1  ;;  %v1986_v14 = vrot.slane %v5346_v54, 2 }
  0x54   :  { %4458 = vmatpush3.bf16.msra.mxu0 %v4813_v40  ;;  %4299 = vmatprep.subr.bf16.mxu1 %v4814_v58  ;;  %v4823_v40 = vld [vmem:[%s7157_s1 + $0x1a8] sm:$0xff]  }
  0x55   :  { %4459 = vmatprep.subr.bf16.mxu0 %v4815_v56  ;;  %4277 = vmatprep.mubr.bf16.mxu1 %v4980_v25  ;;  %v4818_v25 = vld [vmem:[%s7157_s1 + $0x98] sm:$0xff]   ;;  %v5286_v30 = vsel %vm641_vm3, %v657_v19, %v659_v29  ;;  %v1989_v61 = vsel %vm1649_vm2, %v1986_v14, %v1988_v60  ;;  %v2582_v19 = vrot.slane %v5346_v54, 3 }
  0x56   :  { %4437 = vmatprep.mubr.bf16.mxu0 %v1656_v2  ;;  %v5376_v2 = vld [vmem:[%s7158_s0 + $0x28] sm:$0xff]  }
  0x57   :  { %4300 = vmatpush3.bf16.msra.mxu1 %v4814_v58  ;;  %v4826_v58 = vld [vmem:[%s7158_s0 + $0x58] ss:$0 sps:$4 sm:$0x77]  }
  0x58   :  { %4460 = vmatpush3.bf16.msra.mxu0 %v4815_v56  ;;  %4301 = vmatprep.subr.bf16.mxu1 %v4816_v13 }
  0x59   :  { %4461 = vmatprep.subr.bf16.mxu0 %v4817_v15 }
  0x5a   :  { %4278 = vmatmul.mubr.bf16.gmra.mrb[4].mxu1 %v5009_v53  ;;  %v4820_v53 = vld [vmem:[%s7157_s1 + $0xa0] sm:$0xff]  }
  0x5b   :  { %4438 = vmatmul.mubr.bf16.gmra.mrb[4].mxu0 %v1658_v12  ;;  %4302 = vmatpush3.bf16.msra.mxu1 %v4816_v13  ;;  %v5405_v12 = vld [vmem:[%s7158_s0 + $0x40] sm:$0xff]  }
  0x5c   :  { %4462 = vmatpush3.bf16.msra.mxu0 %v4817_v15  ;;  %4281 = vmatprep.mubr.bf16.mxu1 %v5022_v59  ;;  %v5289_v59 = vsel %vm641_vm3, %v659_v29, %v661_v62  ;;  %v1992_v15 = vrot.slane %v5376_v2, 2  ;;  %v2594_v26 = vrot.slane %v5405_v12, 3  ;;  %v4843_v29 = vld [vmem:[%s7157_s1 + $0xd8] sm:$0xff]  }
  0x5d   :  { %4441 = vmatprep.mubr.bf16.mxu0 %v1660_v27  ;;  %4303 = vmatprep.subr.bf16.mxu1 %v4818_v25  ;;  %v2592_v27 = vrot.slane %v5399_v1, 3 }
  0x5e   :  { %4463 = vmatprep.subr.bf16.mxu0 %v4819_v20 }
  0x5f   :  { %4304 = vmatpush3.bf16.msra.mxu1 %v4818_v25 }
  0x60   :  { %4464 = vmatpush3.bf16.msra.mxu0 %v4819_v20  ;;  %4305 = vmatprep.subr.bf16.mxu1 %v4820_v53 }
  0x61   :  { %4465 = vmatprep.subr.bf16.mxu0 %v4821_v39 }
  0x62   :  { %4282 = vmatmul.mubr.bf16.gmra.mrb[8].mxu1 %v5050_v21  ;;  %v1667_v21 = vrot.slane %v5142_v38, 2  ;;  %v4828_v38 = vld [vmem:[%s7157_s1 + $0x1b8] sm:$0xff]  }
  0x63   :  { %4442 = vmatmul.mubr.bf16.gmra.mrb[8].mxu0 %v1662_v32  ;;  %4285 = vmatprep.mubr.bf16.mxu1 %v5066_v31 }
  0x64   :  { %4445 = vmatprep.mubr.bf16.mxu0 %v1664_v34  ;;  %4306 = vmatpush3.bf16.msra.mxu1 %v4820_v53  ;;  %v1668_v31 = vsel %vm1649_vm2, %v1665_v43, %v1667_v21  ;;  %v1670_v50 = vsel %vm1649_vm2, %v1667_v21, %v1669_v48  ;;  %v2584_v53 = vrot.slane %v5358_v37, 3  ;;  %v1995_v34 = vsel %vm1649_vm2, %v1992_v15, %v1994_v11 }
  0x65   :  { %4466 = vmatpush3.bf16.msra.mxu0 %v4821_v39  ;;  %4307 = vmatprep.subr.bf16.mxu1 %v4822_v35  ;;  %v5441_v43 = vsel %vm2580_vm4, %v2592_v27, %v2594_v26 }
  0x66   :  { %4467 = vmatprep.subr.bf16.mxu0 %v4823_v40  ;;  %v5444_v21 = vsel %vm2580_vm4, %v2582_v19, %v2584_v53 }
  0x68   :  { %4308 = vmatpush3.bf16.msra.mxu1 %v4822_v35  ;;  %v4844_v35 = vld [vmem:[%s7157_s1 + $0x1d8] sm:$0xff]  }
  0x69   :  { %4468 = vmatpush3.bf16.msra.mxu0 %v4823_v40  ;;  %4309 = vmatprep.subr.bf16.mxu1 %v4824_v45  ;;  %v5438_v40 = vld [vmem:[%s7158_s0 + $0x58] sm:$0xff]  }
  0x6a   :  { %4286 = vmatmul.mubr.bf16.gmra.mrb[12].mxu1 %v5091_v51  ;;  %4469 = vmatprep.subr.bf16.mxu0 %v4825_v46  ;;  %v4832_v51 = vld [vmem:[%s7157_s1 + $0xc0] sm:$0xff]  }
  0x6b   :  { %4446 = vmatmul.mubr.bf16.gmra.mrb[12].mxu0 %v1666_v47  ;;  %4289 = vmatprep.mubr.bf16.mxu1 %v5105_v3  ;;  %v1885_v3 = vld [vmem:[%s7158_s0 + $0xc] sm:$0xf] }
  0x6c   :  { %4449 = vmatprep.mubr.bf16.mxu0 %v1668_v31  ;;  %4310 = vmatpush3.bf16.msra.mxu1 %v4824_v45  ;;  %v5341_v9 = vcombine.low %v1884_v18, %v1885_v3  ;;  %v3981_v25 = vcombine.low %v2559_v16, %v1885_v3  ;;  %v2598_v45 = vrot.slane %v5421_v23, 3  ;;  %v2588_v31 = vrot.slane %v5376_v2, 3 }
  0x6d   :  { %4470 = vmatpush3.bf16.msra.mxu0 %v4825_v46  ;;  %4311 = vmatprep.subr.bf16.mxu1 %v4827_v7  ;;  %v2600_v18 = vrot.slane %v5438_v40, 3 }
  0x6e   :  { %4471 = vmatprep.subr.bf16.mxu0 %v4828_v38  ;;  %v1985_v24 = vrot.slane %v5341_v9, 2  ;;  %v2581_v39 = vrot.slane %v3981_v25, 3  ;;  %v2242_v16 = vshrl.u32 %v5341_v9, 16 }
  0x70   :  { %4312 = vmatpush3.bf16.msra.mxu1 %v4827_v7  ;;  %v1996_v7 = vrot.slane %v5399_v1, 2 }
  0x71   :  { %4472 = vmatpush3.bf16.msra.mxu0 %v4828_v38  ;;  %4337 = vmatprep.subr.bf16.mxu1 %v4832_v51  ;;  %v4846_v38 = vld [vmem:[%s7157_s1 + $0xe0] sm:$0xff]  }
  0x72   :  { %4290 = vmatmul.mubr.bf16.gmra.mrb[16].mxu1 %v5137_v36  ;;  %4497 = vmatprep.subr.bf16.mxu0 %v4834_v44  ;;  %v1987_v36 = vsel %vm1649_vm2, %v1985_v24, %v1986_v14  ;;  %v1997_v24 = vsel %vm1649_vm2, %v1994_v11, %v1996_v7  ;;  %v2004_v11 = vrot.slane %v5438_v40, 2 }
  0x73   :  { %4450 = vmatmul.mubr.bf16.gmra.mrb[16].mxu0 %v1670_v50  ;;  %4293 = vmatprep.mubr.bf16.mxu1 %v5148_v42  ;;  %v5365_v42 = vld [vmem:[%s7158_s0 + $0x20] sm:$0xff]  }
  0x74   :  { %4453 = vmatprep.mubr.bf16.mxu0 %v1672_v52  ;;  %v1990_v56 = vrot.slane %v5365_v42, 2  ;;  %v2586_v32 = vrot.slane %v5365_v42, 3 }
  0x76   :  { %v1991_v13 = vsel %vm1649_vm2, %v1988_v60, %v1990_v56  ;;  %v1993_v20 = vsel %vm1649_vm2, %v1990_v56, %v1992_v15  ;;  %v5454_v47 = vsel %vm2580_vm4, %v2584_v53, %v2586_v32  ;;  %v5472_v3 = vsel %vm2580_vm4, %v2586_v32, %v2588_v31 }
  0x77   :  { %v2002_v56 = vrot.slane %v5421_v23, 2  ;;  %v2244_v53 = vrot.slane %v2242_v16, 2  ;;  %v2291_v16 = vrot.slane %v2289_v6, 3 }
  0x7a   :  { %4294 = vmatmul.mubr.bf16.gmra.mrb[24].mxu1 %v4826_v58  ;;  %v4849_v58 = vld [vmem:[%s7157_s1 + $0xe8] sm:$0xff]  }
  0x7b   :  { %4454 = vmatmul.mubr.bf16.gmra.mrb[24].mxu0 %v1671_v49  ;;  %4313 = vmatprep.mubr.bf16.mxu1 %v5250_v10  ;;  %v4839_v10 = vld [vmem:[%s7157_s1 + $0xd0] sm:$0xff]   ;;  %v2590_v49 = vrot.slane %v5385_v5, 3 }
  0x7c   :  { %4473 = vmatprep.mubr.bf16.mxu0 %v1987_v36  ;;  %v4850_v36 = vld [vmem:[%s7157_s1 + $0x1e8] sm:$0xff]  }
  0x7d   :  { %v5480_v50 = vsel %vm2580_vm4, %v2588_v31, %v2590_v49  ;;  %v5483_v52 = vsel %vm2580_vm4, %v2590_v49, %v2592_v27  ;;  %v2253_v27 = vshll.u32 %v5346_v54, 16  ;;  %v2271_v49 = vshll.u32 %v5365_v42, 16 }
  0x82   :  { %4314 = vmatmul.mubr.bf16.vlgmr.msra.gmra.mrb[0].mxu1 %v5215_v55  ;;  %v4840_v55 = vld [vmem:[%s7157_s1 + $0x1d0] sm:$0xff]  }
  0x83   :  { %4474 = vmatmul.mubr.bf16.vlgmr.msra.gmra.mrb[0].mxu0 %v1989_v61  ;;  %4338 = vmatpush3.bf16.msra.mxu1 %v4832_v51  ;;  %v1998_v51 = vrot.slane %v5405_v12, 2  ;;  %v4853_v61 = vld [vmem:[%s7157_s1 + $0xf0] sm:$0xff]  }
  0x84   :  { %4498 = vmatpush3.bf16.msra.mxu0 %v4834_v44  ;;  %4339 = vmatprep.subr.bf16.mxu1 %v4835_v0  ;;  %v5477_v44 = vsel %vm2580_vm4, %v2598_v45, %v2600_v18 }
  0x85   :  { %4499 = vmatprep.subr.bf16.mxu0 %v4836_v4  ;;  %4317 = vmatprep.mubr.bf16.mxu1 %v5218_v57  ;;  %v5413_v57 = vld [vmem:[%s7158_s0 + $0x48] sm:$0xff]   ;;  %v1999_v14 = vsel %vm1649_vm2, %v1996_v7, %v1998_v51 }
  0x86   :  { %4477 = vmatprep.mubr.bf16.mxu0 %v1991_v13  ;;  %v2596_v62 = vrot.slane %v5413_v57, 3  ;;  %v2000_v60 = vrot.slane %v5413_v57, 2 }
  0x87   :  { %4340 = vmatpush3.bf16.msra.mxu1 %v4835_v0  ;;  %v1907_v0 = vld [vmem:[%s7158_s0 + $0x64] sm:$0x1] }
  0x88   :  { %4500 = vmatpush3.bf16.msra.mxu0 %v4836_v4  ;;  %4341 = vmatprep.subr.bf16.mxu1 %v4839_v10  ;;  %v5451_v46 = vsel %vm2580_vm4, %v2594_v26, %v2596_v62  ;;  %v5463_v48 = vsel %vm2580_vm4, %v2596_v62, %v2598_v45  ;;  %v2001_v4 = vsel %vm1649_vm2, %v1998_v51, %v2000_v60  ;;  %v4859_v26 = vld [vmem:[%s7158_s0 + $0x4] sm:$0xfe]   ;;  %v2255_v62 = vrot.slane %v2253_v27, 3  ;;  %v4866_v27 = vld [vmem:[%s7157_s1 + $0x210] sm:$0xff]  }
  0x89   :  { %4501 = vmatprep.subr.bf16.mxu0 %v4840_v55  ;;  %v2003_v13 = vsel %vm1649_vm2, %v2000_v60, %v2002_v56  ;;  %v974_v32 = vrot.slane %v4859_v26, 1  ;;  %v2262_v45 = vshll.u32 %v5358_v37, 16  ;;  %v2277_v60 = vshrl.u32 %v5376_v2, 16 }
  0x8a   :  { %4318 = vmatmul.mubr.bf16.gmra.mrb[4].mxu1 %v5234_v63  ;;  %v5448_v63 = vsel %vm2580_vm4, %v2581_v39, %v2582_v19  ;;  %v2245_v19 = vshll.u32 %v5341_v9, 16  ;;  %v4860_v9 = vld [vmem:[%s7158_s0 + $0xc] sm:$0xff]   ;;  %v2298_v26 = vshll.u32 %v5399_v1, 16 }
  0x8b   :  { %4478 = vmatmul.mubr.bf16.gmra.mrb[4].mxu0 %v1993_v20  ;;  %4342 = vmatpush3.bf16.msra.mxu1 %v4839_v10  ;;  %v4857_v10 = vld [vmem:[%s7157_s1 + $0xf8] sm:$0xff]   ;;  %v4862_v20 = vld [vmem:[%s7157_s1 + $0x200] sm:$0xff]  }
  0x8c   :  { %4502 = vmatpush3.bf16.msra.mxu0 %v4840_v55  ;;  %4321 = vmatprep.mubr.bf16.mxu1 %v5246_v8  ;;  %v4848_v8 = vld [vmem:[%s7157_s1 + $0x1e0] sm:$0xff]   ;;  %v4858_v55 = vld [vmem:[%s7157_s1 + $0x1f8] sm:$0xff]  }
  0x8d   :  { %4481 = vmatprep.mubr.bf16.mxu0 %v1995_v34  ;;  %4343 = vmatprep.subr.bf16.mxu1 %v4843_v29  ;;  %v975_v34 = vrot.slane %v4860_v9, 1 }
  0x8e   :  { %4503 = vmatprep.subr.bf16.mxu0 %v4844_v35 }
  0x8f   :  { %4344 = vmatpush3.bf16.msra.mxu1 %v4843_v29 }
  0x90   :  { %4504 = vmatpush3.bf16.msra.mxu0 %v4844_v35  ;;  %4345 = vmatprep.subr.bf16.mxu1 %v4846_v38  ;;  %v2259_v35 = vshrl.u32 %v5358_v37, 16  ;;  %v4864_v37 = vld [vmem:[%s7158_s0 + $0x1c] sm:$0xff]  }
  0x91   :  { %4505 = vmatprep.subr.bf16.mxu0 %v4848_v8 }
  0x92   :  { %4322 = vmatmul.mubr.bf16.gmra.mrb[8].mxu1 %v5260_v17  ;;  %v4854_v17 = vld [vmem:[%s7157_s1 + $0x1f0] sm:$0xff]   ;;  %v2261_v51 = vrot.slane %v2259_v35, 2  ;;  %v4869_v35 = vld [vmem:[%s7157_s1 + $0x218] sm:$0xff]  }
  0x93   :  { %4482 = vmatmul.mubr.bf16.gmra.mrb[8].mxu0 %v1997_v24  ;;  %4325 = vmatprep.mubr.bf16.mxu1 %v5269_v22  ;;  %v5506_v22 = vld [vmem:[%s7158_s0 + $0x60] sm:$0xf] }
  0x94   :  { %4485 = vmatprep.mubr.bf16.mxu0 %v1999_v14  ;;  %4346 = vmatpush3.bf16.msra.mxu1 %v4846_v38  ;;  %v3931_v15 = vcombine.low %v5506_v22, %v1907_v0  ;;  %v4861_v38 = vld [vmem:[%s7158_s0 + $0x14] sm:$0xff]  }
  0x95   :  { %4506 = vmatpush3.bf16.msra.mxu0 %v4848_v8  ;;  %4347 = vmatprep.subr.bf16.mxu1 %v4849_v58  ;;  %v2264_v8 = vrot.slane %v2262_v45, 3  ;;  %v977_v14 = vrot.slane %v4861_v38, 1 }
  0x96   :  { %4507 = vmatprep.subr.bf16.mxu0 %v4850_v36  ;;  %v2006_v25 = vrot.slane %v3931_v15, 2  ;;  %v4863_v15 = vld [vmem:[%s7157_s1 + $0x208] sm:$0xff]  }
  0x98   :  { %4348 = vmatpush3.bf16.msra.mxu1 %v4849_v58  ;;  %v2007_v29 = vsel %vm1649_vm2, %v2004_v11, %v2006_v25 }
  0x99   :  { %4508 = vmatpush3.bf16.msra.mxu0 %v4850_v36  ;;  %4349 = vmatprep.subr.bf16.mxu1 %v4853_v61  ;;  %v2273_v36 = vrot.slane %v2271_v49, 3 }
  0x9a   :  { %4326 = vmatmul.mubr.bf16.gmra.mrb[12].mxu1 %v5274_v28  ;;  %4509 = vmatprep.subr.bf16.mxu0 %v4854_v17  ;;  %v2250_v28 = vshrl.u32 %v5346_v54, 16  ;;  %v2247_v54 = vrot.slane %v2245_v19, 3 }
  0x9b   :  { %4486 = vmatmul.mubr.bf16.gmra.mrb[12].mxu0 %v2001_v4  ;;  %4329 = vmatprep.mubr.bf16.mxu1 %v5286_v30  ;;  %v2005_v30 = vsel %vm1649_vm2, %v2002_v56, %v2004_v11  ;;  %v2280_v56 = vshll.u32 %v5376_v2, 16  ;;  %v4865_v4 = vld [vmem:[%s7158_s0 + $0x24] sm:$0xff]  }
  0x9c   :  { %4489 = vmatprep.mubr.bf16.mxu0 %v2003_v13  ;;  %4350 = vmatpush3.bf16.msra.mxu1 %v4853_v61  ;;  %v2252_v39 = vrot.slane %v2250_v28, 2  ;;  %v2248_v31 = vor.u32 %v2247_v54, %v2244_v53  ;;  %v979_v61 = vrot.slane %v4864_v37, 1  ;;  %v981_v19 = vrot.slane %v4865_v4, 1 }
  0x9d   :  { %4510 = vmatpush3.bf16.msra.mxu0 %v4854_v17  ;;  %4351 = vmatprep.subr.bf16.mxu1 %v4857_v10  ;;  %v2286_v17 = vshrl.u32 %v5385_v5, 16  ;;  %v2282_v2 = vrot.slane %v2280_v56, 3  ;;  %v2304_v53 = vshrl.u32 %v5405_v12, 16  ;;  %v2322_v37 = vshrl.u32 %v5421_v23, 16 }
  0x9e   :  { %4511 = vmatprep.subr.bf16.mxu0 %v4858_v55  ;;  %v2256_v7 = vor.u32 %v2255_v62, %v2252_v39  ;;  %v980_v5 = vsel %vm641_vm3, %v977_v14, %v979_v61  ;;  %v4868_v39 = vld [vmem:[%s7158_s0 + $0x34] sm:$0xff]  }
  0x9f   :  { %v2288_v11 = vrot.slane %v2286_v17, 2  ;;  %v2306_v45 = vrot.slane %v2304_v53, 2  ;;  %v985_v38 = vrot.slane %v4868_v39, 1 }
  0xa0   :  { %4352 = vmatpush3.bf16.msra.mxu1 %v4857_v10  ;;  %v2257_v24 = vsel %vm2240_vm5, %v2248_v31, %v2256_v7  ;;  %v2279_v10 = vrot.slane %v2277_v60, 2 }
  0xa1   :  { %4512 = vmatpush3.bf16.msra.mxu0 %v4858_v55  ;;  %4577 = vmatprep.subr.bf16.mxu1 %v4862_v20  ;;  %v4867_v55 = vld [vmem:[%s7158_s0 + $0x2c] sm:$0xff]   ;;  %v2292_v54 = vor.u32 %v2291_v16, %v2288_v11 }
  0xa2   :  { %4330 = vmatmul.mubr.bf16.gmra.mrb[16].mxu1 %v5289_v59  ;;  %4537 = vmatprep.subr.bf16.mxu0 %v4862_v20  ;;  %v2268_v59 = vshrl.u32 %v5365_v42, 16  ;;  %v2265_v42 = vor.u32 %v2264_v8, %v2261_v51  ;;  %v2283_v28 = vor.u32 %v2282_v2, %v2279_v10  ;;  %v983_v9 = vrot.slane %v4867_v55, 1  ;;  %v4872_v8 = vld [vmem:[%s7157_s1 + $0x220] sm:$0xff]  }
  0xa3   :  { %4490 = vmatmul.mubr.bf16.gmra.mrb[16].mxu0 %v2005_v30  ;;  %4333 = vmatprep.mubr.bf16.mxu1 %v5304_v41  ;;  %v976_v41 = vsel %vm641_vm3, %v974_v32, %v975_v34  ;;  %v2295_v30 = vshrl.u32 %v5399_v1, 16  ;;  %v2300_v32 = vrot.slane %v2298_v26, 3  ;;  %v2316_v51 = vshll.u32 %v5413_v57, 16 }
  0xa4   :  { %4493 = vmatprep.mubr.bf16.mxu0 %v2007_v29  ;;  %v2270_v58 = vrot.slane %v2268_v59, 2  ;;  %v2266_v13 = vsel %vm2240_vm5, %v2256_v7, %v2265_v42  ;;  %v2307_v29 = vshll.u32 %v5405_v12, 16  ;;  %v984_v12 = vsel %vm641_vm3, %v981_v19, %v983_v9 }
  0xa5   :  { %v2297_v1 = vrot.slane %v2295_v30, 2  ;;  %v2293_v7 = vsel %vm2240_vm5, %v2283_v28, %v2292_v54  ;;  %v2334_v2 = vshll.u32 %v5438_v40, 16 }
  0xa6   :  { %v2274_v0 = vor.u32 %v2273_v36, %v2270_v58  ;;  %v2309_v31 = vrot.slane %v2307_v29, 3  ;;  %v2219_v58 = vld [vmem:[%s7158_s0 + $0x64] sm:$0x3]  ;;  %v986_v36 = vsel %vm641_vm3, %v983_v9, %v985_v38  ;;  %v4877_v9 = vld [vmem:[%s7158_s0 + $0x5c] ss:$0 sps:$4 sm:$0xff]  }
  0xa7   :  { %v2301_v59 = vor.u32 %v2300_v32, %v2297_v1  ;;  %v5611_v17 = vcombine.low %v5506_v22, %v2219_v58  ;;  %v2331_v22 = vshrl.u32 %v5438_v40, 16  ;;  %v2336_v26 = vrot.slane %v2334_v2, 3 }
  0xa8   :  { %v2284_v62 = vsel %vm2240_vm5, %v2274_v0, %v2283_v28  ;;  %v995_v1 = vrot.slane %v4877_v9, 1 }
  0xa9   :  { %v2340_v11 = vshrl.u32 %v5611_v17, 16  ;;  %v2343_v16 = vshll.u32 %v5611_v17, 16  ;;  %v2333_v30 = vrot.slane %v2331_v22, 2 }
  0xaa   :  { %4334 = vmatmul.mubr.bf16.gmra.mrb[28].mxu1 %v663_v33  ;;  %v978_v33 = vsel %vm641_vm3, %v975_v34, %v977_v14  ;;  %v4870_v34 = vld [vmem:[%s7158_s0 + $0x3c] sm:$0xff]   ;;  %v2325_v14 = vshll.u32 %v5421_v23, 16  ;;  %v4874_v23 = vld [vmem:[%s7158_s0 + $0x4c] sm:$0xff]  }
  0xab   :  { %4494 = vmatmul.mubr.bf16.gmra.mrb[28].mxu0 %v2006_v25  ;;  %4353 = vmatprep.mubr.bf16.mxu1 %v976_v41  ;;  %v2275_v25 = vsel %vm2240_vm5, %v2265_v42, %v2274_v0  ;;  %v987_v49 = vrot.slane %v4870_v34, 1  ;;  %v2313_v41 = vshrl.u32 %v5413_v57, 16  ;;  %v4871_v57 = vld [vmem:[%s7158_s0 + $0x44] sm:$0xff]   ;;  %v2302_v42 = vsel %vm2240_vm5, %v2292_v54, %v2301_v59 }
  0xac   :  { %4513 = vmatprep.mubr.bf16.mxu0 %v2257_v24  ;;  %v2310_v24 = vor.u32 %v2309_v31, %v2306_v45  ;;  %v2324_v0 = vrot.slane %v2322_v37, 2  ;;  %v2327_v4 = vrot.slane %v2325_v14, 3  ;;  %v991_v10 = vrot.slane %v4874_v23, 1 }
  0xad   :  { %v988_v60 = vsel %vm641_vm3, %v985_v38, %v987_v49  ;;  %v2315_v56 = vrot.slane %v2313_v41, 2  ;;  %v2342_v29 = vrot.slane %v2340_v11, 2  ;;  %v2345_v54 = vrot.slane %v2343_v16, 3 }
  0xae   :  { %v2311_v6 = vsel %vm2240_vm5, %v2301_v59, %v2310_v24  ;;  %v2328_v55 = vor.u32 %v2327_v4, %v2324_v0  ;;  %v2602_v31 = vrot.slane %v5611_v17, 3 }
  0xaf   :  { %v2346_v32 = vor.u32 %v2345_v54, %v2342_v29 }
  0xb2   :  { %4354 = vmatmul.mubr.bf16.vlgmr.msra.gmra.mrb[0].mxu1 %v978_v33  ;;  %v4873_v33 = vld [vmem:[%s7157_s1 + $0x228] sm:$0xff]  }
  0xb3   :  { %4514 = vmatmul.mubr.bf16.vlgmr.msra.gmra.mrb[0].mxu0 %v2266_v13  ;;  %4585 = vmatpush3.bf16.msra.mxu1 %v4862_v20  ;;  %v989_v13 = vrot.slane %v4871_v57, 1 }
  0xb4   :  { %4538 = vmatpush3.bf16.msra.mxu0 %v4862_v20  ;;  %4578 = vmatprep.subr.bf16.mxu1 %v4863_v15  ;;  %v982_v20 = vsel %vm641_vm3, %v979_v61, %v981_v19  ;;  %v2318_v61 = vrot.slane %v2316_v51, 3  ;;  %v4875_v19 = vld [vmem:[%s7158_s0 + $0x54] sm:$0xff]  }
  0xb5   :  { %4539 = vmatprep.subr.bf16.mxu0 %v4863_v15  ;;  %4357 = vmatprep.mubr.bf16.mxu1 %v980_v5  ;;  %v4876_v5 = vld [vmem:[%s7157_s1 + $0x230] sm:$0xff]   ;;  %v993_v39 = vrot.slane %v4875_v19, 1 }
  0xb6   :  { %4517 = vmatprep.mubr.bf16.mxu0 %v2275_v25  ;;  %v990_v25 = vsel %vm641_vm3, %v987_v49, %v989_v13 }
  0xb7   :  { %4586 = vmatpush3.bf16.msra.mxu1 %v4863_v15  ;;  %v994_v34 = vsel %vm641_vm3, %v991_v10, %v993_v39 }
  0xb8   :  { %4540 = vmatpush3.bf16.msra.mxu0 %v4863_v15  ;;  %4579 = vmatprep.subr.bf16.mxu1 %v4866_v27  ;;  %v2319_v15 = vor.u32 %v2318_v61, %v2315_v56 }
  0xb9   :  { %4541 = vmatprep.subr.bf16.mxu0 %v4866_v27 }
  0xba   :  { %4358 = vmatmul.mubr.bf16.gmra.mrb[4].mxu1 %v982_v20  ;;  %v2320_v28 = vsel %vm2240_vm5, %v2310_v24, %v2319_v15  ;;  %v2329_v53 = vsel %vm2240_vm5, %v2319_v15, %v2328_v55  ;;  %v4878_v20 = vld [vmem:[%s7157_s1 + $0x238] sm:$0xff]  }
  0xbb   :  { %4518 = vmatmul.mubr.bf16.gmra.mrb[4].mxu0 %v2284_v62  ;;  %4587 = vmatpush3.bf16.msra.mxu1 %v4866_v27  ;;  %v2337_v62 = vor.u32 %v2336_v26, %v2333_v30 }
  0xbc   :  { %4542 = vmatpush3.bf16.msra.mxu0 %v4866_v27  ;;  %4361 = vmatprep.mubr.bf16.mxu1 %v984_v12  ;;  %v992_v27 = vsel %vm641_vm3, %v989_v13, %v991_v10 }
  0xbd   :  { %4521 = vmatprep.mubr.bf16.mxu0 %v2293_v7  ;;  %4543 = vmatprep.subr.bf16.mxu0 %v4869_v35  ;;  %v2338_v12 = vsel %vm2240_vm5, %v2328_v55, %v2337_v62  ;;  %v2347_v45 = vsel %vm2240_vm5, %v2337_v62, %v2346_v32  ;;  %v2603_v7 = vsel %vm2580_vm4, %v2600_v18, %v2602_v31 }
  0xbe   :  { %4580 = vmatprep.subr.bf16.mxu1 %v4869_v35 }
  0xbf   :  { %4588 = vmatpush3.bf16.msra.mxu1 %v4869_v35 }
  0xc0   :  { %4544 = vmatpush3.bf16.msra.mxu0 %v4869_v35  ;;  %4581 = vmatprep.subr.bf16.mxu1 %v4872_v8  ;;  %v996_v35 = vsel %vm641_vm3, %v993_v39, %v995_v1 }
  0xc1   :  { %4545 = vmatprep.subr.bf16.mxu0 %v4872_v8 }
  0xc2   :  { %4362 = vmatmul.mubr.bf16.gmra.mrb[8].mxu1 %v986_v36 }
  0xc3   :  { %4522 = vmatmul.mubr.bf16.gmra.mrb[8].mxu0 %v2302_v42  ;;  %4365 = vmatprep.mubr.bf16.mxu1 %v988_v60 }
  0xc4   :  { %4525 = vmatprep.mubr.bf16.mxu0 %v2311_v6  ;;  %4546 = vmatpush3.bf16.msra.mxu0 %v4872_v8 }
  0xc5   :  { %4589 = vmatpush3.bf16.msra.mxu1 %v4872_v8  ;;  %4547 = vmatprep.subr.bf16.mxu0 %v4873_v33 }
  0xc6   :  { %4582 = vmatprep.subr.bf16.mxu1 %v4873_v33 }
  0xc8   :  { %4548 = vmatpush3.bf16.msra.mxu0 %v4873_v33 }
  0xc9   :  { %4590 = vmatpush3.bf16.msra.mxu1 %v4873_v33  ;;  %4549 = vmatprep.subr.bf16.mxu0 %v4876_v5 }
  0xca   :  { %4366 = vmatmul.mubr.bf16.gmra.mrb[12].mxu1 %v990_v25  ;;  %4583 = vmatprep.subr.bf16.mxu1 %v4876_v5 }
  0xcb   :  { %4526 = vmatmul.mubr.bf16.gmra.mrb[12].mxu0 %v2320_v28  ;;  %4369 = vmatprep.mubr.bf16.mxu1 %v992_v27 }
  0xcc   :  { %4529 = vmatprep.mubr.bf16.mxu0 %v2329_v53  ;;  %4550 = vmatpush3.bf16.msra.mxu0 %v4876_v5 }
  0xcd   :  { %4591 = vmatpush3.bf16.msra.mxu1 %v4876_v5  ;;  %4551 = vmatprep.subr.bf16.mxu0 %v4878_v20 }
  0xce   :  { %4584 = vmatprep.subr.bf16.mxu1 %v4878_v20 }
  0xd0   :  { %4552 = vmatpush3.bf16.msra.mxu0 %v4878_v20 }
  0xd1   :  { %4592 = vmatpush3.bf16.msra.mxu1 %v4878_v20 }
  0xd2   :  { %4370 = vmatmul.mubr.bf16.gmra.mrb[16].mxu1 %v994_v34 }
  0xd3   :  { %4530 = vmatmul.mubr.bf16.gmra.mrb[16].mxu0 %v2338_v12  ;;  %4373 = vmatprep.mubr.bf16.mxu1 %v996_v35 }
  0xd4   :  { %4533 = vmatprep.mubr.bf16.mxu0 %v2347_v45 }
  0xda   :  { %4374 = vmatmul.mubr.bf16.gmra.mrb[32].mxu1 %v995_v1 }
  0xdb   :  { %4534 = vmatmul.mubr.bf16.gmra.mrb[32].mxu0 %v2346_v32  ;;  %4565 = vmatprep.mubr.bf16.mxu1 %v5441_v43 }
  0xdc   :  { %4553 = vmatprep.mubr.bf16.mxu0 %v5448_v63 }
  0xe2   :  { %4566 = vmatmul.mubr.bf16.vlgmr.msra.gmra.mrb[36].mxu1 %v5451_v46 }
  0xe3   :  { %4554 = vmatmul.mubr.bf16.vlgmr.msra.gmra.mrb[0].mxu0 %v5444_v21  ;;  %4569 = vmatprep.mubr.bf16.mxu1 %v5463_v48 }
  0xe4   :  { %4557 = vmatprep.mubr.bf16.mxu0 %v5454_v47 }
  0xea   :  { %4570 = vmatmul.mubr.bf16.gmra.mrb[40].mxu1 %v5477_v44  ;;  %v2867_v44 = vlaneseq }
  0xeb   :  { %4558 = vmatmul.mubr.bf16.gmra.mrb[4].mxu0 %v5472_v3  ;;  %4573 = vmatprep.mubr.bf16.mxu1 %v2603_v7  ;;  %v4880_v3 = vmov 0  }
  0xec   :  { %4561 = vmatprep.mubr.bf16.mxu0 %v5480_v50  ;;  %v5661_v38 = vshrl.u32 %v2867_v44, 7  ;;  %15 = vst [vmem:[%s7159_s3] sm:$0xf] %v4880_v3  ;;  %v19_v50 = vld [vmem:[%s7159_s3 + $0x4] sm:$0x3]  ;;  %28 = vst [vmem:[%s7159_s3 + $0x64] sm:$0xf] %v4880_v3 }
  0xee   :  { %v2870_v59 = vadd.s32 16, %v5661_v38  ;;  %v2882_v49 = vadd.s32 112, %v5661_v38  ;;  %v2880_v51 = vadd.s32 96, %v5661_v38  ;;  %v2871_v24 = vadd.s32 24, %v5661_v38 }
  0xef   :  { %v2891_v37 = vadd.s32 11, %v5661_v38  ;;  %v2883_v23 = vadd.s32 120, %v5661_v38  ;;  %v2869_v5 = vadd.s32 8, %v5661_v38  ;;  %v2881_v62 = vadd.s32 104, %v5661_v38 }
  0xf0   :  { %v2893_v41 = vadd.s32 11, %v2870_v59  ;;  %v2905_v8 = vadd.s32 11, %v2882_v49  ;;  %v2903_v58 = vadd.s32 11, %v2880_v51  ;;  %v2894_v57 = vadd.s32 11, %v2871_v24 }
  0xf1   :  { %v2914_v42 = vcvt.s32.f32 %v2891_v37  ;;  %v5695_v28 = vadd.s32 11, %v2883_v23  ;;  %v5697_v26 = vadd.s32 11, %v2869_v5  ;;  %v2874_v32 = vadd.s32 48, %v5661_v38 }
  0xf2   :  { %4574 = vmatmul.mubr.bf16.gmra.mrb[44].mxu1 %v2602_v31  ;;  %v2916_v14 = vcvt.s32.f32 %v2893_v41  ;;  %v2928_v36 = vcvt.s32.f32 %v2905_v8  ;;  %v2926_v61 = vcvt.s32.f32 %v2903_v58  ;;  %v2917_v4 = vcvt.s32.f32 %v2894_v57 }
  0xf3   :  { %4562 = vmatmul.mubr.bf16.gmra.mrb[8].mxu0 %v5483_v52  ;;  %v20_v52 = vsel %vm18_vm8, 0, %v19_v50  ;;  %v2937_v55 = vadd.f32 0.5, %v2914_v42  ;;  %v2929_v54 = vcvt.s32.f32 %v5695_v28  ;;  %v2915_v1 = vcvt.s32.f32 %v5697_v26 }
  0xf4   :  { %21 = vst [vmem:[%s7159_s3 + $0x4] sm:$0x3] %v20_v52  ;;  %v2939_v56 = vadd.f32 0.5, %v2916_v14  ;;  %v2951_v0 = vadd.f32 0.5, %v2928_v36  ;;  %v2949_v19 = vadd.f32 0.5, %v2926_v61  ;;  %v2940_v30 = vadd.f32 0.5, %v2917_v4 }
  0xf5   :  { %v2960_v53 = vmul.f32 0.009615385, %v2937_v55  ;;  %v2952_v45 = vadd.f32 0.5, %v2929_v54  ;;  %v2886_v59 = vadd.s32 144, %v5661_v38  ;;  %v2872_v8 = vadd.s32 32, %v5661_v38 }
  0xf6   :  { %v2962_v25 = vmul.f32 0.009615385, %v2939_v56  ;;  %v2974_v27 = vmul.f32 0.009615385, %v2951_v0  ;;  %v2972_v29 = vmul.f32 0.009615385, %v2949_v19 }
  0xf7   :  { %v2963_v39 = vmul.f32 0.009615385, %v2940_v30  ;;  %v2983_v12 = vfloor.f32 %v2960_v53  ;;  %v2975_v3 = vmul.f32 0.009615385, %v2952_v45  ;;  %v5731_v0 = vadd.s32 11, %v2872_v8 }
  0xf8   :  { %v2985_v9 = vfloor.f32 %v2962_v25  ;;  %v2997_v20 = vfloor.f32 %v2974_v27  ;;  %v2995_v35 = vfloor.f32 %v2972_v29  ;;  %v2884_v5 = vadd.s32 128, %v5661_v38 }
  0xf9   :  { %v2986_v7 = vfloor.f32 %v2963_v39  ;;  %v2998_v58 = vfloor.f32 %v2975_v3  ;;  %v2875_v19 = vadd.s32 56, %v5661_v38  ;;  %v2918_v30 = vcvt.s32.f32 %v5731_v0 }
  0xfa   :  { %v3008_v34 = vmul.f32 104.0, %v2985_v9  ;;  %v3020_v31 = vmul.f32 104.0, %v2997_v20  ;;  %v3018_v44 = vmul.f32 104.0, %v2995_v35  ;;  %v2887_v9 = vadd.s32 152, %v5661_v38  ;;  %v25_v20 = vld [vmem:[%s7159_s3 + $0x60] sm:$0xf] }
  0xfb   :  { %v3009_v52 = vmul.f32 104.0, %v2986_v7  ;;  %v2878_v26 = vadd.s32 80, %v5661_v38 }
  0xfc   :  { %v5711_v50 = vsub.f32 %v2928_v36, %v3020_v31  ;;  %v5754_v31 = vadd.s32 11, %v2875_v19 }
  0xfd   :  { %v5723_v57 = vsub.f32 %v2917_v4, %v3009_v52  ;;  %v2873_v52 = vadd.s32 40, %v5661_v38 }
  0xfe   :  { %v3066_v36 = vadd.f32 0.5, %v5711_v50 }
  0xff   :  { %v3055_v4 = vadd.f32 0.5, %v5723_v57 }
 0x101   :  { %v3078_v7 = vmul.f32 0.1, %v3055_v4 }
 0x11d   :  { %v4255_v43 = vpop.f32.mrb[20].mxu1 }
 0x11e   :  { %v5655_v21 = vpop.f32.mrb[20].mxu0  ;;  %v415_v63 = vpop.f32.mrb[21].mxu1 }
 0x11f   :  { %v5657_v46 = vpop.f32.mrb[21].mxu0  ;;  %v4256_v47 = vpop.f32.mrb[22].mxu1 }
 0x120   :  { %v4416_v40 = vpop.f32.mrb[22].mxu0  ;;  %v418_v48 = vpop.f32.mrb[23].mxu1  ;;  %v5707_v47 = vadd.s32 11, %v2874_v32  ;;  %v5748_v32 = vadd.s32 11, %v2884_v5 }
 0x121   :  { %v5659_v18 = vpop.f32.mrb[23].mxu0  ;;  %v5709_v40 = vsub.f32 %v2916_v14, %v3008_v34  ;;  %v5720_v14 = vsub.f32 %v2926_v61, %v3018_v44  ;;  %v26_v34 = vsel %vm24_vm11, 0, %v25_v20 }
 0x122   :  { %7174 = vst [vmem:[#allocation2_spill] sm:$0xff] %v5659_v18  ;;  %v2920_v51 = vcvt.s32.f32 %v5707_v47  ;;  %27 = vst [vmem:[%s7159_s3 + $0x60] sm:$0xf] %v26_v34  ;;  %v2890_v47 = vadd.s32 176, %v5661_v38 }
 0x123   :  { %v3054_v24 = vadd.f32 0.5, %v5709_v40 }
 0x14d   :  { %v4295_v60 = vpop.f32.mrb[24].mxu1 }
 0x14e   :  { %v5682_v17 = vadd.f32 %v4295_v60, %v4255_v43  ;;  %v5684_v6 = vpop.f32.mrb[24].mxu0  ;;  %v606_v33 = vpop.f32.mrb[25].mxu1  ;;  %v5703_v43 = vadd.s32 11, %v2881_v62  ;;  %v5725_v60 = vadd.s32 11, %v2886_v59  ;;  %v2885_v59 = vadd.s32 136, %v5661_v38 }
 0x14f   :  { %v5686_v13 = vadd.f32 %v606_v33, %v415_v63  ;;  %v5688_v15 = vpop.f32.mrb[25].mxu0  ;;  %v4296_v10 = vpop.f32.mrb[26].mxu1  ;;  %v2938_v63 = vadd.f32 0.5, %v2915_v1  ;;  %v2943_v33 = vadd.f32 0.5, %v2920_v51 }
 0x150   :  { %7175 = vst [vmem:[#allocation3_spill] sm:$0xff] %v5688_v15  ;;  %v4456_v22 = vpop.f32.mrb[26].mxu0  ;;  %v609_v2 = vpop.f32.mrb[27].mxu1  ;;  %v2927_v49 = vcvt.s32.f32 %v5703_v43  ;;  %v3064_v10 = vadd.f32 0.5, %v5720_v14  ;;  %v2932_v55 = vcvt.s32.f32 %v5725_v60  ;;  %v5785_v4 = vadd.s32 11, %v2885_v59 }
 0x151   :  { %v5691_v11 = vadd.f32 %v609_v2, %v418_v48  ;;  %v5693_v16 = vpop.f32.mrb[27].mxu0  ;;  %v3006_v48 = vmul.f32 104.0, %v2983_v12  ;;  %v2961_v41 = vmul.f32 0.009615385, %v2938_v63  ;;  %v3021_v22 = vmul.f32 104.0, %v2998_v58 }
 0x152   :  { %7176 = vst [vmem:[#allocation4_spill] sm:$0xff] %v5693_v16  ;;  %v2950_v56 = vadd.f32 0.5, %v2927_v49  ;;  %v3089_v2 = vmul.f32 0.1, %v3066_v36  ;;  %v2966_v27 = vmul.f32 0.009615385, %v2943_v33  ;;  %v7166_v58 = vcvt.s32.f32 %v5748_v32 }
 0x153   :  { %v5718_v37 = vsub.f32 %v2914_v42, %v3006_v48  ;;  %v2984_v23 = vfloor.f32 %v2961_v41  ;;  %v3077_v42 = vmul.f32 0.1, %v3054_v24  ;;  %v3087_v29 = vmul.f32 0.1, %v3064_v10 }
 0x154   :  { %v2973_v25 = vmul.f32 0.009615385, %v2950_v56  ;;  %v5744_v39 = vsub.f32 %v2929_v54, %v3021_v22  ;;  %v2955_v62 = vadd.f32 0.5, %v2932_v55  ;;  %v5752_v35 = vfloor.f32 %v3089_v2 }
 0x155   :  { %v3052_v61 = vadd.f32 0.5, %v5718_v37  ;;  %v3007_v28 = vmul.f32 104.0, %v2984_v23  ;;  %v5750_v12 = vfloor.f32 %v3077_v42  ;;  %v2989_v54 = vfloor.f32 %v2966_v27 }
 0x156   :  { %v2996_v45 = vfloor.f32 %v2973_v25  ;;  %v2941_v63 = vadd.f32 0.5, %v2918_v30  ;;  %v5761_v48 = vadd.s32 11, %v2887_v9  ;;  %v5771_v41 = vfloor.f32 %v3087_v29 }
 0x157   :  { %v3075_v53 = vmul.f32 0.1, %v3052_v61  ;;  %v5767_v3 = vsub.f32 %v2915_v1, %v3007_v28  ;;  %v3067_v8 = vadd.f32 0.5, %v5744_v39  ;;  %v2978_v24 = vmul.f32 0.009615385, %v2955_v62 }
 0x158   :  { %v3123_v36 = vmul.f32 10.0, %v5750_v12  ;;  %v3019_v56 = vmul.f32 104.0, %v2996_v45  ;;  %v7165_v23 = vcvt.s32.f32 %v5754_v31  ;;  %v3135_v1 = vmul.f32 10.0, %v5752_v35 }
 0x159   :  { %v5763_v44 = vfloor.f32 %v3075_v53  ;;  %v3012_v33 = vmul.f32 104.0, %v2989_v54  ;;  %v2964_v42 = vmul.f32 0.009615385, %v2941_v63  ;;  %v7164_v61 = vcvt.s32.f32 %v5761_v48 }
 0x15a   :  { %v5780_v10 = vfloor.f32 %v3078_v7  ;;  %v3053_v22 = vadd.f32 0.5, %v5767_v3  ;;  %v5783_v2 = vadd.s32 11, %v2873_v52  ;;  %v3133_v25 = vmul.f32 10.0, %v5771_v41 }
 0x15b   :  { %v3121_v5 = vmul.f32 10.0, %v5763_v44  ;;  %v3001_v19 = vfloor.f32 %v2978_v24  ;;  %v2953_v28 = vadd.f32 0.5, %v7166_v58  ;;  %v3090_v27 = vmul.f32 0.1, %v3067_v8 }
 0x15c   :  { %v5793_v9 = vsub.f32 %v2927_v49, %v3019_v56  ;;  %v2944_v53 = vadd.f32 0.5, %v7165_v23  ;;  %v5797_v29 = vadd.s32 11, %v2878_v26  ;;  %v5800_v20 = vsub.f32 %v5709_v40, %v3123_v36 }
 0x15d   :  { %v5804_v62 = vsub.f32 %v2920_v51, %v3012_v33  ;;  %v2987_v34 = vfloor.f32 %v2964_v42  ;;  %v2956_v45 = vadd.f32 0.5, %v7164_v61  ;;  %v5809_v43 = vsub.f32 %v5711_v50, %v3135_v1 }
 0x15e   :  { %v3124_v49 = vmul.f32 10.0, %v5780_v10  ;;  %v7161_v7 = vcvt.s32.f32 %v5783_v2  ;;  %v7162_v54 = vcvt.s32.f32 %v5785_v4  ;;  %v3076_v63 = vmul.f32 0.1, %v3053_v22 }
 0x15f   :  { %v3024_v40 = vmul.f32 104.0, %v3001_v19  ;;  %v2976_v52 = vmul.f32 0.009615385, %v2953_v28  ;;  %v3065_v51 = vadd.f32 0.5, %v5793_v9  ;;  %v2967_v59 = vmul.f32 0.009615385, %v2944_v53 }
 0x160   :  { %v7163_v8 = vcvt.s32.f32 %v5797_v29  ;;  %v2876_v24 = vadd.s32 64, %v5661_v38  ;;  %v3058_v50 = vadd.f32 0.5, %v5804_v62  ;;  %v3010_v36 = vmul.f32 104.0, %v2987_v34 }
 0x161   :  { %v2979_v56 = vmul.f32 0.009615385, %v2956_v45  ;;  %v2888_v26 = vadd.s32 160, %v5661_v38  ;;  %v5821_v1 = vsub.f32 %v5718_v37, %v3121_v5  ;;  %v5823_v33 = vfloor.f32 %v3090_v27 }
 0x162   :  { %v2942_v42 = vadd.f32 0.5, %v7161_v7  ;;  %v2954_v22 = vadd.f32 0.5, %v7162_v54  ;;  %v5830_v19 = vsub.f32 %v5720_v14, %v3133_v25  ;;  %v5834_v28 = vsub.f32 %v2932_v55, %v3024_v40 }
 0x163   :  { %v2999_v53 = vfloor.f32 %v2976_v52  ;;  %v5836_v34 = vadd.s32 11, %v2890_v47  ;;  %v3088_v37 = vmul.f32 0.1, %v3065_v51  ;;  %v2990_v5 = vfloor.f32 %v2967_v59 }
 0x164   :  { %v2947_v27 = vadd.f32 0.5, %v7163_v8  ;;  %v5840_v45 = vadd.s32 11, %v2876_v24  ;;  %v3081_v7 = vmul.f32 0.1, %v3058_v50  ;;  %v5844_v54 = vsub.f32 %v2918_v30, %v3010_v36 }
 0x165   :  { %v3002_v14 = vfloor.f32 %v2979_v56  ;;  %v5846_v25 = vadd.s32 11, %v2888_v26  ;;  %v3136_v55 = vmul.f32 10.0, %v5823_v33  ;;  %v5849_v40 = vfloor.f32 %v3076_v63 }
 0x166   :  { %v2965_v52 = vmul.f32 0.009615385, %v2942_v42  ;;  %v2977_v47 = vmul.f32 0.009615385, %v2954_v22  ;;  %v3070_v0 = vadd.f32 0.5, %v5834_v28  ;;  %v3022_v30 = vmul.f32 104.0, %v2999_v53 }
 0x167   :  { %v7169_v50 = vcvt.s32.f32 %v5836_v34  ;;  %v3013_v26 = vmul.f32 104.0, %v2990_v5  ;;  %v2970_v42 = vmul.f32 0.009615385, %v2947_v27  ;;  %v7168_v22 = vcvt.s32.f32 %v5840_v45 }
 0x168   :  { %v5864_v8 = vfloor.f32 %v3088_v37  ;;  %v3056_v61 = vadd.f32 0.5, %v5844_v54  ;;  %v3025_v23 = vmul.f32 104.0, %v3002_v14  ;;  %v7167_v53 = vcvt.s32.f32 %v5846_v25 }
 0x169   :  { %v2988_v5 = vfloor.f32 %v2965_v52  ;;  %v3000_v27 = vfloor.f32 %v2977_v47  ;;  %vm3169_vm12 = vcmp.ge.f32.partialorder %v5750_v12, 1.0  ;;  %vm3192_vm13 = vcmp.le.f32.partialorder %v5750_v12, 8.0 }
 0x16a   :  { %v5878_v37 = vsub.f32 %v5723_v57, %v3124_v49  ;;  %v3122_v14 = vmul.f32 10.0, %v5849_v40  ;;  %vm3181_vm14 = vcmp.ge.f32.partialorder %v5752_v35, 1.0  ;;  %vm3204_vm15 = vcmp.le.f32.partialorder %v5752_v35, 8.0  ;;  %vm5976_vm7 = vmand %vm3169_vm12, %vm3192_vm13 }
 0x16b   :  { %v7181_v47 = vcvt.s32.f32 %v5754_v31  ;;  %v2993_v57 = vfloor.f32 %v2970_v42  ;;  %v2945_v49 = vadd.f32 0.5, %v7168_v22  ;;  %vm3167_vm0 = vcmp.ge.f32.partialorder %v5763_v44, 1.0  ;;  %vm5991_vm12 = vmand %vm3181_vm14, %vm3204_vm15 }
 0x16c   :  { %vm3190_vm1 = vcmp.le.f32.partialorder %v5763_v44, 8.0  ;;  %v2957_v31 = vadd.f32 0.5, %v7167_v53  ;;  %vm3179_vm2 = vcmp.ge.f32.partialorder %v5771_v41, 1.0  ;;  %vm3202_vm3 = vcmp.le.f32.partialorder %v5771_v41, 8.0 }
 0x16d   :  { %v3134_v42 = vmul.f32 10.0, %v5864_v8  ;;  %vm3170_vm4 = vcmp.ge.f32.partialorder %v5780_v10, 1.0  ;;  %vm3193_vm5 = vcmp.le.f32.partialorder %v5780_v10, 8.0  ;;  %vm3205_vm8 = vcmp.le.f32.partialorder %v5823_v33, 8.0  ;;  %vm6008_vm14 = vmand %vm3167_vm0, %vm3190_vm1 }
 0x16e   :  { %v3016_v22 = vmul.f32 104.0, %v2993_v57  ;;  %vm6023_vm15 = vmand %vm3179_vm2, %vm3202_vm3  ;;  %vm7204_vm3 = vcmp.ge.f32.partialorder %v5823_v33, 1.0  ;;  %v7207_v10 = vcvt.s32.f32 %v5836_v34  ;;  %vm7216_vm13 = vcmp.ge.f32.partialorder %v5864_v8, 1.0 }
 0x16f   :  { %vm6037_vm0 = vmand %vm3170_vm4, %vm3193_vm5  ;;  %vm7210_vm4 = vcmp.le.f32.partialorder %v5849_v40, 8.0  ;;  %vm7211_vm5 = vcmp.ge.f32.partialorder %v5849_v40, 1.0  ;;  %v7284_v35 = vmov 0 }
 0x170   :  { %vm6047_vm6 = vmand %vm7204_vm3, %vm3205_vm8  ;;  %vm7215_vm3 = vcmp.le.f32.partialorder %v5864_v8, 8.0 }
 0x171   :  { %vm6064_vm8 = vmand %vm7211_vm5, %vm7210_vm4  ;;  %vm7221_vm5 = vcmp.ge.f32.partialorder %v5800_v20, 1.0  ;;  %vm7224_vm4 = vcmp.ge.f32.partialorder %v5809_v43, 1.0 }
 0x172   :  { %vm6078_vm1 = vmand %vm7216_vm13, %vm7215_vm3 }
 0x173   :  { %vm6096_vm13 = vmand %vm5976_vm7, %vm7221_vm5 }
 0x174   :  { %vm6105_vm2 = vmand %vm5991_vm12, %vm7224_vm4  ;;  %vm7231_vm12 = vcmp.ge.f32.partialorder %v5821_v1, 1.0 }
 0x175   :  { %vm6130_vm4 = vmand %vm6008_vm14, %vm7231_vm12 }
 0x17d   :  { %v4335_v60 = vpop.f32.mrb[28].mxu1 }
 0x17e   :  { %v5852_v51 = vadd.f32 %v4335_v60, %v5682_v17  ;;  %v5854_v59 = vpop.f32.mrb[28].mxu0  ;;  %v839_v24 = vpop.f32.mrb[29].mxu1 }
 0x17f   :  { %7177 = vst [vmem:[#allocation5_spill] sm:$0xff] %v5854_v59  ;;  %v5859_v36 = vadd.f32 %v839_v24, %v5686_v13  ;;  %v5861_v56 = vpop.f32.mrb[29].mxu0  ;;  %v4336_v63 = vpop.f32.mrb[30].mxu1  ;;  %v5873_v24 = vfloor.f32 %v3081_v7  ;;  %v7180_v7 = vcvt.s32.f32 %v5748_v32  ;;  %v7182_v32 = vcvt.s32.f32 %v5761_v48 }
 0x180   :  { %7178 = vst [vmem:[#allocation6_spill] sm:$0xff] %v5861_v56  ;;  %v4496_v17 = vpop.f32.mrb[30].mxu0  ;;  %v842_v60 = vpop.f32.mrb[31].mxu1  ;;  %v3093_v63 = vmul.f32 0.1, %v3070_v0  ;;  %v5898_v0 = vsub.f32 %v5744_v39, %v3136_v55  ;;  %v3011_v39 = vmul.f32 104.0, %v2988_v5 }
 0x181   :  { %v5869_v58 = vadd.f32 %v842_v60, %v5691_v11  ;;  %v5871_v13 = vpop.f32.mrb[31].mxu0  ;;  %v2959_v11 = vadd.f32 0.5, %v7169_v50  ;;  %v5887_v52 = vsub.f32 %v7180_v7, %v3022_v30  ;;  %v5891_v17 = vsub.f32 %v7181_v47, %v3013_v26 }
 0x182   :  { %7179 = vst [vmem:[#allocation7_spill] sm:$0xff] %v5871_v13  ;;  %v3079_v60 = vmul.f32 0.1, %v3056_v61  ;;  %v5902_v30 = vsub.f32 %v7182_v32, %v3025_v23  ;;  %v3127_v7 = vmul.f32 10.0, %v5873_v24  ;;  %v3023_v55 = vmul.f32 104.0, %v3000_v27 }
 0x183   :  { %v5916_v48 = vfloor.f32 %v3093_v63  ;;  %v2982_v23 = vmul.f32 0.009615385, %v2959_v11  ;;  %v2879_v47 = vadd.s32 88, %v5661_v38  ;;  %v2877_v32 = vadd.s32 72, %v5661_v38 }
 0x184   :  { %v3068_v5 = vadd.f32 0.5, %v5887_v52  ;;  %v3059_v27 = vadd.f32 0.5, %v5891_v17  ;;  %v2968_v50 = vmul.f32 0.009615385, %v2945_v49  ;;  %v5929_v63 = vsub.f32 %v5767_v3, %v3122_v14 }
 0x185   :  { %v5906_v26 = vpop.f32.mrb[0].mxu1  ;;  %v5933_v11 = vfloor.f32 %v3079_v60  ;;  %v5937_v13 = vsub.f32 %v5793_v9, %v3134_v42  ;;  %v5942_v57 = vsub.f32 %v5804_v62, %v3127_v7  ;;  %v7187_v3 = vcvt.s32.f32 %v5783_v2 }
 0x186   :  { %7183 = vst [vmem:[#allocation8_spill] sm:$0xff] %v5906_v26  ;;  %v5912_v61 = vpop.f32.mrb[1].mxu1  ;;  %v2980_v26 = vmul.f32 0.009615385, %v2957_v31  ;;  %v7188_v49 = vcvt.s32.f32 %v5785_v4  ;;  %v3139_v9 = vmul.f32 10.0, %v5916_v48  ;;  %v3005_v31 = vfloor.f32 %v2982_v23 }
 0x187   :  { %7184 = vst [vmem:[#allocation9_spill] sm:$0xff] %v5912_v61  ;;  %v5920_v53 = vpop.f32.mrb[2].mxu1  ;;  %v5946_v14 = vsub.f32 %v7187_v3, %v3011_v39  ;;  %v5956_v42 = vadd.s32 11, %v2879_v47  ;;  %v5958_v62 = vadd.s32 11, %v2877_v32  ;;  %v3091_v2 = vmul.f32 0.1, %v3068_v5 }
 0x188   :  { %7185 = vst [vmem:[#allocation10_spill] sm:$0xff] %v5920_v53  ;;  %v5926_v61 = vpop.f32.mrb[3].mxu1  ;;  %v3071_v53 = vadd.f32 0.5, %v5902_v30  ;;  %v5950_v60 = vsub.f32 %v7188_v49, %v3023_v55  ;;  %v3082_v4 = vmul.f32 0.1, %v3059_v27  ;;  %v7189_v7 = vcvt.s32.f32 %v5797_v29 }
 0x189   :  { %7186 = vst [vmem:[#allocation11_spill] sm:$0xff] %v5926_v61  ;;  %v2991_v55 = vfloor.f32 %v2968_v50  ;;  %vm3196_vm9 = vcmp.le.f32.partialorder %v5873_v24, 8.0  ;;  %v3125_v23 = vmul.f32 10.0, %v5933_v11  ;;  %v3003_v32 = vfloor.f32 %v2980_v26 }
 0x18a   :  { %v5964_v39 = vsub.f32 %v7189_v7, %v3016_v22  ;;  %v3094_v47 = vmul.f32 0.1, %v3071_v53  ;;  %v3057_v50 = vadd.f32 0.5, %v5946_v14  ;;  %v3069_v22 = vadd.f32 0.5, %v5950_v60 }
 0x18b   :  { %v5998_v26 = vsub.f32 %v5834_v28, %v3139_v9  ;;  %v3028_v5 = vmul.f32 104.0, %v3005_v31  ;;  %v3014_v9 = vmul.f32 104.0, %v2991_v55  ;;  %v6028_v44 = vsub.f32 %v5844_v54, %v3125_v23 }
 0x18c   :  { %v3062_v28 = vadd.f32 0.5, %v5964_v39  ;;  %v2889_v27 = vadd.s32 168, %v5661_v38  ;;  %v3080_v41 = vmul.f32 0.1, %v3057_v50  ;;  %v3092_v54 = vmul.f32 0.1, %v3069_v22 }
 0x18d   :  { %v5970_v3 = vpop.f32.mrb[4].mxu1  ;;  %v6054_v23 = vsub.f32 %v7207_v10, %v3028_v5  ;;  %v7209_v50 = vcvt.s32.f32 %v5958_v62  ;;  %v7214_v10 = vcvt.s32.f32 %v5840_v45  ;;  %vm7227_vm11 = vcmp.ge.f32.partialorder %v5873_v24, 1.0 }
 0x18e   :  { %7190 = vst [vmem:[#allocation12_spill] sm:$0xff] %v5970_v3  ;;  %v5985_v53 = vpop.f32.mrb[5].mxu1  ;;  %v6014_v3 = vfloor.f32 %v3082_v4  ;;  %v3026_v4 = vmul.f32 104.0, %v3003_v32  ;;  %v3085_v5 = vmul.f32 0.1, %v3062_v28  ;;  %v6088_v28 = vadd.s32 11, %v2889_v27  ;;  %vm6114_vm7 = vmand %vm7227_vm11, %vm3196_vm9 }
 0x18f   :  { %7193 = vst [vmem:[#allocation13_spill] sm:$0xff] %v5985_v53  ;;  %v6002_v7 = vpop.f32.mrb[6].mxu1  ;;  %v6012_v53 = vfloor.f32 %v3091_v2  ;;  %v6030_v2 = vfloor.f32 %v3094_v47  ;;  %v7208_v47 = vcvt.s32.f32 %v5956_v42  ;;  %v2946_v22 = vadd.f32 0.5, %v7209_v50 }
 0x190   :  { %7196 = vst [vmem:[#allocation14_spill] sm:$0xff] %v6002_v7  ;;  %v6017_v31 = vpop.f32.mrb[7].mxu1  ;;  %v3128_v34 = vmul.f32 10.0, %v6014_v3  ;;  %v6072_v7 = vsub.f32 %v7214_v10, %v3014_v9  ;;  %v7219_v50 = vcvt.s32.f32 %v5846_v25  ;;  %v7225_v25 = vmov 0 }
 0x191   :  { %7199 = vst [vmem:[#allocation15_spill] sm:$0xff] %v6017_v31  ;;  %v2948_v32 = vadd.f32 0.5, %v7208_v47  ;;  %v3137_v31 = vmul.f32 10.0, %v6012_v53  ;;  %v3140_v40 = vmul.f32 10.0, %v6030_v2  ;;  %v7226_v25 = vsel %vm6105_vm2, 4294967295, %v7225_v25 }
 0x192   :  { %v6086_v61 = vsub.f32 %v7219_v50, %v3026_v4  ;;  %v6120_v27 = vfloor.f32 %v3080_v41  ;;  %v6122_v12 = vfloor.f32 %v3092_v54  ;;  %vm7234_vm11 = vcmp.ge.f32.partialorder %v5830_v19, 1.0 }
 0x193   :  { %vm6139_vm10 = vmand %vm6023_vm15, %vm7234_vm11  ;;  %v7235_v4 = vmov 0  ;;  %vm7237_vm3 = vcmp.le.f32.partialorder %v5916_v48, 8.0  ;;  %vm7238_vm2 = vcmp.ge.f32.partialorder %v5916_v48, 1.0  ;;  %v3074_v41 = vadd.f32 0.5, %v6054_v23 }
 0x194   :  { %v7236_v4 = vsel %vm6139_vm10, 4294967295, %v7235_v4  ;;  %vm6148_vm14 = vmand %vm7238_vm2, %vm7237_vm3  ;;  %v2971_v54 = vmul.f32 0.009615385, %v2948_v32  ;;  %v2969_v10 = vmul.f32 0.009615385, %v2946_v22  ;;  %vm7242_vm15 = vcmp.ge.f32.partialorder %v5878_v37, 1.0 }
 0x195   :  { %v6090_v45 = vpop.f32.mrb[8].mxu1  ;;  %vm6159_vm12 = vmand %vm6037_vm0, %vm7242_vm15  ;;  %vm7245_vm2 = vcmp.ge.f32.partialorder %v5898_v0, 1.0  ;;  %vm7248_vm10 = vcmp.le.f32.partialorder %v5933_v11, 8.0  ;;  %vm7249_vm0 = vcmp.ge.f32.partialorder %v5933_v11, 1.0  ;;  %v6183_v32 = vsub.f32 %v5887_v52, %v3137_v31 }
 0x196   :  { %7220 = vst [vmem:[#allocation16_spill] sm:$0xff] %v6090_v45  ;;  %v6124_v9 = vpop.f32.mrb[9].mxu1  ;;  %vm6168_vm3 = vmand %vm6047_vm6, %vm7245_vm2  ;;  %v6186_v38 = vsub.f32 %v5891_v17, %v3128_v34  ;;  %v6188_v22 = vfloor.f32 %v3085_v5  ;;  %vm7253_vm6 = vcmp.ge.f32.partialorder %v5929_v63, 1.0  ;;  %v7254_v11 = vmov 0 }
 0x197   :  { %7230 = vst [vmem:[#allocation17_spill] sm:$0xff] %v6124_v9  ;;  %v6153_v50 = vpop.f32.mrb[10].mxu1  ;;  %vm6178_vm15 = vmand %vm7249_vm0, %vm7248_vm10  ;;  %v6203_v52 = vsub.f32 %v5902_v30, %v3140_v40  ;;  %v3072_v17 = vadd.f32 0.5, %v6086_v61  ;;  %vm7256_vm0 = vcmp.ge.f32.partialorder %v5937_v13, 1.0  ;;  %vm3197_vm2 = vcmp.le.f32.partialorder %v6014_v3, 8.0 }
 0x198   :  { %7241 = vst [vmem:[#allocation18_spill] sm:$0xff] %v6153_v50  ;;  %v3060_v50 = vadd.f32 0.5, %v6072_v7  ;;  %v6191_v9 = vpop.f32.mrb[11].mxu1  ;;  %vm6197_vm10 = vmand %vm6064_vm8, %vm7253_vm6  ;;  %vm7259_vm6 = vcmp.ge.f32.partialorder %v5942_v57, 1.0  ;;  %v3126_v33 = vmul.f32 10.0, %v6120_v27  ;;  %v3138_v5 = vmul.f32 10.0, %v6122_v12 }
 0x199   :  { %7252 = vst [vmem:[#allocation19_spill] sm:$0xff] %v6191_v9  ;;  %v7255_v11 = vsel %vm6197_vm10, 4294967295, %v7254_v11  ;;  %vm6211_vm9 = vmand %vm6078_vm1, %vm7256_vm0  ;;  %vm7262_vm1 = vcmp.ge.f32.partialorder %v5998_v26, 1.0  ;;  %v7266_v40 = vmov 0  ;;  %v3097_v29 = vmul.f32 0.1, %v3074_v41 }
 0x19a   :  { %vm6220_vm5 = vmand %vm6114_vm7, %vm7259_vm6  ;;  %vm7265_vm6 = vcmp.ge.f32.partialorder %v6028_v44, 1.0  ;;  %v2994_v31 = vfloor.f32 %v2971_v54  ;;  %v2992_v9 = vfloor.f32 %v2969_v10  ;;  %v3131_v55 = vmul.f32 10.0, %v6188_v22 }
 0x19b   :  { %vm6233_vm0 = vmand %vm6148_vm14, %vm7262_vm1  ;;  %vm7268_vm14 = vcmp.le.f32.partialorder %v6012_v53, 8.0  ;;  %vm7269_vm1 = vcmp.ge.f32.partialorder %v6012_v53, 1.0  ;;  %v3083_v45 = vmul.f32 0.1, %v3060_v50  ;;  %v3095_v53 = vmul.f32 0.1, %v3072_v17 }
 0x19c   :  { %vm6242_vm11 = vmand %vm6178_vm15, %vm7265_vm6  ;;  %vm7272_vm6 = vcmp.ge.f32.partialorder %v6014_v3, 1.0  ;;  %v7275_v54 = vcvt.s32.f32 %v6088_v28  ;;  %vm7276_vm15 = vcmp.le.f32.partialorder %v6030_v2, 8.0  ;;  %vm7277_vm7 = vcmp.ge.f32.partialorder %v6030_v2, 1.0 }
 0x19d   :  { %v7267_v40 = vsel %vm6242_vm11, 4294967295, %v7266_v40  ;;  %vm6251_vm10 = vmand %vm7269_vm1, %vm7268_vm14  ;;  %v4367_v16 = vpop.f32.mrb[12].mxu1  ;;  %v6279_v3 = vsub.f32 %v5946_v14, %v3126_v33  ;;  %v6283_v56 = vsub.f32 %v5950_v60, %v3138_v5  ;;  %vm7280_vm1 = vcmp.ge.f32.partialorder %v6183_v32, 1.0 }
 0x19e   :  { %vm6262_vm8 = vmand %vm7272_vm6, %vm3197_vm2  ;;  %v2958_v10 = vadd.f32 0.5, %v7275_v54  ;;  %v4527_v17 = vpop.f32.mrb[12].mxu0  ;;  %v1139_v54 = vpop.f32.mrb[13].mxu1  ;;  %v6295_v14 = vfloor.f32 %v3097_v29  ;;  %v3017_v33 = vmul.f32 104.0, %v2994_v31  ;;  %v3015_v59 = vmul.f32 104.0, %v2992_v9 }
 0x19f   :  { %vm6274_vm11 = vmand %vm7277_vm7, %vm7276_vm15  ;;  %v6297_v60 = vadd.f32 %v4527_v17, %v4367_v16  ;;  %v2490_v5 = vpop.f32.mrb[13].mxu0  ;;  %v4368_v18 = vpop.f32.mrb[14].mxu1  ;;  %vm7283_vm6 = vcmp.ge.f32.partialorder %v6186_v38, 1.0  ;;  %v6308_v15 = vsub.f32 %v5964_v39, %v3131_v55  ;;  %v6311_v29 = vfloor.f32 %v3083_v45 }
 0x1a0   :  { %vm6290_vm7 = vmand %vm6251_vm10, %vm7280_vm1  ;;  %v6313_v9 = vadd.f32 %v2490_v5, %v1139_v54  ;;  %v4528_v16 = vpop.f32.mrb[14].mxu0  ;;  %v1142_v31 = vpop.f32.mrb[15].mxu1  ;;  %vm7286_vm1 = vcmp.le.f32.partialorder %v5800_v20, 8.0  ;;  %v7287_v41 = vmov 0  ;;  %v7291_v39 = vmov 0 }
 0x1a1   :  { %vm6303_vm2 = vmand %vm6262_vm8, %vm7283_vm6  ;;  %vm7289_vm8 = vcmp.le.f32.partialorder %v5809_v43, 8.0  ;;  %vm7290_vm6 = vnez %v7226_v25  ;;  %vm7293_vm10 = vcmp.ge.f32.partialorder %v6203_v52, 1.0  ;;  %v7294_v20 = vmov 0  ;;  %v2493_v25 = vpop.f32.mrb[15].mxu0 }
 0x1a2   :  { %v7285_v35 = vsel %vm6303_vm2, 4294967295, %v7284_v35  ;;  %vm6319_vm15 = vmand %vm6096_vm13, %vm7286_vm1  ;;  %v6340_v45 = vfloor.f32 %v3095_v53  ;;  %v2981_v8 = vmul.f32 0.009615385, %v2958_v10  ;;  %v6342_v43 = vadd.f32 %v4528_v16, %v4368_v18 }
 0x1a3   :  { %v7288_v41 = vsel %vm6319_vm15, 4294967295, %v7287_v41  ;;  %vm6327_vm14 = vmand %vm7290_vm6, %vm7289_vm8  ;;  %vm7296_vm1 = vcmp.le.f32.partialorder %v5821_v1, 8.0  ;;  %vm7304_vm15 = vcmp.ge.f32.partialorder %v6120_v27, 1.0  ;;  %v6371_v1 = vadd.f32 %v2493_v25, %v1142_v31 }
 0x1a4   :  { %v7292_v39 = vsel %vm6327_vm14, 4294967295, %v7291_v39  ;;  %vm6335_vm2 = vmand %vm6274_vm11, %vm7293_vm10  ;;  %vm7299_vm11 = vcmp.le.f32.partialorder %v5830_v19, 8.0  ;;  %vm7300_vm10 = vnez %v7236_v4  ;;  %vm7303_vm14 = vcmp.le.f32.partialorder %v6120_v27, 8.0 }
 0x1a5   :  { %v7295_v20 = vsel %vm6335_vm2, 4294967295, %v7294_v20  ;;  %vm6348_vm8 = vmand %vm6130_vm4, %vm7296_vm1  ;;  %v7308_v19 = vmov 0  ;;  %vm7310_vm13 = vcmp.le.f32.partialorder %v5898_v0, 8.0  ;;  %v7311_v27 = vmov 0 }
 0x1a6   :  { %vm6356_vm6 = vmand %vm7300_vm10, %vm7299_vm11  ;;  %vm7307_vm11 = vcmp.le.f32.partialorder %v5878_v37, 8.0  ;;  %vm7314_vm1 = vnez %v7255_v11  ;;  %v7315_v37 = vmov 0  ;;  %v3143_v24 = vmul.f32 10.0, %v6295_v14 }
 0x1a7   :  { %vm6365_vm2 = vmand %vm7304_vm15, %vm7303_vm14  ;;  %vm7313_vm15 = vcmp.le.f32.partialorder %v5929_v63, 8.0  ;;  %v7321_v4 = vcvt.s32.f32 %v5956_v42  ;;  %v7322_v63 = vcvt.s32.f32 %v5958_v62  ;;  %v3129_v42 = vmul.f32 10.0, %v6311_v29 }
 0x1a8   :  { %vm6377_vm10 = vmand %vm6159_vm12, %vm7307_vm11  ;;  %vm7317_vm12 = vcmp.le.f32.partialorder %v6122_v12, 8.0  ;;  %vm7318_vm11 = vcmp.ge.f32.partialorder %v6122_v12, 1.0  ;;  %v7331_v62 = vmov 0  ;;  %v3004_v11 = vfloor.f32 %v2981_v8 }
 0x1a9   :  { %v7309_v19 = vsel %vm6377_vm10, 4294967295, %v7308_v19  ;;  %vm6385_vm14 = vmand %vm6168_vm3, %vm7310_vm13  ;;  %v6408_v49 = vsub.f32 %v7321_v4, %v3017_v33  ;;  %v6412_v48 = vsub.f32 %v7322_v63, %v3015_v59  ;;  %vm7330_vm13 = vcmp.le.f32.partialorder %v5942_v57, 8.0  ;;  %v4371_v57 = vpop.f32.mrb[16].mxu1 }
 0x1aa   :  { %v7312_v27 = vsel %vm6385_vm14, 4294967295, %v7311_v27  ;;  %vm6393_vm4 = vmand %vm7314_vm1, %vm7313_vm15  ;;  %vm7323_vm1 = vcmp.le.f32.partialorder %v6188_v22, 8.0  ;;  %vm7324_vm15 = vcmp.ge.f32.partialorder %v6188_v22, 1.0  ;;  %v3141_v22 = vmul.f32 10.0, %v6340_v45  ;;  %v1155_v47 = vpop.f32.mrb[17].mxu1 }
 0x1ab   :  { %v7316_v37 = vsel %vm6393_vm4, 4294967295, %v7315_v37  ;;  %vm6401_vm10 = vmand %vm7318_vm11, %vm7317_vm12  ;;  %vm7327_vm4 = vcmp.le.f32.partialorder %v5937_v13, 8.0  ;;  %vm7333_vm11 = vcmp.ge.f32.partialorder %v6279_v3, 1.0  ;;  %v7351_v53 = vmov 0  ;;  %v4372_v33 = vpop.f32.mrb[18].mxu1 }
 0x1ac   :  { %vm6420_vm12 = vmand %vm7324_vm15, %vm7323_vm1  ;;  %vm7343_vm15 = vcmp.ge.f32.partialorder %v6283_v56, 1.0  ;;  %v6504_v10 = vsub.f32 %v6054_v23, %v3143_v24  ;;  %v3061_v17 = vadd.f32 0.5, %v6412_v48  ;;  %v3152_v23 = vsub.f32 %v6072_v7, %v3129_v42  ;;  %v1158_v31 = vpop.f32.mrb[19].mxu1 }
 0x1ad   :  { %vm6430_vm14 = vmand %vm6211_vm9, %vm7327_vm4  ;;  %vm7336_vm9 = vcmp.le.f32.partialorder %v5998_v26, 8.0  ;;  %vm7339_vm4 = vcmp.le.f32.partialorder %v6028_v44, 8.0  ;;  %v4531_v44 = vpop.f32.mrb[16].mxu0  ;;  %v7364_v7 = vmov 0  ;;  %v3027_v8 = vmul.f32 104.0, %v3004_v11  ;;  %v4375_v42 = vpop.f32.mrb[32].mxu1 }
 0x1ae   :  { %vm6438_vm1 = vmand %vm6220_vm5, %vm7330_vm13  ;;  %vm7340_vm13 = vnez %v7267_v40  ;;  %v6509_v54 = vadd.f32 %v4531_v44, %v4371_v57  ;;  %v2506_v2 = vpop.f32.mrb[17].mxu0  ;;  %v3084_v0 = vmul.f32 0.1, %v3061_v17  ;;  %v7171_v24 = vmov 0.0  }
 0x1af   :  { %v7332_v62 = vsel %vm6438_vm1, 4294967295, %v7331_v62  ;;  %vm6447_vm3 = vmand %vm6365_vm2, %vm7333_vm11  ;;  %vm7349_vm11 = vcmp.le.f32.partialorder %v6186_v38, 8.0  ;;  %v3063_v38 = vadd.f32 0.5, %v6408_v49  ;;  %v4532_v16 = vpop.f32.mrb[18].mxu0 }
 0x1b0   :  { %vm6456_vm5 = vmand %vm6233_vm0, %vm7336_vm9  ;;  %vm7353_vm9 = vcmp.ge.f32.partialorder %v6308_v15, 1.0  ;;  %v2509_v25 = vpop.f32.mrb[19].mxu0  ;;  %v6635_v57 = vfloor.f32 %v3084_v0  ;;  %v7403_v0 = vld [vmem:[#allocation5_spill] sm:$0xff] }
 0x1b1   :  { %vm6464_vm2 = vmand %vm7340_vm13, %vm7339_vm4  ;;  %vm7346_vm4 = vcmp.le.f32.partialorder %v6183_v32, 8.0  ;;  %v6554_v18 = vadd.f32 %v2509_v25, %v1158_v31  ;;  %v6659_v59 = vsel %vm6456_vm5, 1.0, %v7171_v24  ;;  %v7399_v25 = vld [vmem:[#allocation3_spill] sm:$0xff] }
 0x1b2   :  { %vm6473_vm1 = vmand %vm6401_vm10, %vm7343_vm15  ;;  %vm7350_vm10 = vnez %v7285_v35  ;;  %v6522_v35 = vadd.f32 %v2506_v2, %v1155_v47 }
 0x1b3   :  { %vm6483_vm13 = vmand %vm6290_vm7, %vm7346_vm4  ;;  %vm3212_vm4 = vcmp.le.f32.partialorder %v6295_v14, 8.0  ;;  %vm7360_vm7 = vcmp.le.f32.partialorder %v6279_v3, 8.0  ;;  %v6542_v3 = vadd.f32 %v4532_v16, %v4372_v33 }
 0x1b4   :  { %vm6491_vm15 = vmand %vm7350_vm10, %vm7349_vm11  ;;  %vm7356_vm11 = vcmp.le.f32.partialorder %v6203_v52, 8.0  ;;  %v7361_v52 = vmov 0  ;;  %vm7369_vm10 = vcmp.ge.f32.partialorder %v6295_v14, 1.0  ;;  %v6680_v30 = vsel %vm6483_vm13, 1.0, %v7171_v24 }
 0x1b5   :  { %v7352_v53 = vsel %vm6491_vm15, 4294967295, %v7351_v53  ;;  %vm6499_vm0 = vmand %vm6420_vm12, %vm7353_vm9  ;;  %vm7357_vm12 = vnez %v7295_v20  ;;  %v3164_v20 = vsub.f32 %v6086_v61, %v3141_v22  ;;  %v1171_v22 = vpop.f32.mrb[33].mxu1 }
 0x1b6   :  { %vm6515_vm9 = vmand %vm7357_vm12, %vm7356_vm11  ;;  %vm7363_vm11 = vcmp.le.f32.partialorder %v6283_v56, 8.0  ;;  %v7367_v56 = vmov 0  ;;  %v1205_v26 = vadd.f32 %v1171_v22, %v5859_v36  ;;  %v4376_v47 = vpop.f32.mrb[34].mxu1  ;;  %vm7394_vm5 = vnez %v7352_v53 }
 0x1b7   :  { %vm6528_vm15 = vmand %vm6447_vm3, %vm7360_vm7  ;;  %vm7366_vm3 = vcmp.le.f32.partialorder %v6308_v15, 8.0  ;;  %v3086_v15 = vmul.f32 0.1, %v3063_v38  ;;  %v1174_v2 = vpop.f32.mrb[35].mxu1 }
 0x1b8   :  { %v7362_v52 = vsel %vm6528_vm15, 4294967295, %v7361_v52  ;;  %vm6536_vm12 = vmand %vm6473_vm1, %vm7363_vm11  ;;  %vm3187_vm1 = vcmp.ge.f32.partialorder %v6340_v45, 1.0  ;;  %vm3210_vm11 = vcmp.le.f32.partialorder %v6340_v45, 8.0  ;;  %vm3244_vm15 = vcmp.ge.f32.partialorder %v3152_v23, 1.0 }
 0x1b9   :  { %v7365_v7 = vsel %vm6536_vm12, 4294967295, %v7364_v7  ;;  %vm6548_vm7 = vmand %vm6499_vm0, %vm7366_vm3  ;;  %vm7372_vm0 = vnez %v7288_v41  ;;  %vm7373_vm3 = vnez %v7292_v39  ;;  %v6586_v41 = vsel %vm6348_vm8, 1.0, %v7171_v24 }
 0x1ba   :  { %v7368_v56 = vsel %vm6548_vm7, 4294967295, %v7367_v56  ;;  %vm6560_vm12 = vmand %vm7369_vm10, %vm3212_vm4  ;;  %v6568_v4 = vsel %vm7372_vm0, 1.0, %v7171_v24  ;;  %v6573_v45 = vsel %vm7373_vm3, 1.0, %v7171_v24  ;;  %vm7374_vm4 = vcmp.le.f32.partialorder %v6311_v29, 8.0 }
 0x1bb   :  { %vm7375_vm10 = vcmp.ge.f32.partialorder %v6311_v29, 1.0  ;;  %v6591_v39 = vsel %vm6356_vm6, 1.0, %v7171_v24  ;;  %vm6593_vm0 = vmand %vm3187_vm1, %vm3210_vm11  ;;  %vm3256_vm3 = vcmp.ge.f32.partialorder %v3164_v20, 1.0  ;;  %v7380_v29 = vcvt.s32.f32 %v6088_v28 }
 0x1bc   :  { %vm6579_vm7 = vmand %vm7375_vm10, %vm7374_vm4  ;;  %vm7381_vm4 = vnez %v7309_v19  ;;  %vm7382_vm8 = vnez %v7312_v27  ;;  %vm7383_vm6 = vnez %v7316_v37  ;;  %vm7384_vm1 = vcmp.ge.f32.partialorder %v6504_v10, 1.0  ;;  %v4535_v27 = vpop.f32.mrb[32].mxu0  ;;  %v4567_v37 = vpop.f32.mrb[36].mxu1 }
 0x1bd   :  { %v6599_v12 = vsub.f32 %v7380_v29, %v3027_v8  ;;  %v6604_v55 = vsel %vm7381_vm4, 1.0, %v7171_v24  ;;  %v6609_v50 = vsel %vm7382_vm8, 1.0, %v7171_v24  ;;  %v6614_v13 = vsel %vm7383_vm6, 1.0, %v7171_v24  ;;  %vm6620_vm11 = vmand %vm6560_vm12, %vm7384_vm1  ;;  %v2522_v44 = vpop.f32.mrb[33].mxu0  ;;  %v7408_v8 = vld [vmem:[#allocation8_spill] sm:$0xff] }
 0x1be   :  { %vm3304_vm10 = vcmp.le.f32.partialorder %v6504_v10, 8.0  ;;  %v1207_v19 = vadd.f32 %v4375_v42, %v5852_v51  ;;  %vm6629_vm4 = vmand %vm6579_vm7, %vm3244_vm15  ;;  %vm3290_vm8 = vcmp.le.f32.partialorder %v3152_v23, 8.0  ;;  %v6633_v11 = vfloor.f32 %v3086_v15  ;;  %v4536_v17 = vpop.f32.mrb[34].mxu0  ;;  %v7400_v15 = vld [vmem:[#allocation2_spill] sm:$0xff] }
 0x1bf   :  { %v6641_v51 = vsel %vm6430_vm14, 1.0, %v7171_v24  ;;  %vm7389_vm15 = vnez %v7332_v62  ;;  %vm6651_vm12 = vmand %vm6593_vm0, %vm3256_vm3  ;;  %vm3302_vm7 = vcmp.le.f32.partialorder %v3164_v20, 8.0  ;;  %v6664_v62 = vsel %vm6464_vm2, 1.0, %v7171_v24  ;;  %v2525_v31 = vpop.f32.mrb[35].mxu0  ;;  %v7405_v42 = vld [vmem:[#allocation6_spill] sm:$0xff]  ;;  %v2746_v17 = vpop.f32.mrb[37].mxu1 }
 0x1c0   :  { %v6646_v32 = vsel %vm7389_vm15, 1.0, %v7171_v24  ;;  %v1627_v36 = vadd.f32 %v5655_v21, %v1207_v19  ;;  %vm6670_vm14 = vmand %vm6620_vm11, %vm3304_vm10  ;;  %v3073_v21 = vadd.f32 0.5, %v6599_v12  ;;  %v1625_v16 = vadd.f32 %v5657_v46, %v1205_v26  ;;  %v7406_v19 = vld [vmem:[#allocation4_spill] sm:$0xff]  ;;  %v4555_v38 = vpop.f32.mrb[0].mxu0 }
 0x1c1   :  { %v1206_v34 = vadd.f32 %v1174_v2, %v5869_v58  ;;  %v6685_v10 = vsel %vm7394_vm5, 1.0, %v7171_v24  ;;  %vm6690_vm2 = vmand %vm6629_vm4, %vm3290_vm8  ;;  %v6698_v58 = vsel %vm6515_vm9, 1.0, %v7171_v24  ;;  %v3132_v53 = vmul.f32 10.0, %v6633_v11  ;;  %v2698_v40 = vpop.f32.mrb[1].mxu0 }
 0x1c2   :  { %v1883_v46 = vadd.f32 %v5684_v6, %v1627_v36  ;;  %vm6703_vm13 = vmand %vm6651_vm12, %vm3302_vm7  ;;  %v3130_v23 = vmul.f32 10.0, %v6635_v57  ;;  %v1881_v61 = vadd.f32 %v7399_v25, %v1625_v16  ;;  %vm7401_vm0 = vnez %v7362_v52  ;;  %v7407_v16 = vld [vmem:[#allocation7_spill] sm:$0xff]  ;;  %v4568_v25 = vpop.f32.mrb[38].mxu1 }
 0x1c3   :  { %v1626_v6 = vadd.f32 %v7400_v15, %v1206_v34  ;;  %v6714_v5 = vsel %vm7401_vm0, 1.0, %v7171_v24  ;;  %vm7402_vm9 = vnez %v7365_v7  ;;  %vm7404_vm3 = vnez %v7368_v56  ;;  %v6737_v7 = vld [vmem:[%s7160_s2] ss:$0 sm:$0xff] }
 0x1c4   :  { %v6719_v20 = vsel %vm7402_vm9, 1.0, %v7171_v24  ;;  %v2218_v14 = vadd.f32 %v7403_v0, %v1883_v46  ;;  %v6725_v63 = vsel %vm7404_vm3, 1.0, %v7171_v24  ;;  %v6730_v29 = vsel %vm6670_vm14, 1.0, %v7171_v24 }
 0x1c5   :  { %v3096_v52 = vmul.f32 0.1, %v3073_v21  ;;  %v2216_v28 = vadd.f32 %v7405_v42, %v1881_v61  ;;  %v1882_v22 = vadd.f32 %v7406_v19, %v1626_v6  ;;  %v6742_v56 = vsel %vm6690_vm2, 1.0, %v7171_v24  ;;  %v4556_v6 = vpop.f32.mrb[2].mxu0 }
 0x1c6   :  { %v6747_v26 = vsel %vm6703_vm13, 1.0, %v7171_v24  ;;  %v6749_v47 = vadd.f32 %v4535_v27, %v2218_v14  ;;  %v4606_v36 = vadd.f32 %v6297_v60, %v4567_v37  ;;  %v6753_v2 = vsub.f32 %v6408_v49, %v3132_v53  ;;  %v7409_v60 = vld [vmem:[#allocation9_spill] sm:$0xff]  ;;  %v2749_v53 = vpop.f32.mrb[39].mxu1  ;;  %v7411_v14 = vld [vmem:[#allocation10_spill] sm:$0xff]  ;;  %v7420_v24 = vld [vmem:[#allocation12_spill] sm:$0xff] }
 0x1c7   :  { %v6756_v33 = vsub.f32 %v6412_v48, %v3130_v23  ;;  %v6758_v21 = vadd.f32 %v2522_v44, %v2216_v28  ;;  %v2217_v34 = vadd.f32 %v7407_v16, %v1882_v22  ;;  %v4593_v46 = vadd.f32 %v4555_v38, %v7408_v8 }
 0x1c8   :  { %v4608_v27 = vadd.f32 %v6313_v9, %v2746_v17  ;;  %v2835_v61 = vadd.f32 %v4606_v36, %v6737_v7  ;;  %v4594_v15 = vadd.f32 %v2698_v40, %v7409_v60  ;;  %v4610_v49 = vadd.f32 %v6342_v43, %v4568_v25  ;;  %v2701_v9 = vpop.f32.mrb[3].mxu0  ;;  %v7412_v43 = vld [vmem:[#allocation11_spill] sm:$0xff]  ;;  %v6784_v25 = vpop.f32.mrb[40].mxu1 }
 0x1c9   :  { %v6766_v48 = vfloor.f32 %v3096_v52  ;;  %v6768_v44 = vadd.f32 %v2525_v31, %v2217_v34  ;;  %v2823_v23 = vadd.f32 %v4593_v46, %v6737_v7  ;;  %v4595_v42 = vadd.f32 %v4556_v6, %v7411_v14  ;;  %v4559_v6 = vpop.f32.mrb[4].mxu0 }
 0x1ca   :  { %v2833_v0 = vadd.f32 %v4608_v27, %v6737_v7  ;;  %v2858_v28 = vmax.f32 %v2835_v61, 0.0  ;;  %v2821_v19 = vadd.f32 %v4594_v15, %v6737_v7  ;;  %vm3699_vm6 = vcmask 1043457  }
 0x1cb   :  { %7410 = vst [vmem:[#allocation3_spill] sm:$0xff] %v6768_v44  ;;  %vm3700_vm1 = vsmask.f32 7942  ;;  %v2836_v22 = vadd.f32 %v4610_v49, %v6737_v7  ;;  %v4596_v37 = vadd.f32 %v2701_v9, %v7412_v43  ;;  %v2846_v52 = vmax.f32 %v2823_v23, 0.0  ;;  %v6790_v49 = vpop.f32.mrb[41].mxu1 }
 0x1cc   :  { %v2856_v38 = vmax.f32 %v2833_v0, 0.0  ;;  %v2824_v31 = vadd.f32 %v4595_v42, %v6737_v7  ;;  %v4612_v36 = vadd.f32 %v6371_v1, %v2749_v53  ;;  %v3365_v17 = vmul.f32 %v6573_v45, %v2858_v28  ;;  %v2714_v0 = vpop.f32.mrb[5].mxu0  ;;  %v6794_v14 = vpop.f32.mrb[42].mxu1  ;;  %vm6808_vm10 = vmand %vm3699_vm6, %vm3700_vm1 }
 0x1cd   :  { %v2844_v16 = vmax.f32 %v2821_v19, 0.0  ;;  %v2859_v34 = vmax.f32 %v2836_v22, 0.0  ;;  %v6780_v8 = vadd.f32 %v4596_v37, %v6737_v7  ;;  %v3353_v46 = vmul.f32 %v6568_v4, %v2846_v52  ;;  %v6796_v19 = vpop.f32.mrb[6].mxu0 }
 0x1ce   :  { %vm3444_vm11 = vsmask.f32 5392  ;;  %v3363_v40 = vmul.f32 %v6591_v39, %v2856_v38  ;;  %v2847_v27 = vmax.f32 %v2824_v31, 0.0  ;;  %v3142_v61 = vmul.f32 10.0, %v6766_v48  ;;  %v6800_v38 = vpop.f32.mrb[7].mxu0 }
 0x1cf   :  { %v4028_v60 = vpack.c.bf16 %v3365_v17, %v3365_v17  ;;  %v3351_v1 = vmul.f32 %v6586_v41, %v2844_v16  ;;  %v3366_v45 = vmul.f32 %v6609_v50, %v2859_v34  ;;  %v2834_v15 = vadd.f32 %v4612_v36, %v6737_v7  ;;  %v6798_v50 = vpop.f32.mrb[43].mxu1 }
 0x1d0   :  { %v4016_v53 = vpack.c.bf16 %v3353_v46, %v3353_v46  ;;  %v4026_v4 = vpack.c.bf16 %v3363_v40, %v3363_v40  ;;  %v3354_v23 = vmul.f32 %v6604_v55, %v2847_v27  ;;  %v2845_v39 = vmax.f32 %v6780_v8, 0.0 }
 0x1d1   :  { %v3586_v42 = vshrl.u32 %v4028_v60, 16  ;;  %v3589_v9 = vshll.u32 %v4028_v60, 16  ;;  %v4014_v28 = vpack.c.bf16 %v3351_v1, %v3351_v1  ;;  %v4029_v41 = vpack.c.bf16 %v3366_v45, %v3366_v45 }
 0x1d2   :  { %v3466_v22 = vshrl.u32 %v4016_v53, 16  ;;  %v3469_v43 = vshll.u32 %v4016_v53, 16  ;;  %v3566_v37 = vshrl.u32 %v4026_v4, 16  ;;  %v3569_v52 = vshll.u32 %v4026_v4, 16  ;;  %v3702_v4 = vld [vmem:[%s7159_s3 + $0x4] sm:$0xe] }
 0x1d3   :  { %v3588_v55 = vrot.slane %v3586_v42, 6  ;;  %v3591_v31 = vrot.slane %v3589_v9, 7  ;;  %v3447_v36 = vshrl.u32 %v4014_v28, 16  ;;  %v3450_v17 = vshll.u32 %v4014_v28, 16 }
 0x1d4   :  { %v3468_v16 = vrot.slane %v3466_v22, 6  ;;  %v3471_v34 = vrot.slane %v3469_v43, 7  ;;  %v3568_v8 = vrot.slane %v3566_v37, 6  ;;  %v3571_v46 = vrot.slane %v3569_v52, 7  ;;  %v6815_v22 = vpop.f32.mrb[44].mxu1  ;;  %v6819_v52 = vpop.f32.mrb[8].mxu0 }
 0x1d5   :  { %v6802_v40 = vor.u32 %v3591_v31, %v3588_v55  ;;  %v3449_v27 = vrot.slane %v3447_v36, 6  ;;  %v3452_v60 = vrot.slane %v3450_v17, 7  ;;  %v4017_v1 = vpack.c.bf16 %v3354_v23, %v3354_v23  ;;  %v6821_v55 = vpop.f32.mrb[45].mxu1 }
 0x1d6   :  { %v6804_v45 = vor.u32 %v3471_v34, %v3468_v16  ;;  %v3596_v42 = vshrl.u32 %v4029_v41, 16  ;;  %v3599_v9 = vshll.u32 %v4029_v41, 16  ;;  %v2857_v28 = vmax.f32 %v2834_v15, 0.0  ;;  %v6829_v15 = vpop.f32.mrb[9].mxu0  ;;  %v4576_v34 = vpop.f32.mrb[46].mxu1 }
 0x1d7   :  { %v6817_v43 = vor.u32 %v3452_v60, %v3449_v27  ;;  %v3476_v23 = vshrl.u32 %v4017_v1, 16  ;;  %v3479_v37 = vshll.u32 %v4017_v1, 16  ;;  %v6824_v31 = vsub.f32 %v6599_v12, %v3142_v61  ;;  %v6843_v1 = vpop.f32.mrb[47].mxu1 }
 0x1d8   :  { %v3594_v36 = vrot.slane %v6802_v40, 4  ;;  %v6827_v17 = vor.u32 %v3571_v46, %v3568_v8  ;;  %v3598_v16 = vrot.slane %v3596_v42, 6  ;;  %v3601_v41 = vrot.slane %v3599_v9, 7  ;;  %v6841_v46 = vpop.f32.mrb[10].mxu0  ;;  %7419 = vst [vmem:[#allocation5_spill] sm:$0xff] %v6843_v1 }
 0x1d9   :  { %v3474_v27 = vrot.slane %v6804_v45, 4  ;;  %vm7416_vm4 = vsmask.f32 1280  ;;  %v3703_v12 = vsel %vm6808_vm10, %v6817_v43, %v3702_v4  ;;  %v3478_v61 = vrot.slane %v3476_v23, 6  ;;  %v6853_v53 = vpop.f32.mrb[11].mxu0 }
 0x1da   :  { %7415 = vst [vmem:[#allocation2_spill] sm:$0xff] %v6827_v17  ;;  %vm6834_vm8 = vmor %vm7416_vm4, %vm3444_vm11  ;;  %v3481_v8 = vrot.slane %v3479_v37, 7  ;;  %v6848_v42 = vor.u32 %v3601_v41, %v3598_v16  ;;  %v3352_v9 = vmul.f32 %v6614_v13, %v2845_v39  ;;  %v3364_v34 = vmul.f32 %v6641_v51, %v2857_v28  ;;  %v7421_v37 = vld [vmem:[#allocation13_spill] sm:$0xff] }
 0x1db   :  { %3704 = vst [vmem:[%s7159_s3 + $0x4] sm:$0xe] %v3703_v12  ;;  %v4597_v44 = vadd.f32 %v4559_v6, %v7420_v24  ;;  %v4614_v23 = vadd.f32 %v6509_v54, %v6784_v25  ;;  %v4598_v1 = vadd.f32 %v2714_v0, %v7421_v37  ;;  %v4616_v12 = vadd.f32 %v6522_v35, %v6790_v49 }
 0x1dc   :  { %v6855_v4 = vor.u32 %v3481_v8, %v3478_v61  ;;  %v3574_v16 = vrot.slane %v6827_v17, 4  ;;  %v3603_v13 = vsel %vm6834_vm8, %v3594_v36, %v6848_v42  ;;  %v4015_v51 = vpack.c.bf16 %v3352_v9, %v3352_v9  ;;  %v7422_v17 = vld [vmem:[#allocation14_spill] sm:$0xff] }
 0x1dd   :  { %v4027_v24 = vpack.c.bf16 %v3364_v34, %v3364_v34  ;;  %v3454_v6 = vrot.slane %v6817_v43, 4  ;;  %3719 = vst [vmem:[%s7159_s3 + $0x40] sm:$0xf] %v3603_v13  ;;  %v2827_v54 = vadd.f32 %v4597_v44, %v6737_v7  ;;  %v2839_v35 = vadd.f32 %v4614_v23, %v6737_v7 }
 0x1de   :  { %v3483_v39 = vsel %vm6834_vm8, %v3474_v27, %v6855_v4  ;;  %v3456_v25 = vshrl.u32 %v4015_v51, 16  ;;  %v3459_v49 = vshll.u32 %v4015_v51, 16  ;;  %v2825_v41 = vadd.f32 %v4598_v1, %v6737_v7 }
 0x1df   :  { %3707 = vst [vmem:[%s7159_s3 + $0x10] sm:$0xf] %v3483_v39  ;;  %v3576_v0 = vshrl.u32 %v4027_v24, 16  ;;  %v3579_v28 = vshll.u32 %v4027_v24, 16  ;;  %v2850_v43 = vmax.f32 %v2827_v54, 0.0  ;;  %v2862_v36 = vmax.f32 %v2839_v35, 0.0 }
 0x1e0   :  { %v2837_v27 = vadd.f32 %v4616_v12, %v6737_v7  ;;  %v3458_v61 = vrot.slane %v3456_v25, 6  ;;  %v3461_v8 = vrot.slane %v3459_v49, 7  ;;  %v2848_v37 = vmax.f32 %v2825_v41, 0.0 }
 0x1e1   :  { %v3578_v9 = vrot.slane %v3576_v0, 6  ;;  %v3581_v44 = vrot.slane %v3579_v28, 7  ;;  %v3357_v34 = vmul.f32 %v6646_v32, %v2850_v43  ;;  %v3369_v23 = vmul.f32 %v6659_v59, %v2862_v36 }
 0x1e2   :  { %v2860_v13 = vmax.f32 %v2837_v27, 0.0  ;;  %v3462_v39 = vor.u32 %v3461_v8, %v3458_v61  ;;  %v4599_v24 = vadd.f32 %v6796_v19, %v7422_v17  ;;  %v4618_v1 = vadd.f32 %v6542_v3, %v6794_v14 }
 0x1e3   :  { %v3582_v51 = vor.u32 %v3581_v44, %v3578_v9  ;;  %v4020_v54 = vpack.c.bf16 %v3357_v34, %v3357_v34  ;;  %v4032_v12 = vpack.c.bf16 %v3369_v23, %v3369_v23  ;;  %v3355_v35 = vmul.f32 %v6664_v62, %v2848_v37 }
 0x1e4   :  { %v3367_v25 = vmul.f32 %v6680_v30, %v2860_v13  ;;  %v3463_v32 = vsel %vm6834_vm8, %v3454_v6, %v3462_v39  ;;  %v3464_v59 = vrot.slane %v3462_v39, 4  ;;  %v2828_v44 = vadd.f32 %v4599_v24, %v6737_v7 }
 0x1e5   :  { %v3583_v49 = vsel %vm6834_vm8, %v3574_v16, %v3582_v51  ;;  %v3584_v0 = vrot.slane %v3582_v51, 4  ;;  %3705 = vst [vmem:[%s7159_s3 + $0x8] sm:$0xf] %v3463_v32  ;;  %v3506_v3 = vshrl.u32 %v4020_v54, 16  ;;  %v3509_v62 = vshll.u32 %v4020_v54, 16 }
 0x1e6   :  { %3717 = vst [vmem:[%s7159_s3 + $0x38] sm:$0xf] %v3583_v49  ;;  %v3626_v14 = vshrl.u32 %v4032_v12, 16  ;;  %v3629_v30 = vshll.u32 %v4032_v12, 16  ;;  %v3473_v19 = vsel %vm6834_vm8, %v3464_v59, %v6804_v45  ;;  %v4018_v16 = vpack.c.bf16 %v3355_v35, %v3355_v35  ;;  %v7423_v59 = vld [vmem:[#allocation15_spill] sm:$0xff]  ;;  %v7424_v49 = vld [vmem:[#allocation16_spill] sm:$0xff] }
 0x1e7   :  { %v3593_v17 = vsel %vm6834_vm8, %v3584_v0, %v6802_v40  ;;  %v4030_v6 = vpack.c.bf16 %v3367_v25, %v3367_v25  ;;  %3706 = vst [vmem:[%s7159_s3 + $0xc] sm:$0xf] %v3473_v19  ;;  %v3508_v28 = vrot.slane %v3506_v3, 6  ;;  %v3511_v43 = vrot.slane %v3509_v62, 7 }
 0x1e8   :  { %3718 = vst [vmem:[%s7159_s3 + $0x3c] sm:$0xf] %v3593_v17  ;;  %v3628_v36 = vrot.slane %v3626_v14, 6  ;;  %v3631_v41 = vrot.slane %v3629_v30, 7  ;;  %v3486_v27 = vshrl.u32 %v4018_v16, 16  ;;  %v3489_v45 = vshll.u32 %v4018_v16, 16 }
 0x1e9   :  { %v3606_v61 = vshrl.u32 %v4030_v6, 16  ;;  %v3609_v8 = vshll.u32 %v4030_v6, 16  ;;  %v6910_v9 = vor.u32 %v3511_v43, %v3508_v28  ;;  %v2840_v34 = vadd.f32 %v4618_v1, %v6737_v7  ;;  %v7425_v30 = vld [vmem:[#allocation17_spill] sm:$0xff] }
 0x1ea   :  { %v6912_v40 = vor.u32 %v3631_v41, %v3628_v36  ;;  %v3488_v23 = vrot.slane %v3486_v27, 6  ;;  %v3491_v37 = vrot.slane %v3489_v45, 7  ;;  %v3484_v51 = vrot.slane %v6855_v4, 4 }
 0x1eb   :  { %v3608_v13 = vrot.slane %v3606_v61, 6  ;;  %v3611_v39 = vrot.slane %v3609_v8, 7  ;;  %v3604_v54 = vrot.slane %v6848_v42, 4  ;;  %v2851_v12 = vmax.f32 %v2828_v44, 0.0 }
 0x1ec   :  { %v2863_v35 = vmax.f32 %v2840_v34, 0.0  ;;  %vm3727_vm15 = vcmask 1040384   ;;  %vm3728_vm12 = vsmask.f32 256  ;;  %v6918_v25 = vor.u32 %v3491_v37, %v3488_v23 }
 0x1ed   :  { %v6920_v32 = vor.u32 %v3611_v39, %v3608_v13  ;;  %v4600_v24 = vadd.f32 %v6800_v38, %v7423_v59  ;;  %v4620_v1 = vadd.f32 %v6554_v18, %v6798_v50  ;;  %vm3178_vm7 = vcmp.ge.f32.partialorder %v6633_v11, 1.0  ;;  %vm6976_vm11 = vmand %vm3727_vm15, %vm3728_vm12 }
 0x1ee   :  { %vm3201_vm14 = vcmp.le.f32.partialorder %v6633_v11, 8.0  ;;  %v3358_v42 = vmul.f32 %v6685_v10, %v2851_v12  ;;  %v3370_v4 = vmul.f32 %v6698_v58, %v2863_v35  ;;  %v4601_v0 = vadd.f32 %v6819_v52, %v7424_v49 }
 0x1ef   :  { %v2814_v3 = vadd.f32 %v6815_v22, %v6749_v47  ;;  %vm3176_vm5 = vcmp.ge.f32.partialorder %v6635_v57, 1.0  ;;  %vm3199_vm2 = vcmp.le.f32.partialorder %v6635_v57, 8.0  ;;  %v3514_v18 = vrot.slane %v6910_v9, 4  ;;  %vm6992_vm10 = vmand %vm3178_vm7, %vm3201_vm14 }
 0x1f0   :  { %v3634_v50 = vrot.slane %v6912_v40, 4  ;;  %v3493_v10 = vsel %vm6834_vm8, %v3484_v51, %v6918_v25  ;;  %v3613_v58 = vsel %vm6834_vm8, %v3604_v54, %v6920_v32  ;;  %vm3188_vm13 = vcmp.ge.f32.partialorder %v6766_v48, 1.0  ;;  %vm3222_vm4 = vmand %vm3176_vm5, %vm3199_vm2 }
 0x1f1   :  { %3708 = vst [vmem:[%s7159_s3 + $0x14] sm:$0xf] %v3493_v10  ;;  %3720 = vst [vmem:[%s7159_s3 + $0x44] sm:$0xf] %v3613_v58  ;;  %v4021_v47 = vpack.c.bf16 %v3358_v42, %v3358_v42  ;;  %v4033_v38 = vpack.c.bf16 %v3370_v4, %v3370_v4  ;;  %v2826_v22 = vadd.f32 %v4600_v24, %v6737_v7  ;;  %vm3247_vm0 = vcmp.ge.f32.partialorder %v6753_v2, 1.0 }
 0x1f2   :  { %v2838_v52 = vadd.f32 %v4620_v1, %v6737_v7  ;;  %v2831_v62 = vadd.f32 %v4601_v0, %v6737_v7  ;;  %v2843_v14 = vadd.f32 %v6737_v7, %v2814_v3  ;;  %v4602_v19 = vadd.f32 %v6829_v15, %v7425_v30  ;;  %vm7021_vm12 = vmand %vm6992_vm10, %vm3247_vm0 }
 0x1f3   :  { %v2812_v17 = vadd.f32 %v6821_v55, %v6758_v21  ;;  %vm3245_vm9 = vcmp.ge.f32.partialorder %v6756_v33, 1.0  ;;  %v3516_v16 = vshrl.u32 %v4021_v47, 16  ;;  %v3519_v6 = vshll.u32 %v4021_v47, 16 }
 0x1f4   :  { %v3636_v28 = vshrl.u32 %v4033_v38, 16  ;;  %v3639_v43 = vshll.u32 %v4033_v38, 16  ;;  %v2849_v36 = vmax.f32 %v2826_v22, 0.0  ;;  %v2861_v41 = vmax.f32 %v2838_v52, 0.0  ;;  %vm7029_vm7 = vmand %vm3222_vm4, %vm3245_vm9  ;;  %v3730_v52 = vld [vmem:[%s7159_s3 + $0x60] sm:$0x1] }
 0x1f5   :  { %v2854_v27 = vmax.f32 %v2831_v62, 0.0  ;;  %v2866_v45 = vmax.f32 %v2843_v14, 0.0  ;;  %vm3293_vm3 = vcmp.le.f32.partialorder %v6753_v2, 8.0  ;;  %v3518_v61 = vrot.slane %v3516_v16, 6  ;;  %v7438_v16 = vld [vmem:[#allocation18_spill] sm:$0xff] }
 0x1f6   :  { %v3521_v8 = vrot.slane %v3519_v6, 7  ;;  %v3638_v44 = vrot.slane %v3636_v28, 6  ;;  %v3641_v34 = vrot.slane %v3639_v43, 7  ;;  %v3356_v15 = vmul.f32 %v6714_v5, %v2849_v36 }
 0x1f7   :  { %v3368_v21 = vmul.f32 %v6719_v20, %v2861_v41  ;;  %v3361_v55 = vmul.f32 %v6725_v63, %v2854_v27  ;;  %v3373_v23 = vmul.f32 %v6730_v29, %v2866_v45  ;;  %vm3211_vm6 = vcmp.le.f32.partialorder %v6766_v48, 8.0 }
 0x1f8   :  { %v6966_v37 = vor.u32 %v3521_v8, %v3518_v61  ;;  %v6968_v13 = vor.u32 %v3641_v34, %v3638_v44  ;;  %vm3257_vm1 = vcmp.ge.f32.partialorder %v6824_v31, 1.0  ;;  %v4019_v39 = vpack.c.bf16 %v3356_v15, %v3356_v15  ;;  %vm7013_vm15 = vmand %vm3188_vm13, %vm3211_vm6 }
 0x1f9   :  { %v4031_v51 = vpack.c.bf16 %v3368_v21, %v3368_v21  ;;  %v4024_v54 = vpack.c.bf16 %v3361_v55, %v3361_v55  ;;  %v6972_v12 = vpack.c.bf16 %v3373_v23, %v3373_v23  ;;  %v2829_v29 = vadd.f32 %v4602_v19, %v6737_v7  ;;  %vm7042_vm2 = vmand %vm7013_vm15, %vm3257_vm1  ;;  %v7445_v21 = vld [vmem:[#allocation3_spill] sm:$0xff]  ;;  %v7446_v55 = vld [vmem:[#allocation5_spill] sm:$0xff] }
 0x1fa   :  { %v3523_v20 = vsel %vm6834_vm8, %v3514_v18, %v6966_v37  ;;  %v3643_v63 = vsel %vm6834_vm8, %v3634_v50, %v6968_v13  ;;  %v2841_v35 = vadd.f32 %v6737_v7, %v2812_v17  ;;  %v3496_v24 = vshrl.u32 %v4019_v39, 16  ;;  %vm7053_vm13 = vmand %vm7021_vm12, %vm3293_vm3 }
 0x1fb   :  { %3711 = vst [vmem:[%s7159_s3 + $0x20] sm:$0xf] %v3523_v20  ;;  %3723 = vst [vmem:[%s7159_s3 + $0x50] sm:$0xf] %v3643_v63  ;;  %v3499_v1 = vshll.u32 %v4019_v39, 16  ;;  %v3616_v42 = vshrl.u32 %v4031_v51, 16  ;;  %v4603_v6 = vadd.f32 %v6841_v46, %v7438_v16  ;;  %v2813_v23 = vadd.f32 %v7446_v55, %v7445_v21 }
 0x1fc   :  { %v3619_v4 = vshll.u32 %v4031_v51, 16  ;;  %v3494_v11 = vrot.slane %v6918_v25, 4  ;;  %v3614_v49 = vrot.slane %v6920_v32, 4  ;;  %v3546_v0 = vshrl.u32 %v4024_v54, 16 }
 0x1fd   :  { %v3666_v3 = vshrl.u32 %v6972_v12, 16  ;;  %v3498_v50 = vrot.slane %v3496_v24, 6  ;;  %v3501_v10 = vrot.slane %v3499_v1, 7  ;;  %v3618_v58 = vrot.slane %v3616_v42, 6 }
 0x1fe   :  { %v3621_v57 = vrot.slane %v3619_v4, 7  ;;  %v3549_v32 = vshll.u32 %v4024_v54, 16  ;;  %vm3291_vm14 = vcmp.le.f32.partialorder %v6756_v33, 8.0  ;;  %vm3303_vm5 = vcmp.le.f32.partialorder %v6824_v31, 8.0 }
 0x1ff   :  { %v7025_v47 = vrot.slane %v3666_v3, 6  ;;  %v3502_v38 = vor.u32 %v3501_v10, %v3498_v50  ;;  %v2852_v62 = vmax.f32 %v2829_v29, 0.0  ;;  %v2864_v14 = vmax.f32 %v2841_v35, 0.0  ;;  %vm7065_vm0 = vmand %vm7029_vm7, %vm3291_vm14 }
 0x200   :  { %v3622_v22 = vor.u32 %v3621_v57, %v3618_v58  ;;  %v3548_v19 = vrot.slane %v3546_v0, 6  ;;  %v3551_v46 = vrot.slane %v3549_v32, 7  ;;  %vm3326_vm9 = vmand %vm7042_vm2, %vm3303_vm5  ;;  %v2842_v1 = vadd.f32 %v6737_v7, %v2813_v23 }
 0x201   :  { %v3674_v17 = vrot.slane %v7025_v47, 4  ;;  %v3503_v43 = vsel %vm6834_vm8, %v3494_v11, %v3502_v38  ;;  %v3504_v36 = vrot.slane %v3502_v38, 4  ;;  %v3359_v33 = vmul.f32 %v6742_v56, %v2852_v62 }
 0x202   :  { %v3623_v41 = vsel %vm6834_vm8, %v3614_v49, %v3622_v22  ;;  %v3624_v27 = vrot.slane %v3622_v22, 4  ;;  %3709 = vst [vmem:[%s7159_s3 + $0x18] sm:$0xf] %v3503_v43  ;;  %v3371_v61 = vmul.f32 %v6747_v26, %v2864_v14  ;;  %v2832_v56 = vadd.f32 %v4603_v6, %v6737_v7  ;;  %v7443_v26 = vld [vmem:[#allocation19_spill] sm:$0xff] }
 0x203   :  { %3721 = vst [vmem:[%s7159_s3 + $0x48] sm:$0xf] %v3623_v41  ;;  %v3731_v45 = vsel %vm6976_vm11, %v3674_v17, %v3730_v52  ;;  %v3513_v8 = vsel %vm6834_vm8, %v3504_v36, %v6910_v9  ;;  %v4604_v31 = vadd.f32 %v6853_v53, %v7443_v26  ;;  %v4022_v9 = vpack.c.bf16 %v3359_v33, %v3359_v33 }
 0x204   :  { %v3633_v44 = vsel %vm6834_vm8, %v3624_v27, %v6912_v40  ;;  %3732 = vst [vmem:[%s7159_s3 + $0x60] sm:$0x1] %v3731_v45  ;;  %3710 = vst [vmem:[%s7159_s3 + $0x1c] sm:$0xf] %v3513_v8  ;;  %v4034_v34 = vpack.c.bf16 %v3371_v61, %v3371_v61  ;;  %v7444_v40 = vmov 0.0   ;;  %v2855_v39 = vmax.f32 %v2832_v56, 0.0 }
 0x205   :  { %3722 = vst [vmem:[%s7159_s3 + $0x4c] sm:$0xf] %v3633_v44  ;;  %v3339_v15 = vsel %vm7053_vm13, 1.0, %v7444_v40  ;;  %v2830_v53 = vadd.f32 %v4604_v31, %v6737_v7  ;;  %v3337_v51 = vsel %vm7065_vm0, 1.0, %v7444_v40  ;;  %v3349_v54 = vsel %vm3326_vm9, 1.0, %v7444_v40  ;;  %v7447_v61 = vld [vmem:[#allocation2_spill] sm:$0xff] }
 0x206   :  { %v3526_v5 = vshrl.u32 %v4022_v9, 16  ;;  %v3529_v20 = vshll.u32 %v4022_v9, 16  ;;  %v3646_v63 = vshrl.u32 %v4034_v34, 16  ;;  %v3649_v29 = vshll.u32 %v4034_v34, 16 }
 0x207   :  { %v3552_v35 = vor.u32 %v3551_v46, %v3548_v19  ;;  %v3362_v59 = vmul.f32 %v3339_v15, %v2855_v39  ;;  %v2853_v24 = vmax.f32 %v2830_v53, 0.0  ;;  %v2865_v18 = vmax.f32 %v2842_v1, 0.0 }
 0x208   :  { %v3528_v42 = vrot.slane %v3526_v5, 6  ;;  %v3531_v4 = vrot.slane %v3529_v20, 7  ;;  %v3648_v11 = vrot.slane %v3646_v63, 6  ;;  %v3651_v49 = vrot.slane %v3649_v29, 7 }
 0x209   :  { %v4025_v0 = vpack.c.bf16 %v3362_v59, %v3362_v59  ;;  %v3360_v3 = vmul.f32 %v3337_v51, %v2853_v24  ;;  %v3524_v50 = vrot.slane %v6966_v37, 4  ;;  %v3644_v10 = vrot.slane %v6968_v13, 4 }
 0x20a   :  { %v3532_v58 = vor.u32 %v3531_v4, %v3528_v42  ;;  %v3652_v57 = vor.u32 %v3651_v49, %v3648_v11  ;;  %v3372_v38 = vmul.f32 %v3349_v54, %v2865_v18  ;;  %v3554_v22 = vrot.slane %v3552_v35, 4 }
 0x20b   :  { %v3556_v25 = vshrl.u32 %v4025_v0, 16  ;;  %v3559_v32 = vshll.u32 %v4025_v0, 16  ;;  %v4023_v48 = vpack.c.bf16 %v3360_v3, %v3360_v3  ;;  %v3669_v30 = vshll.u32 %v6972_v12, 16 }
 0x20c   :  { %v3533_v7 = vsel %vm6834_vm8, %v3524_v50, %v3532_v58  ;;  %v3653_v52 = vsel %vm6834_vm8, %v3644_v10, %v3652_v57  ;;  %v4035_v19 = vpack.c.bf16 %v3372_v38, %v3372_v38  ;;  %v3534_v17 = vrot.slane %v3532_v58, 4 }
 0x20d   :  { %3712 = vst [vmem:[%s7159_s3 + $0x24] sm:$0xf] %v3533_v7  ;;  %3724 = vst [vmem:[%s7159_s3 + $0x54] sm:$0xf] %v3653_v52  ;;  %v3558_v37 = vrot.slane %v3556_v25, 6  ;;  %v3561_v13 = vrot.slane %v3559_v32, 7 }
 0x20e   :  { %v3536_v62 = vshrl.u32 %v4023_v48, 16  ;;  %v3539_v14 = vshll.u32 %v4023_v48, 16  ;;  %v3656_v43 = vshrl.u32 %v4035_v19, 16  ;;  %v3659_v36 = vshll.u32 %v4035_v19, 16 }
 0x20f   :  { %v3562_v16 = vor.u32 %v3561_v13, %v3558_v37  ;;  %v3671_v46 = vrot.slane %v3669_v30, 7  ;;  %v3654_v45 = vrot.slane %v3652_v57, 4 }
 0x210   :  { %v3538_v6 = vrot.slane %v3536_v62, 6  ;;  %v3541_v28 = vrot.slane %v3539_v14, 7  ;;  %v3658_v33 = vrot.slane %v3656_v43, 6  ;;  %v3661_v12 = vrot.slane %v3659_v36, 7 }
 0x211   :  { %v3563_v41 = vsel %vm6834_vm8, %v3554_v22, %v3562_v16  ;;  %v3564_v27 = vrot.slane %v3562_v16, 4  ;;  %v3672_v9 = vor.u32 %v3671_v46, %v7025_v47 }
 0x212   :  { %v3542_v2 = vor.u32 %v3541_v28, %v3538_v6  ;;  %3715 = vst [vmem:[%s7159_s3 + $0x30] sm:$0xf] %v3563_v41  ;;  %v3662_v26 = vor.u32 %v3661_v12, %v3658_v33 }
 0x213   :  { %v3573_v8 = vsel %vm6834_vm8, %v3564_v27, %v7447_v61 }
 0x214   :  { %v3543_v44 = vsel %vm6834_vm8, %v3534_v17, %v3542_v2  ;;  %v3544_v56 = vrot.slane %v3542_v2, 4  ;;  %3716 = vst [vmem:[%s7159_s3 + $0x34] sm:$0xf] %v3573_v8  ;;  %v3663_v34 = vsel %vm6834_vm8, %v3654_v45, %v3662_v26  ;;  %v3664_v40 = vrot.slane %v3662_v26, 4 }
 0x215   :  { %3713 = vst [vmem:[%s7159_s3 + $0x28] sm:$0xf] %v3543_v44  ;;  %3725 = vst [vmem:[%s7159_s3 + $0x58] sm:$0xf] %v3663_v34 }
 0x216   :  { %v3553_v31 = vsel %vm6834_vm8, %v3544_v56, %v3552_v35  ;;  %v3673_v15 = vsel %vm6834_vm8, %v3664_v40, %v3672_v9 }
 0x217   :  { %3714 = vst [vmem:[%s7159_s3 + $0x2c] sm:$0xf] %v3553_v31  ;;  %3726 = vst [vmem:[%s7159_s3 + $0x5c] sm:$0xf] %v3673_v15 }

// kernel: resnet_forward.7
= control target key start
LH: loop header
LB: loop body
LE: loop exit
PB: predicated region body
PF: predicated region fallthrough
CT: control target
= control target key end

     0   :  { %v346_v1 = vmov 0.0   ;;  %vm347_vm0 = vmmov 0   ;;  %vm22_vm1 = vcmask 1040384   ;;  %vm27_vm2 = vcmask 1043456   ;;  %s466_s0 = inlined_call_operand.vmem [shape: bf16[80,128], index: 0, kind: input, shape index: {}]   ;;  %s467_s1 = inlined_call_operand.vmem [shape: bf16[128,128], index: 1, kind: input, shape index: {}]   ;;  %s468_s2 = inlined_call_operand.vmem [shape: f32[1,128], index: 2, kind: input, shape index: {}]   ;;  %s469_s3 = inlined_call_operand.hbm [shape: f32[1,2,128], index: 3, kind: output, shape index: {}]  }
   0x1   :  { %v314_v0 = vld [vmem:[%s467_s1] sm:$0xff]   ;;  %291 = vmatprep.subr.bf16.mxu0 %v346_v1  ;;  %v315_v2 = vld [vmem:[%s467_s1 + $0x8] sm:$0xff]   ;;  %307 = vmatprep.mubr.msk.bf16.mxu0 %vm347_vm0, %v346_v1  ;;  %v316_v3 = vld [vmem:[%s467_s1 + $0x10] sm:$0xff]   ;;  %vm42_vm3 = vcmask 1042432  }
   0x2   :  { %292 = vmatpush3.bf16.msra.mxu0 %v314_v0  ;;  %v317_v4 = vld [vmem:[%s467_s1 + $0x18] sm:$0xff]   ;;  %v16_v5 = vld [vmem:[%s466_s0] sm:$0x8]  ;;  %v17_v6 = vld [vmem:[%s466_s0 + $0x4] sm:$0x3] }
   0x3   :  { %293 = vmatprep.subr.bf16.mxu0 %v346_v1  ;;  %v36_v7 = vld [vmem:[%s466_s0 + $0x4] sm:$0xc]  ;;  %v18_v8 = vunpack.c.l.bf16 %v16_v5  ;;  %v19_v9 = vunpack.c.l.bf16 %v17_v6  ;;  %v37_v10 = vld [vmem:[%s466_s0 + $0x8] sm:$0x1]  ;;  %v55_v12 = vld [vmem:[%s466_s0 + $0x8] sm:$0xe] }
   0x4   :  { %v38_v11 = vunpack.c.l.bf16 %v36_v7  ;;  %v68_v13 = vld [vmem:[%s466_s0 + $0xc] sm:$0x7]  ;;  %v39_v14 = vunpack.c.l.bf16 %v37_v10  ;;  %v56_v15 = vunpack.c.l.bf16 %v55_v12  ;;  %v82_v17 = vld [vmem:[%s466_s0 + $0x14] sm:$0x8]  ;;  %v83_v18 = vld [vmem:[%s466_s0 + $0x18] sm:$0x3] }
   0x5   :  { %v69_v16 = vunpack.c.l.bf16 %v68_v13  ;;  %v100_v19 = vld [vmem:[%s466_s0 + $0x18] sm:$0xc]  ;;  %v23_v20 = vrot.slane %v18_v8, 7  ;;  %v24_v21 = vrot.slane %v19_v9, 7  ;;  %v84_v23 = vunpack.c.l.bf16 %v82_v17  ;;  %v101_v24 = vld [vmem:[%s466_s0 + $0x1c] sm:$0x1] }
   0x6   :  { %294 = vmatpush3.bf16.msra.mxu0 %v315_v2  ;;  %v43_v22 = vrot.slane %v38_v11, 5  ;;  %v44_v25 = vrot.slane %v39_v14, 5  ;;  %v58_v26 = vrot.slane %v56_v15, 3  ;;  %v85_v28 = vunpack.c.l.bf16 %v83_v18  ;;  %v118_v33 = vld [vmem:[%s466_s0 + $0x1c] sm:$0xe]  ;;  %v318_v34 = vld [vmem:[%s467_s1 + $0x20] sm:$0xff]  }
   0x7   :  { %295 = vmatprep.subr.bf16.mxu0 %v346_v1  ;;  %v71_v27 = vrot.slane %v69_v16, 1  ;;  %v25_v29 = vsel %vm22_vm1, %v23_v20, %v24_v21  ;;  %v88_v30 = vrot.slane %v84_v23, 7  ;;  %v102_v31 = vunpack.c.l.bf16 %v100_v19 }
   0x8   :  { %v103_v32 = vunpack.c.l.bf16 %v101_v24  ;;  %v28_v35 = vsel %vm27_vm2, %v25_v29, 0.0  ;;  %v45_v36 = vsel %vm42_vm3, %v43_v22, %v44_v25  ;;  %v60_v37 = vsel %vm27_vm2, %v58_v26, 0.0 }
   0x9   :  { %v73_v38 = vsel %vm27_vm2, %v71_v27, 0.0 }
   0xa   :  { %296 = vmatpush3.bf16.msra.mxu0 %v316_v3 }
   0xb   :  { %297 = vmatprep.subr.bf16.mxu0 %v346_v1 }
   0xe   :  { %298 = vmatpush3.bf16.msra.mxu0 %v317_v4 }
   0xf   :  { %8 = vsyncpa [#allocation3], 0  ;;  %299 = vmatprep.subr.bf16.mxu0 %v346_v1  ;;  %v29_v39 = vrot.slane %v28_v35, 4  ;;  %v47_v40 = vsel %vm27_vm2, %v45_v36, 0.0  ;;  %v61_v41 = vrot.slane %v60_v37, 4  ;;  %v74_v42 = vrot.slane %v73_v38, 4 }
  0x10   :  { %v131_v43 = vld [vmem:[%s466_s0 + $0x20] sm:$0x7]  ;;  %v48_v44 = vrot.slane %v47_v40, 4  ;;  %v89_v45 = vrot.slane %v85_v28, 7  ;;  %v106_v46 = vrot.slane %v102_v31, 5  ;;  %v107_v47 = vrot.slane %v103_v32, 5 }
  0x11   :  { %v30_v48 = vadd.f32 %v29_v39, %v28_v35  ;;  %v62_v49 = vadd.f32 %v61_v41, %v60_v37  ;;  %v75_v50 = vadd.f32 %v74_v42, %v73_v38  ;;  %v119_v51 = vunpack.c.l.bf16 %v118_v33  ;;  %v319_v52 = vld [vmem:[%s467_s1 + $0x28] sm:$0xff]   ;;  %v320_v6 = vld [vmem:[%s467_s1 + $0x30] sm:$0xff]   ;;  %v321_v22 = vld [vmem:[%s467_s1 + $0x38] sm:$0xff]   ;;  %s348_s25 = smov [#allocation2]  }
  0x12   :  { %300 = vmatpush3.bf16.msra.mxu0 %v318_v34  ;;  %v49_v53 = vadd.f32 %v48_v44, %v47_v40  ;;  %v90_v54 = vsel %vm22_vm1, %v88_v30, %v89_v45  ;;  %v108_v55 = vsel %vm42_vm3, %v106_v46, %v107_v47  ;;  %v132_v56 = vunpack.c.l.bf16 %v131_v43  ;;  %s265_s26 = sshll.u32 %s348_s25, 4  ;;  %s266_s26 = int_to_ptr.vmem [resolvable:$true] %s265_s26 }
  0x13   :  { %301 = vmatprep.subr.bf16.mxu0 %v346_v1  ;;  %v31_v57 = vrot.slane %v30_v48, 2  ;;  %v63_v58 = vrot.slane %v62_v49, 2  ;;  %v76_v59 = vrot.slane %v75_v50, 2  ;;  %v92_v60 = vsel %vm27_vm2, %v90_v54, 0.0  ;;  %s322_s27 = scalar_lea.vmem %s266_s26, 32  ;;  %p327_p1 = scmp.lt.s32.totalorder %s266_s26, %s266_s26 }
  0x14   :  { %v50_v61 = vrot.slane %v49_v53, 2  ;;  %v93_v62 = vrot.slane %v92_v60, 4  ;;  %v110_v63 = vsel %vm27_vm2, %v108_v55, 0.0  ;;  %v121_v0 = vrot.slane %v119_v51, 3  ;;  %v273_v51 = vld [vmem:[%s468_s2] ss:$0 sm:$0xff]  ;;  %p323_p0 = scmp.ne.s32.totalorder %s266_s26, %s322_s27  ;;  %p328_p2 = scmp.lt.s32.totalorder %s322_s27, %s322_s27 }
  0x15   :  { %v32_v2 = vadd.f32 %v31_v57, %v30_v48  ;;  %v64_v3 = vadd.f32 %v63_v58, %v62_v49  ;;  %v77_v4 = vadd.f32 %v76_v59, %v75_v50  ;;  %v111_v5 = vrot.slane %v110_v63, 4 }
  0x16   :  { %302 = vmatpush3.bf16.msra.mxu0 %v319_v52  ;;  %v51_v7 = vadd.f32 %v50_v61, %v49_v53  ;;  %v94_v8 = vadd.f32 %v93_v62, %v92_v60  ;;  %v123_v9 = vsel %vm27_vm2, %v121_v0, 0.0  ;;  %v134_v10 = vrot.slane %v132_v56, 1  ;;  %p329_p3 = por %p328_p2, %p327_p1 }
  0x17   :  { %303 = vmatprep.subr.bf16.mxu0 %v346_v1  ;;  %v33_v11 = vrot.slane %v32_v2, 1  ;;  %v65_v12 = vrot.slane %v64_v3, 1  ;;  %v112_v13 = vadd.f32 %v111_v5, %v110_v63  ;;  %v124_v16 = vrot.slane %v123_v9, 4 }
  0x18   :  { %v52_v14 = vrot.slane %v51_v7, 1  ;;  %v95_v15 = vrot.slane %v94_v8, 2  ;;  %v136_v17 = vsel %vm27_vm2, %v134_v10, 0.0  ;;  %v78_v20 = vrot.slane %v77_v4, 1  ;;  %p330_p4 = pnand %p329_p3, %p323_p0 }
  0x19   :  { %v34_v18 = vadd.f32 %v33_v11, %v32_v2  ;;  %v66_v19 = vadd.f32 %v65_v12, %v64_v3  ;;  %v113_v21 = vrot.slane %v112_v13, 2  ;;  %v125_v25 = vadd.f32 %v124_v16, %v123_v9 }
  0x1a   :  { %304 = vmatpush3.bf16.msra.mxu0 %v320_v6  ;;  %v53_v23 = vadd.f32 %v52_v14, %v51_v7  ;;  %v96_v24 = vadd.f32 %v95_v15, %v94_v8  ;;  %v137_v26 = vrot.slane %v136_v17, 4  ;;  %v79_v32 = vadd.f32 %v78_v20, %v77_v4 }
  0x1b   :  { %305 = vmatprep.subr.bf16.mxu0 %v346_v1  ;;  %v114_v27 = vadd.f32 %v113_v21, %v112_v13  ;;  %v126_v30 = vrot.slane %v125_v25, 2 }
  0x1c   :  { %v54_v28 = vadd.f32 %v53_v23, %v34_v18  ;;  %v97_v29 = vrot.slane %v96_v24, 1  ;;  %v138_v31 = vadd.f32 %v137_v26, %v136_v17 }
  0x1d   :  { %v115_v33 = vrot.slane %v114_v27, 1  ;;  %v127_v36 = vadd.f32 %v126_v30, %v125_v25 }
  0x1e   :  { %306 = vmatpush3.bf16.msra.mxu0 %v321_v22  ;;  %v67_v34 = vadd.f32 %v66_v19, %v54_v28  ;;  %v98_v35 = vadd.f32 %v97_v29, %v96_v24  ;;  %v139_v37 = vrot.slane %v138_v31, 2 }
  0x1f   :  { %v116_v38 = vadd.f32 %v115_v33, %v114_v27  ;;  %v128_v39 = vrot.slane %v127_v36, 1 }
  0x20   :  { %v140_v40 = vadd.f32 %v139_v37, %v138_v31  ;;  %v80_v42 = vadd.f32 %v79_v32, %v67_v34 }
  0x21   :  { %v117_v41 = vadd.f32 %v116_v38, %v98_v35  ;;  %v129_v43 = vadd.f32 %v128_v39, %v127_v36 }
  0x22   :  { %v141_v44 = vrot.slane %v140_v40, 1  ;;  %v81_v46 = vmul.f32 0.0625, %v80_v42 }
  0x23   :  { %v130_v1 = vadd.f32 %v129_v43, %v117_v41 }
  0x24   :  { %v142_v45 = vadd.f32 %v141_v44, %v140_v40 }
  0x26   :  { %v143_v47 = vadd.f32 %v142_v45, %v130_v1 }
  0x28   :  { %v144_v48 = vmul.f32 0.0625, %v143_v47 }
  0x2a   :  { %v145_v49 = vsel %vm22_vm1, %v81_v46, %v144_v48 }
  0x2b   :  { %v146_v50 = vpack.c.bf16 %v145_v49, %v145_v49 }
  0x2d   :  { %308 = vmatmul.mubr.bf16.vlgmr.msra.gmra.mrb[0].mxu0 %v146_v50 }
 0x100   :  { %v252_v52 = vpop.f32.mrb[0].mxu0 }
 0x101   :  { %v253_v53 = vadd.f32 %v273_v51, %v252_v52  ;;  %v309_v54 = vpop.f32.mrb[1].mxu0 }
 0x102   :  { %v255_v55 = vpop.f32.mrb[2].mxu0 }
 0x103   :  { %258 = vst [vmem:[#allocation2] sm:$0x3] %v253_v53  ;;  %v310_v56 = vpop.f32.mrb[3].mxu0 }
 0x104   :  { %333 = shalt.err (!%p330_p4)
}
 0x105   :  { %s334_s2 = scalar_lea.hbm %s469_s3, 32 }
 0x106   :  { %p335_p5 = scmp.ne.s32.totalorder %s469_s3, %s334_s2  ;;  %p338_p6 = scmp.lt.u32.totalorder %s334_s2, %s469_s3 }
 0x108   :  { %p340_p7 = pnand %p338_p6, %p335_p5 }
 0x10a   :  { %343 = shalt.err (!%p340_p7)
}
 0x10b   :  { %268 = dma.vmem_to_hbm [thread:$0]  %s266_s26, 32, %s469_s3, [#allocation3]  }
 0x10c   :  { %344 = dma.done.wait [#allocation3], 32  }
 0x10d   :  { %345 = vsyncadd [#allocation3], 4294967264 }
 0x10e   :  { %272 = vsyncpa [#allocation3], 1 }

// kernel: resnet_forward.5
= control target key start
LH: loop header
LB: loop body
LE: loop exit
PB: predicated region body
PF: predicated region fallthrough
CT: control target
= control target key end

     0   :  { %vm11754_vm0 = vsmask.f32 7424  ;;  %vm11753_vm1 = vcmask 1046528   ;;  %vm1313_vm2 = vsmask.f32 6400  ;;  %vm11752_vm3 = vcmask 1045504   ;;  %s11745_s1 = inlined_call_operand.vmem [shape: bf16[9,128,128], index: 1, kind: input, shape index: {}]   ;;  %s11746_s0 = inlined_call_operand.vmem [shape: bf16[208,128], index: 0, kind: input, shape index: {}]   ;;  %s11747_s3 = inlined_call_operand.vmem [shape: bf16[9,128,128], index: 3, kind: input, shape index: {}]   ;;  %s11748_s5 = inlined_call_operand.vmem [shape: bf16[208,128], index: 5, kind: output, shape index: {}]   ;;  %s11749_s2 = inlined_call_operand.vmem [shape: f32[1,128], index: 2, kind: input, shape index: {}]   ;;  %s11750_s4 = inlined_call_operand.vmem [shape: f32[1,128], index: 4, kind: input, shape index: {}]  }
   0x1   :  { %v8545_v0 = vld [vmem:[%s11745_s1 + $0x40] sm:$0xff]   ;;  %v8546_v1 = vld [vmem:[%s11745_s1 + $0x48] sm:$0xff]   ;;  %v8547_v2 = vld [vmem:[%s11745_s1 + $0x50] sm:$0xff]   ;;  %vm11755_vm4 = vsmask.f32 5376  ;;  %vm11751_vm5 = vcmask 1044480  }
   0x2   :  { %7503 = vmatprep.subr.bf16.mxu0 %v8545_v0  ;;  %v8548_v3 = vld [vmem:[%s11745_s1 + $0x58] sm:$0xff]   ;;  %v34_v4 = vld [vmem:[%s11746_s0] sm:$0xf]  ;;  %v8793_v5 = vld [vmem:[%s11746_s0 + $0x4] sm:$0xf]  ;;  %vm27_vm7 = vcmask 1047552  }
   0x3   :  { %7504 = vmatpush3.bf16.msra.mxu0 %v8545_v0  ;;  %v8796_v6 = vcombine.low %v34_v4, %v8793_v5  ;;  %v8801_v7 = vld [vmem:[%s11746_s0 + $0x8] sm:$0xff]   ;;  %v8549_v11 = vld [vmem:[%s11745_s1 + $0x60] sm:$0xff]   ;;  %v8816_v17 = vld [vmem:[%s11746_s0 + $0x10] sm:$0xff]   ;;  %vm28_vm8 = vsmask.f32 7938  ;;  %vm3538_vm10 = vcmask 1043456  }
   0x4   :  { %7505 = vmatprep.subr.bf16.mxu0 %v8546_v1  ;;  %v158_v10 = vshll.u32 %v8801_v7, 16  ;;  %v8550_v14 = vld [vmem:[%s11745_s1 + $0x68] sm:$0xff]   ;;  %v8551_v18 = vld [vmem:[%s11745_s1 + $0x70] sm:$0xff]   ;;  %v8824_v19 = vld [vmem:[%s11746_s0 + $0x18] sm:$0xff]   ;;  %v166_v20 = vshll.u32 %v8816_v17, 16  ;;  %v162_v22 = vshrl.u32 %v8801_v7, 16 }
   0x5   :  { %v151_v8 = vshrl.u32 %v8796_v6, 16  ;;  %v153_v9 = vshll.u32 %v8796_v6, 16  ;;  %v8552_v21 = vld [vmem:[%s11745_s1 + $0x78] sm:$0xff]   ;;  %v170_v23 = vshrl.u32 %v8816_v17, 16  ;;  %v174_v24 = vshll.u32 %v8824_v19, 16  ;;  %v8836_v26 = vld [vmem:[%s11746_s0 + $0x20] sm:$0xff]   ;;  %vm23_vm6 = vmand %vm11752_vm3, %vm11755_vm4 }
   0x6   :  { %v160_v13 = vrot.slane %v158_v10, 1  ;;  %v168_v25 = vrot.slane %v166_v20, 1  ;;  %v8556_v28 = vld [vmem:[%s11745_s1] sm:$0xff]   ;;  %v8844_v31 = vld [vmem:[%s11746_s0 + $0x28] sm:$0xff]   ;;  %v178_v33 = vshrl.u32 %v8824_v19, 16  ;;  %v182_v34 = vshll.u32 %v8836_v26, 16  ;;  %vm29_vm9 = vmand %vm27_vm7, %vm28_vm8 }
   0x7   :  { %7506 = vmatpush3.bf16.msra.mxu0 %v8546_v1  ;;  %v155_v12 = vrot.slane %v153_v9, 1  ;;  %v176_v30 = vrot.slane %v174_v24, 1  ;;  %v8557_v32 = vld [vmem:[%s11745_s1 + $0x8] sm:$0xff]   ;;  %v186_v37 = vshrl.u32 %v8836_v26, 16  ;;  %v190_v38 = vshll.u32 %v8844_v31, 16  ;;  %v8858_v40 = vld [vmem:[%s11746_s0 + $0x30] sm:$0xff]   ;;  %vm3539_vm11 = vmand %vm3538_vm10, %vm28_vm8 }
   0x8   :  { %7507 = vmatprep.subr.bf16.mxu0 %v8547_v2  ;;  %v164_v27 = vor.u32 %v162_v22, %v160_v13  ;;  %v172_v29 = vor.u32 %v170_v23, %v168_v25  ;;  %v184_v39 = vrot.slane %v182_v34, 1  ;;  %v8560_v42 = vld [vmem:[%s11745_s1 + $0x10] sm:$0xff]   ;;  %v8866_v45 = vld [vmem:[%s11746_s0 + $0x38] sm:$0xff]   ;;  %v198_v46 = vshll.u32 %v8858_v40, 16  ;;  %v8880_v54 = vld [vmem:[%s11746_s0 + $0x40] sm:$0xff]  }
   0x9   :  { %v156_v15 = vor.u32 %v155_v12, %v151_v8  ;;  %v180_v41 = vor.u32 %v178_v33, %v176_v30  ;;  %v192_v44 = vrot.slane %v190_v38, 1  ;;  %v194_v48 = vshrl.u32 %v8844_v31, 16  ;;  %v8563_v49 = vld [vmem:[%s11745_s1 + $0x18] sm:$0xff]   ;;  %v8566_v56 = vld [vmem:[%s11745_s1 + $0x20] sm:$0xff]   ;;  %v8888_v59 = vld [vmem:[%s11746_s0 + $0x48] sm:$0xff]  }
   0xa   :  { %v169_v35 = vsel %vm11754_vm0, %v164_v27, %v168_v25  ;;  %v177_v36 = vsel %vm11754_vm0, %v172_v29, %v176_v30  ;;  %v188_v43 = vor.u32 %v186_v37, %v184_v39  ;;  %v202_v51 = vshrl.u32 %v8858_v40, 16  ;;  %v8567_v63 = vld [vmem:[%s11745_s1 + $0x28] sm:$0xff]   ;;  %v8902_v4 = vld [vmem:[%s11746_s0 + $0x50] sm:$0xff]   ;;  %v8907_v9 = vld [vmem:[%s11746_s0 + $0x58] ss:$0 sps:$4 sm:$0xff]  }
   0xb   :  { %7508 = vmatpush3.bf16.msra.mxu0 %v8547_v2  ;;  %v161_v16 = vsel %vm11754_vm0, %v156_v15, %v160_v13  ;;  %v185_v47 = vsel %vm11754_vm0, %v180_v41, %v184_v39  ;;  %v206_v52 = vshll.u32 %v8866_v45, 16  ;;  %v200_v53 = vrot.slane %v198_v46, 1  ;;  %v8570_v12 = vld [vmem:[%s11745_s1 + $0x30] sm:$0xff]   ;;  %v8573_v25 = vld [vmem:[%s11745_s1 + $0x80] sm:$0xff]   ;;  %v8574_v33 = vld [vmem:[%s11745_s1 + $0x88] sm:$0xff]  }
   0xc   :  { %7509 = vmatprep.subr.bf16.mxu0 %v8548_v3  ;;  %7519 = vmatprep.mubr.bf16.mxu0 %v161_v16  ;;  %v193_v50 = vsel %vm11754_vm0, %v188_v43, %v192_v44  ;;  %v196_v55 = vor.u32 %v194_v48, %v192_v44  ;;  %v214_v60 = vshll.u32 %v8880_v54, 16  ;;  %v210_v62 = vshrl.u32 %v8866_v45, 16  ;;  %v8575_v34 = vld [vmem:[%s11745_s1 + $0x90] sm:$0xff]   ;;  %v8581_v38 = vld [vmem:[%s11745_s1 + $0xb8] sm:$0xff]   ;;  %v8583_v39 = vld [vmem:[%s11745_s1 + $0xc0] sm:$0xff]  }
   0xd   :  { %v204_v57 = vor.u32 %v202_v51, %v200_v53  ;;  %v208_v58 = vrot.slane %v206_v52, 1  ;;  %v218_v1 = vshrl.u32 %v8880_v54, 16  ;;  %v222_v2 = vshll.u32 %v8888_v59, 16  ;;  %v8579_v37 = vld [vmem:[%s11745_s1 + $0xb0] sm:$0xff]   ;;  %v624_v41 = vld [vmem:[%s11746_s0] sm:$0xe] }
   0xe   :  { %v201_v61 = vsel %vm11754_vm0, %v196_v55, %v200_v53  ;;  %v230_v13 = vshll.u32 %v8902_v4, 16  ;;  %v226_v15 = vshrl.u32 %v8888_v59, 16  ;;  %v238_v16 = vshll.u32 %v8907_v9, 16  ;;  %v8580_v46 = vld [vmem:[%s11746_s0 + $0x58] ss:$0 sps:$4 sm:$0x77]  }
   0xf   :  { %7510 = vmatpush3.bf16.msra.mxu0 %v8548_v3  ;;  %v209_v0 = vsel %vm11754_vm0, %v204_v57, %v208_v58  ;;  %v216_v3 = vrot.slane %v214_v60, 1  ;;  %v212_v8 = vor.u32 %v210_v62, %v208_v58  ;;  %v234_v20 = vshrl.u32 %v8902_v4, 16  ;;  %v8586_v55 = vld [vmem:[%s11745_s1 + $0xd8] sm:$0xff]   ;;  %v8588_v60 = vld [vmem:[%s11745_s1 + $0xe8] sm:$0xff]  }
  0x10   :  { %7511 = vmatprep.subr.bf16.mxu0 %v8549_v11  ;;  %v232_v22 = vrot.slane %v230_v13, 1  ;;  %v240_v24 = vrot.slane %v238_v16, 1  ;;  %v242_v30 = vshrl.u32 %v8907_v9, 16  ;;  %v647_v44 = vrot.slane %v8801_v7, 1  ;;  %v8596_v13 = vld [vmem:[%s11746_s0 + $0x1c] sm:$0xff]  }
  0x11   :  { %v220_v10 = vor.u32 %v218_v1, %v216_v3  ;;  %v649_v48 = vrot.slane %v8816_v17, 1  ;;  %v653_v51 = vrot.slane %v8836_v26, 1  ;;  %v8594_v1 = vld [vmem:[%s11745_s1 + $0x100] sm:$0xff]  }
  0x12   :  { %v236_v27 = vor.u32 %v234_v20, %v232_v22  ;;  %v8595_v20 = vld [vmem:[%s11745_s1 + $0x108] sm:$0xff]  }
  0x13   :  { %7512 = vmatpush3.bf16.msra.mxu0 %v8549_v11  ;;  %v224_v11 = vrot.slane %v222_v2, 1 }
  0x14   :  { %7513 = vmatprep.subr.bf16.mxu0 %v8550_v14  ;;  %v241_v29 = vsel %vm11754_vm0, %v236_v27, %v240_v24 }
  0x15   :  { %v228_v23 = vor.u32 %v226_v15, %v224_v11  ;;  %v983_v15 = vrot.slane %v8596_v13, 1 }
  0x17   :  { %7514 = vmatpush3.bf16.msra.mxu0 %v8550_v14  ;;  %v217_v14 = vsel %vm11754_vm0, %v212_v8, %v216_v3  ;;  %v8591_v8 = vld [vmem:[%s11746_s0 + $0x4] sm:$0xfe]  }
  0x18   :  { %7515 = vmatprep.subr.bf16.mxu0 %v8551_v18 }
  0x1b   :  { %7516 = vmatpush3.bf16.msra.mxu0 %v8551_v18  ;;  %v225_v18 = vsel %vm11754_vm0, %v220_v10, %v224_v11  ;;  %v8593_v11 = vld [vmem:[%s11746_s0 + $0x14] sm:$0xff]  }
  0x1c   :  { %7517 = vmatprep.subr.bf16.mxu0 %v8552_v21 }
  0x1f   :  { %7518 = vmatpush3.bf16.msra.mxu0 %v8552_v21  ;;  %v8572_v21 = vld [vmem:[%s11745_s1 + $0x38] sm:$0xff]  }
  0x20   :  { %7543 = vmatprep.subr.bf16.mxu0 %v8556_v28 }
  0x22   :  { %7520 = vmatmul.mubr.bf16.vlgmr.msra.gmra.mrb[0].mxu0 %v169_v35  ;;  %v8577_v35 = vld [vmem:[%s11745_s1 + $0xa0] sm:$0xff]  }
  0x23   :  { %7544 = vmatpush3.bf16.msra.mxu0 %v8556_v28  ;;  %7523 = vmatprep.mubr.bf16.mxu0 %v177_v36  ;;  %v233_v28 = vsel %vm11754_vm0, %v228_v23, %v232_v22  ;;  %v8578_v36 = vld [vmem:[%s11745_s1 + $0xa8] sm:$0xff]  }
  0x24   :  { %7545 = vmatprep.subr.bf16.mxu0 %v8557_v32  ;;  %v8599_v22 = vld [vmem:[%s11746_s0 + $0x2c] sm:$0xff]  }
  0x27   :  { %7546 = vmatpush3.bf16.msra.mxu0 %v8557_v32  ;;  %v244_v32 = vor.u32 %v242_v30, %v240_v24  ;;  %v8598_v24 = vld [vmem:[%s11745_s1 + $0x110] sm:$0xff]   ;;  %v8601_v30 = vld [vmem:[%s11745_s1 + $0x118] sm:$0xff]  }
  0x28   :  { %7547 = vmatprep.subr.bf16.mxu0 %v8560_v42 }
  0x2a   :  { %7524 = vmatmul.mubr.bf16.gmra.mrb[4].mxu0 %v185_v47 }
  0x2b   :  { %7548 = vmatpush3.bf16.msra.mxu0 %v8560_v42  ;;  %7527 = vmatprep.mubr.bf16.mxu0 %v193_v50  ;;  %v6648_v42 = vcombine.low %v624_v41, %v8793_v5  ;;  %v651_v5 = vrot.slane %v8824_v19, 1  ;;  %v8584_v50 = vld [vmem:[%s11745_s1 + $0xc8] sm:$0xff]  }
  0x2c   :  { %7549 = vmatprep.subr.bf16.mxu0 %v8563_v49 }
  0x2d   :  { %v646_v43 = vrot.slane %v6648_v42, 1  ;;  %v654_v52 = vsel %vm11753_vm1, %v651_v5, %v653_v51 }
  0x2f   :  { %7550 = vmatpush3.bf16.msra.mxu0 %v8563_v49  ;;  %v648_v47 = vsel %vm11753_vm1, %v646_v43, %v647_v44  ;;  %v650_v49 = vsel %vm11753_vm1, %v647_v44, %v649_v48  ;;  %v8608_v43 = vld [vmem:[%s11745_s1 + $0x130] sm:$0xff]   ;;  %v1212_v44 = vld [vmem:[%s11746_s0 + $0x4] sm:$0xe] }
  0x30   :  { %7551 = vmatprep.subr.bf16.mxu0 %v8566_v56 }
  0x32   :  { %7528 = vmatmul.mubr.bf16.gmra.mrb[8].mxu0 %v201_v61  ;;  %v8589_v61 = vld [vmem:[%s11745_s1 + $0xf0] sm:$0xff]  }
  0x33   :  { %7531 = vmatprep.mubr.bf16.mxu0 %v209_v0  ;;  %7552 = vmatpush3.bf16.msra.mxu0 %v8566_v56  ;;  %v659_v56 = vrot.slane %v8866_v45, 1  ;;  %v8590_v0 = vld [vmem:[%s11745_s1 + $0xf8] sm:$0xff]  }
  0x34   :  { %7553 = vmatprep.subr.bf16.mxu0 %v8567_v63 }
  0x37   :  { %7554 = vmatpush3.bf16.msra.mxu0 %v8567_v63 }
  0x38   :  { %7555 = vmatprep.subr.bf16.mxu0 %v8570_v12 }
  0x3a   :  { %7532 = vmatmul.mubr.bf16.gmra.mrb[12].mxu0 %v217_v14  ;;  %v981_v14 = vrot.slane %v8593_v11, 1 }
  0x3b   :  { %7535 = vmatprep.mubr.bf16.mxu0 %v225_v18  ;;  %7556 = vmatpush3.bf16.msra.mxu0 %v8570_v12  ;;  %v8597_v18 = vld [vmem:[%s11746_s0 + $0x24] sm:$0xff]  }
  0x3c   :  { %7557 = vmatprep.subr.bf16.mxu0 %v8572_v21  ;;  %v985_v23 = vrot.slane %v8597_v18, 1 }
  0x3e   :  { %v986_v27 = vsel %vm11753_vm1, %v983_v15, %v985_v23 }
  0x3f   :  { %7558 = vmatpush3.bf16.msra.mxu0 %v8572_v21  ;;  %v984_v21 = vsel %vm11753_vm1, %v981_v14, %v983_v15 }
  0x40   :  { %7583 = vmatprep.subr.bf16.mxu0 %v8573_v25 }
  0x42   :  { %7536 = vmatmul.mubr.bf16.gmra.mrb[16].mxu0 %v233_v28  ;;  %v8600_v28 = vld [vmem:[%s11746_s0 + $0x34] sm:$0xff]  }
  0x43   :  { %7539 = vmatprep.mubr.bf16.mxu0 %v241_v29 }
  0x4a   :  { %7540 = vmatmul.mubr.bf16.gmra.mrb[20].mxu0 %v244_v32  ;;  %v8602_v32 = vld [vmem:[%s11746_s0 + $0x3c] sm:$0xff]  }
  0x4b   :  { %7559 = vmatprep.mubr.bf16.mxu0 %v8796_v6  ;;  %v8576_v6 = vld [vmem:[%s11745_s1 + $0x98] sm:$0xff]  }
  0x52   :  { %7560 = vmatmul.mubr.bf16.vlgmr.msra.gmra.mrb[0].mxu0 %v8801_v7  ;;  %v652_v7 = vsel %vm11753_vm1, %v649_v48, %v651_v5  ;;  %v8607_v48 = vld [vmem:[%s11746_s0 + $0x54] sm:$0xff]   ;;  %v8609_v5 = vld [vmem:[%s11746_s0 + $0x5c] ss:$0 sps:$4 sm:$0xff]  }
  0x53   :  { %7584 = vmatpush3.bf16.msra.mxu0 %v8573_v25  ;;  %7563 = vmatprep.mubr.bf16.mxu0 %v8816_v17  ;;  %v8585_v17 = vld [vmem:[%s11745_s1 + $0xd0] sm:$0xff]   ;;  %v987_v25 = vrot.slane %v8599_v22, 1 }
  0x54   :  { %7585 = vmatprep.subr.bf16.mxu0 %v8574_v33 }
  0x55   :  { %v988_v29 = vsel %vm11753_vm1, %v985_v23, %v987_v25 }
  0x57   :  { %7586 = vmatpush3.bf16.msra.mxu0 %v8574_v33  ;;  %v989_v33 = vrot.slane %v8600_v28, 1 }
  0x58   :  { %7587 = vmatprep.subr.bf16.mxu0 %v8575_v34 }
  0x5a   :  { %7564 = vmatmul.mubr.bf16.gmra.mrb[4].mxu0 %v8824_v19  ;;  %v655_v19 = vrot.slane %v8844_v31, 1 }
  0x5b   :  { %7588 = vmatpush3.bf16.msra.mxu0 %v8575_v34  ;;  %7567 = vmatprep.mubr.bf16.mxu0 %v8836_v26  ;;  %v657_v26 = vrot.slane %v8858_v40, 1  ;;  %v991_v34 = vrot.slane %v8602_v32, 1 }
  0x5c   :  { %7589 = vmatprep.subr.bf16.mxu0 %v8576_v6  ;;  %v656_v53 = vsel %vm11753_vm1, %v653_v51, %v655_v19  ;;  %v9093_v51 = vld [vmem:[%s11746_s0 + $0xc] sm:$0xff]  }
  0x5d   :  { %v658_v57 = vsel %vm11753_vm1, %v655_v19, %v657_v26  ;;  %v660_v58 = vsel %vm11753_vm1, %v657_v26, %v659_v56  ;;  %v999_v19 = vrot.slane %v8609_v5, 1  ;;  %v1326_v26 = vshll.u32 %v9093_v51, 16  ;;  %v9166_v5 = vld [vmem:[%s11746_s0 + $0x4c] sm:$0xff]  }
  0x5f   :  { %7590 = vmatpush3.bf16.msra.mxu0 %v8576_v6  ;;  %v8604_v6 = vld [vmem:[%s11745_s1 + $0x120] sm:$0xff]  }
  0x60   :  { %7591 = vmatprep.subr.bf16.mxu0 %v8577_v35 }
  0x62   :  { %7568 = vmatmul.mubr.bf16.gmra.mrb[8].mxu0 %v8844_v31  ;;  %v8587_v31 = vld [vmem:[%s11745_s1 + $0xe0] sm:$0xff]  }
  0x63   :  { %7571 = vmatprep.mubr.bf16.mxu0 %v8858_v40  ;;  %7592 = vmatpush3.bf16.msra.mxu0 %v8577_v35  ;;  %v661_v40 = vrot.slane %v8880_v54, 1  ;;  %v990_v35 = vsel %vm11753_vm1, %v987_v25, %v989_v33  ;;  %v8615_v25 = vld [vmem:[%s11745_s1 + $0x148] sm:$0xff]  }
  0x64   :  { %7593 = vmatprep.subr.bf16.mxu0 %v8578_v36 }
  0x65   :  { %v662_v62 = vsel %vm11753_vm1, %v659_v56, %v661_v40  ;;  %v8614_v56 = vld [vmem:[%s11745_s1 + $0x140] sm:$0xff]  }
  0x67   :  { %7594 = vmatpush3.bf16.msra.mxu0 %v8578_v36  ;;  %v8603_v36 = vld [vmem:[%s11746_s0 + $0x44] sm:$0xff]  }
  0x68   :  { %7595 = vmatprep.subr.bf16.mxu0 %v8579_v37  ;;  %v993_v41 = vrot.slane %v8603_v36, 1 }
  0x6a   :  { %7572 = vmatmul.mubr.bf16.gmra.mrb[12].mxu0 %v8866_v45  ;;  %v663_v45 = vrot.slane %v8888_v59, 1 }
  0x6b   :  { %7575 = vmatprep.mubr.bf16.mxu0 %v8880_v54  ;;  %7596 = vmatpush3.bf16.msra.mxu0 %v8579_v37  ;;  %v665_v54 = vrot.slane %v8902_v4, 1  ;;  %v992_v37 = vsel %vm11753_vm1, %v989_v33, %v991_v34 }
  0x6c   :  { %7597 = vmatprep.subr.bf16.mxu0 %v8581_v38  ;;  %v664_v63 = vsel %vm11753_vm1, %v661_v40, %v663_v45 }
  0x6d   :  { %v666_v2 = vsel %vm11753_vm1, %v663_v45, %v665_v54 }
  0x6f   :  { %7598 = vmatpush3.bf16.msra.mxu0 %v8581_v38  ;;  %v8605_v38 = vld [vmem:[%s11745_s1 + $0x128] sm:$0xff]  }
  0x70   :  { %7623 = vmatprep.subr.bf16.mxu0 %v8583_v39 }
  0x72   :  { %7576 = vmatmul.mubr.bf16.gmra.mrb[16].mxu0 %v8888_v59  ;;  %v667_v59 = vrot.slane %v8907_v9, 1  ;;  %v978_v9 = vrot.slane %v8591_v8, 1 }
  0x73   :  { %7579 = vmatprep.mubr.bf16.mxu0 %v8902_v4  ;;  %v8592_v4 = vld [vmem:[%s11746_s0 + $0xc] sm:$0xff]  }
  0x74   :  { %v668_v3 = vsel %vm11753_vm1, %v665_v54, %v667_v59  ;;  %v979_v10 = vrot.slane %v8592_v4, 1  ;;  %v9119_v4 = vld [vmem:[%s11746_s0 + $0x24] sm:$0xff]  }
  0x75   :  { %v1353_v15 = vshll.u32 %v9119_v4, 16 }
  0x76   :  { %v980_v12 = vsel %vm11753_vm1, %v978_v9, %v979_v10  ;;  %v982_v16 = vsel %vm11753_vm1, %v979_v10, %v981_v14  ;;  %v1350_v14 = vshrl.u32 %v9119_v4, 16 }
  0x77   :  { %v1355_v23 = vrot.slane %v1353_v15, 2  ;;  %v8630_v15 = vld [vmem:[%s11745_s1 + $0x178] sm:$0xff]  }
  0x78   :  { %v1352_v22 = vrot.slane %v1350_v14, 1 }
  0x7a   :  { %7580 = vmatmul.mubr.bf16.gmra.mrb[24].mxu0 %v8580_v46  ;;  %v9076_v46 = vld [vmem:[%s11746_s0 + $0x8] sm:$0xf]  ;;  %v1356_v32 = vor.u32 %v1355_v23, %v1352_v22 }
  0x7b   :  { %7599 = vmatprep.mubr.bf16.mxu0 %v648_v47  ;;  %v994_v47 = vsel %vm11753_vm1, %v991_v34, %v993_v41 }
  0x82   :  { %7600 = vmatmul.mubr.bf16.vlgmr.msra.gmra.mrb[0].mxu0 %v650_v49 }
  0x83   :  { %7624 = vmatpush3.bf16.msra.mxu0 %v8583_v39  ;;  %7603 = vmatprep.mubr.bf16.mxu0 %v652_v7  ;;  %v8606_v39 = vld [vmem:[%s11746_s0 + $0x4c] sm:$0xff]   ;;  %v6709_v7 = vcombine.low %v1212_v44, %v9076_v46  ;;  %v8621_v44 = vld [vmem:[%s11745_s1 + $0x158] sm:$0xff]  }
  0x84   :  { %7625 = vmatprep.subr.bf16.mxu0 %v8584_v50  ;;  %v995_v42 = vrot.slane %v8606_v39, 1 }
  0x86   :  { %v996_v49 = vsel %vm11753_vm1, %v993_v41, %v995_v42 }
  0x87   :  { %7626 = vmatpush3.bf16.msra.mxu0 %v8584_v50  ;;  %v8610_v50 = vld [vmem:[%s11745_s1 + $0x138] sm:$0xff]  }
  0x88   :  { %7627 = vmatprep.subr.bf16.mxu0 %v8585_v17 }
  0x8a   :  { %7604 = vmatmul.mubr.bf16.gmra.mrb[4].mxu0 %v654_v52  ;;  %v1315_v52 = vshrl.u32 %v6709_v7, 16 }
  0x8b   :  { %7628 = vmatpush3.bf16.msra.mxu0 %v8585_v17  ;;  %7607 = vmatprep.mubr.bf16.mxu0 %v656_v53  ;;  %v997_v17 = vrot.slane %v8607_v48, 1  ;;  %v1318_v53 = vshll.u32 %v6709_v7, 16 }
  0x8c   :  { %7629 = vmatprep.subr.bf16.mxu0 %v8586_v55 }
  0x8d   :  { %v1320_v40 = vrot.slane %v1318_v53, 2  ;;  %v1398_v53 = vshll.u32 %v9166_v5, 16 }
  0x8f   :  { %7630 = vmatpush3.bf16.msra.mxu0 %v8586_v55  ;;  %v1323_v55 = vshrl.u32 %v9093_v51, 16 }
  0x90   :  { %7631 = vmatprep.subr.bf16.mxu0 %v8587_v31 }
  0x91   :  { %v1325_v45 = vrot.slane %v1323_v55, 1 }
  0x92   :  { %7608 = vmatmul.mubr.bf16.gmra.mrb[8].mxu0 %v658_v57  ;;  %v1000_v57 = vsel %vm11753_vm1, %v997_v17, %v999_v19 }
  0x93   :  { %7611 = vmatprep.mubr.bf16.mxu0 %v660_v58  ;;  %7632 = vmatpush3.bf16.msra.mxu0 %v8587_v31  ;;  %v998_v31 = vsel %vm11753_vm1, %v995_v42, %v997_v17  ;;  %v9105_v58 = vld [vmem:[%s11746_s0 + $0x14] sm:$0xff]   ;;  %v9157_v42 = vld [vmem:[%s11746_s0 + $0x44] sm:$0xff]  }
  0x94   :  { %7633 = vmatprep.subr.bf16.mxu0 %v8588_v60  ;;  %v1389_v7 = vshll.u32 %v9157_v42, 16 }
  0x97   :  { %7634 = vmatpush3.bf16.msra.mxu0 %v8588_v60  ;;  %v1317_v60 = vrot.slane %v1315_v52, 1  ;;  %v1395_v52 = vshrl.u32 %v9166_v5, 16 }
  0x98   :  { %7635 = vmatprep.subr.bf16.mxu0 %v8589_v61 }
  0x99   :  { %v1321_v54 = vor.u32 %v1320_v40, %v1317_v60  ;;  %v8625_v60 = vld [vmem:[%s11745_s1 + $0x168] sm:$0xff]   ;;  %v1397_v40 = vrot.slane %v1395_v52, 1  ;;  %v8643_v52 = vld [vmem:[%s11745_s1 + $0x1c0] sm:$0xff]  }
  0x9a   :  { %7612 = vmatmul.mubr.bf16.gmra.mrb[12].mxu0 %v662_v62  ;;  %v9110_v62 = vld [vmem:[%s11746_s0 + $0x1c] sm:$0xff]  }
  0x9b   :  { %7615 = vmatprep.mubr.bf16.mxu0 %v664_v63  ;;  %7636 = vmatpush3.bf16.msra.mxu0 %v8589_v61  ;;  %v1328_v61 = vrot.slane %v1326_v26, 2  ;;  %v1332_v63 = vshrl.u32 %v9105_v58, 16 }
  0x9c   :  { %7637 = vmatprep.subr.bf16.mxu0 %v8590_v0 }
  0x9f   :  { %7638 = vmatpush3.bf16.msra.mxu0 %v8590_v0  ;;  %v1335_v0 = vshll.u32 %v9105_v58, 16 }
  0xa0   :  { %7663 = vmatprep.subr.bf16.mxu0 %v8594_v1 }
  0xa1   :  { %v1337_v8 = vrot.slane %v1335_v0, 2 }
  0xa2   :  { %7616 = vmatmul.mubr.bf16.gmra.mrb[16].mxu0 %v666_v2  ;;  %v1344_v2 = vshll.u32 %v9110_v62, 16 }
  0xa3   :  { %7619 = vmatprep.mubr.bf16.mxu0 %v668_v3  ;;  %v1334_v3 = vrot.slane %v1332_v63, 1 }
  0xa4   :  { %v1346_v11 = vrot.slane %v1344_v2, 2 }
  0xa5   :  { %v1338_v13 = vor.u32 %v1337_v8, %v1334_v3 }
  0xaa   :  { %7620 = vmatmul.mubr.bf16.gmra.mrb[28].mxu0 %v667_v59  ;;  %v1329_v59 = vor.u32 %v1328_v61, %v1325_v45  ;;  %v1400_v45 = vrot.slane %v1398_v53, 2  ;;  %v9188_v61 = vld [vmem:[%s11746_s0 + $0x5c] sm:$0x1f]   ;;  %v1887_v53 = vld [vmem:[%s11746_s0 + $0x8] sm:$0xc] }
  0xab   :  { %7639 = vmatprep.mubr.bf16.mxu0 %v980_v12  ;;  %v9125_v12 = vld [vmem:[%s11746_s0 + $0x2c] sm:$0xff]   ;;  %v1413_v2 = vshrl.u32 %v9188_v61, 16  ;;  %v1416_v3 = vshll.u32 %v9188_v61, 16 }
  0xac   :  { %v1330_v9 = vsel %vm1313_vm2, %v1321_v54, %v1329_v59  ;;  %v1359_v18 = vshrl.u32 %v9125_v12, 16 }
  0xad   :  { %v1418_v14 = vrot.slane %v1416_v3, 2 }
  0xae   :  { %v1361_v28 = vrot.slane %v1359_v18, 1 }
  0xb2   :  { %7640 = vmatmul.mubr.bf16.vlgmr.msra.gmra.mrb[0].mxu0 %v982_v16 }
  0xb3   :  { %7664 = vmatpush3.bf16.msra.mxu0 %v8594_v1  ;;  %7643 = vmatprep.mubr.bf16.mxu0 %v984_v21  ;;  %v1341_v1 = vshrl.u32 %v9110_v62, 16  ;;  %v1339_v21 = vsel %vm1313_vm2, %v1329_v59, %v1338_v13  ;;  %v1401_v59 = vor.u32 %v1400_v45, %v1397_v40  ;;  %v9284_v45 = vld [vmem:[%s11746_s0 + $0x18] sm:$0xff]  }
  0xb4   :  { %7665 = vmatprep.subr.bf16.mxu0 %v8595_v20 }
  0xb5   :  { %v1343_v10 = vrot.slane %v1341_v1, 1  ;;  %v8628_v1 = vld [vmem:[%s11745_s1 + $0x170] sm:$0xff]  }
  0xb7   :  { %7666 = vmatpush3.bf16.msra.mxu0 %v8595_v20  ;;  %v1347_v16 = vor.u32 %v1346_v11, %v1343_v10  ;;  %v1362_v20 = vshll.u32 %v9125_v12, 16 }
  0xb8   :  { %7667 = vmatprep.subr.bf16.mxu0 %v8598_v24 }
  0xba   :  { %7644 = vmatmul.mubr.bf16.gmra.mrb[4].mxu0 %v986_v27  ;;  %v1348_v27 = vsel %vm1313_vm2, %v1338_v13, %v1347_v16  ;;  %v1415_v13 = vrot.slane %v1413_v2, 1  ;;  %v8644_v2 = vld [vmem:[%s11745_s1 + $0x1c8] sm:$0xff]  }
  0xbb   :  { %7668 = vmatpush3.bf16.msra.mxu0 %v8598_v24  ;;  %7647 = vmatprep.mubr.bf16.mxu0 %v988_v29  ;;  %v9135_v24 = vld [vmem:[%s11746_s0 + $0x34] sm:$0xff]   ;;  %v1364_v29 = vrot.slane %v1362_v20, 2  ;;  %v8632_v20 = vld [vmem:[%s11745_s1 + $0x180] sm:$0xff]  }
  0xbc   :  { %7669 = vmatprep.subr.bf16.mxu0 %v8601_v30  ;;  %v1368_v33 = vshrl.u32 %v9135_v24, 16  ;;  %v1371_v34 = vshll.u32 %v9135_v24, 16  ;;  %v1419_v18 = vor.u32 %v1418_v14, %v1415_v13  ;;  %v9318_v14 = vld [vmem:[%s11746_s0 + $0x38] sm:$0xff]  }
  0xbe   :  { %v1370_v39 = vrot.slane %v1368_v33, 1  ;;  %v1373_v41 = vrot.slane %v1371_v34, 2  ;;  %v1658_v33 = vrot.slane %v9110_v62, 2  ;;  %v1662_v62 = vrot.slane %v9125_v12, 2  ;;  %v8636_v12 = vld [vmem:[%s11745_s1 + $0x1a0] sm:$0xff]  }
  0xbf   :  { %7670 = vmatpush3.bf16.msra.mxu0 %v8601_v30  ;;  %v9144_v30 = vld [vmem:[%s11746_s0 + $0x3c] sm:$0xff]  }
  0xc0   :  { %7671 = vmatprep.subr.bf16.mxu0 %v8604_v6  ;;  %v1377_v36 = vshrl.u32 %v9144_v30, 16 }
  0xc2   :  { %7648 = vmatmul.mubr.bf16.gmra.mrb[8].mxu0 %v990_v35  ;;  %v1365_v35 = vor.u32 %v1364_v29, %v1361_v28  ;;  %v1654_v28 = vrot.slane %v9093_v51, 2  ;;  %v1660_v51 = vrot.slane %v9119_v4, 2  ;;  %v1664_v4 = vrot.slane %v9135_v24, 2  ;;  %v8637_v24 = vld [vmem:[%s11745_s1 + $0x1a8] sm:$0xff]  }
  0xc3   :  { %7651 = vmatprep.mubr.bf16.mxu0 %v992_v37  ;;  %7672 = vmatpush3.bf16.msra.mxu0 %v8604_v6  ;;  %v8618_v6 = vld [vmem:[%s11745_s1 + $0x150] sm:$0xff]   ;;  %v1380_v37 = vshll.u32 %v9144_v30, 16 }
  0xc4   :  { %7673 = vmatprep.subr.bf16.mxu0 %v8605_v38 }
  0xc5   :  { %v1382_v48 = vrot.slane %v1380_v37, 2  ;;  %v8635_v37 = vld [vmem:[%s11745_s1 + $0x198] sm:$0xff]  }
  0xc7   :  { %7674 = vmatpush3.bf16.msra.mxu0 %v8605_v38  ;;  %v1357_v38 = vsel %vm1313_vm2, %v1347_v16, %v1356_v32 }
  0xc8   :  { %7675 = vmatprep.subr.bf16.mxu0 %v8608_v43 }
  0xca   :  { %7652 = vmatmul.mubr.bf16.gmra.mrb[12].mxu0 %v994_v47  ;;  %v1379_v47 = vrot.slane %v1377_v36, 1  ;;  %v1663_v36 = vsel %vm11752_vm3, %v1660_v51, %v1662_v62 }
  0xcb   :  { %7655 = vmatprep.mubr.bf16.mxu0 %v996_v49  ;;  %7676 = vmatpush3.bf16.msra.mxu0 %v8608_v43  ;;  %v1366_v43 = vsel %vm1313_vm2, %v1356_v32, %v1365_v35  ;;  %v1374_v49 = vor.u32 %v1373_v41, %v1370_v39  ;;  %v1656_v32 = vrot.slane %v9105_v58, 2  ;;  %v8634_v58 = vld [vmem:[%s11745_s1 + $0x190] sm:$0xff]  }
  0xcc   :  { %7677 = vmatprep.subr.bf16.mxu0 %v8610_v50  ;;  %v1383_v17 = vor.u32 %v1382_v48, %v1379_v47 }
  0xcd   :  { %v1375_v55 = vsel %vm1313_vm2, %v1365_v35, %v1374_v49  ;;  %v1657_v34 = vsel %vm11752_vm3, %v1654_v28, %v1656_v32  ;;  %v1661_v35 = vsel %vm11752_vm3, %v1658_v33, %v1660_v51  ;;  %v9353_v51 = vld [vmem:[%s11746_s0 + $0x50] sm:$0xff]  }
  0xcf   :  { %7678 = vmatpush3.bf16.msra.mxu0 %v8610_v50  ;;  %v1386_v50 = vshrl.u32 %v9157_v42, 16 }
  0xd0   :  { %7703 = vmatprep.subr.bf16.mxu0 %v8614_v56 }
  0xd1   :  { %v1388_v26 = vrot.slane %v1386_v50, 1  ;;  %v8638_v50 = vld [vmem:[%s11745_s1 + $0x1b0] sm:$0xff]  }
  0xd2   :  { %7656 = vmatmul.mubr.bf16.gmra.mrb[16].mxu0 %v998_v31  ;;  %v9179_v31 = vld [vmem:[%s11746_s0 + $0x54] sm:$0xff]  }
  0xd3   :  { %7659 = vmatprep.mubr.bf16.mxu0 %v1000_v57  ;;  %v1384_v57 = vsel %vm1313_vm2, %v1374_v49, %v1383_v17  ;;  %v1404_v0 = vshrl.u32 %v9179_v31, 16  ;;  %v1407_v54 = vshll.u32 %v9179_v31, 16  ;;  %v1670_v49 = vrot.slane %v9166_v5, 2 }
  0xd4   :  { %v1674_v5 = vrot.slane %v9188_v61, 2 }
  0xd5   :  { %v1409_v10 = vrot.slane %v1407_v54, 2 }
  0xda   :  { %7660 = vmatmul.mubr.bf16.gmra.mrb[32].mxu0 %v999_v19  ;;  %v8624_v19 = vld [vmem:[%s11745_s1 + $0x160] sm:$0xff]  }
  0xdb   :  { %7679 = vmatprep.mubr.bf16.mxu0 %v1330_v9  ;;  %v1406_v9 = vrot.slane %v1404_v0, 1  ;;  %v1991_v0 = vrot.slane %v9284_v45, 2 }
  0xdd   :  { %v1410_v16 = vor.u32 %v1409_v10, %v1406_v9  ;;  %v8647_v10 = vld [vmem:[%s11745_s1 + $0x1d0] sm:$0xff]  }
  0xdf   :  { %v1411_v22 = vsel %vm1313_vm2, %v1401_v59, %v1410_v16  ;;  %v1420_v23 = vsel %vm1313_vm2, %v1410_v16, %v1419_v18  ;;  %v8650_v16 = vld [vmem:[%s11745_s1 + $0x1d8] sm:$0xff]  }
  0xe2   :  { %7680 = vmatmul.mubr.bf16.vlgmr.msra.gmra.mrb[0].mxu0 %v1339_v21  ;;  %v1632_v21 = vld [vmem:[%s11746_s0 + $0x4] sm:$0xc] }
  0xe3   :  { %7704 = vmatpush3.bf16.msra.mxu0 %v8614_v56  ;;  %7683 = vmatprep.mubr.bf16.mxu0 %v1348_v27  ;;  %v1391_v56 = vrot.slane %v1389_v7, 2 }
  0xe4   :  { %7705 = vmatprep.subr.bf16.mxu0 %v8615_v25 }
  0xe5   :  { %v1392_v63 = vor.u32 %v1391_v56, %v1388_v26 }
  0xe7   :  { %7706 = vmatpush3.bf16.msra.mxu0 %v8615_v25  ;;  %v1393_v8 = vsel %vm1313_vm2, %v1383_v17, %v1392_v63  ;;  %v1402_v11 = vsel %vm1313_vm2, %v1392_v63, %v1401_v59  ;;  %v6745_v25 = vcombine.low %v1632_v21, %v9076_v46  ;;  %v8633_v46 = vld [vmem:[%s11745_s1 + $0x188] sm:$0xff]   ;;  %v9290_v63 = vld [vmem:[%s11746_s0 + $0x20] sm:$0xff]  }
  0xe8   :  { %7707 = vmatprep.subr.bf16.mxu0 %v8618_v6  ;;  %v1993_v54 = vrot.slane %v9290_v63, 2 }
  0xe9   :  { %v1653_v27 = vrot.slane %v6745_v25, 2 }
  0xea   :  { %7684 = vmatmul.mubr.bf16.gmra.mrb[4].mxu0 %v1357_v38  ;;  %v1666_v38 = vrot.slane %v9144_v30, 2  ;;  %v1668_v30 = vrot.slane %v9157_v42, 2  ;;  %v1672_v42 = vrot.slane %v9179_v31, 2  ;;  %v1994_v3 = vsel %vm11752_vm3, %v1991_v0, %v1993_v54 }
  0xeb   :  { %7708 = vmatpush3.bf16.msra.mxu0 %v8618_v6  ;;  %7687 = vmatprep.mubr.bf16.mxu0 %v1366_v43  ;;  %v1655_v29 = vsel %vm11752_vm3, %v1653_v27, %v1654_v28  ;;  %v1659_v6 = vsel %vm11752_vm3, %v1656_v32, %v1658_v33  ;;  %v9344_v33 = vld [vmem:[%s11746_s0 + $0x48] sm:$0xff]  }
  0xec   :  { %7709 = vmatprep.subr.bf16.mxu0 %v8621_v44  ;;  %v1667_v48 = vsel %vm11752_vm3, %v1664_v4, %v1666_v38  ;;  %v1669_v7 = vsel %vm11752_vm3, %v1666_v38, %v1668_v30  ;;  %v1671_v17 = vsel %vm11752_vm3, %v1668_v30, %v1670_v49  ;;  %v1673_v26 = vsel %vm11752_vm3, %v1670_v49, %v1672_v42 }
  0xed   :  { %v1675_v56 = vsel %vm11752_vm3, %v1672_v42, %v1674_v5 }
  0xef   :  { %7710 = vmatpush3.bf16.msra.mxu0 %v8621_v44  ;;  %v1665_v44 = vsel %vm11752_vm3, %v1662_v62, %v1664_v4  ;;  %v2003_v62 = vrot.slane %v9344_v33, 2  ;;  %v1910_v4 = vld [vmem:[%s11746_s0 + $0x64] sm:$0x1] }
  0xf0   :  { %7711 = vmatprep.subr.bf16.mxu0 %v8624_v19 }
  0xf2   :  { %7688 = vmatmul.mubr.bf16.gmra.mrb[8].mxu0 %v1375_v55  ;;  %v9267_v55 = vld [vmem:[%s11746_s0 + $0xc] sm:$0xf] }
  0xf3   :  { %7691 = vmatprep.mubr.bf16.mxu0 %v1384_v57  ;;  %7712 = vmatpush3.bf16.msra.mxu0 %v8624_v19  ;;  %v8639_v19 = vld [vmem:[%s11745_s1 + $0x1b8] sm:$0xff]   ;;  %v9272_v31 = vcombine.low %v1887_v53, %v9267_v55  ;;  %v9277_v57 = vld [vmem:[%s11746_s0 + $0x10] sm:$0xff]   ;;  %v2261_v53 = vshrl.u32 %v9284_v45, 16 }
  0xf4   :  { %7713 = vmatprep.subr.bf16.mxu0 %v8625_v60  ;;  %v1989_v40 = vrot.slane %v9277_v57, 2  ;;  %v2252_v30 = vshrl.u32 %v9277_v57, 16  ;;  %v2255_v49 = vshll.u32 %v9277_v57, 16 }
  0xf6   :  { %v1992_v59 = vsel %vm11752_vm3, %v1989_v40, %v1991_v0 }
  0xf7   :  { %7714 = vmatpush3.bf16.msra.mxu0 %v8625_v60  ;;  %v1988_v60 = vrot.slane %v9272_v31, 2 }
  0xf8   :  { %7715 = vmatprep.subr.bf16.mxu0 %v8628_v1 }
  0xf9   :  { %v1990_v61 = vsel %vm11752_vm3, %v1988_v60, %v1989_v40  ;;  %v2270_v60 = vshrl.u32 %v9290_v63, 16  ;;  %v2273_v40 = vshll.u32 %v9290_v63, 16 }
  0xfa   :  { %7692 = vmatmul.mubr.bf16.gmra.mrb[12].mxu0 %v1393_v8  ;;  %v9307_v8 = vld [vmem:[%s11746_s0 + $0x30] sm:$0xff]  }
  0xfb   :  { %7695 = vmatprep.mubr.bf16.mxu0 %v1402_v11  ;;  %7716 = vmatpush3.bf16.msra.mxu0 %v8628_v1  ;;  %v9298_v1 = vld [vmem:[%s11746_s0 + $0x28] sm:$0xff]   ;;  %v1997_v11 = vrot.slane %v9307_v8, 2 }
  0xfc   :  { %7717 = vmatprep.subr.bf16.mxu0 %v8630_v15  ;;  %v1995_v9 = vrot.slane %v9298_v1, 2 }
  0xfe   :  { %v1996_v13 = vsel %vm11752_vm3, %v1993_v54, %v1995_v9 }
  0xff   :  { %7718 = vmatpush3.bf16.msra.mxu0 %v8630_v15  ;;  %v1998_v15 = vsel %vm11752_vm3, %v1995_v9, %v1997_v11  ;;  %v2279_v9 = vshrl.u32 %v9298_v1, 16 }
 0x100   :  { %7743 = vmatprep.subr.bf16.mxu0 %v8632_v20 }
 0x102   :  { %7696 = vmatmul.mubr.bf16.gmra.mrb[16].mxu0 %v1411_v22  ;;  %v8653_v22 = vld [vmem:[%s11745_s1 + $0x1e0] sm:$0xff]  }
 0x103   :  { %7699 = vmatprep.mubr.bf16.mxu0 %v1420_v23 }
 0x10a   :  { %7700 = vmatmul.mubr.bf16.gmra.mrb[36].mxu0 %v1419_v18  ;;  %v9327_v18 = vld [vmem:[%s11746_s0 + $0x40] sm:$0xff]  }
 0x10b   :  { %7719 = vmatprep.mubr.bf16.mxu0 %v1655_v29  ;;  %v2001_v21 = vrot.slane %v9327_v18, 2 }
 0x10d   :  { %v2004_v38 = vsel %vm11752_vm3, %v2001_v21, %v2003_v62 }
 0x112   :  { %7720 = vmatmul.mubr.bf16.vlgmr.msra.gmra.mrb[0].mxu0 %v1657_v34 }
 0x113   :  { %7744 = vmatpush3.bf16.msra.mxu0 %v8632_v20  ;;  %7723 = vmatprep.mubr.bf16.mxu0 %v1659_v6  ;;  %v1999_v20 = vrot.slane %v9318_v14, 2  ;;  %v8654_v6 = vld [vmem:[%s11745_s1 + $0x1e8] sm:$0xff]  }
 0x114   :  { %7745 = vmatprep.subr.bf16.mxu0 %v8633_v46 }
 0x115   :  { %v2000_v32 = vsel %vm11752_vm3, %v1997_v11, %v1999_v20 }
 0x117   :  { %7746 = vmatpush3.bf16.msra.mxu0 %v8633_v46  ;;  %v2002_v46 = vsel %vm11752_vm3, %v1999_v20, %v2001_v21  ;;  %v2281_v20 = vrot.slane %v2279_v9, 2 }
 0x118   :  { %7747 = vmatprep.subr.bf16.mxu0 %v8634_v58 }
 0x11a   :  { %7724 = vmatmul.mubr.bf16.gmra.mrb[4].mxu0 %v1661_v35  ;;  %v2005_v35 = vrot.slane %v9353_v51, 2 }
 0x11b   :  { %7748 = vmatpush3.bf16.msra.mxu0 %v8634_v58  ;;  %7727 = vmatprep.mubr.bf16.mxu0 %v1663_v36  ;;  %v8657_v36 = vld [vmem:[%s11745_s1 + $0x1f0] sm:$0xff]  }
 0x11c   :  { %7749 = vmatprep.subr.bf16.mxu0 %v8635_v37 }
 0x11d   :  { %v9235_v39 = vpop.f32.mrb[20].mxu0 }
 0x11e   :  { %v9237_v41 = vpop.f32.mrb[21].mxu0 }
 0x11f   :  { %v7542_v43 = vpop.f32.mrb[22].mxu0  ;;  %7750 = vmatpush3.bf16.msra.mxu0 %v8635_v37  ;;  %v9366_v37 = vld [vmem:[%s11746_s0 + $0x60] sm:$0xf] }
 0x120   :  { %v9240_v47 = vpop.f32.mrb[23].mxu0  ;;  %7751 = vmatprep.subr.bf16.mxu0 %v8636_v12  ;;  %v8660_v43 = vld [vmem:[%s11745_s1 + $0x1f8] sm:$0xff]  }
 0x122   :  { %7728 = vmatmul.mubr.bf16.gmra.mrb[8].mxu0 %v1665_v44 }
 0x123   :  { %7731 = vmatprep.mubr.bf16.mxu0 %v1667_v48  ;;  %7752 = vmatpush3.bf16.msra.mxu0 %v8636_v12  ;;  %v9375_v12 = vld [vmem:[%s11746_s0 + $0x58] sm:$0xff]   ;;  %v2244_v48 = vshrl.u32 %v9272_v31, 16 }
 0x124   :  { %7753 = vmatprep.subr.bf16.mxu0 %v8637_v24  ;;  %v2007_v44 = vrot.slane %v9375_v12, 2 }
 0x127   :  { %7754 = vmatpush3.bf16.msra.mxu0 %v8637_v24  ;;  %v2247_v24 = vshll.u32 %v9272_v31, 16 }
 0x128   :  { %7755 = vmatprep.subr.bf16.mxu0 %v8638_v50 }
 0x129   :  { %v2249_v42 = vrot.slane %v2247_v24, 3  ;;  %v2315_v24 = vshrl.u32 %v9344_v33, 16 }
 0x12a   :  { %7732 = vmatmul.mubr.bf16.gmra.mrb[12].mxu0 %v1669_v7  ;;  %v2008_v7 = vsel %vm11752_vm3, %v2005_v35, %v2007_v44 }
 0x12b   :  { %7735 = vmatprep.mubr.bf16.mxu0 %v1671_v17  ;;  %7756 = vmatpush3.bf16.msra.mxu0 %v8638_v50  ;;  %v8661_v50 = vld [vmem:[%s11745_s1 + $0x200] sm:$0xff]  }
 0x12c   :  { %7757 = vmatprep.subr.bf16.mxu0 %v8639_v19 }
 0x12f   :  { %7758 = vmatpush3.bf16.msra.mxu0 %v8639_v19  ;;  %v2246_v19 = vrot.slane %v2244_v48, 2 }
 0x130   :  { %7783 = vmatprep.subr.bf16.mxu0 %v8643_v52 }
 0x132   :  { %7736 = vmatmul.mubr.bf16.gmra.mrb[16].mxu0 %v1673_v26  ;;  %v2264_v26 = vshll.u32 %v9284_v45, 16 }
 0x133   :  { %7739 = vmatprep.mubr.bf16.mxu0 %v1675_v56  ;;  %v2250_v56 = vor.u32 %v2249_v42, %v2246_v19  ;;  %v2222_v19 = vld [vmem:[%s11746_s0 + $0x64] sm:$0x3] }
 0x134   :  { %v2266_v0 = vrot.slane %v2264_v26, 3 }
 0x13a   :  { %7740 = vmatmul.mubr.bf16.gmra.mrb[40].mxu0 %v1674_v5  ;;  %v2254_v5 = vrot.slane %v2252_v30, 2  ;;  %v2318_v30 = vshll.u32 %v9344_v33, 16 }
 0x13b   :  { %7759 = vmatprep.mubr.bf16.mxu0 %v1990_v61  ;;  %v2263_v61 = vrot.slane %v2261_v53, 2 }
 0x142   :  { %7760 = vmatmul.mubr.bf16.vlgmr.msra.gmra.mrb[0].mxu0 %v1992_v59  ;;  %v2272_v59 = vrot.slane %v2270_v60, 2  ;;  %v2320_v60 = vrot.slane %v2318_v30, 3 }
 0x143   :  { %7784 = vmatpush3.bf16.msra.mxu0 %v8643_v52  ;;  %7763 = vmatprep.mubr.bf16.mxu0 %v1994_v3  ;;  %v2257_v52 = vrot.slane %v2255_v49, 3  ;;  %v2267_v3 = vor.u32 %v2266_v0, %v2263_v61 }
 0x144   :  { %7785 = vmatprep.subr.bf16.mxu0 %v8644_v2 }
 0x145   :  { %v2258_v31 = vor.u32 %v2257_v52, %v2254_v5 }
 0x147   :  { %7786 = vmatpush3.bf16.msra.mxu0 %v8644_v2  ;;  %v2259_v54 = vsel %vm11755_vm4, %v2250_v56, %v2258_v31  ;;  %v2275_v2 = vrot.slane %v2273_v40, 3  ;;  %v9436_v40 = vcombine.low %v9366_v37, %v2222_v19 }
 0x148   :  { %7787 = vmatprep.subr.bf16.mxu0 %v8647_v10 }
 0x149   :  { %v2276_v11 = vor.u32 %v2275_v2, %v2272_v59 }
 0x14a   :  { %7764 = vmatmul.mubr.bf16.gmra.mrb[4].mxu0 %v1996_v13  ;;  %v2288_v13 = vshrl.u32 %v9307_v8, 16 }
 0x14b   :  { %7788 = vmatpush3.bf16.msra.mxu0 %v8647_v10  ;;  %7767 = vmatprep.mubr.bf16.mxu0 %v1998_v15  ;;  %v2282_v10 = vshll.u32 %v9298_v1, 16  ;;  %v2291_v15 = vshll.u32 %v9307_v8, 16 }
 0x14c   :  { %7789 = vmatprep.subr.bf16.mxu0 %v8650_v16 }
 0x14d   :  { %v7581_v23 = vpop.f32.mrb[24].mxu0  ;;  %v2284_v21 = vrot.slane %v2282_v10, 3  ;;  %v8667_v10 = vld [vmem:[%s11745_s1 + $0x230] sm:$0xff]  }
 0x14e   :  { %v9335_v25 = vadd.f32 %v7581_v23, %v9235_v39  ;;  %v610_v27 = vpop.f32.mrb[25].mxu0  ;;  %v6781_v39 = vcombine.low %v9366_v37, %v1910_v4  ;;  %v2277_v23 = vsel %vm11755_vm4, %v2267_v3, %v2276_v11  ;;  %v2333_v37 = vshrl.u32 %v9375_v12, 16 }
 0x14f   :  { %v9338_v28 = vadd.f32 %v610_v27, %v9237_v41  ;;  %v7582_v29 = vpop.f32.mrb[26].mxu0  ;;  %7790 = vmatpush3.bf16.msra.mxu0 %v8650_v16  ;;  %v2006_v41 = vsel %vm11752_vm3, %v2003_v62, %v2005_v35  ;;  %v2268_v16 = vsel %vm11755_vm4, %v2258_v31, %v2267_v3  ;;  %v2290_v27 = vrot.slane %v2288_v13, 2 }
 0x150   :  { %v613_v34 = vpop.f32.mrb[27].mxu0  ;;  %7791 = vmatprep.subr.bf16.mxu0 %v8653_v22  ;;  %v2293_v29 = vrot.slane %v2291_v15, 3  ;;  %v2306_v35 = vshrl.u32 %v9327_v18, 16  ;;  %v2317_v31 = vrot.slane %v2315_v24, 2  ;;  %v2336_v3 = vshll.u32 %v9375_v12, 16 }
 0x151   :  { %v9356_v58 = vadd.f32 %v613_v34, %v9240_v47  ;;  %v2009_v47 = vrot.slane %v6781_v39, 2  ;;  %v2297_v34 = vshrl.u32 %v9318_v14, 16  ;;  %v2345_v13 = vshll.u32 %v9436_v40, 16 }
 0x152   :  { %7768 = vmatmul.mubr.bf16.gmra.mrb[8].mxu0 %v2000_v32  ;;  %v2285_v32 = vor.u32 %v2284_v21, %v2281_v20  ;;  %v2294_v62 = vor.u32 %v2293_v29, %v2290_v27  ;;  %v2321_v2 = vor.u32 %v2320_v60, %v2317_v31  ;;  %v2335_v15 = vrot.slane %v2333_v37, 2 }
 0x153   :  { %7771 = vmatprep.mubr.bf16.mxu0 %v2002_v46  ;;  %7792 = vmatpush3.bf16.msra.mxu0 %v8653_v22  ;;  %v2010_v17 = vsel %vm11752_vm3, %v2007_v44, %v2009_v47  ;;  %v8662_v22 = vld [vmem:[%s11745_s1 + $0x208] sm:$0xff]   ;;  %v2300_v46 = vshll.u32 %v9318_v14, 16  ;;  %v2308_v44 = vrot.slane %v2306_v35, 2  ;;  %v2584_v35 = vrot.slane %v9277_v57, 3 }
 0x154   :  { %7793 = vmatprep.subr.bf16.mxu0 %v8654_v6  ;;  %v2286_v4 = vsel %vm11755_vm4, %v2276_v11, %v2285_v32  ;;  %v2342_v11 = vshrl.u32 %v9436_v40, 16 }
 0x155   :  { %v2302_v39 = vrot.slane %v2300_v46, 3 }
 0x156   :  { %v2344_v21 = vrot.slane %v2342_v11, 2 }
 0x157   :  { %7794 = vmatpush3.bf16.msra.mxu0 %v8654_v6  ;;  %v8663_v6 = vld [vmem:[%s11745_s1 + $0x210] sm:$0xff]  }
 0x158   :  { %7795 = vmatprep.subr.bf16.mxu0 %v8657_v36 }
 0x15a   :  { %7772 = vmatmul.mubr.bf16.gmra.mrb[12].mxu0 %v2004_v38  ;;  %v2299_v38 = vrot.slane %v2297_v34, 2 }
 0x15b   :  { %7775 = vmatprep.mubr.bf16.mxu0 %v2006_v41  ;;  %7796 = vmatpush3.bf16.msra.mxu0 %v8657_v36  ;;  %v2309_v36 = vshll.u32 %v9327_v18, 16  ;;  %v2295_v41 = vsel %vm11755_vm4, %v2285_v32, %v2294_v62  ;;  %v2561_v32 = vld [vmem:[%s11746_s0 + $0x8] sm:$0x8] }
 0x15c   :  { %7797 = vmatprep.subr.bf16.mxu0 %v8660_v43  ;;  %v2303_v48 = vor.u32 %v2302_v39, %v2299_v38  ;;  %v2588_v38 = vrot.slane %v9290_v63, 3  ;;  %v2596_v63 = vrot.slane %v9327_v18, 3  ;;  %v2600_v18 = vrot.slane %v9353_v51, 3 }
 0x15e   :  { %v2304_v56 = vsel %vm11755_vm4, %v2294_v62, %v2303_v48 }
 0x15f   :  { %7798 = vmatpush3.bf16.msra.mxu0 %v8660_v43  ;;  %v8664_v43 = vld [vmem:[%s11745_s1 + $0x218] sm:$0xff]  }
 0x160   :  { %7823 = vmatprep.subr.bf16.mxu0 %v8661_v50 }
 0x162   :  { %7776 = vmatmul.mubr.bf16.gmra.mrb[16].mxu0 %v2008_v7  ;;  %v2324_v7 = vshrl.u32 %v9353_v51, 16 }
 0x163   :  { %7779 = vmatprep.mubr.bf16.mxu0 %v2010_v17  ;;  %v2327_v17 = vshll.u32 %v9353_v51, 16 }
 0x16a   :  { %7780 = vmatmul.mubr.bf16.gmra.mrb[44].mxu0 %v2009_v47  ;;  %v2311_v47 = vrot.slane %v2309_v36, 3 }
 0x16b   :  { %7799 = vmatprep.mubr.bf16.mxu0 %v2259_v54  ;;  %v2326_v54 = vrot.slane %v2324_v7, 2 }
 0x16c   :  { %v2312_v49 = vor.u32 %v2311_v47, %v2308_v44 }
 0x16e   :  { %v2313_v0 = vsel %vm11755_vm4, %v2303_v48, %v2312_v49 }
 0x172   :  { %7800 = vmatmul.mubr.bf16.vlgmr.msra.gmra.mrb[0].mxu0 %v2268_v16  ;;  %v2338_v16 = vrot.slane %v2336_v3, 3 }
 0x173   :  { %7824 = vmatpush3.bf16.msra.mxu0 %v8661_v50  ;;  %7803 = vmatprep.mubr.bf16.mxu0 %v2277_v23  ;;  %v8665_v50 = vld [vmem:[%s11745_s1 + $0x220] sm:$0xff]   ;;  %v8668_v23 = vld [vmem:[%s11745_s1 + $0x238] sm:$0xff]  }
 0x174   :  { %7825 = vmatprep.subr.bf16.mxu0 %v8662_v22  ;;  %v2339_v27 = vor.u32 %v2338_v16, %v2335_v15 }
 0x177   :  { %7826 = vmatpush3.bf16.msra.mxu0 %v8662_v22  ;;  %v2347_v22 = vrot.slane %v2345_v13, 3  ;;  %v8673_v13 = vld [vmem:[%s11747_s3 + $0x58] sm:$0xff]  }
 0x178   :  { %7827 = vmatprep.subr.bf16.mxu0 %v8663_v6 }
 0x179   :  { %v2348_v29 = vor.u32 %v2347_v22, %v2344_v21  ;;  %v8674_v21 = vld [vmem:[%s11747_s3 + $0x60] sm:$0xff]  }
 0x17a   :  { %7804 = vmatmul.mubr.bf16.gmra.mrb[4].mxu0 %v2286_v4  ;;  %v2586_v4 = vrot.slane %v9284_v45, 3  ;;  %v2594_v45 = vrot.slane %v9318_v14, 3  ;;  %v2598_v14 = vrot.slane %v9344_v33, 3 }
 0x17b   :  { %7828 = vmatpush3.bf16.msra.mxu0 %v8663_v6  ;;  %7807 = vmatprep.mubr.bf16.mxu0 %v2295_v41  ;;  %v2349_v46 = vsel %vm11755_vm4, %v2339_v27, %v2348_v29  ;;  %v6831_v6 = vcombine.low %v2561_v32, %v9267_v55  ;;  %v2590_v55 = vrot.slane %v9298_v1, 3  ;;  %v8675_v32 = vld [vmem:[%s11747_s3 + $0x68] sm:$0xff]  }
 0x17c   :  { %7829 = vmatprep.subr.bf16.mxu0 %v8664_v43  ;;  %v2587_v39 = vsel %vm11751_vm5, %v2584_v35, %v2586_v4  ;;  %v2589_v41 = vsel %vm11751_vm5, %v2586_v4, %v2588_v38  ;;  %v2601_v19 = vsel %vm11751_vm5, %v2598_v14, %v2600_v18 }
 0x17d   :  { %v7621_v42 = vpop.f32.mrb[28].mxu0  ;;  %v2583_v62 = vrot.slane %v6831_v6, 3  ;;  %v2591_v57 = vsel %vm11751_vm5, %v2588_v38, %v2590_v55 }
 0x17e   :  { %v9429_v5 = vadd.f32 %v7621_v42, %v9335_v25  ;;  %v843_v52 = vpop.f32.mrb[29].mxu0  ;;  %v8666_v25 = vld [vmem:[%s11745_s1 + $0x228] sm:$0xff]   ;;  %v2602_v42 = vrot.slane %v9375_v12, 3  ;;  %v8670_v12 = vld [vmem:[%s11747_s3 + $0x40] sm:$0xff]  }
 0x17f   :  { %v9432_v53 = vadd.f32 %v843_v52, %v9338_v28  ;;  %v7622_v26 = vpop.f32.mrb[30].mxu0  ;;  %7830 = vmatpush3.bf16.msra.mxu0 %v8664_v43  ;;  %v2329_v28 = vrot.slane %v2327_v17, 3  ;;  %v2585_v36 = vsel %vm11751_vm5, %v2583_v62, %v2584_v35  ;;  %v2592_v43 = vrot.slane %v9307_v8, 3  ;;  %7863 = vmatprep.subr.bf16.mxu1 %v8670_v12 }
 0x180   :  { %v846_v61 = vpop.f32.mrb[31].mxu0  ;;  %7831 = vmatprep.subr.bf16.mxu0 %v8665_v50  ;;  %v2599_v17 = vsel %vm11751_vm5, %v2596_v63, %v2598_v14  ;;  %v2603_v52 = vsel %vm11751_vm5, %v2600_v18, %v2602_v42  ;;  %7864 = vmatpush3.bf16.msra.mxu1 %v8670_v12 }
 0x181   :  { %v9443_v59 = vadd.f32 %v846_v61, %v9356_v58  ;;  %v2330_v9 = vor.u32 %v2329_v28, %v2326_v54  ;;  %v2322_v58 = vsel %vm11755_vm4, %v2312_v49, %v2321_v2  ;;  %v2593_v44 = vsel %vm11751_vm5, %v2590_v55, %v2592_v43  ;;  %v8671_v54 = vld [vmem:[%s11747_s3 + $0x48] sm:$0xff]   ;;  %v24_v28 = vld [vmem:[#allocation2] sm:$0x3f] }
 0x182   :  { %7808 = vmatmul.mubr.bf16.gmra.mrb[8].mxu0 %v2304_v56  ;;  %v2595_v1 = vsel %vm11751_vm5, %v2592_v43, %v2594_v45  ;;  %7865 = vmatprep.subr.bf16.mxu1 %v8671_v54  ;;  %v25_v3 = vsel %vm23_vm6, 0, %v24_v28 }
 0x183   :  { %7811 = vmatprep.mubr.bf16.mxu0 %v2313_v0  ;;  %7832 = vmatpush3.bf16.msra.mxu0 %v8665_v50  ;;  %v2331_v20 = vsel %vm11755_vm4, %v2321_v2, %v2330_v9  ;;  %v2340_v34 = vsel %vm11755_vm4, %v2330_v9, %v2339_v27  ;;  %v2597_v50 = vsel %vm11751_vm5, %v2594_v45, %v2596_v63  ;;  %v2869_v0 = vlaneseq  ;;  %v8672_v2 = vld [vmem:[%s11747_s3 + $0x50] sm:$0xff]  }
 0x184   :  { %7833 = vmatprep.subr.bf16.mxu0 %v8666_v25  ;;  %7866 = vmatpush3.bf16.msra.mxu1 %v8671_v54  ;;  %26 = vst [vmem:[#allocation2] sm:$0x3f] %v25_v3 }
 0x185   :  { %7867 = vmatprep.subr.bf16.mxu1 %v8672_v2 }
 0x187   :  { %7834 = vmatpush3.bf16.msra.mxu0 %v8666_v25  ;;  %v9488_v25 = vshrl.u32 %v2869_v0, 7 }
 0x188   :  { %7835 = vmatprep.subr.bf16.mxu0 %v8667_v10  ;;  %7868 = vmatpush3.bf16.msra.mxu1 %v8672_v2 }
 0x189   :  { %v2873_v37 = vadd.s32 24, %v9488_v25  ;;  %v2871_v9 = vadd.s32 8, %v9488_v25  ;;  %7869 = vmatprep.subr.bf16.mxu1 %v8673_v13  ;;  %v2876_v6 = vadd.s32 48, %v9488_v25  ;;  %v2874_v38 = vadd.s32 32, %v9488_v25 }
 0x18a   :  { %7812 = vmatmul.mubr.bf16.gmra.mrb[12].mxu0 %v2322_v58  ;;  %v2881_v0 = vadd.s32 88, %v9488_v25  ;;  %v2879_v54 = vadd.s32 72, %v9488_v25 }
 0x18b   :  { %7815 = vmatprep.mubr.bf16.mxu0 %v2331_v20  ;;  %7836 = vmatpush3.bf16.msra.mxu0 %v8667_v10  ;;  %v2893_v10 = vadd.s32 11, %v9488_v25  ;;  %v9508_v58 = vadd.s32 11, %v2873_v37  ;;  %v9510_v15 = vadd.s32 11, %v2871_v9  ;;  %v9529_v63 = vadd.s32 11, %v2876_v6 }
 0x18c   :  { %7837 = vmatprep.subr.bf16.mxu0 %v8668_v23  ;;  %7870 = vmatpush3.bf16.msra.mxu1 %v8673_v13 }
 0x18d   :  { %v2916_v16 = vcvt.s32.f32 %v2893_v10  ;;  %v2919_v22 = vcvt.s32.f32 %v9508_v58  ;;  %7871 = vmatprep.subr.bf16.mxu1 %v8674_v21 }
 0x18f   :  { %7838 = vmatpush3.bf16.msra.mxu0 %v8668_v23  ;;  %v2917_v23 = vcvt.s32.f32 %v9510_v15  ;;  %v2939_v27 = vadd.f32 0.5, %v2916_v16  ;;  %v2884_v15 = vadd.s32 112, %v9488_v25 }
 0x190   :  { %7872 = vmatpush3.bf16.msra.mxu1 %v8674_v21 }
 0x191   :  { %7873 = vmatprep.subr.bf16.mxu1 %v8675_v32  ;;  %v2962_v35 = vmul.f32 0.009615385, %v2939_v27 }
 0x192   :  { %7816 = vmatmul.mubr.bf16.gmra.mrb[16].mxu0 %v2340_v34  ;;  %v2942_v34 = vadd.f32 0.5, %v2919_v22 }
 0x193   :  { %7819 = vmatprep.mubr.bf16.mxu0 %v2349_v46  ;;  %v2940_v46 = vadd.f32 0.5, %v2917_v23 }
 0x194   :  { %7874 = vmatpush3.bf16.msra.mxu1 %v8675_v32 }
 0x195   :  { %v2963_v45 = vmul.f32 0.009615385, %v2940_v46 }
 0x197   :  { %v2986_v18 = vfloor.f32 %v2963_v45 }
 0x19a   :  { %7820 = vmatmul.mubr.bf16.gmra.mrb[48].mxu0 %v2348_v29 }
 0x19b   :  { %7839 = vmatprep.mubr.bf16.mxu0 %v2585_v36 }
 0x1a2   :  { %7840 = vmatmul.mubr.bf16.vlgmr.msra.gmra.mrb[0].mxu0 %v2587_v39  ;;  %v8676_v39 = vld [vmem:[%s11747_s3 + $0x70] sm:$0xff]  }
 0x1a3   :  { %7843 = vmatprep.mubr.bf16.mxu0 %v2589_v41  ;;  %7875 = vmatprep.subr.bf16.mxu1 %v8676_v39 }
 0x1a4   :  { %7876 = vmatpush3.bf16.msra.mxu1 %v8676_v39  ;;  %v2885_v39 = vadd.s32 120, %v9488_v25 }
 0x1aa   :  { %7844 = vmatmul.mubr.bf16.gmra.mrb[4].mxu0 %v2591_v57  ;;  %v2965_v57 = vmul.f32 0.009615385, %v2942_v34 }
 0x1ab   :  { %7847 = vmatprep.mubr.bf16.mxu0 %v2593_v44 }
 0x1ad   :  { %v7661_v47 = vpop.f32.mrb[32].mxu0 }
 0x1ae   :  { %v1211_v48 = vadd.f32 %v7661_v47, %v9429_v5  ;;  %v1175_v24 = vpop.f32.mrb[33].mxu0  ;;  %v2604_v5 = vrot.slane %v9436_v40, 3  ;;  %v2872_v40 = vadd.s32 16, %v9488_v25  ;;  %v2877_v47 = vadd.s32 56, %v9488_v25 }
 0x1af   :  { %v1209_v30 = vadd.f32 %v1175_v24, %v9432_v53  ;;  %v7662_v49 = vpop.f32.mrb[34].mxu0  ;;  %v2985_v24 = vfloor.f32 %v2962_v35  ;;  %v9586_v35 = vadd.s32 11, %v2884_v15  ;;  %v8743_v15 = vmov 0  }
 0x1b0   :  { %v1178_v8 = vpop.f32.mrb[35].mxu0  ;;  %v2605_v53 = vsel %vm11751_vm5, %v2602_v42, %v2604_v5  ;;  %v9538_v14 = vadd.s32 11, %v2877_v47  ;;  %3531 = vst [vmem:[%s11748_s5] sm:$0xf] %v8743_v15  ;;  %3543 = vst [vmem:[%s11748_s5 + $0x64] sm:$0xf] %v8743_v15 }
 0x1b1   :  { %v1210_v7 = vadd.f32 %v1178_v8, %v9443_v59  ;;  %v2895_v59 = vadd.s32 11, %v2872_v40  ;;  %v2988_v8 = vfloor.f32 %v2965_v57 }
 0x1b2   :  { %7848 = vmatmul.mubr.bf16.gmra.mrb[8].mxu0 %v2595_v1  ;;  %v2875_v1 = vadd.s32 40, %v9488_v25 }
 0x1b3   :  { %7851 = vmatprep.mubr.bf16.mxu0 %v2597_v50  ;;  %v2918_v11 = vcvt.s32.f32 %v2895_v59  ;;  %v3008_v50 = vmul.f32 104.0, %v2985_v24 }
 0x1b5   :  { %v2941_v20 = vadd.f32 0.5, %v2918_v11 }
 0x1b7   :  { %v2964_v29 = vmul.f32 0.009615385, %v2941_v20  ;;  %v9578_v20 = vadd.s32 11, %v2879_v54 }
 0x1b9   :  { %v2987_v43 = vfloor.f32 %v2964_v29 }
 0x1ba   :  { %7852 = vmatmul.mubr.bf16.gmra.mrb[12].mxu0 %v2599_v17 }
 0x1bb   :  { %7855 = vmatprep.mubr.bf16.mxu0 %v2601_v19  ;;  %v3010_v49 = vmul.f32 104.0, %v2987_v43  ;;  %v2880_v19 = vadd.s32 80, %v9488_v25 }
 0x1bd   :  { %v9542_v42 = vsub.f32 %v2918_v11, %v3010_v49  ;;  %v9573_v11 = vadd.s32 11, %v2881_v0 }
 0x1bf   :  { %v3056_v12 = vadd.f32 0.5, %v9542_v42  ;;  %v2927_v46 = vcvt.s32.f32 %v9573_v11 }
 0x1c1   :  { %v2950_v49 = vadd.f32 0.5, %v2927_v46 }
 0x1c2   :  { %7856 = vmatmul.mubr.bf16.gmra.mrb[16].mxu0 %v2603_v52  ;;  %v8677_v52 = vld [vmem:[%s11747_s3 + $0x78] sm:$0xff]  }
 0x1c3   :  { %7859 = vmatprep.mubr.bf16.mxu0 %v2605_v53  ;;  %v3011_v53 = vmul.f32 104.0, %v2988_v8  ;;  %7877 = vmatprep.subr.bf16.mxu1 %v8677_v52  ;;  %v2973_v54 = vmul.f32 0.009615385, %v2950_v49 }
 0x1c4   :  { %7878 = vmatpush3.bf16.msra.mxu1 %v8677_v52 }
 0x1c5   :  { %v9563_v28 = vsub.f32 %v2919_v22, %v3011_v53  ;;  %v9604_v53 = vadd.s32 11, %v2885_v39 }
 0x1c7   :  { %v3057_v21 = vadd.f32 0.5, %v9563_v28 }
 0x1c9   :  { %v3080_v43 = vmul.f32 0.1, %v3057_v21 }
 0x1ca   :  { %7860 = vmatmul.mubr.bf16.gmra.mrb[52].mxu0 %v2604_v5  ;;  %v9544_v5 = vadd.s32 11, %v2875_v1 }
 0x1cc   :  { %v2921_v40 = vcvt.s32.f32 %v9544_v5  ;;  %v2886_v5 = vadd.s32 128, %v9488_v25 }
 0x1ce   :  { %v2944_v58 = vadd.f32 0.5, %v2921_v40 }
 0x1dd   :  { %v7701_v33 = vpop.f32.mrb[36].mxu0 }
 0x1de   :  { %v1631_v26 = vadd.f32 %v7701_v33, %v1211_v48  ;;  %v1595_v51 = vpop.f32.mrb[37].mxu0  ;;  %v9549_v33 = vsub.f32 %v2916_v16, %v3008_v50  ;;  %v3079_v16 = vmul.f32 0.1, %v3056_v12  ;;  %v2930_v50 = vcvt.s32.f32 %v9586_v35 }
 0x1df   :  { %v1629_v56 = vadd.f32 %v1595_v51, %v1209_v30  ;;  %v7702_v31 = vpop.f32.mrb[38].mxu0  ;;  %v9534_v30 = vadd.s32 11, %v2874_v38  ;;  %v2923_v51 = vcvt.s32.f32 %v9538_v14  ;;  %v2925_v38 = vcvt.s32.f32 %v9578_v20 }
 0x1e0   :  { %v1598_v60 = vpop.f32.mrb[39].mxu0  ;;  %v3009_v31 = vmul.f32 104.0, %v2986_v18  ;;  %v3054_v3 = vadd.f32 0.5, %v9549_v33 }
 0x1e1   :  { %v1630_v61 = vadd.f32 %v1598_v60, %v1210_v7  ;;  %v2922_v7 = vcvt.s32.f32 %v9529_v63  ;;  %v2920_v17 = vcvt.s32.f32 %v9534_v30  ;;  %v2946_v2 = vadd.f32 0.5, %v2923_v51 }
 0x1e2   :  { %v9570_v9 = vsub.f32 %v2917_v23, %v3009_v31  ;;  %v3077_v29 = vmul.f32 0.1, %v3054_v3  ;;  %v2948_v52 = vadd.f32 0.5, %v2925_v38  ;;  %v2953_v3 = vadd.f32 0.5, %v2930_v50 }
 0x1e3   :  { %v2943_v60 = vadd.f32 0.5, %v2920_v17  ;;  %v2969_v27 = vmul.f32 0.009615385, %v2946_v2 }
 0x1e4   :  { %v3055_v32 = vadd.f32 0.5, %v9570_v9  ;;  %v9595_v45 = vfloor.f32 %v3077_v29  ;;  %v2996_v29 = vfloor.f32 %v2973_v54 }
 0x1e5   :  { %v2966_v13 = vmul.f32 0.009615385, %v2943_v60  ;;  %v2992_v47 = vfloor.f32 %v2969_v27  ;;  %v9613_v60 = vfloor.f32 %v3080_v43  ;;  %v2888_v43 = vadd.s32 144, %v9488_v25 }
 0x1e6   :  { %v3078_v1 = vmul.f32 0.1, %v3055_v32  ;;  %v30_v32 = vld [vmem:[#allocation2 + $0x60] sm:$0xff]  ;;  %vm3169_vm14 = vcmp.ge.f32.partialorder %v9595_v45, 1.0  ;;  %vm3192_vm15 = vcmp.le.f32.partialorder %v9595_v45, 8.0 }
 0x1e7   :  { %v2989_v6 = vfloor.f32 %v2966_v13  ;;  %v3015_v0 = vmul.f32 104.0, %v2992_v47  ;;  %v9636_v30 = vmul.f32 10.0, %v9613_v60  ;;  %v31_v47 = vsel %vm29_vm9, 0, %v30_v32 }
 0x1e8   :  { %v9618_v2 = vfloor.f32 %v3078_v1  ;;  %32 = vst [vmem:[#allocation2 + $0x60] sm:$0xff] %v31_v47  ;;  %vm3172_vm2 = vcmp.ge.f32.partialorder %v9613_v60, 1.0  ;;  %vm3195_vm6 = vcmp.le.f32.partialorder %v9613_v60, 8.0 }
 0x1e9   :  { %v3012_v8 = vmul.f32 104.0, %v2989_v6  ;;  %v2976_v6 = vmul.f32 0.009615385, %v2953_v3  ;;  %v9668_v3 = vadd.s32 11, %v2888_v43 }
 0x1ea   :  { %v9651_v14 = vmul.f32 10.0, %v9618_v2  ;;  %vm3170_vm7 = vcmp.ge.f32.partialorder %v9618_v2, 1.0  ;;  %vm3193_vm8 = vcmp.le.f32.partialorder %v9618_v2, 8.0 }
 0x1eb   :  { %v9625_v63 = vsub.f32 %v2920_v17, %v3012_v8  ;;  %v9640_v17 = vsub.f32 %v2923_v51, %v3015_v0  ;;  %v3019_v8 = vmul.f32 104.0, %v2996_v29  ;;  %v2934_v29 = vcvt.s32.f32 %v9668_v3 }
 0x1ed   :  { %v3061_v49 = vadd.f32 0.5, %v9640_v17  ;;  %v9683_v15 = vsub.f32 %v2927_v46, %v3019_v8  ;;  %v9694_v46 = vadd.s32 11, %v2886_v5 }
 0x1ef   :  { %v2932_v35 = vcvt.s32.f32 %v9694_v46 }
 0x20d   :  { %v7741_v62 = vpop.f32.mrb[40].mxu0 }
 0x20e   :  { %v9521_v36 = vadd.f32 %v7741_v62, %v1631_v26  ;;  %v1850_v4 = vpop.f32.mrb[41].mxu0  ;;  %v2945_v26 = vadd.f32 0.5, %v2922_v7  ;;  %v2967_v62 = vmul.f32 0.009615385, %v2944_v58  ;;  %v2931_v58 = vcvt.s32.f32 %v9604_v53 }
 0x20f   :  { %v9527_v41 = vadd.f32 %v1850_v4, %v1629_v56  ;;  %v7742_v55 = vpop.f32.mrb[42].mxu0  ;;  %v2878_v56 = vadd.s32 64, %v9488_v25  ;;  %v2882_v4 = vadd.s32 96, %v9488_v25 }
 0x210   :  { %v1853_v44 = vpop.f32.mrb[43].mxu0  ;;  %v2968_v59 = vmul.f32 0.009615385, %v2945_v26  ;;  %v9591_v55 = vfloor.f32 %v3079_v16  ;;  %v2954_v39 = vadd.f32 0.5, %v2931_v58 }
 0x211   :  { %v9532_v48 = vadd.f32 %v1853_v44, %v1630_v61  ;;  %v9557_v61 = vadd.s32 11, %v2880_v19  ;;  %v9567_v37 = vadd.s32 11, %v2878_v56  ;;  %v9600_v18 = vadd.s32 11, %v2882_v4 }
 0x212   :  { %v2991_v22 = vfloor.f32 %v2968_v59  ;;  %v2990_v19 = vfloor.f32 %v2967_v62  ;;  %v9607_v26 = vmul.f32 10.0, %v9591_v55  ;;  %v9616_v59 = vmul.f32 10.0, %v9595_v45 }
 0x213   :  { %v2926_v10 = vcvt.s32.f32 %v9557_v61  ;;  %v2924_v23 = vcvt.s32.f32 %v9567_v37  ;;  %v2928_v13 = vcvt.s32.f32 %v9600_v18  ;;  %v2883_v4 = vadd.s32 104, %v9488_v25  ;;  %v3540_v61 = vld [vmem:[%s11748_s5 + $0x60] sm:$0xf] }
 0x214   :  { %v3014_v57 = vmul.f32 104.0, %v2991_v22  ;;  %v3013_v21 = vmul.f32 104.0, %v2990_v19  ;;  %v2977_v54 = vmul.f32 0.009615385, %v2954_v39  ;;  %v3541_v32 = vsel %vm3539_vm11, 0, %v3540_v61 }
 0x215   :  { %v2949_v34 = vadd.f32 0.5, %v2926_v10  ;;  %v2947_v44 = vadd.f32 0.5, %v2924_v23  ;;  %v2951_v62 = vadd.f32 0.5, %v2928_v13  ;;  %v9666_v0 = vadd.s32 11, %v2883_v4  ;;  %3542 = vst [vmem:[%s11748_s5 + $0x60] sm:$0xf] %v3541_v32 }
 0x216   :  { %v9611_v56 = vsub.f32 %v2922_v7, %v3014_v57  ;;  %v2971_v7 = vmul.f32 0.009615385, %v2948_v52  ;;  %v9660_v1 = vsub.f32 %v2921_v40, %v3013_v21  ;;  %v2999_v52 = vfloor.f32 %v2976_v6 }
 0x217   :  { %v2972_v24 = vmul.f32 0.009615385, %v2949_v34  ;;  %v2970_v31 = vmul.f32 0.009615385, %v2947_v44  ;;  %v8678_v34 = vld [vmem:[%s11747_s3] sm:$0xff]   ;;  %v2929_v21 = vcvt.s32.f32 %v9666_v0  ;;  %v3065_v4 = vadd.f32 0.5, %v9683_v15 }
 0x218   :  { %v3060_v16 = vadd.f32 0.5, %v9611_v56  ;;  %v2994_v51 = vfloor.f32 %v2971_v7  ;;  %7903 = vmatprep.subr.bf16.mxu1 %v8678_v34  ;;  %v3084_v34 = vmul.f32 0.1, %v3061_v49  ;;  %vm3171_vm12 = vcmp.ge.f32.partialorder %v9591_v55, 1.0 }
 0x219   :  { %v2995_v12 = vfloor.f32 %v2972_v24  ;;  %v2993_v22 = vfloor.f32 %v2970_v31  ;;  %v3058_v24 = vadd.f32 0.5, %v9625_v63  ;;  %v2974_v31 = vmul.f32 0.009615385, %v2951_v62 }
 0x21a   :  { %v3083_v57 = vmul.f32 0.1, %v3060_v16  ;;  %v9714_v8 = vfloor.f32 %v3084_v34  ;;  %v3088_v5 = vmul.f32 0.1, %v3065_v4  ;;  %v2955_v4 = vadd.f32 0.5, %v2932_v35 }
 0x21b   :  { %v3018_v27 = vmul.f32 104.0, %v2995_v12  ;;  %v3016_v44 = vmul.f32 104.0, %v2993_v22  ;;  %v3017_v12 = vmul.f32 104.0, %v2994_v51  ;;  %v3081_v16 = vmul.f32 0.1, %v3058_v24 }
 0x21c   :  { %v9678_v40 = vfloor.f32 %v3083_v57  ;;  %v2997_v22 = vfloor.f32 %v2974_v31  ;;  %v2889_v51 = vadd.s32 152, %v9488_v25  ;;  %v2957_v24 = vadd.f32 0.5, %v2934_v29 }
 0x21d   :  { %v9664_v19 = vsub.f32 %v2926_v10, %v3018_v27  ;;  %v9672_v7 = vsub.f32 %v2924_v23, %v3016_v44  ;;  %v3059_v10 = vadd.f32 0.5, %v9660_v1  ;;  %v3022_v23 = vmul.f32 104.0, %v2999_v52 }
 0x21e   :  { %v3000_v27 = vfloor.f32 %v2977_v54  ;;  %v9692_v11 = vsub.f32 %v2925_v38, %v3017_v12  ;;  %v9702_v39 = vmul.f32 10.0, %v9678_v40  ;;  %v2952_v38 = vadd.f32 0.5, %v2929_v21 }
 0x21f   :  { %v3064_v37 = vadd.f32 0.5, %v9664_v19  ;;  %v3062_v6 = vadd.f32 0.5, %v9672_v7  ;;  %v3082_v62 = vmul.f32 0.1, %v3059_v10  ;;  %v9706_v20 = vsub.f32 %v2930_v50, %v3022_v23 }
 0x220   :  { %v9710_v57 = vfloor.f32 %v3081_v16  ;;  %v3020_v44 = vmul.f32 104.0, %v2997_v22  ;;  %v3023_v47 = vmul.f32 104.0, %v3000_v27  ;;  %v3063_v31 = vadd.f32 0.5, %v9692_v11 }
 0x221   :  { %v3087_v43 = vmul.f32 0.1, %v3064_v37  ;;  %v3085_v52 = vmul.f32 0.1, %v3062_v6  ;;  %v9721_v54 = vfloor.f32 %v3082_v62  ;;  %v9723_v61 = vadd.s32 11, %v2889_v51 }
 0x222   :  { %v3068_v23 = vadd.f32 0.5, %v9706_v20  ;;  %v2975_v22 = vmul.f32 0.009615385, %v2952_v38  ;;  %v9737_v32 = vsub.f32 %v2931_v58, %v3023_v47  ;;  %v2980_v34 = vmul.f32 0.009615385, %v2957_v24 }
 0x223   :  { %v9728_v37 = vfloor.f32 %v3087_v43  ;;  %v2887_v6 = vadd.s32 136, %v9488_v25  ;;  %v3127_v62 = vmul.f32 10.0, %v9710_v57  ;;  %vm3194_vm13 = vcmp.le.f32.partialorder %v9591_v55, 8.0 }
 0x224   :  { %v3130_v18 = vmul.f32 10.0, %v9714_v8  ;;  %v3128_v53 = vmul.f32 10.0, %v9721_v54  ;;  %v2935_v58 = vcvt.s32.f32 %v9723_v61  ;;  %v9756_v51 = vfloor.f32 %v3088_v5  ;;  %vm9831_vm4 = vmand %vm3171_vm12, %vm3194_vm13 }
 0x225   :  { %v3086_v43 = vmul.f32 0.1, %v3063_v31  ;;  %v2998_v38 = vfloor.f32 %v2975_v22  ;;  %v3069_v24 = vadd.f32 0.5, %v9737_v32  ;;  %v3003_v31 = vfloor.f32 %v2980_v34  ;;  %vm9849_vm12 = vmand %vm3169_vm14, %vm3192_vm15 }
 0x226   :  { %v9779_v22 = vsub.f32 %v9563_v28, %v9636_v30  ;;  %vm3175_vm9 = vcmp.ge.f32.partialorder %v9678_v40, 1.0  ;;  %vm3198_vm10 = vcmp.le.f32.partialorder %v9678_v40, 8.0  ;;  %vm3196_vm5 = vcmp.le.f32.partialorder %v9710_v57, 8.0  ;;  %vm9867_vm14 = vmand %vm3172_vm2, %vm3195_vm6 }
 0x227   :  { %v3092_v34 = vmul.f32 0.1, %v3069_v24  ;;  %vm3199_vm0 = vcmp.le.f32.partialorder %v9714_v8, 8.0  ;;  %v3026_v28 = vmul.f32 104.0, %v3003_v31  ;;  %v9804_v24 = vsub.f32 %v9611_v56, %v9702_v39  ;;  %vm9886_vm2 = vmand %vm3170_vm7, %vm3193_vm8 }
 0x228   :  { %v9807_v31 = vsub.f32 %v9625_v63, %v3127_v62  ;;  %vm9902_vm7 = vmand %vm3175_vm9, %vm3198_vm10  ;;  %vm11801_vm3 = vcmp.ge.f32.partialorder %v9710_v57, 1.0  ;;  %v11876_v61 = vmov 0 }
 0x229   :  { %v9880_v60 = vsub.f32 %v2934_v29, %v3026_v28  ;;  %vm9918_vm11 = vmand %vm11801_vm3, %vm3196_vm5  ;;  %vm11807_vm3 = vcmp.ge.f32.partialorder %v9714_v8, 1.0 }
 0x22a   :  { %vm9937_vm5 = vmand %vm11807_vm3, %vm3199_vm0 }
 0x23d   :  { %v7781_v49 = vpop.f32.mrb[44].mxu0 }
 0x23e   :  { %v9719_v50 = vadd.f32 %v7781_v49, %v9521_v36  ;;  %v2185_v12 = vpop.f32.mrb[45].mxu0  ;;  %v9733_v36 = vsub.f32 %v2928_v13, %v3020_v44  ;;  %v9750_v13 = vfloor.f32 %v3085_v52  ;;  %v3091_v44 = vmul.f32 0.1, %v3068_v23 }
 0x23f   :  { %v9726_v10 = vadd.f32 %v2185_v12, %v9527_v41  ;;  %v7782_v16 = vpop.f32.mrb[46].mxu0  ;;  %v9762_v49 = vadd.s32 11, %v2887_v6  ;;  %v9766_v52 = vsub.f32 %v9542_v42, %v9607_v26  ;;  %v2978_v12 = vmul.f32 0.009615385, %v2955_v4 }
 0x240   :  { %v2188_v27 = vpop.f32.mrb[47].mxu0  ;;  %v3066_v47 = vadd.f32 0.5, %v9733_v36  ;;  %v3131_v5 = vmul.f32 10.0, %v9750_v13  ;;  %v2958_v16 = vadd.f32 0.5, %v2935_v58  ;;  %v9775_v23 = vsub.f32 %v9549_v33, %v9616_v59 }
 0x241   :  { %v9741_v41 = vadd.f32 %v2188_v27, %v9532_v48  ;;  %v3133_v48 = vmul.f32 10.0, %v9728_v37  ;;  %v3134_v42 = vmul.f32 10.0, %v9756_v51  ;;  %v3021_v26 = vmul.f32 104.0, %v2998_v38 }
 0x242   :  { %v3089_v27 = vmul.f32 0.1, %v3066_v47  ;;  %v2933_v33 = vcvt.s32.f32 %v9762_v49  ;;  %v2892_v59 = vadd.s32 176, %v9488_v25  ;;  %v3001_v30 = vfloor.f32 %v2978_v12 }
 0x243   :  { %v2890_v6 = vadd.s32 160, %v9488_v25  ;;  %v9794_v4 = vsub.f32 %v9570_v9, %v9651_v14  ;;  %v9798_v38 = vfloor.f32 %v3086_v43  ;;  %v2981_v47 = vmul.f32 0.009615385, %v2958_v16 }
 0x244   :  { %v9809_v9 = vfloor.f32 %v3091_v44  ;;  %v9813_v14 = vsub.f32 %v2929_v21, %v3021_v26  ;;  %v9816_v43 = vsub.f32 %v9640_v17, %v3130_v18  ;;  %v9819_v12 = vsub.f32 %v9660_v1, %v3128_v53 }
 0x245   :  { %v2956_v56 = vadd.f32 0.5, %v2933_v33  ;;  %v9825_v63 = vadd.s32 11, %v2892_v59  ;;  %v9836_v17 = vsub.f32 %v9664_v19, %v3133_v48  ;;  %v9839_v1 = vsub.f32 %v9672_v7, %v3131_v5 }
 0x246   :  { %v3024_v21 = vmul.f32 104.0, %v3001_v30  ;;  %v9843_v39 = vadd.s32 11, %v2890_v6  ;;  %v9854_v19 = vsub.f32 %v9683_v15, %v3134_v42  ;;  %v3132_v7 = vmul.f32 10.0, %v9798_v38 }
 0x247   :  { %v9859_v62 = vfloor.f32 %v3089_v27  ;;  %v9861_v18 = vfloor.f32 %v3092_v34  ;;  %vm3239_vm15 = vcmp.ge.f32.partialorder %v9794_v4, 1.0  ;;  %v3137_v15 = vmul.f32 10.0, %v9809_v9 }
 0x248   :  { %v3067_v53 = vadd.f32 0.5, %v9813_v14  ;;  %v3004_v48 = vfloor.f32 %v2981_v47  ;;  %v2979_v5 = vmul.f32 0.009615385, %v2956_v56  ;;  %v2938_v16 = vcvt.s32.f32 %v9825_v63 }
 0x249   :  { %v9895_v3 = vsub.f32 %v2932_v35, %v3024_v21  ;;  %v2936_v29 = vcvt.s32.f32 %v9843_v39  ;;  %v9909_v42 = vmul.f32 10.0, %v9859_v62  ;;  %v9912_v46 = vmul.f32 10.0, %v9861_v18 }
 0x24a   :  { %v3090_v35 = vmul.f32 0.1, %v3067_v53  ;;  %v3072_v26 = vadd.f32 0.5, %v9880_v60  ;;  %v3027_v27 = vmul.f32 104.0, %v3004_v48  ;;  %vm11804_vm10 = vcmp.ge.f32.partialorder %v9766_v52, 1.0 }
 0x24b   :  { %vm9928_vm6 = vmand %vm9831_vm4, %vm11804_vm10  ;;  %v3002_v59 = vfloor.f32 %v2979_v5  ;;  %v2961_v28 = vadd.f32 0.5, %v2938_v16  ;;  %v2891_v30 = vadd.s32 168, %v9488_v25  ;;  %vm11810_vm4 = vcmp.le.f32.partialorder %v9721_v54, 8.0 }
 0x24c   :  { %vm11811_vm10 = vcmp.ge.f32.partialorder %v9721_v54, 1.0  ;;  %v3070_v8 = vadd.f32 0.5, %v9895_v3  ;;  %v2959_v47 = vadd.f32 0.5, %v2936_v29  ;;  %vm11814_vm3 = vcmp.ge.f32.partialorder %v9775_v23, 1.0 }
 0x24d   :  { %vm9948_vm9 = vmand %vm11811_vm10, %vm11810_vm4  ;;  %v11815_v25 = vmov 0  ;;  %vm11817_vm10 = vcmp.ge.f32.partialorder %v9779_v22, 1.0  ;;  %v11818_v54 = vmov 0  ;;  %v9976_v56 = vsub.f32 %v9692_v11, %v3132_v7 }
 0x24e   :  { %vm9961_vm1 = vmand %vm9849_vm12, %vm11814_vm3  ;;  %vm11820_vm12 = vcmp.le.f32.partialorder %v9728_v37, 8.0  ;;  %vm11821_vm3 = vcmp.ge.f32.partialorder %v9728_v37, 1.0  ;;  %v3095_v21 = vmul.f32 0.1, %v3072_v26  ;;  %vm11824_vm4 = vcmp.le.f32.partialorder %v9750_v13, 8.0 }
 0x24f   :  { %v11816_v25 = vsel %vm9961_vm1, 4294967295, %v11815_v25  ;;  %vm9970_vm8 = vmand %vm9867_vm14, %vm11817_vm10  ;;  %vm11825_vm14 = vcmp.ge.f32.partialorder %v9750_v13, 1.0  ;;  %v9995_v11 = vsub.f32 %v9706_v20, %v3137_v15  ;;  %v3025_v7 = vmul.f32 104.0, %v3002_v59 }
 0x250   :  { %v11819_v54 = vsel %vm9970_vm8, 4294967295, %v11818_v54  ;;  %vm9982_vm13 = vmand %vm11821_vm3, %vm11820_vm12  ;;  %v2984_v45 = vmul.f32 0.009615385, %v2961_v28  ;;  %v9997_v53 = vadd.s32 11, %v2891_v30  ;;  %vm11828_vm12 = vcmp.le.f32.partialorder %v9756_v51, 8.0 }
 0x251   :  { %vm9990_vm10 = vmand %vm11825_vm14, %vm11824_vm4  ;;  %vm11829_vm3 = vcmp.ge.f32.partialorder %v9756_v51, 1.0  ;;  %v3093_v13 = vmul.f32 0.1, %v3070_v8  ;;  %v11832_v20 = vmov 0  ;;  %vm11834_vm8 = vcmp.ge.f32.partialorder %v9804_v24, 1.0 }
 0x252   :  { %vm10003_vm0 = vmand %vm11829_vm3, %vm11828_vm12  ;;  %vm11837_vm3 = vcmp.ge.f32.partialorder %v9807_v31, 1.0  ;;  %vm11840_vm14 = vcmp.le.f32.partialorder %v9798_v38, 8.0  ;;  %v2982_v44 = vmul.f32 0.009615385, %v2959_v47  ;;  %v3007_v2 = vfloor.f32 %v2984_v45 }
 0x253   :  { %vm10011_vm4 = vmand %vm9886_vm2, %vm3239_vm15  ;;  %v2937_v40 = vcvt.s32.f32 %v9997_v53  ;;  %v3113_v34 = vfloor.f32 %v3090_v35  ;;  %v10129_v47 = vsub.f32 %v2935_v58, %v3027_v27  ;;  %v10133_v0 = vfloor.f32 %v3095_v21 }
 0x254   :  { %v11833_v20 = vsel %vm10011_vm4, 4294967295, %v11832_v20  ;;  %vm10020_vm1 = vmand %vm9902_vm7, %vm11834_vm8  ;;  %vm11841_vm4 = vcmp.ge.f32.partialorder %v9798_v38, 1.0  ;;  %v11848_v38 = vmov 0  ;;  %v3030_v6 = vmul.f32 104.0, %v3007_v2 }
 0x255   :  { %vm10029_vm15 = vmand %vm9918_vm11, %vm11837_vm3  ;;  %vm11844_vm3 = vcmp.ge.f32.partialorder %v9816_v43, 1.0  ;;  %v2960_v8 = vadd.f32 0.5, %v2937_v40  ;;  %vm11871_vm11 = vnez %v11819_v54  ;;  %v3161_v54 = vsub.f32 %v9737_v32, %v9912_v46 }
 0x256   :  { %vm10038_vm7 = vmand %vm11841_vm4, %vm11840_vm14  ;;  %vm11847_vm14 = vcmp.ge.f32.partialorder %v9819_v12, 1.0  ;;  %vm11863_vm4 = vcmp.ge.f32.partialorder %v9809_v9, 1.0  ;;  %v11882_v32 = vmov 0  ;;  %v3136_v49 = vmul.f32 10.0, %v3113_v34 }
 0x257   :  { %vm10049_vm2 = vmand %vm9937_vm5, %vm11844_vm3  ;;  %vm11850_vm5 = vcmp.ge.f32.partialorder %v9836_v17, 1.0  ;;  %v2983_v46 = vmul.f32 0.009615385, %v2960_v8  ;;  %v11902_v35 = vmov 0  ;;  %v8744_v45 = vmov 0.0  }
 0x258   :  { %vm10058_vm8 = vmand %vm9948_vm9, %vm11847_vm14  ;;  %vm11853_vm14 = vcmp.ge.f32.partialorder %v9839_v1, 1.0  ;;  %vm11859_vm9 = vcmp.le.f32.partialorder %v9766_v52, 8.0  ;;  %v11868_v52 = vmov 0 }
 0x259   :  { %v11849_v38 = vsel %vm10058_vm8, 4294967295, %v11848_v38  ;;  %vm10069_vm3 = vmand %vm9982_vm13, %vm11850_vm5  ;;  %vm11856_vm13 = vcmp.ge.f32.partialorder %v9854_v19, 1.0  ;;  %v3006_v15 = vfloor.f32 %v2983_v46 }
 0x25a   :  { %vm10078_vm12 = vmand %vm9990_vm10, %vm11853_vm14  ;;  %vm11862_vm14 = vcmp.le.f32.partialorder %v9809_v9, 8.0  ;;  %v11872_v9 = vmov 0 }
 0x25b   :  { %vm10089_vm5 = vmand %vm10003_vm0, %vm11856_vm13  ;;  %vm11866_vm0 = vcmp.le.f32.partialorder %v9775_v23, 8.0  ;;  %vm11867_vm13 = vnez %v11816_v25  ;;  %v3158_v23 = vsub.f32 %v9733_v36, %v9909_v42  ;;  %v3005_v25 = vfloor.f32 %v2982_v44 }
 0x25c   :  { %vm10097_vm10 = vmand %vm9928_vm6, %vm11859_vm9  ;;  %vm11870_vm9 = vcmp.le.f32.partialorder %v9779_v22, 8.0  ;;  %v10137_v22 = vsub.f32 %v2933_v33, %v3025_v7  ;;  %v11879_v36 = vmov 0  ;;  %v10173_v33 = vfloor.f32 %v3093_v13 }
 0x25d   :  { %vm10105_vm8 = vmand %vm11863_vm4, %vm11862_vm14  ;;  %vm11875_vm14 = vnez %v11833_v20  ;;  %v3028_v42 = vmul.f32 104.0, %v3005_v25  ;;  %v10270_v37 = vsel %vm10097_vm10, 1.0, %v8744_v45  ;;  %v3029_v8 = vmul.f32 104.0, %v3006_v15 }
 0x25e   :  { %vm10115_vm6 = vmand %vm11867_vm13, %vm11866_vm0  ;;  %vm11878_vm13 = vcmp.le.f32.partialorder %v9804_v24, 8.0  ;;  %v10178_v24 = vsub.f32 %v2938_v16, %v3030_v6  ;;  %v3141_v16 = vmul.f32 10.0, %v10133_v0  ;;  %v3139_v55 = vmul.f32 10.0, %v10173_v33  ;;  %11920 = vst [vmem:[#allocation3_spill] sm:$0xff] %v10270_v37 }
 0x25f   :  { %v11869_v52 = vsel %vm10115_vm6, 4294967295, %v11868_v52  ;;  %vm10123_vm4 = vmand %vm11871_vm11, %vm11870_vm9  ;;  %vm11874_vm11 = vcmp.le.f32.partialorder %v9794_v4, 8.0  ;;  %v3073_v4 = vadd.f32 0.5, %v10129_v47  ;;  %v10421_v63 = vsub.f32 %v2937_v40, %v3029_v8 }
 0x260   :  { %v11873_v9 = vsel %vm10123_vm4, 4294967295, %v11872_v9  ;;  %vm10145_vm0 = vmand %vm11875_vm14, %vm11874_vm11  ;;  %vm11881_vm4 = vcmp.le.f32.partialorder %v9807_v31, 8.0  ;;  %vm11884_vm11 = vcmp.ge.f32.partialorder %v9976_v56, 1.0  ;;  %v3162_v5 = vsub.f32 %v9895_v3, %v3139_v55 }
 0x261   :  { %v11877_v61 = vsel %vm10145_vm0, 4294967295, %v11876_v61  ;;  %vm10153_vm9 = vmand %vm10020_vm1, %vm11878_vm13  ;;  %vm11895_vm1 = vnez %v11849_v38  ;;  %v3096_v7 = vmul.f32 0.1, %v3073_v4 }
 0x262   :  { %v11880_v36 = vsel %vm10153_vm9, 4294967295, %v11879_v36  ;;  %vm10161_vm6 = vmand %vm10029_vm15, %vm11881_vm4  ;;  %vm11887_vm4 = vcmp.le.f32.partialorder %v9859_v62, 8.0  ;;  %vm11894_vm15 = vcmp.le.f32.partialorder %v9819_v12, 8.0  ;;  %v3071_v12 = vadd.f32 0.5, %v10137_v22 }
 0x263   :  { %v11883_v32 = vsel %vm10161_vm6, 4294967295, %v11882_v32  ;;  %vm10169_vm14 = vmand %vm10038_vm7, %vm11884_vm11  ;;  %vm11888_vm7 = vcmp.ge.f32.partialorder %v9859_v62, 1.0  ;;  %vm11891_vm6 = vcmp.le.f32.partialorder %v9816_v43, 8.0  ;;  %v11896_v62 = vmov 0 }
 0x264   :  { %vm10186_vm13 = vmand %vm11888_vm7, %vm11887_vm4  ;;  %vm11898_vm4 = vcmp.ge.f32.partialorder %v9995_v11, 1.0  ;;  %vm11908_vm11 = vcmp.ge.f32.partialorder %v9861_v18, 1.0  ;;  %v3094_v51 = vmul.f32 0.1, %v3071_v12  ;;  %v10315_v38 = vfloor.f32 %v3096_v7 }
 0x265   :  { %vm10194_vm9 = vmand %vm10049_vm2, %vm11891_vm6  ;;  %vm11901_vm6 = vcmp.le.f32.partialorder %v9836_v17, 8.0  ;;  %vm11907_vm2 = vcmp.le.f32.partialorder %v9861_v18, 8.0 }
 0x266   :  { %vm10202_vm0 = vmand %vm11895_vm1, %vm11894_vm15  ;;  %v10341_v6 = vfloor.f32 %v3094_v51 }
 0x267   :  { %v11897_v62 = vsel %vm10202_vm0, 4294967295, %v11896_v62  ;;  %vm10210_vm7 = vmand %vm10105_vm8, %vm11898_vm4  ;;  %vm11904_vm8 = vcmp.le.f32.partialorder %v9839_v1, 8.0  ;;  %vm3296_vm4 = vcmp.le.f32.partialorder %v3158_v23, 8.0 }
 0x268   :  { %vm10221_vm1 = vmand %vm10069_vm3, %vm11901_vm6  ;;  %vm3253_vm3 = vcmp.ge.f32.partialorder %v3161_v54, 1.0  ;;  %vm11911_vm6 = vcmp.le.f32.partialorder %v9854_v19, 8.0  ;;  %v3159_v19 = vsub.f32 %v9813_v14, %v3136_v49  ;;  %v10282_v14 = vsub.f32 %v2936_v29, %v3028_v42  ;;  %v10399_v49 = vld [vmem:[%s11749_s2] ss:$0 sm:$0xff] }
 0x269   :  { %v11903_v35 = vsel %vm10221_vm1, 4294967295, %v11902_v35  ;;  %vm10229_vm15 = vmand %vm10078_vm12, %vm11904_vm8  ;;  %vm11914_vm12 = vcmp.le.f32.partialorder %v9976_v56, 8.0  ;;  %v3076_v56 = vadd.f32 0.5, %v10178_v24  ;;  %v3140_v42 = vmul.f32 10.0, %v10341_v6 }
 0x26a   :  { %vm10237_vm0 = vmand %vm11908_vm11, %vm11907_vm2  ;;  %vm11917_vm11 = vcmp.ge.f32.partialorder %v3158_v23, 1.0  ;;  %v3074_v3 = vadd.f32 0.5, %v10282_v14  ;;  %v10409_v4 = vsel %vm10229_vm15, 1.0, %v8744_v45  ;;  %vm11964_vm15 = vcmp.ge.f32.partialorder %v3162_v5, 1.0 }
 0x26b   :  { %vm10245_vm1 = vmand %vm10089_vm5, %vm11911_vm6  ;;  %vm11921_vm5 = vcmp.le.f32.partialorder %v9995_v11, 8.0  ;;  %vm3205_vm6 = vcmp.le.f32.partialorder %v3113_v34, 8.0  ;;  %v3164_v11 = vsub.f32 %v9880_v60, %v3141_v16  ;;  %v3099_v2 = vmul.f32 0.1, %v3076_v56  ;;  %11958 = vst [vmem:[#allocation12_spill] sm:$0xff] %v10409_v4 }
 0x26c   :  { %vm10253_vm8 = vmand %vm10169_vm14, %vm11914_vm12  ;;  %v3097_v58 = vmul.f32 0.1, %v3074_v3  ;;  %v3075_v56 = vadd.f32 0.5, %v10421_v63 }
 0x26d   :  { %vm10260_vm2 = vmand %vm10186_vm13, %vm11917_vm11  ;;  %vm3182_vm13 = vcmp.ge.f32.partialorder %v3113_v34, 1.0  ;;  %vm11928_vm11 = vnez %v11873_v9  ;;  %v7821_v60 = vpop.f32.mrb[48].mxu0  ;;  %v10431_v43 = vsel %vm10253_vm8, 1.0, %v8744_v45  ;;  %vm3188_vm8 = vcmp.ge.f32.partialorder %v10315_v38, 1.0 }
 0x26e   :  { %vm10276_vm14 = vmand %vm10210_vm7, %vm11921_vm5  ;;  %vm11926_vm7 = vnez %v11869_v52  ;;  %v10299_v39 = vsel %vm11928_vm11, 1.0, %v8744_v45  ;;  %vm3210_vm5 = vcmp.le.f32.partialorder %v10133_v0, 8.0  ;;  %v10318_v26 = vadd.f32 %v7821_v60, %v9719_v50  ;;  %v2524_v57 = vpop.f32.mrb[49].mxu0  ;;  %11962 = vst [vmem:[#allocation14_spill] sm:$0xff] %v10431_v43 }
 0x26f   :  { %vm10286_vm12 = vmand %vm10237_vm0, %vm3253_vm3  ;;  %v10294_v48 = vsel %vm11926_vm7, 1.0, %v8744_v45  ;;  %11929 = vst [vmem:[#allocation5_spill] sm:$0xff] %v10299_v39  ;;  %vm3187_vm3 = vcmp.ge.f32.partialorder %v10133_v0, 1.0  ;;  %vm3251_vm7 = vcmp.ge.f32.partialorder %v3159_v19, 1.0  ;;  %v10331_v28 = vadd.f32 %v2524_v57, %v9726_v10  ;;  %v7822_v30 = vpop.f32.mrb[50].mxu0 }
 0x270   :  { %11927 = vst [vmem:[#allocation4_spill] sm:$0xff] %v10294_v48  ;;  %vm10304_vm0 = vmand %vm10260_vm2, %vm3296_vm4  ;;  %vm11934_vm4 = vcmp.le.f32.partialorder %v3161_v54, 8.0  ;;  %v2527_v52 = vpop.f32.mrb[51].mxu0  ;;  %v3142_v54 = vmul.f32 10.0, %v10315_v38  ;;  %v10436_v16 = vsel %vm10276_vm14, 1.0, %v8744_v45  ;;  %vm3211_vm14 = vcmp.le.f32.partialorder %v10315_v38, 8.0 }
 0x271   :  { %vm10310_vm10 = vmand %vm3182_vm13, %vm3205_vm6  ;;  %vm3208_vm6 = vcmp.le.f32.partialorder %v10173_v33, 8.0  ;;  %vm11941_vm13 = vnez %v11880_v36  ;;  %v10366_v25 = vadd.f32 %v2527_v52, %v9741_v41  ;;  %v10382_v36 = vsel %vm10194_vm9, 1.0, %v8744_v45  ;;  %11963 = vst [vmem:[#allocation15_spill] sm:$0xff] %v10436_v16 }
 0x272   :  { %vm10323_vm2 = vmand %vm10286_vm12, %vm11934_vm4  ;;  %vm11939_vm4 = vnez %v11877_v61  ;;  %v10351_v10 = vsel %vm11941_vm13, 1.0, %v8744_v45  ;;  %vm3297_vm12 = vcmp.le.f32.partialorder %v3159_v19, 8.0  ;;  %vm11947_vm13 = vcmp.ge.f32.partialorder %v10173_v33, 1.0  ;;  %11950 = vst [vmem:[#allocation9_spill] sm:$0xff] %v10382_v36 }
 0x273   :  { %vm10337_vm11 = vmand %vm3187_vm3, %vm3210_vm5  ;;  %v10346_v9 = vsel %vm11939_vm4, 1.0, %v8744_v45  ;;  %11942 = vst [vmem:[#allocation7_spill] sm:$0xff] %v10351_v10  ;;  %vm11943_vm3 = vnez %v11883_v32  ;;  %v10377_v61 = vfloor.f32 %v3099_v2  ;;  %vm3508_vm9 = vcmask 1047557  }
 0x274   :  { %11940 = vst [vmem:[#allocation6_spill] sm:$0xff] %v10346_v9  ;;  %v10356_v34 = vsel %vm11943_vm3, 1.0, %v8744_v45  ;;  %vm10361_vm5 = vmand %vm10310_vm10, %vm3251_vm7  ;;  %vm11951_vm10 = vnez %v11897_v62  ;;  %vm11953_vm7 = vcmp.ge.f32.partialorder %v3164_v11, 1.0  ;;  %vm3509_vm3 = vsmask.f32 7958 }
 0x275   :  { %11944 = vst [vmem:[#allocation8_spill] sm:$0xff] %v10356_v34  ;;  %vm10372_vm4 = vmand %vm11947_vm13, %vm3208_vm6  ;;  %v10387_v41 = vsel %vm11951_vm10, 1.0, %v8744_v45  ;;  %vm3302_vm13 = vcmp.le.f32.partialorder %v3164_v11, 8.0  ;;  %vm11956_vm10 = vnez %v11903_v35  ;;  %v10426_v62 = vsel %vm10245_vm1, 1.0, %v8744_v45  ;;  %v7841_v40 = vpop.f32.mrb[0].mxu0 }
 0x276   :  { %11952 = vst [vmem:[#allocation10_spill] sm:$0xff] %v10387_v41  ;;  %vm10392_vm6 = vmand %vm10337_vm11, %vm11953_vm7  ;;  %v10404_v33 = vsel %vm11956_vm10, 1.0, %v8744_v45  ;;  %v10448_v12 = vsel %vm10304_vm0, 1.0, %v8744_v45  ;;  %v10453_v46 = vsel %vm10323_vm2, 1.0, %v8744_v45  ;;  %v3165_v27 = vsub.f32 %v10129_v47, %v3142_v54  ;;  %v2700_v21 = vpop.f32.mrb[1].mxu0 }
 0x277   :  { %11957 = vst [vmem:[#allocation11_spill] sm:$0xff] %v10404_v33  ;;  %vm10414_vm11 = vmand %vm10361_vm5, %vm3297_vm12  ;;  %vm3300_vm5 = vcmp.le.f32.partialorder %v3162_v5, 8.0  ;;  %v3145_v17 = vmul.f32 10.0, %v10377_v61  ;;  %v2825_v1 = vadd.f32 %v7841_v40, %v10399_v49  ;;  %v3120_v18 = vfloor.f32 %v3097_v58  ;;  %v7842_v55 = vpop.f32.mrb[2].mxu0 }
 0x278   :  { %11961 = vst [vmem:[#allocation13_spill] sm:$0xff] %v10426_v62  ;;  %vm10441_vm12 = vmand %vm10372_vm4, %vm11964_vm15  ;;  %v2823_v19 = vadd.f32 %v10399_v49, %v2700_v21  ;;  %v10471_v7 = vsel %vm10414_vm11, 1.0, %v8744_v45  ;;  %v10477_v47 = vsub.f32 %v10137_v22, %v3140_v42  ;;  %v2826_v20 = vadd.f32 %v7842_v55, %v10399_v49  ;;  %v2703_v11 = vpop.f32.mrb[3].mxu0 }
 0x279   :  { %11967 = vst [vmem:[#allocation16_spill] sm:$0xff] %v10448_v12  ;;  %11968 = vst [vmem:[#allocation17_spill] sm:$0xff] %v10453_v46  ;;  %v2848_v13 = vmax.f32 %v2825_v1, 0.0  ;;  %vm3186_vm2 = vcmp.ge.f32.partialorder %v10341_v6, 1.0  ;;  %v2824_v29 = vadd.f32 %v10399_v49, %v2703_v11  ;;  %vm3257_vm7 = vcmp.ge.f32.partialorder %v3165_v27, 1.0 }
 0x27a   :  { %vm10458_vm1 = vmand %vm10392_vm6, %vm3302_vm13  ;;  %11971 = vst [vmem:[#allocation18_spill] sm:$0xff] %v10471_v7  ;;  %v2846_v15 = vmax.f32 %v2823_v19, 0.0  ;;  %v10493_v22 = vsub.f32 %v10178_v24, %v3145_v17  ;;  %v2849_v60 = vmax.f32 %v2826_v20, 0.0  ;;  %vm3209_vm6 = vcmp.le.f32.partialorder %v10341_v6, 8.0 }
 0x27b   :  { %vm3323_vm0 = vmand %vm10441_vm12, %vm3300_vm5  ;;  %v10484_v51 = vsel %vm10458_vm1, 1.0, %v8744_v45  ;;  %v3143_v5 = vmul.f32 10.0, %v3120_v18  ;;  %v2847_v2 = vmax.f32 %v2824_v29, 0.0  ;;  %vm3303_vm13 = vcmp.le.f32.partialorder %v3165_v27, 8.0 }
 0x27c   :  { %11972 = vst [vmem:[#allocation19_spill] sm:$0xff] %v10484_v51  ;;  %vm3234_vm4 = vmand %vm3188_vm8, %vm3211_vm14  ;;  %v10496_v44 = vsel %vm3323_vm0, 1.0, %v8744_v45  ;;  %vm3255_vm10 = vcmp.ge.f32.partialorder %v10477_v47, 1.0  ;;  %v3098_v57 = vmul.f32 0.1, %v3075_v56  ;;  %v3355_v59 = vmul.f32 %v10270_v37, %v2848_v13 }
 0x27d   :  { %11973 = vst [vmem:[#allocation20_spill] sm:$0xff] %v10496_v44  ;;  %v3356_v38 = vmul.f32 %v10299_v39, %v2849_v60  ;;  %vm10502_vm11 = vmand %vm3234_vm4, %vm3257_vm7  ;;  %vm3301_vm15 = vcmp.le.f32.partialorder %v10477_v47, 8.0  ;;  %vm3191_vm12 = vcmp.ge.f32.partialorder %v10377_v61, 1.0  ;;  %v3353_v24 = vmul.f32 %v10294_v48, %v2846_v15  ;;  %v7845_v50 = vpop.f32.mrb[4].mxu0 }
 0x27e   :  { %v3354_v30 = vmul.f32 %v10346_v9, %v2847_v2  ;;  %vm10512_vm5 = vmand %vm3186_vm2, %vm3209_vm6  ;;  %vm3214_vm1 = vcmp.le.f32.partialorder %v10377_v61, 8.0  ;;  %vm3260_vm8 = vcmp.ge.f32.partialorder %v10493_v22, 1.0  ;;  %v2829_v0 = vadd.f32 %v7845_v50, %v10399_v49  ;;  %v2716_v54 = vpop.f32.mrb[5].mxu0 }
 0x27f   :  { %v3377_v52 = vpack.c.bf16 %v3356_v38, %v3355_v59  ;;  %vm10520_vm14 = vmand %vm3508_vm9, %vm3509_vm3  ;;  %v3166_v6 = vsub.f32 %v10282_v14, %v3143_v5  ;;  %vm3189_vm0 = vcmp.ge.f32.partialorder %v3120_v18, 1.0  ;;  %v2827_v58 = vadd.f32 %v10399_v49, %v2716_v54  ;;  %v7846_v31 = vpop.f32.mrb[6].mxu0  ;;  %v3511_v59 = vld [vmem:[#allocation2] sm:$0xe0] }
 0x280   :  { %v3376_v32 = vpack.c.bf16 %v3354_v30, %v3353_v24  ;;  %vm10530_vm2 = vmand %vm10502_vm11, %vm3303_vm13  ;;  %vm3212_vm3 = vcmp.le.f32.partialorder %v3120_v18, 8.0  ;;  %v10534_v53 = vfloor.f32 %v3098_v57  ;;  %v2852_v17 = vmax.f32 %v2829_v0, 0.0  ;;  %v2719_v1 = vpop.f32.mrb[7].mxu0 }
 0x281   :  { %v3397_v40 = vshrl.u32 %v3377_v52, 16  ;;  %v3400_v35 = vshll.u32 %v3377_v52, 16  ;;  %v2830_v14 = vadd.f32 %v7846_v31, %v10399_v49  ;;  %vm10541_vm9 = vmand %vm10512_vm5, %vm3255_vm10  ;;  %v2850_v55 = vmax.f32 %v2827_v58, 0.0 }
 0x282   :  { %v3389_v21 = vshrl.u32 %v3376_v32, 16  ;;  %v3392_v19 = vshll.u32 %v3376_v32, 16  ;;  %v2828_v56 = vadd.f32 %v10399_v49, %v2719_v1  ;;  %vm10550_vm4 = vmand %vm3191_vm12, %vm3214_vm1  ;;  %vm3258_vm6 = vcmp.ge.f32.partialorder %v3166_v6, 1.0 }
 0x283   :  { %v3399_v20 = vrot.slane %v3397_v40, 2  ;;  %v3402_v11 = vrot.slane %v3400_v35, 3  ;;  %v2853_v15 = vmax.f32 %v2830_v14, 0.0  ;;  %vm10556_vm7 = vmand %vm3189_vm0, %vm3212_vm3  ;;  %v10563_v61 = vsel %vm10530_vm2, 1.0, %v8744_v45 }
 0x284   :  { %v3391_v60 = vrot.slane %v3389_v21, 2  ;;  %v3394_v5 = vrot.slane %v3392_v19, 3  ;;  %v2851_v2 = vmax.f32 %v2828_v56, 0.0  ;;  %11988 = vst [vmem:[#allocation21_spill] sm:$0xff] %v10563_v61  ;;  %vm10569_vm13 = vmand %vm10541_vm9, %vm3301_vm15  ;;  %v3359_v38 = vmul.f32 %v10351_v10, %v2852_v17 }
 0x285   :  { %v3403_v18 = vor.u32 %v3402_v11, %v3399_v20  ;;  %v3360_v3 = vmul.f32 %v10382_v36, %v2853_v15  ;;  %vm10579_vm10 = vmand %vm10550_vm4, %vm3260_vm8  ;;  %vm3306_vm11 = vcmp.le.f32.partialorder %v10493_v22, 8.0  ;;  %v3357_v30 = vmul.f32 %v10356_v34, %v2850_v55  ;;  %v7849_v8 = vpop.f32.mrb[8].mxu0 }
 0x286   :  { %v3395_v47 = vor.u32 %v3394_v5, %v3391_v60  ;;  %v3358_v50 = vmul.f32 %v10387_v41, %v2851_v2  ;;  %vm10589_vm15 = vmand %vm10556_vm7, %vm3258_vm6  ;;  %vm3304_vm12 = vcmp.le.f32.partialorder %v3166_v6, 8.0  ;;  %v2833_v54 = vadd.f32 %v7849_v8, %v10399_v49  ;;  %v2732_v32 = vpop.f32.mrb[9].mxu0 }
 0x287   :  { %v3379_v0 = vpack.c.bf16 %v3360_v3, %v3359_v38  ;;  %v10597_v58 = vsel %vm10569_vm13, 1.0, %v8744_v45  ;;  %v3144_v31 = vmul.f32 10.0, %v10534_v53  ;;  %vm11996_vm5 = vsmask.f32 5376  ;;  %v7850_v14 = vpop.f32.mrb[10].mxu0  ;;  %vm10610_vm1 = vmand %vm10579_vm10, %vm3306_vm11 }
 0x288   :  { %11995 = vst [vmem:[#allocation22_spill] sm:$0xff] %v10597_v58  ;;  %v10601_v42 = vsel %vm11996_vm5, %v3395_v47, %v3403_v18  ;;  %v3512_v40 = vsel %vm10520_vm14, %v3395_v47, %v3511_v59  ;;  %v3378_v35 = vpack.c.bf16 %v3358_v50, %v3357_v30  ;;  %v2831_v17 = vadd.f32 %v10399_v49, %v2732_v32  ;;  %v2735_v55 = vpop.f32.mrb[11].mxu0  ;;  %vm3327_vm8 = vmand %vm10589_vm15, %vm3304_vm12 }
 0x289   :  { %3513 = vst [vmem:[#allocation2] sm:$0xe0] %v3512_v40  ;;  %3514 = vst [vmem:[#allocation2 + $0x8] sm:$0xff] %v10601_v42  ;;  %v3415_v27 = vshrl.u32 %v3379_v0, 16  ;;  %v3418_v21 = vshll.u32 %v3379_v0, 16  ;;  %v2856_v19 = vmax.f32 %v2833_v54, 0.0  ;;  %v2834_v23 = vadd.f32 %v7850_v14, %v10399_v49 }
 0x28a   :  { %v3406_v22 = vshrl.u32 %v3378_v35, 16  ;;  %v3409_v56 = vshll.u32 %v3378_v35, 16  ;;  %v2854_v13 = vmax.f32 %v2831_v17, 0.0  ;;  %v2832_v20 = vadd.f32 %v10399_v49, %v2735_v55  ;;  %vm12001_vm14 = vmmov %vm11996_vm5 }
 0x28b   :  { %v3417_v11 = vrot.slane %v3415_v27, 2  ;;  %v3420_v15 = vrot.slane %v3418_v21, 3  ;;  %v2857_v29 = vmax.f32 %v2834_v23, 0.0  ;;  %v10623_v60 = vsel %vm10610_vm1, 1.0, %v8744_v45  ;;  %vm12002_vm0 = vmmov %vm11996_vm5 }
 0x28c   :  { %11999 = vst [vmem:[#allocation23_spill] sm:$0xff] %v10623_v60  ;;  %v3408_v5 = vrot.slane %v3406_v22, 2  ;;  %v3411_v2 = vrot.slane %v3409_v56, 3  ;;  %v2855_v57 = vmax.f32 %v2832_v20, 0.0  ;;  %v10626_v6 = vsel %vm3327_vm8, 1.0, %v8744_v45  ;;  %vm12003_vm7 = vmmov %vm12002_vm0 }
 0x28d   :  { %12000 = vst [vmem:[#allocation24_spill] sm:$0xff] %v10626_v6  ;;  %v3421_v59 = vor.u32 %v3420_v15, %v3417_v11  ;;  %v3363_v38 = vmul.f32 %v10404_v33, %v2856_v19  ;;  %v3364_v3 = vmul.f32 %v10426_v62, %v2857_v29  ;;  %v3599_v24 = vshll.u32 %v10601_v42, 16  ;;  %v7853_v8 = vpop.f32.mrb[12].mxu0  ;;  %vm12004_vm6 = vmmov %vm12002_vm0 }
 0x28e   :  { %v3412_v47 = vor.u32 %v3411_v2, %v3408_v5  ;;  %v3361_v30 = vmul.f32 %v10409_v4, %v2854_v13  ;;  %v3362_v50 = vmul.f32 %v10431_v43, %v2855_v57  ;;  %v10634_v52 = vsub.f32 %v10421_v63, %v3144_v31  ;;  %v2748_v32 = vpop.f32.mrb[13].mxu0  ;;  %vm12011_vm1 = vmmov %vm12002_vm0 }
 0x28f   :  { %v3381_v0 = vpack.c.bf16 %v3364_v3, %v3363_v38  ;;  %v2837_v54 = vadd.f32 %v7853_v8, %v10399_v49  ;;  %v10637_v40 = vrot.slane %v3599_v24, 1  ;;  %v3603_v35 = vshrl.u32 %v10601_v42, 16  ;;  %v7854_v21 = vpop.f32.mrb[14].mxu0  ;;  %vm12012_vm8 = vmmov %vm12002_vm0 }
 0x290   :  { %v10641_v17 = vsel %vm12001_vm14, %v3403_v18, %v3412_v47  ;;  %v10644_v14 = vsel %vm12002_vm0, %v3412_v47, %v3421_v59  ;;  %v3380_v1 = vpack.c.bf16 %v3362_v50, %v3361_v30  ;;  %v2835_v27 = vadd.f32 %v10399_v49, %v2748_v32  ;;  %v2751_v55 = vpop.f32.mrb[15].mxu0  ;;  %v10653_v20 = vld [vmem:[#allocation2] sm:$0xff] }
 0x291   :  { %3515 = vst [vmem:[#allocation2 + $0x10] sm:$0xff] %v10641_v17  ;;  %3516 = vst [vmem:[#allocation2 + $0x18] sm:$0xff] %v10644_v14  ;;  %v3433_v63 = vshrl.u32 %v3381_v0, 16  ;;  %v3436_v31 = vshll.u32 %v3381_v0, 16  ;;  %v2860_v19 = vmax.f32 %v2837_v54, 0.0  ;;  %v2838_v23 = vadd.f32 %v7854_v21, %v10399_v49 }
 0x292   :  { %vm3190_vm2 = vcmp.ge.f32.partialorder %v10534_v53, 1.0  ;;  %vm3213_vm3 = vcmp.le.f32.partialorder %v10534_v53, 8.0  ;;  %v3424_v18 = vshrl.u32 %v3380_v1, 16  ;;  %v3427_v22 = vshll.u32 %v3380_v1, 16 }
 0x293   :  { %v2858_v56 = vmax.f32 %v2835_v27, 0.0  ;;  %v2836_v13 = vadd.f32 %v10399_v49, %v2751_v55  ;;  %v3435_v11 = vrot.slane %v3433_v63, 2  ;;  %v3438_v15 = vrot.slane %v3436_v31, 3  ;;  %vm10685_vm10 = vmand %vm3190_vm2, %vm3213_vm3 }
 0x294   :  { %v3367_v29 = vmul.f32 %v10436_v16, %v2860_v19  ;;  %v2861_v5 = vmax.f32 %v2838_v23, 0.0  ;;  %v3426_v2 = vrot.slane %v3424_v18, 2  ;;  %v3429_v57 = vrot.slane %v3427_v22, 3 }
 0x295   :  { %v3365_v38 = vmul.f32 %v10448_v12, %v2858_v56  ;;  %v2859_v3 = vmax.f32 %v2836_v13, 0.0  ;;  %vm3259_vm9 = vcmp.ge.f32.partialorder %v10634_v52, 1.0  ;;  %v3439_v24 = vor.u32 %v3438_v15, %v3435_v11  ;;  %v7857_v54 = vpop.f32.mrb[16].mxu0 }
 0x296   :  { %v3368_v47 = vmul.f32 %v10453_v46, %v2861_v5  ;;  %v3592_v30 = vshrl.u32 %v10653_v20, 16  ;;  %v3594_v50 = vshll.u32 %v10653_v20, 16  ;;  %v3430_v8 = vor.u32 %v3429_v57, %v3426_v2  ;;  %v2764_v63 = vpop.f32.mrb[17].mxu0  ;;  %vm10705_vm5 = vmand %vm10685_vm10, %vm3259_vm9 }
 0x297   :  { %v3366_v0 = vmul.f32 %v10471_v7, %v2859_v3  ;;  %v3605_v32 = vor.u32 %v3603_v35, %v10637_v40  ;;  %v3607_v1 = vshll.u32 %v10641_v17, 16  ;;  %v2841_v21 = vadd.f32 %v7857_v54, %v10399_v49  ;;  %v7858_v22 = vpop.f32.mrb[18].mxu0  ;;  %vm12021_vm9 = vmmov %vm12011_vm1 }
 0x298   :  { %v3383_v27 = vpack.c.bf16 %v3368_v47, %v3367_v29  ;;  %v3596_v31 = vrot.slane %v3594_v50, 1  ;;  %v3611_v19 = vshrl.u32 %v10641_v17, 16  ;;  %vm3305_vm4 = vcmp.le.f32.partialorder %v10634_v52, 8.0  ;;  %v2767_v29 = vpop.f32.mrb[19].mxu0  ;;  %vm12026_vm10 = vmmov %vm12011_vm1 }
 0x299   :  { %v10668_v23 = vsel %vm12003_vm7, %v3421_v59, %v3430_v8  ;;  %v10671_v55 = vsel %vm12004_vm6, %v3430_v8, %v3439_v24  ;;  %v3382_v18 = vpack.c.bf16 %v3366_v0, %v3365_v38  ;;  %v2839_v35 = vadd.f32 %v10399_v49, %v2764_v63  ;;  %vm10730_vm14 = vmand %vm10705_vm5, %vm3305_vm4 }
 0x29a   :  { %3517 = vst [vmem:[#allocation2 + $0x20] sm:$0xff] %v10668_v23  ;;  %3518 = vst [vmem:[#allocation2 + $0x28] sm:$0xff] %v10671_v55  ;;  %v3451_v56 = vshrl.u32 %v3383_v27, 16  ;;  %v3454_v13 = vshll.u32 %v3383_v27, 16  ;;  %v2864_v11 = vmax.f32 %v2841_v21, 0.0  ;;  %v2842_v15 = vadd.f32 %v7858_v22, %v10399_v49 }
 0x29b   :  { %v3442_v5 = vshrl.u32 %v3382_v18, 16  ;;  %v3445_v59 = vshll.u32 %v3382_v18, 16  ;;  %v2862_v2 = vmax.f32 %v2839_v35, 0.0  ;;  %v3597_v57 = vor.u32 %v3596_v31, %v3592_v30  ;;  %v3528_v21 = vld [vmem:[#allocation2 + $0x60] sm:$0x1]  ;;  %vm12022_vm4 = vmmov %vm12011_vm1 }
 0x29c   :  { %v3453_v3 = vrot.slane %v3451_v56, 2  ;;  %v3456_v47 = vrot.slane %v3454_v13, 3  ;;  %v3371_v38 = vmul.f32 %v10484_v51, %v2864_v11  ;;  %v2865_v50 = vmax.f32 %v2842_v15, 0.0  ;;  %v8679_v13 = vld [vmem:[%s11747_s3 + $0x8] sm:$0xff]  }
 0x29d   :  { %v3444_v8 = vrot.slane %v3442_v5, 2  ;;  %v3447_v0 = vrot.slane %v3445_v59, 3  ;;  %v3369_v54 = vmul.f32 %v10496_v44, %v2862_v2  ;;  %vm12005_vm13 = vsmask.f32 7424  ;;  %v7861_v22 = vpop.f32.mrb[52].mxu0 }
 0x29e   :  { %v3602_v27 = vsel %vm12005_vm13, %v3597_v57, %v10637_v40  ;;  %v10689_v30 = vor.u32 %v3456_v47, %v3453_v3  ;;  %v3372_v63 = vmul.f32 %v10563_v61, %v2865_v50  ;;  %v2840_v31 = vadd.f32 %v10399_v49, %v2767_v29  ;;  %vm12008_vm12 = vmmov %vm12005_vm13  ;;  %v2780_v29 = vpop.f32.mrb[53].mxu0 }
 0x29f   :  { %7879 = vmatprep.mubr.bf16.mxu1 %v3602_v27  ;;  %v3609_v18 = vrot.slane %v3607_v1, 1  ;;  %v3448_v35 = vor.u32 %v3447_v0, %v3444_v8  ;;  %v3615_v40 = vshll.u32 %v10644_v14, 16  ;;  %v3619_v56 = vshrl.u32 %v10644_v14, 16  ;;  %v8742_v0 = vld [vmem:[%s11747_s3] sm:$0xff]   ;;  %vm12015_vm0 = vmmov %vm12008_vm12 }
 0x2a0   :  { %v3623_v53 = vshll.u32 %v10668_v23, 16  ;;  %v3385_v11 = vpack.c.bf16 %v3372_v63, %v3371_v38  ;;  %v2863_v15 = vmax.f32 %v2840_v31, 0.0  ;;  %v2816_v5 = vadd.f32 %v7861_v22, %v10318_v26  ;;  %v8680_v31 = vld [vmem:[%s11747_s3 + $0x10] sm:$0xff]   ;;  %vm12017_vm2 = vmmov %vm12015_vm0 }
 0x2a1   :  { %vm3525_vm11 = vcmask 1040384   ;;  %vm3526_vm15 = vsmask.f32 256  ;;  %v3610_v1 = vsel %vm12008_vm12, %v3605_v32, %v3609_v18  ;;  %v10710_v2 = vsel %vm12011_vm1, %v3439_v24, %v3448_v35  ;;  %v7862_v32 = vpop.f32.mrb[54].mxu0  ;;  %vm12023_vm7 = vmmov %vm12015_vm0 }
 0x2a2   :  { %v10714_v57 = vsel %vm12012_vm8, %v3448_v35, %v10689_v30  ;;  %7880 = vmatmul.mubr.bf16.vlgmr.msra.gmra.mrb[0].mxu1 %v3610_v1  ;;  %v2814_v26 = vadd.f32 %v2780_v29, %v10331_v28  ;;  %v3613_v3 = vor.u32 %v3611_v19, %v3609_v18  ;;  %3519 = vst [vmem:[#allocation2 + $0x30] sm:$0xff] %v10710_v2  ;;  %v3469_v47 = vshrl.u32 %v3385_v11, 16  ;;  %v2783_v8 = vpop.f32.mrb[55].mxu0  ;;  %vm10756_vm3 = vmand %vm3525_vm11, %vm3526_vm15 }
 0x2a3   :  { %3520 = vst [vmem:[#allocation2 + $0x38] sm:$0xff] %v10714_v57  ;;  %v3472_v38 = vshll.u32 %v3385_v11, 16  ;;  %v3370_v50 = vmul.f32 %v10597_v58, %v2863_v15  ;;  %v2845_v24 = vadd.f32 %v10399_v49, %v2816_v5  ;;  %7904 = vmatpush3.bf16.msra.mxu1 %v8742_v0  ;;  %v3617_v27 = vrot.slane %v3615_v40, 1  ;;  %vm12024_vm6 = vmmov %vm12015_vm0 }
 0x2a4   :  { %v2843_v28 = vadd.f32 %v10399_v49, %v2814_v26  ;;  %v2815_v19 = vadd.f32 %v2783_v8, %v10366_v25  ;;  %v3625_v63 = vrot.slane %v3623_v53, 1  ;;  %7905 = vmatprep.subr.bf16.mxu1 %v8679_v13  ;;  %v3471_v18 = vrot.slane %v3469_v47, 2  ;;  %vm12025_vm13 = vmmov %vm12015_vm0 }
 0x2a5   :  { %v3474_v35 = vrot.slane %v3472_v38, 3  ;;  %v3384_v22 = vpack.c.bf16 %v3370_v50, %v3369_v54  ;;  %v2868_v40 = vmax.f32 %v2845_v24, 0.0  ;;  %v3618_v25 = vsel %vm12015_vm0, %v3613_v3, %v3617_v27  ;;  %vm12027_vm11 = vmmov %vm12011_vm1 }
 0x2a6   :  { %v2866_v11 = vmax.f32 %v2843_v28, 0.0  ;;  %v2844_v52 = vadd.f32 %v10399_v49, %v2815_v19  ;;  %v3621_v15 = vor.u32 %v3619_v56, %v3617_v27  ;;  %7883 = vmatprep.mubr.bf16.mxu1 %v3618_v25  ;;  %v10743_v53 = vsel %vm10730_vm14, 1.0, %v8744_v45  ;;  %v8681_v49 = vld [vmem:[%s11747_s3 + $0x18] sm:$0xff]   ;;  %vm12028_vm15 = vmmov %vm12015_vm0 }
 0x2a7   :  { %v3460_v5 = vshrl.u32 %v3384_v22, 16  ;;  %v3463_v1 = vshll.u32 %v3384_v22, 16  ;;  %v3375_v29 = vmul.f32 %v10623_v60, %v2868_v40  ;;  %12016 = vst [vmem:[#allocation25_spill] sm:$0xff] %v10743_v53  ;;  %7906 = vmatpush3.bf16.msra.mxu1 %v8679_v13  ;;  %v3475_v59 = vor.u32 %v3474_v35, %v3471_v18  ;;  %v8682_v40 = vld [vmem:[%s11747_s3 + $0x20] sm:$0xff]   ;;  %vm12029_vm12 = vmmov %vm12015_vm0 }
 0x2a8   :  { %v2867_v54 = vmax.f32 %v2844_v52, 0.0  ;;  %v3626_v26 = vsel %vm12017_vm2, %v3621_v15, %v3625_v63  ;;  %v3627_v32 = vshrl.u32 %v10668_v23, 16  ;;  %7907 = vmatprep.subr.bf16.mxu1 %v8680_v31  ;;  %v3631_v38 = vshll.u32 %v10671_v55, 16  ;;  %vm12030_vm5 = vmmov %vm12015_vm0 }
 0x2a9   :  { %v3462_v56 = vrot.slane %v3460_v5, 2  ;;  %v3465_v3 = vrot.slane %v3463_v1, 3  ;;  %v3387_v47 = vpack.c.bf16 %v3375_v29, %v3375_v29  ;;  %v3373_v45 = vmul.f32 %v10626_v6, %v2866_v11  ;;  %vm12032_vm8 = vmmov %vm12015_vm0 }
 0x2aa   :  { %v3374_v13 = vmul.f32 %v10743_v53, %v2867_v54  ;;  %7884 = vmatmul.mubr.bf16.gmra.mrb[4].mxu1 %v3626_v26  ;;  %v3629_v50 = vor.u32 %v3627_v32, %v3625_v63  ;;  %v3639_v24 = vshll.u32 %v10710_v2, 16  ;;  %v3633_v27 = vrot.slane %v3631_v38, 1 }
 0x2ab   :  { %v3466_v8 = vor.u32 %v3465_v3, %v3462_v56  ;;  %v3487_v0 = vshrl.u32 %v3387_v47, 16  ;;  %v3490_v28 = vshll.u32 %v3387_v47, 16  ;;  %7908 = vmatpush3.bf16.msra.mxu1 %v8680_v31  ;;  %v12018_v19 = vmov 0  ;;  %v8683_v47 = vld [vmem:[%s11747_s3 + $0x28] sm:$0xff]  }
 0x2ac   :  { %v12019_v19 = vsel %vm10756_vm3, 4294967295, %v12018_v19  ;;  %v3386_v18 = vpack.c.bf16 %v3374_v13, %v3373_v45  ;;  %v3635_v35 = vshrl.u32 %v10671_v55, 16  ;;  %v3641_v22 = vrot.slane %v3639_v24, 1  ;;  %7909 = vmatprep.subr.bf16.mxu1 %v8681_v49 }
 0x2ad   :  { %12020 = vst [vmem:[#allocation26_spill] sm:$0xff] %v12019_v19  ;;  %v3647_v63 = vshll.u32 %v10714_v57, 16  ;;  %v10767_v31 = vsel %vm12021_vm9, %v10689_v30, %v3466_v8  ;;  %v10770_v11 = vsel %vm12022_vm4, %v3466_v8, %v3475_v59  ;;  %v3489_v25 = vrot.slane %v3487_v0, 2 }
 0x2ae   :  { %v3643_v52 = vshrl.u32 %v10710_v2, 16  ;;  %3521 = vst [vmem:[#allocation2 + $0x40] sm:$0xff] %v10767_v31  ;;  %3522 = vst [vmem:[#allocation2 + $0x48] sm:$0xff] %v10770_v11  ;;  %v3492_v15 = vrot.slane %v3490_v28, 3  ;;  %v3478_v5 = vshrl.u32 %v3386_v18, 16  ;;  %v3481_v1 = vshll.u32 %v3386_v18, 16 }
 0x2af   :  { %v3634_v29 = vsel %vm12023_vm7, %v3629_v50, %v3633_v27  ;;  %v3529_v54 = vsel %vm10756_vm3, %v3489_v25, %v3528_v21  ;;  %v3637_v30 = vor.u32 %v3635_v35, %v3633_v27  ;;  %7910 = vmatpush3.bf16.msra.mxu1 %v8681_v49  ;;  %v3649_v3 = vrot.slane %v3647_v63, 1  ;;  %v8684_v21 = vld [vmem:[%s11747_s3 + $0x30] sm:$0xff]  }
 0x2b0   :  { %7887 = vmatprep.mubr.bf16.mxu1 %v3634_v29  ;;  %v3645_v26 = vor.u32 %v3643_v52, %v3641_v22  ;;  %3530 = vst [vmem:[#allocation2 + $0x60] sm:$0x1] %v3529_v54  ;;  %v3480_v32 = vrot.slane %v3478_v5, 2  ;;  %v3483_v56 = vrot.slane %v3481_v1, 3  ;;  %7911 = vmatprep.subr.bf16.mxu1 %v8682_v40  ;;  %v3655_v45 = vshll.u32 %v10767_v31, 16  ;;  %v8686_v54 = vld [vmem:[%s11747_s3 + $0x80] sm:$0xff]  }
 0x2b1   :  { %v3642_v38 = vsel %vm12024_vm6, %v3637_v30, %v3641_v22  ;;  %v3493_v13 = vor.u32 %v3492_v15, %v3489_v25  ;;  %v3659_v28 = vshrl.u32 %v10767_v31, 16  ;;  %v3663_v27 = vshll.u32 %v10770_v11, 16 }
 0x2b2   :  { %v3484_v50 = vor.u32 %v3483_v56, %v3480_v32  ;;  %7888 = vmatmul.mubr.bf16.gmra.mrb[8].mxu1 %v3642_v38  ;;  %v3650_v24 = vsel %vm12025_vm13, %v3645_v26, %v3649_v3  ;;  %v3657_v49 = vrot.slane %v3655_v45, 1  ;;  %v3651_v18 = vshrl.u32 %v10714_v57, 16 }
 0x2b3   :  { %7891 = vmatprep.mubr.bf16.mxu1 %v3650_v24  ;;  %7912 = vmatpush3.bf16.msra.mxu1 %v8682_v40  ;;  %v3665_v63 = vrot.slane %v3663_v27, 1  ;;  %v8685_v40 = vld [vmem:[%s11747_s3 + $0x38] sm:$0xff]   ;;  %v3667_v15 = vshrl.u32 %v10770_v11, 16  ;;  %vm12031_vm1 = vcmask 1046528   ;;  %vm4335_vm14 = vcmask 1042432  }
 0x2b4   :  { %v10785_v8 = vsel %vm12026_vm10, %v3475_v59, %v3484_v50  ;;  %v10788_v0 = vsel %vm12027_vm11, %v3484_v50, %v3493_v13  ;;  %7913 = vmatprep.subr.bf16.mxu1 %v8683_v47  ;;  %v3661_v35 = vor.u32 %v3659_v28, %v3657_v49  ;;  %v3653_v22 = vor.u32 %v3651_v18, %v3649_v3  ;;  %v8687_v18 = vld [vmem:[%s11747_s3 + $0x88] sm:$0xff]  }
 0x2b5   :  { %3524 = vst [vmem:[#allocation2 + $0x58] sm:$0xff] %v10788_v0  ;;  %v10798_v59 = vshll.u32 %v10785_v8, 16  ;;  %v3669_v1 = vor.u32 %v3667_v15, %v3665_v63  ;;  %v10813_v30 = vshrl.u32 %v10785_v8, 16  ;;  %v11759_v32 = vrot.slane %v10785_v8, 1 }
 0x2b6   :  { %v3658_v25 = vsel %vm12028_vm15, %v3653_v22, %v3657_v49  ;;  %v3666_v52 = vsel %vm12029_vm12, %v3661_v35, %v3665_v63  ;;  %v11757_v13 = vrot.slane %v10785_v8, 5  ;;  %v11756_v50 = vrot.slane %v10788_v0, 5 }
 0x2b7   :  { %7914 = vmatpush3.bf16.msra.mxu1 %v8683_v47  ;;  %v3673_v5 = vrot.slane %v10798_v59, 1  ;;  %v4696_v35 = vrot.slane %v10798_v59, 6  ;;  %v11761_v22 = vshrl.u32 %v10788_v0, 16  ;;  %v11760_v63 = vshll.u32 %v10788_v0, 16 }
 0x2b8   :  { %7915 = vmatprep.subr.bf16.mxu1 %v8684_v21  ;;  %v10835_v49 = vsel %vm4335_vm14, %v11757_v13, %v11756_v50  ;;  %vm4600_vm0 = vsmask.f32 2304  ;;  %vm3532_vm2 = vcmask 1041408   ;;  %vm12033_vm9 = vcmask 1045504  }
 0x2b9   :  { %v3674_v3 = vsel %vm12030_vm5, %v3669_v1, %v3673_v5  ;;  %v3677_v47 = vor.u32 %v10813_v30, %v3673_v5  ;;  %v10859_v5 = vld [vmem:[#allocation2 + $0x10] sm:$0xff]  ;;  %v10861_v1 = vld [vmem:[#allocation2 + $0x18] sm:$0xff]  ;;  %vm12034_vm4 = vmmov %vm12033_vm9  ;;  %v5229_v58 = vrot.slane %v10785_v8, 2  ;;  %vm12054_vm5 = vsmask.f32 5376 }
 0x2ba   :  { %7892 = vmatmul.mubr.bf16.gmra.mrb[12].mxu1 %v3658_v25  ;;  %v4702_v25 = vrot.slane %v11761_v22, 5  ;;  %v11768_v50 = vrot.slane %v10859_v5, 2  ;;  %v5215_v13 = vrot.slane %v10861_v1, 2  ;;  %vm12035_vm7 = vmmov %vm12034_vm4  ;;  %v12045_v44 = vshll.u32 %v10861_v1, 16 }
 0x2bb   :  { %7895 = vmatprep.mubr.bf16.mxu1 %v3666_v52  ;;  %7916 = vmatpush3.bf16.msra.mxu1 %v8684_v21  ;;  %v4693_v21 = vrot.slane %v10813_v30, 5  ;;  %v8688_v52 = vld [vmem:[%s11747_s3 + $0x90] sm:$0xff]   ;;  %vm12036_vm6 = vmmov %vm12034_vm4  ;;  %v12064_v10 = vshll.u32 %v10788_v0, 16  ;;  %v5771_v9 = vrot.slane %v10788_v0, 3  ;;  %v4081_v48 = vrot.slane %v10601_v42, 1 }
 0x2bc   :  { %v10807_v29 = vld [vmem:[#allocation2 + $0x58] sm:$0xf]  ;;  %7917 = vmatprep.subr.bf16.mxu1 %v8685_v40  ;;  %vm12037_vm13 = vmmov %vm12034_vm4 }
 0x2bd   :  { %v3679_v26 = vshll.u32 %v10807_v29, 16  ;;  %v11758_v56 = vrot.slane %v10807_v29, 1  ;;  %v3683_v28 = vshrl.u32 %v10807_v29, 16  ;;  %vm12038_vm10 = vmmov %vm12034_vm4  ;;  %v3556_v37 = vld [vmem:[#allocation2 + $0x58] sm:$0x7] }
 0x2be   :  { %vm12039_vm11 = vmmov %vm12034_vm4 }
 0x2bf   :  { %v3681_v38 = vrot.slane %v3679_v26, 1  ;;  %7918 = vmatpush3.bf16.msra.mxu1 %v8685_v40  ;;  %v10825_v45 = vsel %vm12031_vm1, %v11759_v32, %v11758_v56  ;;  %v10847_v40 = vor.u32 %v4696_v35, %v4693_v21  ;;  %v10863_v26 = vld [vmem:[#allocation2 + $0x20] sm:$0xff]  ;;  %v10891_v32 = vld [vmem:[#allocation2 + $0x48] sm:$0xff]  ;;  %v10916_v21 = vsel %vm12033_vm9, %v11768_v50, %v5215_v13  ;;  %vm12042_vm15 = vmmov %vm12034_vm4 }
 0x2c0   :  { %7943 = vmatprep.subr.bf16.mxu1 %v8686_v54  ;;  %v5217_v56 = vrot.slane %v10863_v26, 2  ;;  %v8690_v35 = vld [vmem:[%s11747_s3 + $0xa0] sm:$0xff]   ;;  %v5227_v19 = vrot.slane %v10891_v32, 2  ;;  %v12041_v50 = vshll.u32 %v10859_v5, 16  ;;  %vm12043_vm12 = vmmov %vm12034_vm4  ;;  %v12047_v12 = vshll.u32 %v10863_v26, 16 }
 0x2c1   :  { %v3682_v24 = vsel %vm12032_vm8, %v3677_v47, %v3681_v38  ;;  %v3685_v27 = vor.u32 %v3683_v28, %v3681_v38  ;;  %v8689_v47 = vld [vmem:[%s11747_s3 + $0x98] sm:$0xff]   ;;  %v10875_v38 = vld [vmem:[#allocation2 + $0x30] sm:$0xff]  ;;  %v11762_v28 = vrot.slane %v10788_v0, 6  ;;  %vm12056_vm1 = vmmov %vm12054_vm5 }
 0x2c2   :  { %7896 = vmatmul.mubr.bf16.gmra.mrb[16].mxu1 %v3674_v3  ;;  %v10865_v3 = vld [vmem:[#allocation2 + $0x28] sm:$0xff]  ;;  %v10951_v51 = vsel %vm12042_vm15, %v5227_v19, %v5229_v58  ;;  %v12051_v62 = vshll.u32 %v10875_v38, 16  ;;  %vm12057_vm8 = vmmov %vm12056_vm1 }
 0x2c3   :  { %7899 = vmatprep.mubr.bf16.mxu1 %v3682_v24  ;;  %v11763_v24 = vrot.slane %v10785_v8, 6  ;;  %v12048_v16 = vshrl.u32 %v10865_v3, 16  ;;  %vm12059_vm9 = vmmov %vm12056_vm1 }
 0x2c5   :  { %v5484_v43 = vrot.slane %v12048_v16, 2 }
 0x2ca   :  { %7900 = vmatmul.mubr.bf16.gmra.mrb[20].mxu1 %v3685_v27  ;;  %v10919_v27 = vsel %vm12034_vm4, %v5215_v13, %v5217_v56  ;;  %vm12062_vm4 = vmmov %vm12056_vm1 }
 0x2cb   :  { %7919 = vmatprep.mubr.bf16.mxu1 %v10653_v20  ;;  %v4705_v20 = vrot.slane %v11760_v63, 6  ;;  %v10898_v63 = vsel %vm3532_vm2, %v11763_v24, %v11762_v28  ;;  %v5221_v28 = vrot.slane %v10875_v38, 2 }
 0x2cd   :  { %v10857_v15 = vor.u32 %v4705_v20, %v4702_v25  ;;  %v10883_v25 = vld [vmem:[#allocation2 + $0x38] sm:$0xff]  ;;  %v10885_v20 = vld [vmem:[#allocation2 + $0x40] sm:$0xff] }
 0x2ce   :  { %v5223_v24 = vrot.slane %v10883_v25, 2  ;;  %v12052_v16 = vshrl.u32 %v10883_v25, 16 }
 0x2d0   :  { %v10929_v60 = vsel %vm12037_vm13, %v5221_v28, %v5223_v24  ;;  %v5492_v41 = vrot.slane %v12052_v16, 2  ;;  %vm12067_vm13 = vmmov %vm12056_vm1 }
 0x2d2   :  { %7920 = vmatmul.mubr.bf16.vlgmr.msra.gmra.mrb[0].mxu1 %v10601_v42 }
 0x2d3   :  { %7923 = vmatprep.mubr.bf16.mxu1 %v10641_v17  ;;  %7944 = vmatpush3.bf16.msra.mxu1 %v8686_v54  ;;  %v10870_v54 = vsel %vm4600_vm0, %v10847_v40, %v10857_v15 }
 0x2d4   :  { %7945 = vmatprep.subr.bf16.mxu1 %v8687_v18 }
 0x2d7   :  { %7946 = vmatpush3.bf16.msra.mxu1 %v8687_v18  ;;  %v5219_v18 = vrot.slane %v10865_v3, 2 }
 0x2d8   :  { %7947 = vmatprep.subr.bf16.mxu1 %v8688_v52 }
 0x2d9   :  { %v10923_v53 = vsel %vm12035_vm7, %v5217_v56, %v5219_v18  ;;  %v10926_v6 = vsel %vm12036_vm6, %v5219_v18, %v5221_v28  ;;  %v11775_v56 = vrot.slane %v10788_v0, 2  ;;  %v8691_v18 = vld [vmem:[%s11747_s3 + $0xa8] sm:$0xff]   ;;  %v12044_v28 = vshrl.u32 %v10861_v1, 16  ;;  %vm12065_vm7 = vmmov %vm12056_vm1 }
 0x2da   :  { %7924 = vmatmul.mubr.bf16.gmra.mrb[4].mxu1 %v10644_v14  ;;  %vm12066_vm6 = vmmov %vm12056_vm1 }
 0x2db   :  { %7927 = vmatprep.mubr.bf16.mxu1 %v10668_v23  ;;  %7948 = vmatpush3.bf16.msra.mxu1 %v8688_v52  ;;  %v5225_v52 = vrot.slane %v10885_v20, 2  ;;  %v10956_v7 = vsel %vm12043_vm12, %v5229_v58, %v11775_v56  ;;  %v5476_v46 = vrot.slane %v12044_v28, 2  ;;  %v12046_v58 = vshrl.u32 %v10863_v26, 16 }
 0x2dc   :  { %7949 = vmatprep.subr.bf16.mxu1 %v8689_v47  ;;  %v5481_v28 = vrot.slane %v12047_v12, 3  ;;  %v5489_v12 = vrot.slane %v12051_v62, 3 }
 0x2dd   :  { %v10932_v22 = vsel %vm12038_vm10, %v5223_v24, %v5225_v52  ;;  %v10936_v13 = vsel %vm12039_vm11, %v5225_v52, %v5227_v19  ;;  %v5473_v52 = vrot.slane %v12041_v50, 3  ;;  %v5477_v19 = vrot.slane %v12045_v44, 3  ;;  %v8692_v44 = vld [vmem:[%s11747_s3 + $0xb0] sm:$0xff]   ;;  %vm12068_vm10 = vmmov %vm12056_vm1 }
 0x2de   :  { %v5480_v56 = vrot.slane %v12046_v58, 2  ;;  %vm12069_vm11 = vcmask 1044480  }
 0x2df   :  { %7950 = vmatpush3.bf16.msra.mxu1 %v8689_v47  ;;  %v12040_v47 = vshrl.u32 %v10859_v5, 16  ;;  %vm12070_vm15 = vmmov %vm12069_vm11 }
 0x2e0   :  { %7951 = vmatprep.subr.bf16.mxu1 %v8690_v35  ;;  %v5482_v4 = vor.u32 %v5481_v28, %v5480_v56  ;;  %v12058_v56 = vshll.u32 %v10885_v20, 16  ;;  %v8693_v28 = vld [vmem:[%s11747_s3 + $0xb8] sm:$0xff]   ;;  %vm12071_vm12 = vmmov %vm12069_vm11 }
 0x2e1   :  { %v5472_v61 = vrot.slane %v12040_v47, 2  ;;  %v12049_v47 = vshll.u32 %v10865_v3, 16 }
 0x2e2   :  { %7928 = vmatmul.mubr.bf16.gmra.mrb[8].mxu1 %v10671_v55 }
 0x2e3   :  { %v10963_v50 = vor.u32 %v5473_v52, %v5472_v61  ;;  %7931 = vmatprep.mubr.bf16.mxu1 %v10710_v2  ;;  %7952 = vmatpush3.bf16.msra.mxu1 %v8690_v35  ;;  %v5485_v24 = vrot.slane %v12049_v47, 3  ;;  %v5478_v35 = vor.u32 %v5477_v19, %v5476_v46  ;;  %v12050_v52 = vshrl.u32 %v10875_v38, 16 }
 0x2e4   :  { %7953 = vmatprep.subr.bf16.mxu1 %v8691_v18  ;;  %v12053_v47 = vshll.u32 %v10883_v25, 16  ;;  %v12055_v46 = vshrl.u32 %v10885_v20, 16 }
 0x2e5   :  { %v5488_v58 = vrot.slane %v12050_v52, 2  ;;  %v5486_v33 = vor.u32 %v5485_v24, %v5484_v43  ;;  %v10990_v34 = vsel %vm12054_vm5, %v10963_v50, %v5478_v35  ;;  %v10995_v52 = vsel %vm12056_vm1, %v5478_v35, %v5482_v4  ;;  %vm12072_vm5 = vmmov %vm12069_vm11 }
 0x2e6   :  { %v5493_v36 = vrot.slane %v12053_v47, 3  ;;  %v5496_v19 = vrot.slane %v12055_v46, 2  ;;  %v5497_v24 = vrot.slane %v12058_v56, 3  ;;  %v12061_v35 = vshll.u32 %v10891_v32, 16  ;;  %vm12073_vm1 = vmmov %vm12072_vm5 }
 0x2e7   :  { %v5490_v61 = vor.u32 %v5489_v12, %v5488_v58  ;;  %7954 = vmatpush3.bf16.msra.mxu1 %v8691_v18  ;;  %v10998_v62 = vsel %vm12057_vm8, %v5482_v4, %v5486_v33  ;;  %v12060_v18 = vshrl.u32 %v10891_v32, 16  ;;  %v5504_v4 = vrot.slane %v10813_v30, 2  ;;  %vm12074_vm8 = vmmov %vm12073_vm1 }
 0x2e8   :  { %v5494_v43 = vor.u32 %v5493_v36, %v5492_v41  ;;  %7955 = vmatprep.subr.bf16.mxu1 %v8692_v44  ;;  %v5501_v16 = vrot.slane %v12061_v35, 3  ;;  %v5498_v41 = vor.u32 %v5497_v24, %v5496_v19  ;;  %v5505_v47 = vrot.slane %v10798_v59, 3  ;;  %v8694_v59 = vld [vmem:[%s11747_s3 + $0xc0] sm:$0xff]  }
 0x2e9   :  { %v11006_v58 = vsel %vm12059_vm9, %v5486_v33, %v5490_v61  ;;  %v5500_v12 = vrot.slane %v12060_v18, 2  ;;  %v12063_v46 = vshrl.u32 %v10788_v0, 16  ;;  %v5509_v18 = vrot.slane %v12064_v10, 3  ;;  %vm12076_vm9 = vmmov %vm12073_vm1 }
 0x2ea   :  { %v11014_v36 = vsel %vm12062_vm4, %v5490_v61, %v5494_v43  ;;  %7932 = vmatmul.mubr.bf16.gmra.mrb[12].mxu1 %v10714_v57  ;;  %v11024_v30 = vsel %vm12065_vm7, %v5494_v43, %v5498_v41  ;;  %v5506_v61 = vor.u32 %v5505_v47, %v5504_v4  ;;  %v11786_v19 = vrot.slane %v10859_v5, 3  ;;  %vm12078_vm4 = vmmov %vm12073_vm1 }
 0x2eb   :  { %v5508_v56 = vrot.slane %v12063_v46, 2  ;;  %v5502_v33 = vor.u32 %v5501_v16, %v5500_v12  ;;  %7935 = vmatprep.mubr.bf16.mxu1 %v10767_v31  ;;  %7956 = vmatpush3.bf16.msra.mxu1 %v8692_v44  ;;  %v5755_v44 = vrot.slane %v10861_v1, 3  ;;  %v5757_v43 = vrot.slane %v10863_v26, 3  ;;  %vm12080_vm7 = vmmov %vm12073_vm1 }
 0x2ec   :  { %7957 = vmatprep.subr.bf16.mxu1 %v8693_v28  ;;  %v5759_v16 = vrot.slane %v10865_v3, 3  ;;  %v5761_v4 = vrot.slane %v10875_v38, 3  ;;  %v5763_v46 = vrot.slane %v10883_v25, 3 }
 0x2ed   :  { %v11031_v24 = vsel %vm12066_vm6, %v5498_v41, %v5502_v33  ;;  %v11033_v12 = vor.u32 %v5509_v18, %v5508_v56  ;;  %v11036_v10 = vsel %vm12067_vm13, %v5502_v33, %v5506_v61  ;;  %v11049_v41 = vsel %vm12069_vm11, %v11786_v19, %v5755_v44 }
 0x2ee   :  { %v11052_v47 = vsel %vm12070_vm15, %v5755_v44, %v5757_v43  ;;  %v5765_v56 = vrot.slane %v10885_v20, 3  ;;  %v11057_v33 = vsel %vm12071_vm12, %v5757_v43, %v5759_v16  ;;  %v11060_v18 = vsel %vm12072_vm5, %v5759_v16, %v5761_v4  ;;  %v4050_v16 = vld [vmem:[#allocation2] sm:$0xfe] }
 0x2ef   :  { %v11042_v35 = vsel %vm12068_vm10, %v5506_v61, %v11033_v12  ;;  %7958 = vmatpush3.bf16.msra.mxu1 %v8693_v28  ;;  %v5767_v28 = vrot.slane %v10891_v32, 3  ;;  %v11064_v61 = vsel %vm12073_vm1, %v5761_v4, %v5763_v46  ;;  %v5769_v44 = vrot.slane %v10785_v8, 3 }
 0x2f0   :  { %7983 = vmatprep.subr.bf16.mxu1 %v8694_v59  ;;  %v11067_v19 = vsel %vm12074_vm8, %v5763_v46, %v5765_v56  ;;  %v4080_v46 = vrot.slane %v4050_v16, 1  ;;  %vm12081_vm6 = vcmask 1046528   ;;  %v4089_v16 = vrot.slane %v10671_v55, 1 }
 0x2f1   :  { %12075 = vst [vmem:[#allocation27_spill] sm:$0xff] %v11067_v19  ;;  %v11073_v43 = vsel %vm12076_vm9, %v5765_v56, %v5767_v28  ;;  %v11077_v39 = vsel %vm12078_vm4, %v5767_v28, %v5769_v44  ;;  %v11082_v4 = vsel %vm12080_vm7, %v5769_v44, %v5771_v9  ;;  %v4083_v56 = vrot.slane %v10641_v17, 1  ;;  %v8695_v28 = vld [vmem:[%s11747_s3 + $0xc8] sm:$0xff]   ;;  %vm12082_vm13 = vmmov %vm12081_vm6 }
 0x2f2   :  { %7936 = vmatmul.mubr.bf16.gmra.mrb[16].mxu1 %v10770_v11  ;;  %12077 = vst [vmem:[#allocation28_spill] sm:$0xff] %v11073_v43  ;;  %12079 = vst [vmem:[#allocation29_spill] sm:$0xff] %v11077_v39  ;;  %v4082_v19 = vsel %vm12081_vm6, %v4080_v46, %v4081_v48  ;;  %v4085_v43 = vrot.slane %v10644_v14, 1  ;;  %v8698_v46 = vld [vmem:[%s11747_s3 + $0xe0] sm:$0xff]   ;;  %vm12117_vm4 = vsmask.f32 5376 }
 0x2f3   :  { %7939 = vmatprep.mubr.bf16.mxu1 %v10785_v8  ;;  %v4084_v39 = vsel %vm12082_vm13, %v4081_v48, %v4083_v56  ;;  %vm12083_vm10 = vmmov %vm12081_vm6  ;;  %v8697_v48 = vld [vmem:[%s11747_s3 + $0xd8] sm:$0xff]  }
 0x2f4   :  { %v4086_v44 = vsel %vm12083_vm10, %v4083_v56, %v4085_v43  ;;  %vm12084_vm11 = vmmov %vm12081_vm6  ;;  %v4091_v56 = vrot.slane %v10710_v2, 1  ;;  %vm3533_vm10 = vsmask.f32 1280 }
 0x2f5   :  { %vm12085_vm15 = vmmov %vm12081_vm6 }
 0x2f6   :  { %vm12086_vm12 = vmmov %vm12081_vm6 }
 0x2f7   :  { %vm12087_vm5 = vmmov %vm12081_vm6  ;;  %vm12120_vm6 = vcmask 1044480  }
 0x2f8   :  { %vm12088_vm1 = vmmov %vm12087_vm5 }
 0x2f9   :  { %vm12089_vm8 = vmmov %vm12088_vm1 }
 0x2fa   :  { %7940 = vmatmul.mubr.bf16.gmra.mrb[24].mxu1 %v3556_v37  ;;  %v8696_v37 = vld [vmem:[%s11747_s3 + $0xd0] sm:$0xff]   ;;  %vm12091_vm9 = vmmov %vm12088_vm1 }
 0x2fb   :  { %7959 = vmatprep.mubr.bf16.mxu1 %v4082_v19  ;;  %v4087_v19 = vrot.slane %v10668_v23, 1  ;;  %vm12118_vm7 = vmmov %vm12117_vm4 }
 0x2fc   :  { %vm12124_vm13 = vmmov %vm12120_vm6 }
 0x302   :  { %7960 = vmatmul.mubr.bf16.vlgmr.msra.gmra.mrb[0].mxu1 %v4084_v39  ;;  %v4088_v39 = vsel %vm12084_vm11, %v4085_v43, %v4087_v19  ;;  %v8699_v43 = vld [vmem:[%s11747_s3 + $0xe8] sm:$0xff]   ;;  %vm3534_vm11 = vmand %vm3532_vm2, %vm3533_vm10 }
 0x303   :  { %7963 = vmatprep.mubr.bf16.mxu1 %v4086_v44  ;;  %7984 = vmatpush3.bf16.msra.mxu1 %v8694_v59  ;;  %v4090_v59 = vsel %vm12085_vm15, %v4087_v19, %v4089_v16  ;;  %v4092_v44 = vsel %vm12086_vm12, %v4089_v16, %v4091_v56  ;;  %v8700_v19 = vld [vmem:[%s11747_s3 + $0xf0] sm:$0xff]   ;;  %v8701_v16 = vld [vmem:[%s11747_s3 + $0xf8] sm:$0xff]  }
 0x304   :  { %7985 = vmatprep.subr.bf16.mxu1 %v8695_v28 }
 0x307   :  { %7986 = vmatpush3.bf16.msra.mxu1 %v8695_v28  ;;  %v4093_v28 = vrot.slane %v10714_v57, 1 }
 0x308   :  { %7987 = vmatprep.subr.bf16.mxu1 %v8696_v37 }
 0x30a   :  { %7964 = vmatmul.mubr.bf16.gmra.mrb[4].mxu1 %v4088_v39  ;;  %v4095_v39 = vrot.slane %v10767_v31, 1 }
 0x30b   :  { %7967 = vmatprep.mubr.bf16.mxu1 %v4090_v59  ;;  %7988 = vmatpush3.bf16.msra.mxu1 %v8696_v37  ;;  %v4094_v37 = vsel %vm12087_vm5, %v4091_v56, %v4093_v28  ;;  %v8702_v56 = vld [vmem:[%s11747_s3 + $0x100] sm:$0xff]  }
 0x30c   :  { %7989 = vmatprep.subr.bf16.mxu1 %v8697_v48  ;;  %v4096_v59 = vsel %vm12088_vm1, %v4093_v28, %v4095_v39  ;;  %v4314_v28 = vld [vmem:[#allocation2] sm:$0xe0] }
 0x30f   :  { %7990 = vmatpush3.bf16.msra.mxu1 %v8697_v48  ;;  %v4097_v48 = vrot.slane %v10770_v11, 1 }
 0x310   :  { %7991 = vmatprep.subr.bf16.mxu1 %v8698_v46 }
 0x312   :  { %7968 = vmatmul.mubr.bf16.gmra.mrb[8].mxu1 %v4092_v44 }
 0x313   :  { %7971 = vmatprep.mubr.bf16.mxu1 %v4094_v37  ;;  %7992 = vmatpush3.bf16.msra.mxu1 %v8698_v46  ;;  %v4098_v46 = vsel %vm12089_vm8, %v4095_v39, %v4097_v48  ;;  %v4336_v37 = vrot.slane %v4314_v28, 5  ;;  %v4337_v39 = vrot.slane %v10601_v42, 5  ;;  %v8704_v42 = vld [vmem:[%s11747_s3 + $0x110] sm:$0xff]   ;;  %v4349_v28 = vrot.slane %v10714_v57, 5 }
 0x314   :  { %7993 = vmatprep.subr.bf16.mxu1 %v8699_v43  ;;  %v4351_v57 = vrot.slane %v10767_v31, 5  ;;  %v8710_v31 = vld [vmem:[%s11747_s3 + $0x140] sm:$0xff]  }
 0x317   :  { %7994 = vmatpush3.bf16.msra.mxu1 %v8699_v43  ;;  %v12090_v43 = vrot.slane %v10785_v8, 1 }
 0x318   :  { %7995 = vmatprep.subr.bf16.mxu1 %v8700_v19 }
 0x319   :  { %v4100_v44 = vsel %vm12091_vm9, %v4097_v48, %v12090_v43  ;;  %v8703_v48 = vld [vmem:[%s11747_s3 + $0x108] sm:$0xff]  }
 0x31a   :  { %7972 = vmatmul.mubr.bf16.gmra.mrb[12].mxu1 %v4096_v59  ;;  %v4338_v59 = vsel %vm4335_vm14, %v4336_v37, %v4337_v39  ;;  %v8707_v37 = vld [vmem:[%s11747_s3 + $0x128] sm:$0xff]  }
 0x31b   :  { %7975 = vmatprep.mubr.bf16.mxu1 %v4098_v46  ;;  %7996 = vmatpush3.bf16.msra.mxu1 %v8700_v19  ;;  %v12092_v19 = vrot.slane %v10807_v29, 1  ;;  %v4341_v46 = vrot.slane %v10644_v14, 5  ;;  %v4345_v14 = vrot.slane %v10671_v55, 5  ;;  %v8705_v29 = vld [vmem:[%s11747_s3 + $0x118] sm:$0xff]   ;;  %v4347_v55 = vrot.slane %v10710_v2, 5  ;;  %v8708_v2 = vld [vmem:[%s11747_s3 + $0x130] sm:$0xff]  }
 0x31c   :  { %7997 = vmatprep.subr.bf16.mxu1 %v8701_v16 }
 0x31f   :  { %7998 = vmatpush3.bf16.msra.mxu1 %v8701_v16  ;;  %v4339_v16 = vrot.slane %v10641_v17, 5  ;;  %v4343_v17 = vrot.slane %v10668_v23, 5  ;;  %v8706_v23 = vld [vmem:[%s11747_s3 + $0x120] sm:$0xff]  }
 0x320   :  { %8023 = vmatprep.subr.bf16.mxu1 %v8702_v56 }
 0x321   :  { %v4342_v43 = vsel %vm4335_vm14, %v4339_v16, %v4341_v46 }
 0x322   :  { %7976 = vmatmul.mubr.bf16.gmra.mrb[16].mxu1 %v4100_v44  ;;  %v4344_v44 = vsel %vm4335_vm14, %v4341_v46, %v4343_v17  ;;  %v4352_v46 = vsel %vm4335_vm14, %v4349_v28, %v4351_v57 }
 0x323   :  { %7979 = vmatprep.mubr.bf16.mxu1 %v10825_v45  ;;  %v4340_v45 = vsel %vm4335_vm14, %v4337_v39, %v4339_v16  ;;  %v4348_v39 = vsel %vm4335_vm14, %v4345_v14, %v4347_v55  ;;  %v8709_v16 = vld [vmem:[%s11747_s3 + $0x138] sm:$0xff]  }
 0x32a   :  { %7980 = vmatmul.mubr.bf16.gmra.mrb[28].mxu1 %v12092_v19  ;;  %v4350_v19 = vsel %vm4335_vm14, %v4347_v55, %v4349_v28 }
 0x32b   :  { %7999 = vmatprep.mubr.bf16.mxu1 %v4338_v59  ;;  %v4353_v59 = vrot.slane %v10770_v11, 5 }
 0x332   :  { %8000 = vmatmul.mubr.bf16.vlgmr.msra.gmra.mrb[0].mxu1 %v4340_v45  ;;  %v4570_v45 = vld [vmem:[#allocation2] sm:$0xe0] }
 0x333   :  { %8003 = vmatprep.mubr.bf16.mxu1 %v4342_v43  ;;  %8024 = vmatpush3.bf16.msra.mxu1 %v8702_v56  ;;  %v4346_v56 = vsel %vm4335_vm14, %v4343_v17, %v4345_v14  ;;  %v11171_v43 = vld [vmem:[#allocation2 + $0x8] sm:$0xff]  ;;  %v4602_v11 = vshrl.u32 %v4570_v45, 16 }
 0x334   :  { %8025 = vmatprep.subr.bf16.mxu1 %v8703_v48  ;;  %v4610_v17 = vshrl.u32 %v11171_v43, 16  ;;  %v4613_v14 = vshll.u32 %v11171_v43, 16 }
 0x336   :  { %v4612_v55 = vrot.slane %v4610_v17, 5  ;;  %v4615_v28 = vrot.slane %v4613_v14, 6  ;;  %v8711_v14 = vld [vmem:[%s11747_s3 + $0x148] sm:$0xff]  }
 0x337   :  { %8026 = vmatpush3.bf16.msra.mxu1 %v8703_v48  ;;  %v4354_v48 = vsel %vm4335_vm14, %v4351_v57, %v4353_v59  ;;  %v12095_v57 = vshll.u32 %v10859_v5, 16 }
 0x338   :  { %8027 = vmatprep.subr.bf16.mxu1 %v8704_v42 }
 0x33a   :  { %8004 = vmatmul.mubr.bf16.gmra.mrb[4].mxu1 %v4344_v44 }
 0x33b   :  { %8007 = vmatprep.mubr.bf16.mxu1 %v4346_v56  ;;  %8028 = vmatpush3.bf16.msra.mxu1 %v8704_v42  ;;  %v4605_v42 = vshll.u32 %v4570_v45, 16  ;;  %v4604_v56 = vrot.slane %v4602_v11, 5  ;;  %v12098_v11 = vshll.u32 %v10861_v1, 16 }
 0x33c   :  { %8029 = vmatprep.subr.bf16.mxu1 %v8705_v29 }
 0x33f   :  { %8030 = vmatpush3.bf16.msra.mxu1 %v8705_v29  ;;  %v12093_v29 = vrot.slane %v10785_v8, 5 }
 0x340   :  { %8031 = vmatprep.subr.bf16.mxu1 %v8706_v23 }
 0x341   :  { %v4356_v44 = vsel %vm4335_vm14, %v4353_v59, %v12093_v29  ;;  %vm12114_vm14 = vcmask 1045504  }
 0x342   :  { %8008 = vmatmul.mubr.bf16.gmra.mrb[8].mxu1 %v4348_v39  ;;  %v4616_v39 = vor.u32 %v4615_v28, %v4612_v55 }
 0x343   :  { %8011 = vmatprep.mubr.bf16.mxu1 %v4350_v19  ;;  %8032 = vmatpush3.bf16.msra.mxu1 %v8706_v23  ;;  %v4607_v23 = vrot.slane %v4605_v42, 6  ;;  %v12094_v19 = vshrl.u32 %v10859_v5, 16  ;;  %v4633_v42 = vrot.slane %v12098_v11, 6 }
 0x344   :  { %8033 = vmatprep.subr.bf16.mxu1 %v8707_v37 }
 0x347   :  { %8034 = vmatpush3.bf16.msra.mxu1 %v8707_v37  ;;  %v4608_v37 = vor.u32 %v4607_v23, %v4604_v56  ;;  %v12100_v23 = vshll.u32 %v10863_v26, 16 }
 0x348   :  { %8035 = vmatprep.subr.bf16.mxu1 %v8708_v2 }
 0x349   :  { %v4617_v59 = vsel %vm4600_vm0, %v4608_v37, %v4616_v39  ;;  %v4642_v55 = vrot.slane %v12100_v23, 6  ;;  %v12101_v37 = vshrl.u32 %v10865_v3, 16 }
 0x34a   :  { %8012 = vmatmul.mubr.bf16.gmra.mrb[12].mxu1 %v4352_v46  ;;  %v12096_v46 = vrot.slane %v10788_v0, 5 }
 0x34b   :  { %8015 = vmatprep.mubr.bf16.mxu1 %v4354_v48  ;;  %8036 = vmatpush3.bf16.msra.mxu1 %v8708_v2  ;;  %v4621_v2 = vrot.slane %v12094_v19, 5  ;;  %v12097_v48 = vshrl.u32 %v10861_v1, 16  ;;  %v4648_v19 = vrot.slane %v12101_v37, 5 }
 0x34c   :  { %8037 = vmatprep.subr.bf16.mxu1 %v8709_v16 }
 0x34d   :  { %v4630_v45 = vrot.slane %v12097_v48, 5 }
 0x34f   :  { %8038 = vmatpush3.bf16.msra.mxu1 %v8709_v16  ;;  %v4624_v16 = vrot.slane %v12095_v57, 6  ;;  %v4634_v17 = vor.u32 %v4633_v42, %v4630_v45  ;;  %v12103_v45 = vshrl.u32 %v10875_v38, 16 }
 0x350   :  { %8063 = vmatprep.subr.bf16.mxu1 %v8710_v31 }
 0x351   :  { %v4657_v11 = vrot.slane %v12103_v45, 5 }
 0x352   :  { %8016 = vmatmul.mubr.bf16.gmra.mrb[16].mxu1 %v4356_v44  ;;  %v12099_v44 = vshrl.u32 %v10863_v26, 16 }
 0x353   :  { %8019 = vmatprep.mubr.bf16.mxu1 %v10835_v49  ;;  %v4625_v49 = vor.u32 %v4624_v16, %v4621_v2  ;;  %v12102_v2 = vshll.u32 %v10865_v3, 16 }
 0x354   :  { %v4639_v56 = vrot.slane %v12099_v44, 5 }
 0x355   :  { %v4626_v29 = vsel %vm4600_vm0, %v4616_v39, %v4625_v49  ;;  %v4635_v28 = vsel %vm4600_vm0, %v4625_v49, %v4634_v17  ;;  %v4651_v57 = vrot.slane %v12102_v2, 6  ;;  %v8712_v39 = vld [vmem:[%s11747_s3 + $0x150] sm:$0xff]  }
 0x356   :  { %v4643_v16 = vor.u32 %v4642_v55, %v4639_v56 }
 0x358   :  { %v4644_v48 = vsel %vm4600_vm0, %v4634_v17, %v4643_v16  ;;  %v8714_v17 = vld [vmem:[%s11747_s3 + $0x160] sm:$0xff]  }
 0x35a   :  { %8020 = vmatmul.mubr.bf16.gmra.mrb[32].mxu1 %v12096_v46  ;;  %v4652_v46 = vor.u32 %v4651_v57, %v4648_v19  ;;  %v12107_v19 = vshrl.u32 %v10885_v20, 16  ;;  %v12108_v57 = vshll.u32 %v10885_v20, 16 }
 0x35b   :  { %8039 = vmatprep.mubr.bf16.mxu1 %v4617_v59  ;;  %v8713_v59 = vld [vmem:[%s11747_s3 + $0x158] sm:$0xff]  }
 0x35c   :  { %v4653_v49 = vsel %vm4600_vm0, %v4643_v16, %v4652_v46  ;;  %v4675_v2 = vrot.slane %v12107_v19, 5  ;;  %v4956_v19 = vrot.slane %v11171_v43, 6 }
 0x362   :  { %8040 = vmatmul.mubr.bf16.vlgmr.msra.gmra.mrb[0].mxu1 %v4626_v29  ;;  %v12105_v29 = vshrl.u32 %v10883_v25, 16 }
 0x363   :  { %8043 = vmatprep.mubr.bf16.mxu1 %v4635_v28  ;;  %8064 = vmatpush3.bf16.msra.mxu1 %v8710_v31  ;;  %v12104_v31 = vshll.u32 %v10875_v38, 16  ;;  %v8715_v28 = vld [vmem:[%s11747_s3 + $0x168] sm:$0xff]  }
 0x364   :  { %8065 = vmatprep.subr.bf16.mxu1 %v8711_v14  ;;  %v4666_v44 = vrot.slane %v12105_v29, 5 }
 0x365   :  { %v4660_v42 = vrot.slane %v12104_v31, 6 }
 0x367   :  { %8066 = vmatpush3.bf16.msra.mxu1 %v8711_v14  ;;  %v12106_v14 = vshll.u32 %v10883_v25, 16  ;;  %v4661_v23 = vor.u32 %v4660_v42, %v4657_v11 }
 0x368   :  { %8067 = vmatprep.subr.bf16.mxu1 %v8712_v39 }
 0x369   :  { %v4669_v56 = vrot.slane %v12106_v14, 6  ;;  %v4662_v37 = vsel %vm4600_vm0, %v4652_v46, %v4661_v23  ;;  %v8716_v46 = vld [vmem:[%s11747_s3 + $0x170] sm:$0xff]   ;;  %v8718_v14 = vld [vmem:[%s11747_s3 + $0x180] sm:$0xff]  }
 0x36a   :  { %8044 = vmatmul.mubr.bf16.gmra.mrb[4].mxu1 %v4644_v48  ;;  %v12109_v48 = vshrl.u32 %v10891_v32, 16 }
 0x36b   :  { %8047 = vmatprep.mubr.bf16.mxu1 %v4653_v49  ;;  %8068 = vmatpush3.bf16.msra.mxu1 %v8712_v39  ;;  %v4670_v55 = vor.u32 %v4669_v56, %v4666_v44  ;;  %v4678_v39 = vrot.slane %v12108_v57, 6  ;;  %v8717_v49 = vld [vmem:[%s11747_s3 + $0x178] sm:$0xff]   ;;  %v11249_v56 = vld [vmem:[#allocation2 + $0x60] sm:$0x1] }
 0x36c   :  { %8069 = vmatprep.subr.bf16.mxu1 %v8713_v59  ;;  %v4684_v45 = vrot.slane %v12109_v48, 5  ;;  %v4962_v48 = vrot.slane %v10863_v26, 6  ;;  %v8722_v26 = vld [vmem:[%s11747_s3 + $0x1a0] sm:$0xff]  }
 0x36d   :  { %v4671_v16 = vsel %vm4600_vm0, %v4661_v23, %v4670_v55  ;;  %v4679_v31 = vor.u32 %v4678_v39, %v4675_v2  ;;  %v4709_v23 = vshll.u32 %v11249_v56, 16  ;;  %v4958_v39 = vrot.slane %v10859_v5, 6 }
 0x36f   :  { %8070 = vmatpush3.bf16.msra.mxu1 %v8713_v59  ;;  %v12110_v59 = vshll.u32 %v10891_v32, 16  ;;  %v4680_v29 = vsel %vm4600_vm0, %v4670_v55, %v4679_v31  ;;  %v4924_v55 = vld [vmem:[#allocation2] sm:$0xc0] }
 0x370   :  { %8071 = vmatprep.subr.bf16.mxu1 %v8714_v17 }
 0x371   :  { %v4687_v11 = vrot.slane %v12110_v59, 6 }
 0x372   :  { %8048 = vmatmul.mubr.bf16.gmra.mrb[8].mxu1 %v4662_v37  ;;  %v4955_v37 = vrot.slane %v4924_v55, 6  ;;  %v8725_v55 = vld [vmem:[%s11747_s3 + $0x1b8] sm:$0xff]  }
 0x373   :  { %8051 = vmatprep.mubr.bf16.mxu1 %v4671_v16  ;;  %8072 = vmatpush3.bf16.msra.mxu1 %v8714_v17  ;;  %v4688_v42 = vor.u32 %v4687_v11, %v4684_v45  ;;  %v4959_v16 = vsel %vm3532_vm2, %v4956_v19, %v4958_v39  ;;  %v8721_v45 = vld [vmem:[%s11747_s3 + $0x198] sm:$0xff]  }
 0x374   :  { %8073 = vmatprep.subr.bf16.mxu1 %v8715_v28  ;;  %v4957_v57 = vsel %vm3532_vm2, %v4955_v37, %v4956_v19 }
 0x375   :  { %v4689_v44 = vsel %vm4600_vm0, %v4679_v31, %v4688_v42  ;;  %v4698_v17 = vsel %vm4600_vm0, %v4688_v42, %v10847_v40  ;;  %v4960_v40 = vrot.slane %v10861_v1, 6  ;;  %v4964_v1 = vrot.slane %v10865_v3, 6 }
 0x376   :  { %v4966_v3 = vrot.slane %v10875_v38, 6  ;;  %v4968_v42 = vrot.slane %v10883_v25, 6  ;;  %v8724_v38 = vld [vmem:[%s11747_s3 + $0x1b0] sm:$0xff]   ;;  %v4970_v25 = vrot.slane %v10885_v20, 6  ;;  %v8726_v20 = vld [vmem:[%s11747_s3 + $0x1c0] sm:$0xff]  }
 0x377   :  { %8074 = vmatpush3.bf16.msra.mxu1 %v8715_v28  ;;  %v4711_v28 = vrot.slane %v4709_v23, 6  ;;  %v4961_v43 = vsel %vm3532_vm2, %v4958_v39, %v4960_v40  ;;  %v4963_v59 = vsel %vm3532_vm2, %v4960_v40, %v4962_v48  ;;  %v4965_v11 = vsel %vm3532_vm2, %v4962_v48, %v4964_v1 }
 0x378   :  { %8075 = vmatprep.subr.bf16.mxu1 %v8716_v46  ;;  %v4972_v23 = vrot.slane %v10891_v32, 6  ;;  %v12111_v32 = vrot.slane %v10785_v8, 6  ;;  %v12112_v40 = vrot.slane %v10788_v0, 6  ;;  %v8727_v8 = vld [vmem:[%s11747_s3 + $0x1c8] sm:$0xff]  }
 0x379   :  { %v4712_v2 = vsel %vm4600_vm0, %v10857_v15, %v4711_v28  ;;  %v8720_v15 = vld [vmem:[%s11747_s3 + $0x190] sm:$0xff]   ;;  %v4971_v28 = vsel %vm3532_vm2, %v4968_v42, %v4970_v25  ;;  %vm12116_vm0 = vmmov %vm12114_vm14 }
 0x37a   :  { %8052 = vmatmul.mubr.bf16.gmra.mrb[12].mxu1 %v4680_v29  ;;  %v4973_v37 = vsel %vm3532_vm2, %v4970_v25, %v4972_v23  ;;  %v4975_v19 = vsel %vm3532_vm2, %v4972_v23, %v12111_v32 }
 0x37b   :  { %8055 = vmatprep.mubr.bf16.mxu1 %v4689_v44  ;;  %8076 = vmatpush3.bf16.msra.mxu1 %v8716_v46  ;;  %v8723_v44 = vld [vmem:[%s11747_s3 + $0x1a8] sm:$0xff]  }
 0x37c   :  { %8077 = vmatprep.subr.bf16.mxu1 %v8717_v49 }
 0x37f   :  { %8078 = vmatpush3.bf16.msra.mxu1 %v8717_v49 }
 0x380   :  { %8103 = vmatprep.subr.bf16.mxu1 %v8718_v14 }
 0x382   :  { %8056 = vmatmul.mubr.bf16.gmra.mrb[16].mxu1 %v4698_v17  ;;  %v4969_v17 = vsel %vm3532_vm2, %v4966_v3, %v4968_v42  ;;  %v12115_v42 = vrot.slane %v10788_v0, 2 }
 0x383   :  { %8059 = vmatprep.mubr.bf16.mxu1 %v10870_v54  ;;  %v8719_v54 = vld [vmem:[%s11747_s3 + $0x188] sm:$0xff]  }
 0x38a   :  { %8060 = vmatmul.mubr.bf16.gmra.mrb[36].mxu1 %v4712_v2  ;;  %v4978_v2 = vrot.slane %v11249_v56, 6  ;;  %v8729_v56 = vld [vmem:[%s11747_s3 + $0x1d8] sm:$0xff]  }
 0x38b   :  { %8079 = vmatprep.mubr.bf16.mxu1 %v4957_v57  ;;  %v5191_v57 = vld [vmem:[#allocation2 + $0x8] sm:$0xfc] }
 0x38c   :  { %v5212_v39 = vrot.slane %v5191_v57, 2 }
 0x392   :  { %8080 = vmatmul.mubr.bf16.vlgmr.msra.gmra.mrb[0].mxu1 %v4959_v16  ;;  %v12113_v16 = vrot.slane %v10859_v5, 2 }
 0x393   :  { %8083 = vmatprep.mubr.bf16.mxu1 %v4961_v43  ;;  %8104 = vmatpush3.bf16.msra.mxu1 %v8718_v14  ;;  %v4967_v14 = vsel %vm3532_vm2, %v4964_v1, %v4966_v3  ;;  %v5465_v3 = vshrl.u32 %v5191_v57, 16 }
 0x394   :  { %8105 = vmatprep.subr.bf16.mxu1 %v8719_v54  ;;  %v5214_v43 = vsel %vm12114_vm14, %v5212_v39, %v12113_v16  ;;  %v5732_v39 = vld [vmem:[#allocation2 + $0x8] sm:$0xf8] }
 0x397   :  { %8106 = vmatpush3.bf16.msra.mxu1 %v8719_v54  ;;  %v4979_v54 = vsel %vm3532_vm2, %v12112_v40, %v4978_v2  ;;  %v5752_v40 = vrot.slane %v5732_v39, 3  ;;  %vm12125_vm2 = vmmov %vm12120_vm6 }
 0x398   :  { %8107 = vmatprep.subr.bf16.mxu1 %v8720_v15  ;;  %vm12126_vm15 = vmmov %vm12125_vm2 }
 0x399   :  { %vm12127_vm12 = vmmov %vm12125_vm2 }
 0x39a   :  { %8084 = vmatmul.mubr.bf16.gmra.mrb[4].mxu1 %v4963_v59  ;;  %vm12128_vm5 = vmmov %vm12125_vm2 }
 0x39b   :  { %8087 = vmatprep.mubr.bf16.mxu1 %v4965_v11  ;;  %8108 = vmatpush3.bf16.msra.mxu1 %v8720_v15  ;;  %vm12129_vm1 = vmmov %vm12125_vm2 }
 0x39c   :  { %8109 = vmatprep.subr.bf16.mxu1 %v8721_v45  ;;  %vm12130_vm8 = vmmov %vm12129_vm1 }
 0x39d   :  { %v7901_v46 = vpop.f32.mrb[20].mxu1  ;;  %vm12131_vm9 = vmmov %vm12129_vm1 }
 0x39e   :  { %v3860_v31 = vpop.f32.mrb[21].mxu1  ;;  %vm12132_vm14 = vmmov %vm12129_vm1 }
 0x39f   :  { %v7902_v49 = vpop.f32.mrb[22].mxu1  ;;  %8110 = vmatpush3.bf16.msra.mxu1 %v8721_v45 }
 0x3a0   :  { %v3863_v29 = vpop.f32.mrb[23].mxu1  ;;  %8111 = vmatprep.subr.bf16.mxu1 %v8722_v26 }
 0x3a2   :  { %8088 = vmatmul.mubr.bf16.gmra.mrb[8].mxu1 %v4967_v14  ;;  %v8735_v14 = vld [vmem:[%s11747_s3 + $0x208] sm:$0xff]  }
 0x3a3   :  { %8091 = vmatprep.mubr.bf16.mxu1 %v4969_v17  ;;  %8112 = vmatpush3.bf16.msra.mxu1 %v8722_v26  ;;  %v8733_v26 = vld [vmem:[%s11747_s3 + $0x1f8] sm:$0xff]  }
 0x3a4   :  { %8113 = vmatprep.subr.bf16.mxu1 %v8723_v44 }
 0x3a7   :  { %8114 = vmatpush3.bf16.msra.mxu1 %v8723_v44 }
 0x3a8   :  { %8115 = vmatprep.subr.bf16.mxu1 %v8724_v38 }
 0x3aa   :  { %8092 = vmatmul.mubr.bf16.gmra.mrb[12].mxu1 %v4971_v28 }
 0x3ab   :  { %8095 = vmatprep.mubr.bf16.mxu1 %v4973_v37  ;;  %8116 = vmatpush3.bf16.msra.mxu1 %v8724_v38  ;;  %v8740_v37 = vld [vmem:[%s11747_s3 + $0x230] sm:$0xff]  }
 0x3ac   :  { %8117 = vmatprep.subr.bf16.mxu1 %v8725_v55 }
 0x3af   :  { %8118 = vmatpush3.bf16.msra.mxu1 %v8725_v55 }
 0x3b0   :  { %8143 = vmatprep.subr.bf16.mxu1 %v8726_v20 }
 0x3b2   :  { %8096 = vmatmul.mubr.bf16.gmra.mrb[16].mxu1 %v4975_v19  ;;  %v8741_v19 = vld [vmem:[%s11747_s3 + $0x238] sm:$0xff]  }
 0x3b3   :  { %8099 = vmatprep.mubr.bf16.mxu1 %v10898_v63  ;;  %v8728_v63 = vld [vmem:[%s11747_s3 + $0x1d0] sm:$0xff]  }
 0x3ba   :  { %8100 = vmatmul.mubr.bf16.gmra.mrb[40].mxu1 %v4979_v54  ;;  %v12119_v54 = vrot.slane %v10859_v5, 3  ;;  %v12121_v5 = vld [vmem:[#allocation27_spill] sm:$0xff] }
 0x3bb   :  { %8119 = vmatprep.mubr.bf16.mxu1 %v5214_v43 }
 0x3c2   :  { %8120 = vmatmul.mubr.bf16.vlgmr.msra.gmra.mrb[0].mxu1 %v10916_v21 }
 0x3c3   :  { %8123 = vmatprep.mubr.bf16.mxu1 %v10919_v27  ;;  %8144 = vmatpush3.bf16.msra.mxu1 %v8726_v20  ;;  %v8730_v27 = vld [vmem:[%s11747_s3 + $0x1e0] sm:$0xff]  }
 0x3c4   :  { %8145 = vmatprep.subr.bf16.mxu1 %v8727_v8 }
 0x3c7   :  { %8146 = vmatpush3.bf16.msra.mxu1 %v8727_v8 }
 0x3c8   :  { %8147 = vmatprep.subr.bf16.mxu1 %v8728_v63 }
 0x3ca   :  { %8124 = vmatmul.mubr.bf16.gmra.mrb[4].mxu1 %v10923_v53  ;;  %v8731_v53 = vld [vmem:[%s11747_s3 + $0x1e8] sm:$0xff]  }
 0x3cb   :  { %8127 = vmatprep.mubr.bf16.mxu1 %v10926_v6  ;;  %8148 = vmatpush3.bf16.msra.mxu1 %v8728_v63  ;;  %v8732_v6 = vld [vmem:[%s11747_s3 + $0x1f0] sm:$0xff]  }
 0x3cc   :  { %8149 = vmatprep.subr.bf16.mxu1 %v8729_v56 }
 0x3cd   :  { %v7941_v21 = vpop.f32.mrb[24].mxu1 }
 0x3ce   :  { %v4045_v15 = vadd.f32 %v7941_v21, %v7901_v46  ;;  %v4036_v48 = vpop.f32.mrb[25].mxu1  ;;  %v5192_v46 = vld [vmem:[#allocation2 + $0x60] sm:$0x1f] }
 0x3cf   :  { %v4037_v1 = vadd.f32 %v4036_v48, %v3860_v31  ;;  %v7942_v45 = vpop.f32.mrb[26].mxu1  ;;  %8150 = vmatpush3.bf16.msra.mxu1 %v8729_v56  ;;  %v5468_v31 = vshll.u32 %v5191_v57, 16  ;;  %v12122_v56 = vld [vmem:[#allocation28_spill] sm:$0xff] }
 0x3d0   :  { %v4039_v59 = vpop.f32.mrb[27].mxu1  ;;  %8151 = vmatprep.subr.bf16.mxu1 %v8730_v27  ;;  %v3535_v45 = vld [vmem:[%s11748_s5 + $0x4] sm:$0x3] }
 0x3d1   :  { %v4040_v11 = vadd.f32 %v4039_v59, %v3863_v29  ;;  %v5470_v49 = vrot.slane %v5468_v31, 3  ;;  %v3536_v0 = vsel %vm3534_vm11, 0, %v3535_v45  ;;  %v7141_v45 = vld [vmem:[%s11746_s0 + $0x50] sm:$0xff]  }
 0x3d2   :  { %8128 = vmatmul.mubr.bf16.gmra.mrb[8].mxu1 %v10929_v60  ;;  %v8734_v60 = vld [vmem:[%s11747_s3 + $0x200] sm:$0xff]   ;;  %3537 = vst [vmem:[%s11748_s5 + $0x4] sm:$0x3] %v3536_v0 }
 0x3d3   :  { %8131 = vmatprep.mubr.bf16.mxu1 %v10932_v22  ;;  %8152 = vmatpush3.bf16.msra.mxu1 %v8730_v27  ;;  %v5233_v22 = vrot.slane %v5192_v46, 2 }
 0x3d4   :  { %8153 = vmatprep.subr.bf16.mxu1 %v8731_v53 }
 0x3d7   :  { %8154 = vmatpush3.bf16.msra.mxu1 %v8731_v53 }
 0x3d8   :  { %8155 = vmatprep.subr.bf16.mxu1 %v8732_v6 }
 0x3da   :  { %8132 = vmatmul.mubr.bf16.gmra.mrb[12].mxu1 %v10936_v13  ;;  %v5234_v13 = vsel %vm12116_vm0, %v12115_v42, %v5233_v22  ;;  %vm12133_vm0 = vmmov %vm12129_vm1 }
 0x3db   :  { %8135 = vmatprep.mubr.bf16.mxu1 %v10951_v51  ;;  %8156 = vmatpush3.bf16.msra.mxu1 %v8732_v6  ;;  %v5467_v51 = vrot.slane %v5465_v3, 2  ;;  %vm12138_vm11 = vmmov %vm12133_vm0 }
 0x3dc   :  { %8157 = vmatprep.subr.bf16.mxu1 %v8733_v26 }
 0x3dd   :  { %v5471_v29 = vor.u32 %v5470_v49, %v5467_v51  ;;  %v7132_v51 = vld [vmem:[%s11746_s0 + $0x8] sm:$0xff]   ;;  %v7133_v49 = vld [vmem:[%s11746_s0 + $0x10] sm:$0xff]  }
 0x3df   :  { %8158 = vmatpush3.bf16.msra.mxu1 %v8733_v26  ;;  %v5475_v44 = vsel %vm12117_vm4, %v5471_v29, %v10963_v50  ;;  %v8737_v50 = vld [vmem:[%s11747_s3 + $0x218] sm:$0xff]   ;;  %v7091_v29 = vunpack.c.h.bf16 %v7132_v51  ;;  %vm12134_vm4 = vmmov %vm12133_vm0 }
 0x3e0   :  { %8183 = vmatprep.subr.bf16.mxu1 %v8734_v60 }
 0x3e2   :  { %8136 = vmatmul.mubr.bf16.gmra.mrb[16].mxu1 %v10956_v7  ;;  %v8736_v7 = vld [vmem:[%s11747_s3 + $0x210] sm:$0xff]  }
 0x3e3   :  { %8139 = vmatprep.mubr.bf16.mxu1 %v5234_v13 }
 0x3ea   :  { %8140 = vmatmul.mubr.bf16.gmra.mrb[44].mxu1 %v5233_v22 }
 0x3eb   :  { %8159 = vmatprep.mubr.bf16.mxu1 %v5475_v44  ;;  %v7094_v44 = vunpack.c.l.bf16 %v7133_v49 }
 0x3f2   :  { %8160 = vmatmul.mubr.bf16.vlgmr.msra.gmra.mrb[0].mxu1 %v10990_v34  ;;  %v8738_v34 = vld [vmem:[%s11747_s3 + $0x220] sm:$0xff]  }
 0x3f3   :  { %8163 = vmatprep.mubr.bf16.mxu1 %v10995_v52  ;;  %8184 = vmatpush3.bf16.msra.mxu1 %v8734_v60 }
 0x3f4   :  { %8185 = vmatprep.subr.bf16.mxu1 %v8735_v14 }
 0x3f7   :  { %8186 = vmatpush3.bf16.msra.mxu1 %v8735_v14  ;;  %v6015_v14 = vld [vmem:[%s11746_s0 + $0x4] sm:$0xe] }
 0x3f8   :  { %8187 = vmatprep.subr.bf16.mxu1 %v8736_v7 }
 0x3fa   :  { %8164 = vmatmul.mubr.bf16.gmra.mrb[4].mxu1 %v10998_v62  ;;  %v8739_v62 = vld [vmem:[%s11747_s3 + $0x228] sm:$0xff]  }
 0x3fb   :  { %8167 = vmatprep.mubr.bf16.mxu1 %v11006_v58  ;;  %8188 = vmatpush3.bf16.msra.mxu1 %v8736_v7  ;;  %v5446_v58 = vld [vmem:[#allocation2 + $0x60] sm:$0x3f]  ;;  %v7134_v7 = vld [vmem:[%s11746_s0 + $0x18] sm:$0xff]  }
 0x3fc   :  { %8189 = vmatprep.subr.bf16.mxu1 %v8737_v50  ;;  %v5513_v20 = vshrl.u32 %v5446_v58, 16  ;;  %v5516_v32 = vshll.u32 %v5446_v58, 16 }
 0x3fd   :  { %v7981_v52 = vpop.f32.mrb[28].mxu1 }
 0x3fe   :  { %v4313_v17 = vadd.f32 %v7981_v52, %v4045_v15  ;;  %v4277_v38 = vpop.f32.mrb[29].mxu1  ;;  %v5518_v2 = vrot.slane %v5516_v32, 3  ;;  %v6093_v52 = vrot.slane %v7094_v44, 3  ;;  %v7127_v44 = vunpack.c.h.bf16 %v7141_v45 }
 0x3ff   :  { %v4311_v25 = vadd.f32 %v4277_v38, %v4037_v1  ;;  %v7982_v23 = vpop.f32.mrb[30].mxu1  ;;  %8190 = vmatpush3.bf16.msra.mxu1 %v8737_v50  ;;  %v7135_v50 = vld [vmem:[%s11746_s0 + $0x20] sm:$0xff]   ;;  %v6039_v38 = vunpack.c.l.bf16 %v6015_v14 }
 0x400   :  { %v4280_v55 = vpop.f32.mrb[31].mxu1  ;;  %8191 = vmatprep.subr.bf16.mxu1 %v8738_v34  ;;  %v7099_v23 = vunpack.c.h.bf16 %v7134_v7 }
 0x401   :  { %v4312_v28 = vadd.f32 %v4280_v55, %v4040_v11  ;;  %v7102_v55 = vunpack.c.l.bf16 %v7135_v50  ;;  %v6088_v32 = vrot.slane %v6039_v38, 3 }
 0x402   :  { %8168 = vmatmul.mubr.bf16.gmra.mrb[8].mxu1 %v11014_v36  ;;  %v5515_v36 = vrot.slane %v5513_v20, 2 }
 0x403   :  { %8171 = vmatprep.mubr.bf16.mxu1 %v11024_v30  ;;  %8192 = vmatpush3.bf16.msra.mxu1 %v8738_v34  ;;  %v6091_v34 = vrot.slane %v7091_v29, 3 }
 0x404   :  { %8193 = vmatprep.subr.bf16.mxu1 %v8739_v62  ;;  %v5519_v30 = vor.u32 %v5518_v2, %v5515_v36  ;;  %v7138_v36 = vld [vmem:[%s11746_s0 + $0x38] sm:$0xff]   ;;  %v7139_v2 = vld [vmem:[%s11746_s0 + $0x40] sm:$0xff]  }
 0x405   :  { %v11425_v20 = vsel %vm12125_vm2, %v6091_v34, %v6093_v52  ;;  %vm6552_vm2 = vcmask 1043457  }
 0x406   :  { %v5520_v57 = vsel %vm12118_vm7, %v11033_v12, %v5519_v30  ;;  %vm12135_vm7 = vmmov %vm12133_vm0 }
 0x407   :  { %8194 = vmatpush3.bf16.msra.mxu1 %v8739_v62  ;;  %v7098_v62 = vunpack.c.l.bf16 %v7134_v7 }
 0x408   :  { %8195 = vmatprep.subr.bf16.mxu1 %v8740_v37 }
 0x40a   :  { %8172 = vmatmul.mubr.bf16.gmra.mrb[12].mxu1 %v11031_v24  ;;  %v5754_v24 = vsel %vm12120_vm6, %v5752_v40, %v12119_v54  ;;  %vm12136_vm6 = vmmov %vm12133_vm0 }
 0x40b   :  { %8175 = vmatprep.mubr.bf16.mxu1 %v11036_v10  ;;  %8196 = vmatpush3.bf16.msra.mxu1 %v8740_v37  ;;  %v7103_v37 = vunpack.c.h.bf16 %v7135_v50 }
 0x40c   :  { %8197 = vmatprep.subr.bf16.mxu1 %v8741_v19 }
 0x40f   :  { %8198 = vmatpush3.bf16.msra.mxu1 %v8741_v19 }
 0x412   :  { %8176 = vmatmul.mubr.bf16.gmra.mrb[16].mxu1 %v11042_v35 }
 0x413   :  { %8179 = vmatprep.mubr.bf16.mxu1 %v5520_v57 }
 0x41a   :  { %8180 = vmatmul.mubr.bf16.gmra.mrb[48].mxu1 %v5519_v30 }
 0x41b   :  { %8199 = vmatprep.mubr.bf16.mxu1 %v5754_v24  ;;  %v6099_v24 = vrot.slane %v7099_v23, 3 }
 0x422   :  { %8200 = vmatmul.mubr.bf16.vlgmr.msra.gmra.mrb[0].mxu1 %v11049_v41  ;;  %v12123_v41 = vld [vmem:[#allocation29_spill] sm:$0xff] }
 0x423   :  { %8203 = vmatprep.mubr.bf16.mxu1 %v11052_v47  ;;  %v5773_v47 = vrot.slane %v5446_v58, 3  ;;  %v7137_v58 = vld [vmem:[%s11746_s0 + $0x30] sm:$0xff]  }
 0x424   :  { %v7110_v39 = vunpack.c.l.bf16 %v7137_v58 }
 0x42a   :  { %8204 = vmatmul.mubr.bf16.gmra.mrb[4].mxu1 %v11057_v33  ;;  %v5774_v33 = vsel %vm12124_vm13, %v5771_v9, %v5773_v47  ;;  %vm12137_vm13 = vmmov %vm12133_vm0 }
 0x42b   :  { %8207 = vmatprep.mubr.bf16.mxu1 %v11060_v18 }
 0x42d   :  { %v8021_v10 = vpop.f32.mrb[32].mxu1 }
 0x42e   :  { %v4569_v35 = vadd.f32 %v8021_v10, %v4313_v17  ;;  %v4533_v12 = vpop.f32.mrb[33].mxu1  ;;  %v7090_v17 = vunpack.c.l.bf16 %v7132_v51  ;;  %v6101_v10 = vrot.slane %v7102_v55, 3 }
 0x42f   :  { %v4567_v16 = vadd.f32 %v4533_v12, %v4311_v25  ;;  %v8022_v43 = vpop.f32.mrb[34].mxu1  ;;  %v7095_v25 = vunpack.c.h.bf16 %v7133_v49  ;;  %v7111_v12 = vunpack.c.h.bf16 %v7137_v58 }
 0x430   :  { %v4536_v8 = vpop.f32.mrb[35].mxu1  ;;  %v6089_v19 = vrot.slane %v7090_v17, 3 }
 0x431   :  { %v4568_v63 = vadd.f32 %v4536_v8, %v4312_v28  ;;  %v7136_v28 = vld [vmem:[%s11746_s0 + $0x28] sm:$0xff]   ;;  %v6095_v30 = vrot.slane %v7095_v25, 3  ;;  %v6103_v8 = vrot.slane %v7103_v37, 3 }
 0x432   :  { %8208 = vmatmul.mubr.bf16.gmra.mrb[8].mxu1 %v11064_v61  ;;  %v7107_v57 = vunpack.c.h.bf16 %v7136_v28  ;;  %v7106_v40 = vunpack.c.l.bf16 %v7136_v28 }
 0x433   :  { %8211 = vmatprep.mubr.bf16.mxu1 %v12121_v5  ;;  %v7118_v5 = vunpack.c.l.bf16 %v7139_v2 }
 0x43a   :  { %8212 = vmatmul.mubr.bf16.gmra.mrb[12].mxu1 %v12122_v56 }
 0x43b   :  { %8215 = vmatprep.mubr.bf16.mxu1 %v12123_v41 }
 0x442   :  { %8216 = vmatmul.mubr.bf16.gmra.mrb[16].mxu1 %v11082_v4 }
 0x443   :  { %8219 = vmatprep.mubr.bf16.mxu1 %v5774_v33  ;;  %v6092_v33 = vsel %vm12127_vm12, %v6089_v19, %v6091_v34  ;;  %vm6297_vm12 = vsmask.f32 5392 }
 0x44a   :  { %8220 = vmatmul.mubr.bf16.gmra.mrb[52].mxu1 %v5773_v47  ;;  %v6090_v47 = vsel %vm12126_vm15, %v6088_v32, %v6089_v19  ;;  %vm6553_vm15 = vsmask.f32 7942 }
 0x45d   :  { %v8061_v18 = vpop.f32.mrb[36].mxu1 }
 0x45e   :  { %v4923_v27 = vadd.f32 %v8061_v18, %v4569_v35  ;;  %v4887_v21 = vpop.f32.mrb[37].mxu1  ;;  %v6097_v35 = vrot.slane %v7098_v62, 3  ;;  %v7114_v18 = vunpack.c.l.bf16 %v7138_v36 }
 0x45f   :  { %v4921_v15 = vadd.f32 %v4887_v21, %v4567_v16  ;;  %v8062_v61 = vpop.f32.mrb[38].mxu1  ;;  %v6096_v21 = vsel %vm12128_vm5, %v6093_v52, %v6095_v30  ;;  %vm12139_vm5 = vmmov %vm12133_vm0 }
 0x460   :  { %v4890_v48 = vpop.f32.mrb[39].mxu1  ;;  %v6109_v61 = vrot.slane %v7110_v39, 3 }
 0x461   :  { %v4922_v1 = vadd.f32 %v4890_v48, %v4568_v63  ;;  %v7115_v63 = vunpack.c.h.bf16 %v7138_v36  ;;  %v6105_v48 = vrot.slane %v7106_v40, 3 }
 0x463   :  { %v11475_v49 = vsel %vm12134_vm4, %v6103_v8, %v6105_v48  ;;  %vm12146_vm4 = vmmov %vm12133_vm0 }
 0x48d   :  { %v8101_v9 = vpop.f32.mrb[40].mxu1 }
 0x48e   :  { %v5190_v4 = vadd.f32 %v8101_v9, %v4923_v27  ;;  %v5154_v59 = vpop.f32.mrb[41].mxu1  ;;  %v11449_v9 = vsel %vm12129_vm1, %v6099_v24, %v6101_v10  ;;  %vm12140_vm1 = vmmov %vm12133_vm0 }
 0x48f   :  { %v5188_v53 = vadd.f32 %v5154_v59, %v4921_v15  ;;  %v8102_v11 = vpop.f32.mrb[42].mxu1  ;;  %v6107_v15 = vrot.slane %v7107_v57, 3  ;;  %v6111_v59 = vrot.slane %v7111_v12, 3  ;;  %v6127_v57 = vrot.slane %v7127_v44, 3 }
 0x490   :  { %v5157_v6 = vpop.f32.mrb[43].mxu1  ;;  %v6115_v11 = vrot.slane %v7115_v63, 3 }
 0x491   :  { %v5189_v26 = vadd.f32 %v5157_v6, %v4922_v1  ;;  %v7140_v1 = vld [vmem:[%s11746_s0 + $0x48] sm:$0xff]   ;;  %v6117_v6 = vrot.slane %v7118_v5, 3  ;;  %v11472_v51 = vsel %vm12133_vm0, %v6107_v15, %v6109_v61  ;;  %v11478_v7 = vsel %vm12135_vm7, %v6109_v61, %v6111_v59  ;;  %vm12148_vm7 = vmmov %vm12133_vm0 }
 0x492   :  { %v7122_v29 = vunpack.c.l.bf16 %v7140_v1  ;;  %v11481_v50 = vsel %vm12136_vm6, %v6105_v48, %v6107_v15  ;;  %v12145_v15 = vld [vmem:[#allocation4_spill] sm:$0xff]  ;;  %vm12150_vm6 = vmmov %vm12133_vm0 }
 0x493   :  { %v11485_v25 = vsel %vm12137_vm13, %v6115_v11, %v6117_v6  ;;  %vm11531_vm13 = vmand %vm6552_vm2, %vm6553_vm15 }
 0x4bd   :  { %v8141_v46 = vpop.f32.mrb[44].mxu1 }
 0x4be   :  { %v5445_v60 = vadd.f32 %v8141_v46, %v5190_v4  ;;  %v5409_v22 = vpop.f32.mrb[45].mxu1  ;;  %v11452_v4 = vsel %vm12130_vm8, %v6095_v30, %v6097_v35  ;;  %v7142_v46 = vld [vmem:[%s11746_s0 + $0x58] sm:$0xff]   ;;  %v6121_v30 = vrot.slane %v7122_v29, 3  ;;  %vm12141_vm8 = vmmov %vm12133_vm0 }
 0x4bf   :  { %v5443_v3 = vadd.f32 %v5409_v22, %v5188_v53  ;;  %v8142_v31 = vpop.f32.mrb[46].mxu1  ;;  %v11455_v53 = vsel %vm12131_vm9, %v6101_v10, %v6103_v8  ;;  %v11466_v22 = vld [vmem:[%s11750_s4] ss:$0 sm:$0xff]  ;;  %v7131_v34 = vunpack.c.h.bf16 %v7142_v46  ;;  %v7130_v55 = vunpack.c.l.bf16 %v7142_v46  ;;  %vm12143_vm9 = vmmov %vm12133_vm0 }
 0x4c0   :  { %v5412_v42 = vpop.f32.mrb[47].mxu1  ;;  %v6113_v31 = vrot.slane %v7114_v18, 3 }
 0x4c1   :  { %v5444_v13 = vadd.f32 %v5412_v42, %v5189_v26  ;;  %v7119_v26 = vunpack.c.h.bf16 %v7139_v2  ;;  %v7123_v42 = vunpack.c.h.bf16 %v7140_v1 }
 0x4c2   :  { %v11489_v58 = vsel %vm12138_vm11, %v6111_v59, %v6113_v31  ;;  %v11498_v63 = vsel %vm12140_vm1, %v6113_v31, %v6115_v11  ;;  %v12147_v11 = vld [vmem:[#allocation5_spill] sm:$0xff]  ;;  %vm11540_vm11 = vmor %vm3533_vm10, %vm6297_vm12 }
 0x4c3   :  { %v6119_v23 = vrot.slane %v7119_v26, 3  ;;  %v6123_v37 = vrot.slane %v7123_v42, 3  ;;  %v12149_v42 = vld [vmem:[#allocation6_spill] sm:$0xff] }
 0x4c5   :  { %v11495_v12 = vsel %vm12139_vm5, %v6117_v6, %v6119_v23 }
 0x4ed   :  { %v8181_v54 = vpop.f32.mrb[48].mxu1 }
 0x4ee   :  { %v11433_v16 = vadd.f32 %v8181_v54, %v5445_v60  ;;  %v5695_v43 = vpop.f32.mrb[49].mxu1  ;;  %v6038_v60 = vld [vmem:[%s11746_s0 + $0x60] sm:$0x1]  ;;  %v6131_v54 = vrot.slane %v7131_v34, 3 }
 0x4ef   :  { %v11435_v56 = vadd.f32 %v5695_v43, %v5443_v3  ;;  %v8182_v41 = vpop.f32.mrb[50].mxu1  ;;  %v11469_v3 = vsel %vm12132_vm14, %v6097_v35, %v6099_v24  ;;  %v6062_v52 = vunpack.c.l.bf16 %v6038_v60  ;;  %v6129_v43 = vrot.slane %v7130_v55, 3  ;;  %vm12144_vm14 = vmmov %vm12133_vm0 }
 0x4f0   :  { %v5698_v27 = vpop.f32.mrb[51].mxu1  ;;  %v12142_v41 = vld [vmem:[#allocation3_spill] sm:$0xff] }
 0x4f1   :  { %v11446_v0 = vadd.f32 %v5698_v27, %v5444_v13  ;;  %v7126_v13 = vunpack.c.l.bf16 %v7141_v45  ;;  %v6133_v24 = vrot.slane %v6062_v52, 3  ;;  %v11505_v27 = vsel %vm12143_vm9, %v6119_v23, %v6121_v30 }
 0x4f2   :  { %v11520_v60 = vsel %vm12148_vm7, %v6127_v57, %v6129_v43 }
 0x4f3   :  { %v6125_v32 = vrot.slane %v7126_v13, 3  ;;  %v11515_v45 = vsel %vm12146_vm4, %v6131_v54, %v6133_v24 }
 0x4f5   :  { %v8201_v14 = vpop.f32.mrb[0].mxu1  ;;  %v11501_v5 = vsel %vm12141_vm8, %v6123_v37, %v6125_v32 }
 0x4f6   :  { %v5994_v17 = vadd.f32 %v8201_v14, %v11466_v22  ;;  %v5869_v38 = vpop.f32.mrb[1].mxu1  ;;  %v11525_v14 = vsel %vm12150_vm6, %v6129_v43, %v6131_v54 }
 0x4f7   :  { %v5992_v62 = vadd.f32 %v11466_v22, %v5869_v38  ;;  %v8202_v28 = vpop.f32.mrb[2].mxu1 }
 0x4f8   :  { %v6160_v19 = vadd.f32 %v11425_v20, %v5994_v17  ;;  %v5995_v36 = vadd.f32 %v8202_v28, %v11466_v22  ;;  %v5872_v2 = vpop.f32.mrb[3].mxu1 }
 0x4f9   :  { %v6158_v39 = vadd.f32 %v6090_v47, %v5992_v62  ;;  %v5993_v40 = vadd.f32 %v11466_v22, %v5872_v2 }
 0x4fa   :  { %v6183_v10 = vmax.f32 %v6160_v19, 0.0  ;;  %v6161_v35 = vadd.f32 %v6096_v21, %v5995_v36  ;;  %v11508_v21 = vsel %vm12144_vm14, %v6125_v32, %v6127_v57 }
 0x4fb   :  { %v6181_v20 = vmax.f32 %v6158_v39, 0.0  ;;  %v6159_v8 = vadd.f32 %v6092_v33, %v5993_v40  ;;  %v11512_v33 = vsel %vm12133_vm0, %v6121_v30, %v6123_v37 }
 0x4fc   :  { %v6206_v47 = vmul.f32 %v6183_v10, %v12142_v41  ;;  %v6184_v18 = vmax.f32 %v6161_v35, 0.0 }
 0x4fd   :  { %v6204_v61 = vmul.f32 %v6181_v20, %v12145_v15  ;;  %v6182_v48 = vmax.f32 %v6159_v8, 0.0  ;;  %v8205_v1 = vpop.f32.mrb[4].mxu1 }
 0x4fe   :  { %v7067_v59 = vpack.c.bf16 %v6206_v47, %v6206_v47  ;;  %v6207_v6 = vmul.f32 %v6184_v18, %v12147_v11  ;;  %v5998_v26 = vadd.f32 %v8205_v1, %v11466_v22  ;;  %v5885_v46 = vpop.f32.mrb[5].mxu1 }
 0x4ff   :  { %v7065_v31 = vpack.c.bf16 %v6204_v61, %v6204_v61  ;;  %v6205_v13 = vmul.f32 %v6182_v48, %v12149_v42  ;;  %v5996_v29 = vadd.f32 %v11466_v22, %v5885_v46  ;;  %v8206_v44 = vpop.f32.mrb[6].mxu1  ;;  %v12155_v48 = vld [vmem:[#allocation7_spill] sm:$0xff] }
 0x500   :  { %v6319_v34 = vshrl.u32 %v7067_v59, 16  ;;  %v6322_v52 = vshll.u32 %v7067_v59, 16  ;;  %v7068_v17 = vpack.c.bf16 %v6207_v6, %v6207_v6  ;;  %v6164_v38 = vadd.f32 %v11449_v9, %v5998_v26  ;;  %v5888_v23 = vpop.f32.mrb[7].mxu1  ;;  %v6555_v9 = vld [vmem:[%s11748_s5 + $0x4] sm:$0xe] }
 0x501   :  { %v6300_v55 = vshrl.u32 %v7065_v31, 16  ;;  %v6303_v62 = vshll.u32 %v7065_v31, 16  ;;  %v7066_v28 = vpack.c.bf16 %v6205_v13, %v6205_v13  ;;  %v6162_v37 = vadd.f32 %v11452_v4, %v5996_v29  ;;  %v12156_v31 = vld [vmem:[#allocation8_spill] sm:$0xff] }
 0x502   :  { %v6321_v32 = vrot.slane %v6319_v34, 6  ;;  %v6324_v19 = vrot.slane %v6322_v52, 7  ;;  %v6329_v36 = vshrl.u32 %v7068_v17, 16  ;;  %v6332_v2 = vshll.u32 %v7068_v17, 16 }
 0x503   :  { %v6302_v30 = vrot.slane %v6300_v55, 6  ;;  %v6305_v57 = vrot.slane %v6303_v62, 7  ;;  %v6309_v39 = vshrl.u32 %v7066_v28, 16  ;;  %v6312_v40 = vshll.u32 %v7066_v28, 16 }
 0x504   :  { %v6325_v54 = vor.u32 %v6324_v19, %v6321_v32  ;;  %v6331_v4 = vrot.slane %v6329_v36, 6  ;;  %v6334_v10 = vrot.slane %v6332_v2, 7  ;;  %v6187_v35 = vmax.f32 %v6164_v38, 0.0 }
 0x505   :  { %v6306_v20 = vor.u32 %v6305_v57, %v6302_v30  ;;  %v6311_v8 = vrot.slane %v6309_v39, 6  ;;  %v6314_v41 = vrot.slane %v6312_v40, 7  ;;  %v6185_v47 = vmax.f32 %v6162_v37, 0.0  ;;  %v8209_v18 = vpop.f32.mrb[8].mxu1  ;;  %v12157_v40 = vld [vmem:[#allocation9_spill] sm:$0xff] }
 0x506   :  { %v6327_v15 = vrot.slane %v6325_v54, 4  ;;  %v6335_v61 = vor.u32 %v6334_v10, %v6331_v4  ;;  %v6210_v1 = vmul.f32 %v6187_v35, %v12155_v48  ;;  %v5999_v59 = vadd.f32 %v8206_v44, %v11466_v22  ;;  %v5901_v11 = vpop.f32.mrb[9].mxu1 }
 0x507   :  { %v6307_v6 = vrot.slane %v6306_v20, 4  ;;  %v6556_v26 = vsel %vm11531_vm13, %v6306_v20, %v6555_v9  ;;  %v6315_v46 = vor.u32 %v6314_v41, %v6311_v8  ;;  %v6208_v42 = vmul.f32 %v6185_v47, %v12156_v31  ;;  %v8210_v13 = vpop.f32.mrb[10].mxu1 }
 0x508   :  { %6557 = vst [vmem:[%s11748_s5 + $0x4] sm:$0xe] %v6556_v26  ;;  %v6336_v29 = vsel %vm11540_vm11, %v6327_v15, %v6335_v61  ;;  %v6337_v34 = vrot.slane %v6335_v61, 4  ;;  %v7071_v52 = vpack.c.bf16 %v6210_v1, %v6210_v1  ;;  %v6165_v44 = vadd.f32 %v11455_v53, %v5999_v59  ;;  %v5904_v17 = vpop.f32.mrb[11].mxu1  ;;  %v12158_v61 = vld [vmem:[#allocation10_spill] sm:$0xff] }
 0x509   :  { %6560 = vst [vmem:[%s11748_s5 + $0x10] sm:$0xf] %v6336_v29  ;;  %v6316_v38 = vsel %vm11540_vm11, %v6307_v6, %v6315_v46  ;;  %v6317_v55 = vrot.slane %v6315_v46, 4  ;;  %v7069_v62 = vpack.c.bf16 %v6208_v42, %v6208_v42  ;;  %v5997_v28 = vadd.f32 %v11466_v22, %v5888_v23  ;;  %v12159_v46 = vld [vmem:[#allocation11_spill] sm:$0xff] }
 0x50a   :  { %6558 = vst [vmem:[%s11748_s5 + $0x8] sm:$0xf] %v6316_v38  ;;  %v6359_v37 = vshrl.u32 %v7071_v52, 16  ;;  %v6362_v32 = vshll.u32 %v7071_v52, 16  ;;  %v6188_v19 = vmax.f32 %v6165_v44, 0.0  ;;  %v6002_v53 = vadd.f32 %v8209_v18, %v11466_v22 }
 0x50b   :  { %v6326_v36 = vsel %vm11540_vm11, %v6317_v55, %v6325_v54  ;;  %v6339_v2 = vshrl.u32 %v7069_v62, 16  ;;  %v6342_v30 = vshll.u32 %v7069_v62, 16  ;;  %v6163_v57 = vadd.f32 %v11469_v3, %v5997_v28 }
 0x50c   :  { %6559 = vst [vmem:[%s11748_s5 + $0xc] sm:$0xf] %v6326_v36  ;;  %v6361_v23 = vrot.slane %v6359_v37, 6  ;;  %v6364_v39 = vrot.slane %v6362_v32, 7  ;;  %v6211_v24 = vmul.f32 %v6188_v19, %v12157_v40  ;;  %v6168_v9 = vadd.f32 %v11472_v51, %v6002_v53  ;;  %v12160_v37 = vld [vmem:[#allocation12_spill] sm:$0xff] }
 0x50d   :  { %v6341_v4 = vrot.slane %v6339_v2, 6  ;;  %v6344_v10 = vrot.slane %v6342_v30, 7  ;;  %v6186_v35 = vmax.f32 %v6163_v57, 0.0  ;;  %v6000_v20 = vadd.f32 %v11466_v22, %v5901_v11  ;;  %v8213_v54 = vpop.f32.mrb[12].mxu1 }
 0x50e   :  { %v11574_v8 = vor.u32 %v6364_v39, %v6361_v23  ;;  %v7072_v41 = vpack.c.bf16 %v6211_v24, %v6211_v24  ;;  %v6191_v3 = vmax.f32 %v6168_v9, 0.0  ;;  %v6003_v47 = vadd.f32 %v8210_v13, %v11466_v22  ;;  %v5917_v18 = vpop.f32.mrb[13].mxu1 }
 0x50f   :  { %v6345_v15 = vor.u32 %v6344_v10, %v6341_v4  ;;  %v6209_v48 = vmul.f32 %v6186_v35, %v12158_v61  ;;  %v6166_v1 = vadd.f32 %v11475_v49, %v6000_v20  ;;  %v6001_v51 = vadd.f32 %v11466_v22, %v5904_v17  ;;  %v8214_v59 = vpop.f32.mrb[14].mxu1  ;;  %v12162_v61 = vld [vmem:[#allocation14_spill] sm:$0xff] }
 0x510   :  { %v6367_v6 = vrot.slane %v11574_v8, 4  ;;  %v6369_v26 = vshrl.u32 %v7072_v41, 16  ;;  %v6372_v11 = vshll.u32 %v7072_v41, 16  ;;  %v6214_v31 = vmul.f32 %v6191_v3, %v12159_v46  ;;  %v11582_v42 = vpop.f32.mrb[15].mxu1  ;;  %v12161_v41 = vld [vmem:[#allocation13_spill] sm:$0xff] }
 0x511   :  { %v6346_v13 = vsel %vm11540_vm11, %v6337_v34, %v6345_v15  ;;  %v6347_v29 = vrot.slane %v6345_v15, 4  ;;  %v7070_v52 = vpack.c.bf16 %v6209_v48, %v6209_v48  ;;  %v6189_v44 = vmax.f32 %v6166_v1, 0.0 }
 0x512   :  { %6561 = vst [vmem:[%s11748_s5 + $0x14] sm:$0xf] %v6346_v13  ;;  %v6371_v49 = vrot.slane %v6369_v26, 6  ;;  %v6374_v17 = vrot.slane %v6372_v11, 7  ;;  %v7075_v38 = vpack.c.bf16 %v6214_v31, %v6214_v31  ;;  %v6169_v55 = vadd.f32 %v11478_v7, %v6003_v47 }
 0x513   :  { %v6349_v62 = vshrl.u32 %v7070_v52, 16  ;;  %v6352_v28 = vshll.u32 %v7070_v52, 16  ;;  %v6212_v32 = vmul.f32 %v6189_v44, %v12160_v37  ;;  %v6167_v19 = vadd.f32 %v11481_v50, %v6001_v51 }
 0x514   :  { %v6375_v53 = vor.u32 %v6374_v17, %v6371_v49  ;;  %v6399_v34 = vshrl.u32 %v7075_v38, 16  ;;  %v6402_v36 = vshll.u32 %v7075_v38, 16  ;;  %v6192_v2 = vmax.f32 %v6169_v55, 0.0 }
 0x515   :  { %v6351_v30 = vrot.slane %v6349_v62, 6  ;;  %v6354_v57 = vrot.slane %v6352_v28, 7  ;;  %v7073_v23 = vpack.c.bf16 %v6212_v32, %v6212_v32  ;;  %v6190_v39 = vmax.f32 %v6167_v19, 0.0  ;;  %v8217_v40 = vpop.f32.mrb[16].mxu1 }
 0x516   :  { %v6376_v24 = vsel %vm11540_vm11, %v6367_v6, %v6375_v53  ;;  %v6377_v9 = vrot.slane %v6375_v53, 4  ;;  %v6401_v7 = vrot.slane %v6399_v34, 6  ;;  %v6404_v4 = vrot.slane %v6402_v36, 7  ;;  %v5933_v10 = vpop.f32.mrb[17].mxu1 }
 0x517   :  { %6564 = vst [vmem:[%s11748_s5 + $0x20] sm:$0xf] %v6376_v24  ;;  %v6355_v50 = vor.u32 %v6354_v57, %v6351_v30  ;;  %v6379_v35 = vshrl.u32 %v7073_v23, 16  ;;  %v6382_v20 = vshll.u32 %v7073_v23, 16  ;;  %v6215_v3 = vmul.f32 %v6192_v2, %v12161_v41  ;;  %v11598_v47 = vpop.f32.mrb[18].mxu1  ;;  %v12163_v2 = vld [vmem:[#allocation15_spill] sm:$0xff] }
 0x518   :  { %v6405_v15 = vor.u32 %v6404_v4, %v6401_v7  ;;  %v6213_v48 = vmul.f32 %v6190_v39, %v12162_v61  ;;  %v6006_v1 = vadd.f32 %v8213_v54, %v11466_v22  ;;  %v6004_v51 = vadd.f32 %v11466_v22, %v5917_v18  ;;  %v11603_v6 = vpop.f32.mrb[19].mxu1  ;;  %v12164_v57 = vld [vmem:[#allocation16_spill] sm:$0xff] }
 0x519   :  { %v6356_v26 = vsel %vm11540_vm11, %v6347_v29, %v6355_v50  ;;  %v6357_v11 = vrot.slane %v6355_v50, 4  ;;  %v6381_v46 = vrot.slane %v6379_v35, 6  ;;  %v6384_v31 = vrot.slane %v6382_v20, 7 }
 0x51a   :  { %6562 = vst [vmem:[%s11748_s5 + $0x18] sm:$0xf] %v6356_v26  ;;  %v6407_v13 = vrot.slane %v6405_v15, 4  ;;  %v7076_v52 = vpack.c.bf16 %v6215_v3, %v6215_v3  ;;  %v7074_v44 = vpack.c.bf16 %v6213_v48, %v6213_v48  ;;  %v6172_v49 = vadd.f32 %v11485_v25, %v6006_v1 }
 0x51b   :  { %v6366_v54 = vsel %vm11540_vm11, %v6357_v11, %v11574_v8  ;;  %v6385_v18 = vor.u32 %v6384_v31, %v6381_v46  ;;  %v6170_v17 = vadd.f32 %v11489_v58, %v6004_v51  ;;  %v6007_v29 = vadd.f32 %v8214_v59, %v11466_v22  ;;  %v12165_v46 = vld [vmem:[#allocation17_spill] sm:$0xff] }
 0x51c   :  { %6563 = vst [vmem:[%s11748_s5 + $0x1c] sm:$0xf] %v6366_v54  ;;  %v6409_v38 = vshrl.u32 %v7076_v52, 16  ;;  %v6412_v55 = vshll.u32 %v7076_v52, 16  ;;  %v6389_v62 = vshrl.u32 %v7074_v44, 16  ;;  %v6392_v28 = vshll.u32 %v7074_v44, 16 }
 0x51d   :  { %v6386_v25 = vsel %vm11540_vm11, %v6377_v9, %v6385_v18  ;;  %v6387_v37 = vrot.slane %v6385_v18, 4  ;;  %v6195_v32 = vmax.f32 %v6172_v49, 0.0  ;;  %v6193_v19 = vmax.f32 %v6170_v17, 0.0  ;;  %v11621_v8 = vpop.f32.mrb[52].mxu1 }
 0x51e   :  { %6565 = vst [vmem:[%s11748_s5 + $0x24] sm:$0xf] %v6386_v25  ;;  %v6411_v58 = vrot.slane %v6409_v38, 6  ;;  %v6414_v59 = vrot.slane %v6412_v55, 7  ;;  %v6391_v53 = vrot.slane %v6389_v62, 6  ;;  %v6394_v34 = vrot.slane %v6392_v28, 7 }
 0x51f   :  { %v11626_v36 = vpop.f32.mrb[53].mxu1  ;;  %v6218_v30 = vmul.f32 %v6195_v32, %v12163_v2  ;;  %v6216_v23 = vmul.f32 %v6193_v19, %v12164_v57  ;;  %v6173_v39 = vadd.f32 %v11495_v12, %v6007_v29  ;;  %v6005_v24 = vadd.f32 %v11466_v22, %v11582_v42  ;;  %v12166_v29 = vld [vmem:[#allocation18_spill] sm:$0xff] }
 0x520   :  { %v8222_v9 = vpop.f32.mrb[54].mxu1  ;;  %v6415_v7 = vor.u32 %v6414_v59, %v6411_v58  ;;  %v6395_v4 = vor.u32 %v6394_v34, %v6391_v53  ;;  %v6010_v50 = vadd.f32 %v8217_v40, %v11466_v22  ;;  %v6008_v35 = vadd.f32 %v11466_v22, %v5933_v10  ;;  %v12167_v58 = vld [vmem:[#allocation19_spill] sm:$0xff] }
 0x521   :  { %v11635_v20 = vpop.f32.mrb[55].mxu1  ;;  %v7079_v41 = vpack.c.bf16 %v6218_v30, %v6218_v30  ;;  %v7077_v3 = vpack.c.bf16 %v6216_v23, %v6216_v23  ;;  %v6196_v61 = vmax.f32 %v6173_v39, 0.0  ;;  %v6171_v48 = vadd.f32 %v11498_v63, %v6005_v24  ;;  %v12168_v39 = vld [vmem:[#allocation20_spill] sm:$0xff] }
 0x522   :  { %v6416_v12 = vsel %vm11540_vm11, %v6407_v13, %v6415_v7  ;;  %v6417_v1 = vrot.slane %v6415_v7, 4  ;;  %v6396_v42 = vsel %vm11540_vm11, %v6387_v37, %v6395_v4  ;;  %v6397_v51 = vrot.slane %v6395_v4, 4 }
 0x523   :  { %6568 = vst [vmem:[%s11748_s5 + $0x30] sm:$0xf] %v6416_v12  ;;  %6566 = vst [vmem:[%s11748_s5 + $0x28] sm:$0xf] %v6396_v42  ;;  %v6439_v40 = vshrl.u32 %v7079_v41, 16  ;;  %v6442_v10 = vshll.u32 %v7079_v41, 16  ;;  %v6219_v31 = vmul.f32 %v6196_v61, %v12165_v46  ;;  %v6176_v52 = vadd.f32 %v11501_v5, %v6010_v50 }
 0x524   :  { %v6419_v26 = vshrl.u32 %v7077_v3, 16  ;;  %v6422_v63 = vshll.u32 %v7077_v3, 16  ;;  %v6406_v11 = vsel %vm11540_vm11, %v6397_v51, %v6405_v15  ;;  %v6194_v13 = vmax.f32 %v6171_v48, 0.0  ;;  %v12170_v46 = vld [vmem:[#allocation22_spill] sm:$0xff] }
 0x525   :  { %6567 = vst [vmem:[%s11748_s5 + $0x2c] sm:$0xf] %v6406_v11  ;;  %v6441_v44 = vrot.slane %v6439_v40, 6  ;;  %v6444_v49 = vrot.slane %v6442_v10, 7  ;;  %v7080_v17 = vpack.c.bf16 %v6219_v31, %v6219_v31  ;;  %v6199_v55 = vmax.f32 %v6176_v52, 0.0 }
 0x526   :  { %v6421_v54 = vrot.slane %v6419_v26, 6  ;;  %v6424_v18 = vrot.slane %v6422_v63, 7  ;;  %v6217_v38 = vmul.f32 %v6194_v13, %v12166_v29  ;;  %v6174_v62 = vadd.f32 %v11505_v27, %v6008_v35  ;;  %v12169_v63 = vld [vmem:[#allocation21_spill] sm:$0xff] }
 0x527   :  { %v6445_v15 = vor.u32 %v6444_v49, %v6441_v44  ;;  %v6011_v25 = vadd.f32 %v11598_v47, %v11466_v22  ;;  %v6009_v5 = vadd.f32 %v11466_v22, %v11603_v6  ;;  %v6449_v37 = vshrl.u32 %v7080_v17, 16 }
 0x528   :  { %v6425_v28 = vor.u32 %v6424_v18, %v6421_v54  ;;  %v6452_v32 = vshll.u32 %v7080_v17, 16  ;;  %v7078_v19 = vpack.c.bf16 %v6217_v38, %v6217_v38  ;;  %v6222_v59 = vmul.f32 %v6199_v55, %v12167_v58 }
 0x529   :  { %v6447_v53 = vrot.slane %v6445_v15, 4  ;;  %v6197_v30 = vmax.f32 %v6174_v62, 0.0  ;;  %v6451_v27 = vrot.slane %v6449_v37, 6  ;;  %v6177_v9 = vadd.f32 %v11508_v21, %v6011_v25 }
 0x52a   :  { %v6426_v34 = vsel %vm11540_vm11, %v6417_v1, %v6425_v28  ;;  %v6427_v2 = vrot.slane %v6425_v28, 4  ;;  %v6454_v47 = vrot.slane %v6452_v32, 7  ;;  %v6429_v57 = vshrl.u32 %v7078_v19, 16 }
 0x52b   :  { %6569 = vst [vmem:[%s11748_s5 + $0x34] sm:$0xf] %v6426_v34  ;;  %v6432_v23 = vshll.u32 %v7078_v19, 16  ;;  %v7083_v6 = vpack.c.bf16 %v6222_v59, %v6222_v59  ;;  %v6220_v24 = vmul.f32 %v6197_v30, %v12168_v39  ;;  %v6175_v7 = vadd.f32 %v11512_v33, %v6009_v5 }
 0x52c   :  { %v6455_v4 = vor.u32 %v6454_v47, %v6451_v27  ;;  %v6431_v50 = vrot.slane %v6429_v57, 6  ;;  %v5985_v41 = vadd.f32 %v11621_v8, %v11433_v16  ;;  %v6200_v12 = vmax.f32 %v6177_v9, 0.0 }
 0x52d   :  { %v6434_v35 = vrot.slane %v6432_v23, 7  ;;  %v6479_v3 = vshrl.u32 %v7083_v6, 16  ;;  %v6482_v61 = vshll.u32 %v7083_v6, 16  ;;  %v7081_v48 = vpack.c.bf16 %v6220_v24, %v6220_v24 }
 0x52e   :  { %v6456_v1 = vsel %vm11540_vm11, %v6447_v53, %v6455_v4  ;;  %v6457_v42 = vrot.slane %v6455_v4, 4  ;;  %v6198_v40 = vmax.f32 %v6175_v7, 0.0  ;;  %v6223_v11 = vmul.f32 %v6200_v12, %v12169_v63 }
 0x52f   :  { %v6435_v51 = vor.u32 %v6434_v35, %v6431_v50  ;;  %6572 = vst [vmem:[%s11748_s5 + $0x40] sm:$0xf] %v6456_v1  ;;  %v6481_v21 = vrot.slane %v6479_v3, 6  ;;  %v6484_v33 = vrot.slane %v6482_v61, 7  ;;  %v6459_v10 = vshrl.u32 %v7081_v48, 16  ;;  %v12173_v35 = vld [vmem:[#allocation25_spill] sm:$0xff] }
 0x530   :  { %v6462_v26 = vshll.u32 %v7081_v48, 16  ;;  %v6221_v31 = vmul.f32 %v6198_v40, %v12170_v46  ;;  %v6014_v49 = vadd.f32 %v11466_v22, %v5985_v41  ;;  %v7084_v18 = vpack.c.bf16 %v6223_v11, %v6223_v11  ;;  %v6580_v3 = vld [vmem:[%s11748_s5 + $0x60] sm:$0x1] }
 0x531   :  { %v6436_v16 = vsel %vm11540_vm11, %v6427_v2, %v6435_v51  ;;  %v6437_v8 = vrot.slane %v6435_v51, 4  ;;  %v6485_v13 = vor.u32 %v6484_v33, %v6481_v21  ;;  %v6461_v52 = vrot.slane %v6459_v10, 6 }
 0x532   :  { %6570 = vst [vmem:[%s11748_s5 + $0x38] sm:$0xf] %v6436_v16  ;;  %v6464_v44 = vrot.slane %v6462_v26, 7  ;;  %v7082_v17 = vpack.c.bf16 %v6221_v31, %v6221_v31  ;;  %v5983_v29 = vadd.f32 %v11626_v36, %v11435_v56  ;;  %v6180_v62 = vadd.f32 %v11515_v45, %v6014_v49 }
 0x533   :  { %v6446_v54 = vsel %vm11540_vm11, %v6437_v8, %v6445_v15  ;;  %v6487_v38 = vrot.slane %v6485_v13, 4  ;;  %v5984_v28 = vadd.f32 %v11635_v20, %v11446_v0  ;;  %v6489_v25 = vshrl.u32 %v7084_v18, 16  ;;  %v12171_v0 = vld [vmem:[#allocation23_spill] sm:$0xff] }
 0x534   :  { %6571 = vst [vmem:[%s11748_s5 + $0x3c] sm:$0xf] %v6446_v54  ;;  %v6465_v55 = vor.u32 %v6464_v44, %v6461_v52  ;;  %v6492_v5 = vshll.u32 %v7084_v18, 16  ;;  %v6469_v37 = vshrl.u32 %v7082_v17, 16  ;;  %v6472_v15 = vshll.u32 %v7082_v17, 16 }
 0x535   :  { %v6203_v56 = vmax.f32 %v6180_v62, 0.0  ;;  %v6012_v36 = vadd.f32 %v11466_v22, %v5983_v29  ;;  %v6491_v58 = vrot.slane %v6489_v25, 6  ;;  %v6013_v2 = vadd.f32 %v11466_v22, %v5984_v28 }
 0x536   :  { %v6466_v32 = vsel %vm11540_vm11, %v6457_v42, %v6465_v55  ;;  %v6467_v19 = vrot.slane %v6465_v55, 4  ;;  %v6494_v45 = vrot.slane %v6492_v5, 7  ;;  %v6471_v59 = vrot.slane %v6469_v37, 6 }
 0x537   :  { %6573 = vst [vmem:[%s11748_s5 + $0x44] sm:$0xf] %v6466_v32  ;;  %v6474_v53 = vrot.slane %v6472_v15, 7  ;;  %v6226_v20 = vmul.f32 %v6203_v56, %v12171_v0  ;;  %v6178_v34 = vadd.f32 %v11520_v60, %v6012_v36  ;;  %v6179_v23 = vadd.f32 %v11525_v14, %v6013_v2  ;;  %v12172_v60 = vld [vmem:[#allocation24_spill] sm:$0xff] }
 0x538   :  { %v6495_v30 = vor.u32 %v6494_v45, %v6491_v58 }
 0x539   :  { %v6475_v27 = vor.u32 %v6474_v53, %v6471_v59  ;;  %v7087_v47 = vpack.c.bf16 %v6226_v20, %v6226_v20  ;;  %v6201_v57 = vmax.f32 %v6178_v34, 0.0  ;;  %v6202_v7 = vmax.f32 %v6179_v23, 0.0 }
 0x53a   :  { %v6496_v6 = vsel %vm11540_vm11, %v6487_v38, %v6495_v30  ;;  %v6497_v16 = vrot.slane %v6495_v30, 4 }
 0x53b   :  { %v6476_v39 = vsel %vm11540_vm11, %v6467_v19, %v6475_v27  ;;  %v6477_v24 = vrot.slane %v6475_v27, 4  ;;  %6576 = vst [vmem:[%s11748_s5 + $0x50] sm:$0xf] %v6496_v6  ;;  %v6519_v22 = vshrl.u32 %v7087_v47, 16  ;;  %v6224_v9 = vmul.f32 %v6201_v57, %v12172_v60 }
 0x53c   :  { %6574 = vst [vmem:[%s11748_s5 + $0x48] sm:$0xf] %v6476_v39  ;;  %v6225_v41 = vmul.f32 %v6202_v7, %v12173_v35  ;;  %v6522_v1 = vshll.u32 %v7087_v47, 16 }
 0x53d   :  { %v6486_v14 = vsel %vm11540_vm11, %v6477_v24, %v6485_v13  ;;  %v6521_v4 = vrot.slane %v6519_v22, 6  ;;  %v7085_v50 = vpack.c.bf16 %v6224_v9, %v6224_v9 }
 0x53e   :  { %6575 = vst [vmem:[%s11748_s5 + $0x4c] sm:$0xf] %v6486_v14  ;;  %v7086_v42 = vpack.c.bf16 %v6225_v41, %v6225_v41  ;;  %v6524_v63 = vrot.slane %v6522_v1, 7 }
 0x53f   :  { %v6527_v61 = vrot.slane %v6521_v4, 4  ;;  %v6499_v48 = vshrl.u32 %v7085_v50, 16  ;;  %v6502_v12 = vshll.u32 %v7085_v50, 16 }
 0x540   :  { %v6509_v10 = vshrl.u32 %v7086_v42, 16  ;;  %v6512_v26 = vshll.u32 %v7086_v42, 16  ;;  %v6525_v44 = vor.u32 %v6524_v63, %v6521_v4 }
 0x541   :  { %v6581_v40 = vsel %vm10756_vm3, %v6527_v61, %v6580_v3  ;;  %v6501_v21 = vrot.slane %v6499_v48, 6  ;;  %v6504_v33 = vrot.slane %v6502_v12, 7 }
 0x542   :  { %6582 = vst [vmem:[%s11748_s5 + $0x60] sm:$0x1] %v6581_v40  ;;  %v6511_v11 = vrot.slane %v6509_v10, 6  ;;  %v6514_v46 = vrot.slane %v6512_v26, 7 }
 0x543   :  { %v6505_v8 = vor.u32 %v6504_v33, %v6501_v21 }
 0x544   :  { %v6515_v52 = vor.u32 %v6514_v46, %v6511_v11 }
 0x545   :  { %v6506_v31 = vsel %vm11540_vm11, %v6497_v16, %v6505_v8  ;;  %v6507_v13 = vrot.slane %v6505_v8, 4 }
 0x546   :  { %6577 = vst [vmem:[%s11748_s5 + $0x54] sm:$0xf] %v6506_v31  ;;  %v6517_v54 = vrot.slane %v6515_v52, 4 }
 0x547   :  { %v6516_v49 = vsel %vm11540_vm11, %v6507_v13, %v6515_v52 }
 0x548   :  { %6578 = vst [vmem:[%s11748_s5 + $0x58] sm:$0xf] %v6516_v49  ;;  %v6526_v18 = vsel %vm11540_vm11, %v6517_v54, %v6525_v44 }
 0x549   :  { %6579 = vst [vmem:[%s11748_s5 + $0x5c] sm:$0xf] %v6526_v18 }

// kernel: resnet_forward.6
= control target key start
LH: loop header
LB: loop body
LE: loop exit
PB: predicated region body
PF: predicated region fallthrough
CT: control target
= control target key end

     0   :  { %vm6343_vm0 = vsmask.f32 7424  ;;  %vm6342_vm1 = vcmask 1044480   ;;  %vm6341_vm2 = vsmask.f32 4352  ;;  %vm6340_vm3 = vcmask 1043456   ;;  %s6332_s1 = inlined_call_operand.vmem [shape: bf16[9,128,128], index: 1, kind: input, shape index: {}]   ;;  %s6333_s0 = inlined_call_operand.vmem [shape: bf16[4,80,128], index: 0, kind: input, shape index: {}]   ;;  %s6334_s3 = inlined_call_operand.vmem [shape: bf16[9,128,128], index: 3, kind: input, shape index: {}]   ;;  %s6335_s7 = inlined_call_operand.vmem [shape: bf16[80,128], index: 7, kind: output, shape index: {}]   ;;  %s6336_s2 = inlined_call_operand.vmem [shape: f32[1,128], index: 2, kind: input, shape index: {}]   ;;  %s6337_s5 = inlined_call_operand.vmem [shape: bf16[128,128], index: 5, kind: input, shape index: {}]   ;;  %s6338_s4 = inlined_call_operand.vmem [shape: f32[1,128], index: 4, kind: input, shape index: {}]   ;;  %s6339_s6 = inlined_call_operand.vmem [shape: f32[1,128], index: 6, kind: input, shape index: {}]  }
   0x1   :  { %v5022_v0 = vld [vmem:[%s6332_s1 + $0x40] sm:$0xff]   ;;  %v5023_v1 = vld [vmem:[%s6332_s1 + $0x48] sm:$0xff]   ;;  %v5024_v2 = vld [vmem:[%s6332_s1 + $0x50] sm:$0xff]   ;;  %vm6344_vm4 = vsmask.f32 3328  ;;  %vm33_vm6 = vcmask 1047554  }
   0x2   :  { %4404 = vmatprep.subr.bf16.mxu0 %v5022_v0  ;;  %v5025_v3 = vld [vmem:[%s6332_s1 + $0x58] sm:$0xff]   ;;  %v5030_v4 = vld [vmem:[%s6333_s0 + $0x28] sm:$0xff]   ;;  %v5026_v5 = vld [vmem:[%s6332_s1 + $0x60] sm:$0xff]   ;;  %vm34_vm7 = vsmask.f32 7946  ;;  %vm1880_vm9 = vcmask 1043458  }
   0x3   :  { %4405 = vmatpush3.bf16.msra.mxu0 %v5022_v0  ;;  %4420 = vmatprep.mubr.bf16.mxu0 %v5030_v4  ;;  %v5027_v6 = vld [vmem:[%s6332_s1 + $0x68] sm:$0xff]   ;;  %v5028_v7 = vld [vmem:[%s6332_s1 + $0x70] sm:$0xff]   ;;  %v5029_v8 = vld [vmem:[%s6332_s1 + $0x78] sm:$0xff]  }
   0x4   :  { %4406 = vmatprep.subr.bf16.mxu0 %v5023_v1  ;;  %v5031_v9 = vld [vmem:[%s6332_s1] sm:$0xff]   ;;  %v5032_v10 = vld [vmem:[%s6333_s0 + $0x30] sm:$0xff]   ;;  %v5038_v11 = vld [vmem:[%s6333_s0 + $0x38] sm:$0xff]  }
   0x5   :  { %v5033_v12 = vld [vmem:[%s6332_s1 + $0x8] sm:$0xff]   ;;  %v5034_v13 = vld [vmem:[%s6332_s1 + $0x10] sm:$0xff]   ;;  %v5040_v14 = vld [vmem:[%s6333_s0 + $0x40] sm:$0x7f]  }
   0x6   :  { %v5042_v15 = vld [vmem:[%s6333_s0] sm:$0xff]   ;;  %v5035_v16 = vld [vmem:[%s6332_s1 + $0x18] sm:$0xff]   ;;  %v5037_v18 = vld [vmem:[%s6332_s1 + $0x28] sm:$0xff]  }
   0x7   :  { %4407 = vmatpush3.bf16.msra.mxu0 %v5023_v1  ;;  %v5036_v17 = vld [vmem:[%s6332_s1 + $0x20] sm:$0xff]   ;;  %v5039_v19 = vld [vmem:[%s6332_s1 + $0x30] sm:$0xff]   ;;  %v5041_v20 = vld [vmem:[%s6332_s1 + $0x38] sm:$0xff]   ;;  %v389_v23 = vshll.u32 %v5042_v15, 16  ;;  %v387_v27 = vshrl.u32 %v5042_v15, 16 }
   0x8   :  { %4408 = vmatprep.subr.bf16.mxu0 %v5024_v2  ;;  %v5044_v21 = vld [vmem:[%s6333_s0 + $0x8] sm:$0xff]   ;;  %v5043_v22 = vld [vmem:[%s6332_s1 + $0x80] sm:$0xff]   ;;  %v5050_v26 = vld [vmem:[%s6333_s0 + $0x10] sm:$0xff]  }
   0x9   :  { %v394_v24 = vshll.u32 %v5044_v21, 16  ;;  %v5045_v25 = vld [vmem:[%s6332_s1 + $0x88] sm:$0xff]   ;;  %v391_v28 = vrot.slane %v389_v23, 1  ;;  %v46_v30 = vld [vmem:[%s6333_s0 + $0x18] sm:$0xf]  ;;  %v5046_v31 = vld [vmem:[%s6332_s1 + $0x90] sm:$0xff]  }
   0xa   :  { %v47_v32 = vld [vmem:[%s6333_s0 + $0x1c] sm:$0x7]  ;;  %v5048_v37 = vld [vmem:[%s6332_s1 + $0xa0] sm:$0xff]   ;;  %v5049_v38 = vld [vmem:[%s6332_s1 + $0xa8] sm:$0xff]   ;;  %v402_v40 = vshll.u32 %v5050_v26, 16  ;;  %v398_v43 = vshrl.u32 %v5044_v21, 16 }
   0xb   :  { %4409 = vmatpush3.bf16.msra.mxu0 %v5024_v2  ;;  %v396_v29 = vrot.slane %v394_v24, 1  ;;  %v392_v33 = vor.u32 %v391_v28, %v387_v27  ;;  %v3713_v34 = vcombine.low %v46_v30, %v47_v32  ;;  %v5047_v35 = vld [vmem:[%s6332_s1 + $0x98] sm:$0xff]   ;;  %v5051_v41 = vld [vmem:[%s6332_s1 + $0xb0] sm:$0xff]   ;;  %v406_v46 = vshrl.u32 %v5050_v26, 16  ;;  %v5055_v49 = vld [vmem:[%s6332_s1 + $0xc0] sm:$0xff]  }
   0xc   :  { %4410 = vmatprep.subr.bf16.mxu0 %v5025_v3  ;;  %v364_v39 = vld [vmem:[%s6333_s0 + $0x1c] sm:$0xf]  ;;  %v404_v44 = vrot.slane %v402_v40, 1  ;;  %v5056_v53 = vld [vmem:[%s6332_s1 + $0xc8] sm:$0xff]   ;;  %v5057_v56 = vld [vmem:[%s6332_s1 + $0xd0] sm:$0xff]  }
   0xd   :  { %v397_v36 = vsel %vm6343_vm0, %v392_v33, %v396_v29  ;;  %v3738_v42 = vcombine.low %v46_v30, %v364_v39  ;;  %v5054_v45 = vld [vmem:[%s6332_s1 + $0xb8] sm:$0xff]   ;;  %v400_v48 = vor.u32 %v398_v43, %v396_v29  ;;  %v5366_v58 = vld [vmem:[%s6333_s0 + $0x50] sm:$0xff]   ;;  %v5059_v60 = vld [vmem:[%s6332_s1 + $0xe0] sm:$0xff]  }
   0xe   :  { %v408_v50 = vor.u32 %v406_v46, %v404_v44  ;;  %v5058_v59 = vld [vmem:[%s6332_s1 + $0xd8] sm:$0xff]   ;;  %v5060_v61 = vld [vmem:[%s6332_s1 + $0xe8] sm:$0xff]   ;;  %v5061_v62 = vld [vmem:[%s6332_s1 + $0xf0] sm:$0xff]  }
   0xf   :  { %4411 = vmatpush3.bf16.msra.mxu0 %v5025_v3  ;;  %v410_v47 = vshll.u32 %v3738_v42, 16  ;;  %v405_v52 = vsel %vm6343_vm0, %v400_v48, %v404_v44  ;;  %v414_v55 = vshrl.u32 %v3738_v42, 16  ;;  %v5062_v63 = vld [vmem:[%s6332_s1 + $0xf8] sm:$0xff]   ;;  %v5064_v0 = vld [vmem:[%s6332_s1 + $0x100] sm:$0xff]   ;;  %v5066_v3 = vld [vmem:[%s6332_s1 + $0x108] sm:$0xff]  }
  0x10   :  { %4412 = vmatprep.subr.bf16.mxu0 %v5026_v5  ;;  %v5390_v1 = vld [vmem:[%s6333_s0 + $0x58] sm:$0xff]   ;;  %v5395_v2 = vld [vmem:[%s6333_s0 + $0x60] sm:$0xff]   ;;  %v3753_v4 = vld [vmem:[%s6333_s0 + $0x68] sm:$0xf] }
  0x11   :  { %v412_v51 = vrot.slane %v410_v47, 1  ;;  %v5082_v28 = vld [vmem:[%s6332_s1 + $0x160] sm:$0xff]   ;;  %v5083_v29 = vld [vmem:[%s6332_s1 + $0x168] sm:$0xff]   ;;  %v5085_v32 = vld [vmem:[%s6332_s1 + $0x170] sm:$0xff]   ;;  %v921_v33 = vshll.u32 %v5395_v2, 16 }
  0x12   :  { %v3819_v30 = vld [vmem:[%s6333_s0 + $0x6c] sm:$0xf]  ;;  %v5088_v40 = vld [vmem:[%s6332_s1 + $0x180] sm:$0xff]   ;;  %vm5622_vm5 = vmand %vm6340_vm3, %vm6344_vm4 }
  0x13   :  { %4413 = vmatpush3.bf16.msra.mxu0 %v5026_v5  ;;  %v413_v54 = vsel %vm6343_vm0, %v408_v50, %v412_v51  ;;  %v416_v57 = vor.u32 %v414_v55, %v412_v51  ;;  %v3754_v5 = vld [vmem:[%s6333_s0 + $0x6c] sm:$0x7]  ;;  %v5483_v46 = vld [vmem:[%s6333_s0] sm:$0xf8]   ;;  %vm35_vm8 = vmand %vm33_vm6, %vm34_vm7 }
  0x14   :  { %4414 = vmatprep.subr.bf16.mxu0 %v5027_v6  ;;  %v5089_v44 = vld [vmem:[%s6332_s1 + $0x188] sm:$0xff]   ;;  %v1111_v50 = vrot.slane %v5483_v46, 3  ;;  %v5092_v55 = vld [vmem:[%s6332_s1 + $0x1a0] sm:$0xff]   ;;  %vm1881_vm10 = vmand %vm1880_vm9, %vm34_vm7 }
  0x15   :  { %v5488_v47 = vld [vmem:[%s6333_s0 + $0x8] sm:$0xff]  }
  0x16   :  { %v1112_v51 = vrot.slane %v5488_v47, 3 }
  0x17   :  { %4415 = vmatpush3.bf16.msra.mxu0 %v5027_v6  ;;  %v5067_v6 = vld [vmem:[%s6332_s1 + $0x110] sm:$0xff]  }
  0x18   :  { %4416 = vmatprep.subr.bf16.mxu0 %v5028_v7 }
  0x1b   :  { %4417 = vmatpush3.bf16.msra.mxu0 %v5028_v7  ;;  %v3774_v7 = vcombine.low %v3753_v4, %v3754_v5  ;;  %v5110_v5 = vld [vmem:[%s6333_s0 + $0x30] sm:$0xff]  }
  0x1c   :  { %4418 = vmatprep.subr.bf16.mxu0 %v5029_v8 }
  0x1f   :  { %4419 = vmatpush3.bf16.msra.mxu0 %v5029_v8  ;;  %v5076_v8 = vld [vmem:[%s6333_s0 + $0x78] sm:$0xff]  }
  0x20   :  { %4428 = vmatprep.subr.bf16.mxu0 %v5031_v9 }
  0x22   :  { %4421 = vmatmul.mubr.bf16.vlgmr.msra.gmra.mrb[0].mxu0 %v5032_v10  ;;  %v5069_v10 = vld [vmem:[%s6332_s1 + $0x120] sm:$0xff]  }
  0x23   :  { %4429 = vmatpush3.bf16.msra.mxu0 %v5031_v9  ;;  %4424 = vmatprep.mubr.bf16.mxu0 %v5038_v11  ;;  %v5068_v9 = vld [vmem:[%s6332_s1 + $0x118] sm:$0xff]   ;;  %v5070_v11 = vld [vmem:[%s6332_s1 + $0x128] sm:$0xff]  }
  0x24   :  { %4430 = vmatprep.subr.bf16.mxu0 %v5033_v12 }
  0x27   :  { %4431 = vmatpush3.bf16.msra.mxu0 %v5033_v12  ;;  %v5072_v12 = vld [vmem:[%s6332_s1 + $0x130] sm:$0xff]  }
  0x28   :  { %4432 = vmatprep.subr.bf16.mxu0 %v5034_v13 }
  0x2a   :  { %4425 = vmatmul.mubr.bf16.gmra.mrb[4].mxu0 %v5040_v14  ;;  %v908_v14 = vshll.u32 %v5366_v58, 16 }
  0x2b   :  { %4433 = vmatpush3.bf16.msra.mxu0 %v5034_v13  ;;  %4444 = vmatprep.mubr.bf16.mxu0 %v5042_v15  ;;  %v5075_v13 = vld [vmem:[%s6332_s1 + $0x138] sm:$0xff]   ;;  %v5077_v15 = vld [vmem:[%s6332_s1 + $0x140] sm:$0xff]  }
  0x2c   :  { %4434 = vmatprep.subr.bf16.mxu0 %v5035_v16 }
  0x2f   :  { %4435 = vmatpush3.bf16.msra.mxu0 %v5035_v16  ;;  %v5078_v16 = vld [vmem:[%s6333_s0 + $0x80] sm:$0xff]  }
  0x30   :  { %4436 = vmatprep.subr.bf16.mxu0 %v5036_v17 }
  0x33   :  { %4437 = vmatpush3.bf16.msra.mxu0 %v5036_v17  ;;  %v5084_v17 = vld [vmem:[%s6333_s0 + $0x88] sm:$0xff]  }
  0x34   :  { %4438 = vmatprep.subr.bf16.mxu0 %v5037_v18 }
  0x37   :  { %4439 = vmatpush3.bf16.msra.mxu0 %v5037_v18  ;;  %v5079_v18 = vld [vmem:[%s6332_s1 + $0x148] sm:$0xff]  }
  0x38   :  { %4440 = vmatprep.subr.bf16.mxu0 %v5039_v19 }
  0x3b   :  { %4441 = vmatpush3.bf16.msra.mxu0 %v5039_v19  ;;  %v906_v19 = vshrl.u32 %v5366_v58, 16 }
  0x3c   :  { %4442 = vmatprep.subr.bf16.mxu0 %v5041_v20 }
  0x3f   :  { %4443 = vmatpush3.bf16.msra.mxu0 %v5041_v20  ;;  %v910_v20 = vrot.slane %v908_v14, 1  ;;  %v5104_v14 = vld [vmem:[%s6332_s1 + $0x1e8] sm:$0xff]  }
  0x40   :  { %4452 = vmatprep.subr.bf16.mxu0 %v5043_v22 }
  0x41   :  { %v911_v23 = vor.u32 %v910_v20, %v906_v19 }
  0x42   :  { %4445 = vmatmul.mubr.bf16.vlgmr.msra.gmra.mrb[0].mxu0 %v5044_v21  ;;  %v913_v21 = vshll.u32 %v5390_v1, 16 }
  0x43   :  { %4453 = vmatpush3.bf16.msra.mxu0 %v5043_v22  ;;  %4448 = vmatprep.mubr.bf16.mxu0 %v5050_v26  ;;  %v5080_v22 = vld [vmem:[%s6332_s1 + $0x150] sm:$0xff]   ;;  %v5081_v26 = vld [vmem:[%s6332_s1 + $0x158] sm:$0xff]  }
  0x44   :  { %4454 = vmatprep.subr.bf16.mxu0 %v5045_v25  ;;  %v915_v24 = vrot.slane %v913_v21, 1  ;;  %v5111_v21 = vld [vmem:[%s6332_s1 + $0x200] sm:$0xff]  }
  0x46   :  { %v916_v27 = vsel %vm6343_vm0, %v911_v23, %v915_v24  ;;  %v1454_v23 = vshll.u32 %v5483_v46, 16 }
  0x47   :  { %4455 = vmatpush3.bf16.msra.mxu0 %v5045_v25  ;;  %v5086_v25 = vld [vmem:[%s6333_s0 + $0x90] sm:$0x7f]  }
  0x48   :  { %4456 = vmatprep.subr.bf16.mxu0 %v5046_v31 }
  0x4a   :  { %4449 = vmatmul.mubr.bf16.gmra.mrb[4].mxu0 %v3713_v34  ;;  %v917_v34 = vshrl.u32 %v5390_v1, 16 }
  0x4b   :  { %4457 = vmatpush3.bf16.msra.mxu0 %v5046_v31  ;;  %4468 = vmatprep.mubr.bf16.mxu0 %v397_v36  ;;  %v3836_v31 = vcombine.low %v3753_v4, %v3819_v30  ;;  %v925_v36 = vshrl.u32 %v5395_v2, 16  ;;  %v5109_v4 = vld [vmem:[%s6333_s0 + $0x28] sm:$0xf8]  }
  0x4c   :  { %4458 = vmatprep.subr.bf16.mxu0 %v5047_v35  ;;  %v919_v39 = vor.u32 %v917_v34, %v915_v24  ;;  %v1459_v24 = vshrl.u32 %v5488_v47, 16 }
  0x4d   :  { %v933_v48 = vshrl.u32 %v3836_v31, 16 }
  0x4f   :  { %4459 = vmatpush3.bf16.msra.mxu0 %v5047_v35  ;;  %v5087_v35 = vld [vmem:[%s6332_s1 + $0x178] sm:$0xff]  }
  0x50   :  { %4460 = vmatprep.subr.bf16.mxu0 %v5048_v37 }
  0x53   :  { %4461 = vmatpush3.bf16.msra.mxu0 %v5048_v37  ;;  %v929_v37 = vshll.u32 %v3836_v31, 16  ;;  %v1456_v31 = vrot.slane %v1454_v23, 4 }
  0x54   :  { %4462 = vmatprep.subr.bf16.mxu0 %v5049_v38 }
  0x55   :  { %v931_v42 = vrot.slane %v929_v37, 1 }
  0x57   :  { %4463 = vmatpush3.bf16.msra.mxu0 %v5049_v38  ;;  %v923_v38 = vrot.slane %v921_v33, 1 }
  0x58   :  { %4464 = vmatprep.subr.bf16.mxu0 %v5051_v41 }
  0x59   :  { %v924_v43 = vsel %vm6343_vm0, %v919_v39, %v923_v38  ;;  %v5115_v39 = vld [vmem:[%s6332_s1 + $0x218] sm:$0xff]  }
  0x5b   :  { %4465 = vmatpush3.bf16.msra.mxu0 %v5051_v41  ;;  %v927_v41 = vor.u32 %v925_v36, %v923_v38 }
  0x5c   :  { %4466 = vmatprep.subr.bf16.mxu0 %v5054_v45 }
  0x5f   :  { %4467 = vmatpush3.bf16.msra.mxu0 %v5054_v45  ;;  %v932_v45 = vsel %vm6343_vm0, %v927_v41, %v931_v42  ;;  %v5116_v41 = vld [vmem:[%s6332_s1 + $0x220] sm:$0xff]  }
  0x60   :  { %4476 = vmatprep.subr.bf16.mxu0 %v5055_v49 }
  0x62   :  { %4469 = vmatmul.mubr.bf16.vlgmr.msra.gmra.mrb[0].mxu0 %v405_v52  ;;  %v935_v52 = vor.u32 %v933_v48, %v931_v42  ;;  %v5117_v42 = vld [vmem:[%s6332_s1 + $0x228] sm:$0xff]  }
  0x63   :  { %4477 = vmatpush3.bf16.msra.mxu0 %v5055_v49  ;;  %4472 = vmatprep.mubr.bf16.mxu0 %v413_v54  ;;  %v5090_v49 = vld [vmem:[%s6332_s1 + $0x190] sm:$0xff]   ;;  %v1113_v54 = vsel %vm6342_vm1, %v1111_v50, %v1112_v51  ;;  %v5122_v50 = vld [vmem:[%s6333_s0 + $0x20] ss:$0 sps:$4 sm:$0x77]  }
  0x64   :  { %4478 = vmatprep.subr.bf16.mxu0 %v5056_v53 }
  0x67   :  { %4479 = vmatpush3.bf16.msra.mxu0 %v5056_v53  ;;  %v5091_v53 = vld [vmem:[%s6332_s1 + $0x198] sm:$0xff]  }
  0x68   :  { %4480 = vmatprep.subr.bf16.mxu0 %v5057_v56 }
  0x6a   :  { %4473 = vmatmul.mubr.bf16.gmra.mrb[4].mxu0 %v416_v57  ;;  %v5094_v57 = vld [vmem:[%s6332_s1 + $0x1b0] sm:$0xff]  }
  0x6b   :  { %4481 = vmatpush3.bf16.msra.mxu0 %v5057_v56  ;;  %4492 = vmatprep.mubr.bf16.mxu0 %v5366_v58  ;;  %v5093_v56 = vld [vmem:[%s6332_s1 + $0x1a8] sm:$0xff]   ;;  %v5511_v58 = vld [vmem:[%s6333_s0 + $0x10] sm:$0xff]  }
  0x6c   :  { %4482 = vmatprep.subr.bf16.mxu0 %v5058_v59 }
  0x6f   :  { %4483 = vmatpush3.bf16.msra.mxu0 %v5058_v59  ;;  %v5095_v59 = vld [vmem:[%s6332_s1 + $0x1b8] sm:$0xff]  }
  0x70   :  { %4484 = vmatprep.subr.bf16.mxu0 %v5059_v60 }
  0x73   :  { %4485 = vmatpush3.bf16.msra.mxu0 %v5059_v60  ;;  %v5519_v60 = vld [vmem:[%s6333_s0 + $0x18] sm:$0xff]  }
  0x74   :  { %4486 = vmatprep.subr.bf16.mxu0 %v5060_v61 }
  0x77   :  { %4487 = vmatpush3.bf16.msra.mxu0 %v5060_v61  ;;  %v1114_v61 = vrot.slane %v5511_v58, 3 }
  0x78   :  { %4488 = vmatprep.subr.bf16.mxu0 %v5061_v62 }
  0x7b   :  { %4489 = vmatpush3.bf16.msra.mxu0 %v5061_v62  ;;  %v5098_v62 = vld [vmem:[%s6332_s1 + $0x1c0] sm:$0xff]  }
  0x7c   :  { %4490 = vmatprep.subr.bf16.mxu0 %v5062_v63 }
  0x7f   :  { %4491 = vmatpush3.bf16.msra.mxu0 %v5062_v63  ;;  %v1116_v63 = vrot.slane %v5519_v60, 3 }
  0x80   :  { %4500 = vmatprep.subr.bf16.mxu0 %v5064_v0 }
  0x82   :  { %4493 = vmatmul.mubr.bf16.vlgmr.msra.gmra.mrb[0].mxu0 %v5390_v1  ;;  %v5107_v1 = vld [vmem:[%s6333_s0 + $0x20] ss:$0 sps:$4 sm:$0x33]  }
  0x83   :  { %4501 = vmatpush3.bf16.msra.mxu0 %v5064_v0  ;;  %4496 = vmatprep.mubr.bf16.mxu0 %v5395_v2  ;;  %v1115_v0 = vsel %vm6342_vm1, %v1112_v51, %v1114_v61  ;;  %v5100_v2 = vld [vmem:[%s6332_s1 + $0x1c8] sm:$0xff]   ;;  %v5121_v51 = vld [vmem:[%s6332_s1 + $0x238] sm:$0xff]  }
  0x84   :  { %4502 = vmatprep.subr.bf16.mxu0 %v5066_v3 }
  0x87   :  { %4503 = vmatpush3.bf16.msra.mxu0 %v5066_v3  ;;  %v1117_v3 = vsel %vm6342_vm1, %v1114_v61, %v1116_v63 }
  0x88   :  { %4504 = vmatprep.subr.bf16.mxu0 %v5067_v6 }
  0x8a   :  { %4497 = vmatmul.mubr.bf16.gmra.mrb[4].mxu0 %v3774_v7  ;;  %v5101_v7 = vld [vmem:[%s6332_s1 + $0x1d0] sm:$0xff]  }
  0x8b   :  { %4505 = vmatpush3.bf16.msra.mxu0 %v5067_v6  ;;  %4516 = vmatprep.mubr.bf16.mxu0 %v5076_v8  ;;  %v1118_v6 = vrot.slane %v5107_v1, 3  ;;  %v1294_v8 = vrot.slane %v5109_v4, 3  ;;  %v5124_v1 = vld [vmem:[%s6334_s3 + $0x48] sm:$0xff]  }
  0x8c   :  { %4506 = vmatprep.subr.bf16.mxu0 %v5068_v9 }
  0x8f   :  { %4507 = vmatpush3.bf16.msra.mxu0 %v5068_v9  ;;  %v1295_v9 = vrot.slane %v5110_v5, 3 }
  0x90   :  { %4508 = vmatprep.subr.bf16.mxu0 %v5069_v10 }
  0x93   :  { %4509 = vmatpush3.bf16.msra.mxu0 %v5069_v10  ;;  %v1119_v10 = vsel %vm6342_vm1, %v1116_v63, %v1118_v6  ;;  %v5126_v6 = vld [vmem:[%s6334_s3 + $0x58] sm:$0xff]  }
  0x94   :  { %4510 = vmatprep.subr.bf16.mxu0 %v5070_v11 }
  0x97   :  { %4511 = vmatpush3.bf16.msra.mxu0 %v5070_v11  ;;  %v5102_v11 = vld [vmem:[%s6332_s1 + $0x1d8] sm:$0xff]  }
  0x98   :  { %4512 = vmatprep.subr.bf16.mxu0 %v5072_v12 }
  0x9b   :  { %4513 = vmatpush3.bf16.msra.mxu0 %v5072_v12  ;;  %v1296_v12 = vsel %vm6342_vm1, %v1294_v8, %v1295_v9  ;;  %v1877_v8 = vld [vmem:[%s6335_s7] sm:$0xf] }
  0x9c   :  { %4514 = vmatprep.subr.bf16.mxu0 %v5075_v13 }
  0x9f   :  { %4515 = vmatpush3.bf16.msra.mxu0 %v5075_v13  ;;  %v5103_v13 = vld [vmem:[%s6332_s1 + $0x1e0] sm:$0xff]  }
  0xa0   :  { %4524 = vmatprep.subr.bf16.mxu0 %v5077_v15 }
  0xa2   :  { %4517 = vmatmul.mubr.bf16.vlgmr.msra.gmra.mrb[0].mxu0 %v5078_v16  ;;  %v5112_v16 = vld [vmem:[%s6333_s0 + $0x38] sm:$0xff]  }
  0xa3   :  { %4525 = vmatpush3.bf16.msra.mxu0 %v5077_v15  ;;  %4520 = vmatprep.mubr.bf16.mxu0 %v5084_v17  ;;  %v5106_v15 = vld [vmem:[%s6332_s1 + $0x1f0] sm:$0xff]   ;;  %v5118_v17 = vld [vmem:[%s6333_s0 + $0x40] sm:$0xff]   ;;  %v1297_v19 = vrot.slane %v5112_v16, 3 }
  0xa4   :  { %4526 = vmatprep.subr.bf16.mxu0 %v5079_v18  ;;  %v1299_v20 = vrot.slane %v5118_v17, 3  ;;  %v5130_v17 = vld [vmem:[%s6334_s3 + $0x78] sm:$0xff]  }
  0xa7   :  { %4527 = vmatpush3.bf16.msra.mxu0 %v5079_v18  ;;  %v5108_v18 = vld [vmem:[%s6332_s1 + $0x1f8] sm:$0xff]  }
  0xa8   :  { %4528 = vmatprep.subr.bf16.mxu0 %v5080_v22 }
  0xaa   :  { %4521 = vmatmul.mubr.bf16.gmra.mrb[4].mxu0 %v5086_v25  ;;  %v1462_v25 = vshll.u32 %v5488_v47, 16  ;;  %v1480_v47 = vshll.u32 %v5519_v60, 16 }
  0xab   :  { %4529 = vmatpush3.bf16.msra.mxu0 %v5080_v22  ;;  %4540 = vmatprep.mubr.bf16.mxu0 %v916_v27  ;;  %v1451_v22 = vshrl.u32 %v5483_v46, 16  ;;  %v1300_v27 = vsel %vm6342_vm1, %v1297_v19, %v1299_v20  ;;  %v1477_v46 = vshrl.u32 %v5519_v60, 16 }
  0xac   :  { %4530 = vmatprep.subr.bf16.mxu0 %v5081_v26  ;;  %v1464_v33 = vrot.slane %v1462_v25, 4 }
  0xad   :  { %v1453_v30 = vrot.slane %v1451_v22, 3 }
  0xaf   :  { %4531 = vmatpush3.bf16.msra.mxu0 %v5081_v26  ;;  %v1298_v26 = vsel %vm6342_vm1, %v1295_v9, %v1297_v19  ;;  %v1457_v36 = vor.u32 %v1456_v31, %v1453_v30  ;;  %v36_v9 = vld [vmem:[#allocation2 + $0x20] sm:$0xfc]  ;;  %v1641_v19 = vlaneseq }
  0xb0   :  { %4532 = vmatprep.subr.bf16.mxu0 %v5082_v28 }
  0xb3   :  { %4533 = vmatpush3.bf16.msra.mxu0 %v5082_v28  ;;  %v5119_v28 = vld [vmem:[%s6333_s0 + $0x48] ss:$0 sps:$4 sm:$0x33]  }
  0xb4   :  { %4534 = vmatprep.subr.bf16.mxu0 %v5083_v29  ;;  %v1301_v34 = vrot.slane %v5119_v28, 3 }
  0xb6   :  { %v1302_v38 = vsel %vm6342_vm1, %v1299_v20, %v1301_v34  ;;  %v1642_v20 = vshrl.u32 %v1641_v19, 7 }
  0xb7   :  { %4535 = vmatpush3.bf16.msra.mxu0 %v5083_v29  ;;  %v5113_v29 = vld [vmem:[%s6332_s1 + $0x208] sm:$0xff]  }
  0xb8   :  { %4536 = vmatprep.subr.bf16.mxu0 %v5085_v32  ;;  %v1645_v22 = vadd.s32 24, %v1642_v20  ;;  %v1650_v25 = vadd.s32 7, %v1642_v20  ;;  %v1648_v28 = vadd.s32 48, %v1642_v20 }
  0xba   :  { %v1658_v30 = vcvt.s32.f32 %v1650_v25 }
  0xbb   :  { %4537 = vmatpush3.bf16.msra.mxu0 %v5085_v32  ;;  %v1461_v32 = vrot.slane %v1459_v24, 3  ;;  %v1643_v24 = vadd.s32 8, %v1642_v20 }
  0xbc   :  { %4538 = vmatprep.subr.bf16.mxu0 %v5087_v35 }
  0xbd   :  { %v1465_v37 = vor.u32 %v1464_v33, %v1461_v32  ;;  %v1666_v33 = vadd.f32 0.5, %v1658_v30 }
  0xbf   :  { %4539 = vmatpush3.bf16.msra.mxu0 %v5087_v35  ;;  %v5114_v35 = vld [vmem:[%s6332_s1 + $0x210] sm:$0xff]  }
  0xc0   :  { %4548 = vmatprep.subr.bf16.mxu0 %v5088_v40 }
  0xc2   :  { %4541 = vmatmul.mubr.bf16.vlgmr.msra.gmra.mrb[0].mxu0 %v924_v43  ;;  %v1468_v43 = vshrl.u32 %v5511_v58, 16 }
  0xc3   :  { %4549 = vmatpush3.bf16.msra.mxu0 %v5088_v40  ;;  %4544 = vmatprep.mubr.bf16.mxu0 %v932_v45  ;;  %v1466_v40 = vsel %vm6341_vm2, %v1457_v36, %v1465_v37  ;;  %v5120_v45 = vld [vmem:[%s6332_s1 + $0x230] sm:$0xff]   ;;  %v1646_v36 = vadd.s32 32, %v1642_v20 }
  0xc4   :  { %4550 = vmatprep.subr.bf16.mxu0 %v5089_v44  ;;  %v1470_v48 = vrot.slane %v1468_v43, 3 }
  0xc5   :  { %v1654_v43 = vadd.s32 7, %v1646_v36 }
  0xc7   :  { %4551 = vmatpush3.bf16.msra.mxu0 %v5089_v44  ;;  %v1471_v44 = vshll.u32 %v5511_v58, 16 }
  0xc8   :  { %4552 = vmatprep.subr.bf16.mxu0 %v5090_v49 }
  0xca   :  { %4545 = vmatmul.mubr.bf16.gmra.mrb[4].mxu0 %v935_v52  ;;  %v1479_v52 = vrot.slane %v1477_v46, 3 }
  0xcb   :  { %4553 = vmatpush3.bf16.msra.mxu0 %v5090_v49  ;;  %4564 = vmatprep.mubr.bf16.mxu0 %v1113_v54  ;;  %v1473_v49 = vrot.slane %v1471_v44, 4 }
  0xcc   :  { %4554 = vmatprep.subr.bf16.mxu0 %v5091_v53 }
  0xcd   :  { %v1474_v54 = vor.u32 %v1473_v49, %v1470_v48 }
  0xcf   :  { %4555 = vmatpush3.bf16.msra.mxu0 %v5091_v53  ;;  %v1482_v53 = vrot.slane %v1480_v47, 4  ;;  %v1475_v58 = vsel %vm6341_vm2, %v1465_v37, %v1474_v54  ;;  %v1649_v37 = vadd.s32 56, %v1642_v20 }
  0xd0   :  { %4556 = vmatprep.subr.bf16.mxu0 %v5092_v55 }
  0xd1   :  { %v1657_v44 = vadd.s32 7, %v1649_v37 }
  0xd3   :  { %4557 = vmatpush3.bf16.msra.mxu0 %v5092_v55  ;;  %v1486_v55 = vshrl.u32 %v5122_v50, 16 }
  0xd4   :  { %4558 = vmatprep.subr.bf16.mxu0 %v5093_v56 }
  0xd7   :  { %4559 = vmatpush3.bf16.msra.mxu0 %v5093_v56  ;;  %v1489_v56 = vshll.u32 %v5122_v50, 16 }
  0xd8   :  { %4560 = vmatprep.subr.bf16.mxu0 %v5094_v57 }
  0xd9   :  { %v1491_v60 = vrot.slane %v1489_v56, 4 }
  0xdb   :  { %4561 = vmatpush3.bf16.msra.mxu0 %v5094_v57  ;;  %v1483_v57 = vor.u32 %v1482_v53, %v1479_v52  ;;  %v1665_v52 = vcvt.s32.f32 %v1657_v44 }
  0xdc   :  { %4562 = vmatprep.subr.bf16.mxu0 %v5095_v59 }
  0xdd   :  { %v1484_v61 = vsel %vm6341_vm2, %v1474_v54, %v1483_v57 }
  0xdf   :  { %4563 = vmatpush3.bf16.msra.mxu0 %v5095_v59  ;;  %v1488_v59 = vrot.slane %v1486_v55, 3 }
  0xe0   :  { %4572 = vmatprep.subr.bf16.mxu0 %v5098_v62 }
  0xe2   :  { %4565 = vmatmul.mubr.bf16.vlgmr.msra.gmra.mrb[0].mxu0 %v1115_v0  ;;  %v5123_v0 = vld [vmem:[%s6334_s3 + $0x40] sm:$0xff]  }
  0xe3   :  { %4573 = vmatpush3.bf16.msra.mxu0 %v5098_v62  ;;  %4568 = vmatprep.mubr.bf16.mxu0 %v1117_v3  ;;  %v1492_v62 = vor.u32 %v1491_v60, %v1488_v59  ;;  %v5125_v3 = vld [vmem:[%s6334_s3 + $0x50] sm:$0xff]   ;;  %v1673_v60 = vadd.f32 0.5, %v1665_v52 }
  0xe4   :  { %4574 = vmatprep.subr.bf16.mxu0 %v5100_v2  ;;  %4620 = vmatprep.subr.bf16.mxu1 %v5123_v0 }
  0xe5   :  { %v1493_v63 = vsel %vm6341_vm2, %v1483_v57, %v1492_v62  ;;  %4621 = vmatpush3.bf16.msra.mxu1 %v5123_v0  ;;  %v1681_v4 = vmul.f32 0.025, %v1673_v60 }
  0xe6   :  { %4622 = vmatprep.subr.bf16.mxu1 %v5124_v1 }
  0xe7   :  { %4575 = vmatpush3.bf16.msra.mxu0 %v5100_v2  ;;  %v30_v2 = vld [vmem:[#allocation2] sm:$0xf] }
  0xe8   :  { %4576 = vmatprep.subr.bf16.mxu0 %v5101_v7  ;;  %v31_v5 = vsel %vm5622_vm5, 0, %v30_v2 }
  0xe9   :  { %4623 = vmatpush3.bf16.msra.mxu1 %v5124_v1  ;;  %32 = vst [vmem:[#allocation2] sm:$0xf] %v31_v5 }
  0xea   :  { %4569 = vmatmul.mubr.bf16.gmra.mrb[4].mxu0 %v1119_v10  ;;  %4624 = vmatprep.subr.bf16.mxu1 %v5125_v3  ;;  %v1878_v10 = vsel %vm5622_vm5, 0, %v1877_v8 }
  0xeb   :  { %4577 = vmatpush3.bf16.msra.mxu0 %v5101_v7  ;;  %4588 = vmatprep.mubr.bf16.mxu0 %v1296_v12  ;;  %v5127_v7 = vld [vmem:[%s6334_s3 + $0x60] sm:$0xff]   ;;  %v5128_v12 = vld [vmem:[%s6334_s3 + $0x68] sm:$0xff]   ;;  %1879 = vst [vmem:[%s6335_s7] sm:$0xf] %v1878_v10 }
  0xec   :  { %4578 = vmatprep.subr.bf16.mxu0 %v5102_v11 }
  0xed   :  { %4625 = vmatpush3.bf16.msra.mxu1 %v5125_v3 }
  0xee   :  { %4626 = vmatprep.subr.bf16.mxu1 %v5126_v6 }
  0xef   :  { %4579 = vmatpush3.bf16.msra.mxu0 %v5102_v11  ;;  %v5207_v11 = vmov 0  }
  0xf0   :  { %4580 = vmatprep.subr.bf16.mxu0 %v5103_v13  ;;  %1885 = vst [vmem:[%s6335_s7 + $0x24] sm:$0xf] %v5207_v11 }
  0xf1   :  { %4627 = vmatpush3.bf16.msra.mxu1 %v5126_v6 }
  0xf2   :  { %4628 = vmatprep.subr.bf16.mxu1 %v5127_v7 }
  0xf3   :  { %4581 = vmatpush3.bf16.msra.mxu0 %v5103_v13  ;;  %v37_v13 = vsel %vm35_vm8, 0, %v36_v9 }
  0xf4   :  { %4582 = vmatprep.subr.bf16.mxu0 %v5104_v14  ;;  %38 = vst [vmem:[#allocation2 + $0x20] sm:$0xfc] %v37_v13 }
  0xf5   :  { %4629 = vmatpush3.bf16.msra.mxu1 %v5127_v7 }
  0xf6   :  { %4630 = vmatprep.subr.bf16.mxu1 %v5128_v12 }
  0xf7   :  { %4583 = vmatpush3.bf16.msra.mxu0 %v5104_v14  ;;  %v5129_v14 = vld [vmem:[%s6334_s3 + $0x70] sm:$0xff]  }
  0xf8   :  { %4584 = vmatprep.subr.bf16.mxu0 %v5106_v15 }
  0xf9   :  { %4631 = vmatpush3.bf16.msra.mxu1 %v5128_v12  ;;  %v1689_v12 = vfloor.f32 %v1681_v4 }
  0xfa   :  { %4632 = vmatprep.subr.bf16.mxu1 %v5129_v14 }
  0xfb   :  { %4585 = vmatpush3.bf16.msra.mxu0 %v5106_v15  ;;  %v1882_v15 = vld [vmem:[%s6335_s7 + $0x20] sm:$0xc] }
  0xfc   :  { %4586 = vmatprep.subr.bf16.mxu0 %v5108_v18  ;;  %v1883_v16 = vsel %vm1881_vm10, 0, %v1882_v15 }
  0xfd   :  { %4633 = vmatpush3.bf16.msra.mxu1 %v5129_v14  ;;  %1884 = vst [vmem:[%s6335_s7 + $0x20] sm:$0xc] %v1883_v16 }
  0xfe   :  { %4634 = vmatprep.subr.bf16.mxu1 %v5130_v17 }
  0xff   :  { %4587 = vmatpush3.bf16.msra.mxu0 %v5108_v18  ;;  %v5665_v18 = vld [vmem:[%s6334_s3] sm:$0xff]  }
 0x100   :  { %4596 = vmatprep.subr.bf16.mxu0 %v5111_v21 }
 0x101   :  { %4635 = vmatpush3.bf16.msra.mxu1 %v5130_v17 }
 0x102   :  { %4589 = vmatmul.mubr.bf16.vlgmr.msra.gmra.mrb[0].mxu0 %v1298_v26  ;;  %4644 = vmatprep.subr.bf16.mxu1 %v5665_v18  ;;  %v1653_v26 = vadd.s32 7, %v1645_v22 }
 0x103   :  { %4597 = vmatpush3.bf16.msra.mxu0 %v5111_v21  ;;  %4592 = vmatprep.mubr.bf16.mxu0 %v1300_v27  ;;  %v1644_v21 = vadd.s32 16, %v1642_v20  ;;  %v1651_v27 = vadd.s32 7, %v1643_v24 }
 0x104   :  { %4598 = vmatprep.subr.bf16.mxu0 %v5113_v29  ;;  %v1661_v32 = vcvt.s32.f32 %v1653_v26 }
 0x105   :  { %v1652_v23 = vadd.s32 7, %v1644_v21  ;;  %v1659_v34 = vcvt.s32.f32 %v1651_v27  ;;  %v1697_v21 = vmul.f32 40.0, %v1689_v12  ;;  %v5208_v12 = vmov 0.0  }
 0x107   :  { %4599 = vmatpush3.bf16.msra.mxu0 %v5113_v29  ;;  %v1660_v29 = vcvt.s32.f32 %v1652_v23 }
 0x108   :  { %4600 = vmatprep.subr.bf16.mxu0 %v5114_v35 }
 0x109   :  { %v1668_v31 = vadd.f32 0.5, %v1660_v29 }
 0x10a   :  { %4593 = vmatmul.mubr.bf16.gmra.mrb[4].mxu0 %v1302_v38 }
 0x10b   :  { %4601 = vmatpush3.bf16.msra.mxu0 %v5114_v35  ;;  %4612 = vmatprep.mubr.bf16.mxu0 %v1466_v40  ;;  %v1656_v35 = vadd.s32 7, %v1648_v28  ;;  %v1676_v38 = vmul.f32 0.025, %v1668_v31  ;;  %v1674_v40 = vmul.f32 0.025, %v1666_v33 }
 0x10c   :  { %4602 = vmatprep.subr.bf16.mxu0 %v5115_v39 }
 0x10d   :  { %v1684_v46 = vfloor.f32 %v1676_v38  ;;  %v1682_v48 = vfloor.f32 %v1674_v40 }
 0x10f   :  { %4603 = vmatpush3.bf16.msra.mxu0 %v5115_v39  ;;  %v1669_v39 = vadd.f32 0.5, %v1661_v32  ;;  %v1692_v54 = vmul.f32 40.0, %v1684_v46  ;;  %v1690_v56 = vmul.f32 40.0, %v1682_v48 }
 0x110   :  { %4604 = vmatprep.subr.bf16.mxu0 %v5116_v41 }
 0x111   :  { %v1677_v47 = vmul.f32 0.025, %v1669_v39  ;;  %v1700_v62 = vsub.f32 %v1660_v29, %v1692_v54  ;;  %v1698_v0 = vsub.f32 %v1658_v30, %v1690_v56  ;;  %v5668_v29 = vsub.f32 %v1665_v52, %v1697_v21 }
 0x112   :  { %v6349_v56 = vmov 0 }
 0x113   :  { %4605 = vmatpush3.bf16.msra.mxu0 %v5116_v41  ;;  %v1667_v41 = vadd.f32 0.5, %v1659_v34  ;;  %v1685_v55 = vfloor.f32 %v1677_v47  ;;  %v1708_v6 = vadd.f32 0.5, %v1700_v62  ;;  %v1706_v8 = vadd.f32 0.5, %v1698_v0 }
 0x114   :  { %4606 = vmatprep.subr.bf16.mxu0 %v5117_v42  ;;  %v1713_v37 = vadd.f32 0.5, %v5668_v29 }
 0x115   :  { %v1675_v49 = vmul.f32 0.025, %v1667_v41  ;;  %v1716_v14 = vmul.f32 0.16666667, %v1708_v6  ;;  %v1714_v16 = vmul.f32 0.16666667, %v1706_v8 }
 0x117   :  { %4607 = vmatpush3.bf16.msra.mxu0 %v5117_v42  ;;  %v1664_v42 = vcvt.s32.f32 %v1656_v35  ;;  %v1683_v57 = vfloor.f32 %v1675_v49  ;;  %v1724_v23 = vfloor.f32 %v1716_v14  ;;  %v1722_v25 = vfloor.f32 %v1714_v16 }
 0x118   :  { %4608 = vmatprep.subr.bf16.mxu0 %v5120_v45 }
 0x119   :  { %v1672_v50 = vadd.f32 0.5, %v1664_v42  ;;  %v1691_v1 = vmul.f32 40.0, %v1683_v57  ;;  %v1732_v31 = vmul.f32 6.0, %v1724_v23  ;;  %v1730_v33 = vmul.f32 6.0, %v1722_v25 }
 0x11a   :  { %vm1748_vm11 = vcmp.ge.f32.partialorder %v1724_v23, 1.0  ;;  %vm1756_vm12 = vcmp.le.f32.partialorder %v1724_v23, 4.0  ;;  %vm1746_vm13 = vcmp.ge.f32.partialorder %v1722_v25, 1.0  ;;  %vm1754_vm14 = vcmp.le.f32.partialorder %v1722_v25, 4.0 }
 0x11b   :  { %4609 = vmatpush3.bf16.msra.mxu0 %v5120_v45  ;;  %v1647_v45 = vadd.s32 40, %v1642_v20  ;;  %v1699_v9 = vsub.f32 %v1659_v34, %v1691_v1  ;;  %v1740_v39 = vsub.f32 %v1700_v62, %v1732_v31  ;;  %v1738_v41 = vsub.f32 %v1698_v0, %v1730_v33  ;;  %vm1764_vm15 = vmand %vm1748_vm11, %vm1756_vm12  ;;  %v5700_v1 = vld [vmem:[%s6336_s2] ss:$0 sm:$0xff] }
 0x11c   :  { %4610 = vmatprep.subr.bf16.mxu0 %v5121_v51  ;;  %vm1762_vm6 = vmand %vm1746_vm13, %vm1754_vm14 }
 0x11d   :  { %v1655_v53 = vadd.s32 7, %v1647_v45  ;;  %v1707_v17 = vadd.f32 0.5, %v1699_v9  ;;  %v1721_v45 = vmul.f32 0.16666667, %v1713_v37  ;;  %vm1772_vm5 = vcmp.ge.f32.partialorder %v1740_v39, 1.0 }
 0x11e   :  { %vm1770_vm7 = vcmp.ge.f32.partialorder %v1738_v41, 1.0  ;;  %vm1780_vm10 = vmand %vm1764_vm15, %vm1772_vm5  ;;  %vm1788_vm1 = vcmp.le.f32.partialorder %v1740_v39, 4.0  ;;  %vm1786_vm13 = vcmp.le.f32.partialorder %v1738_v41, 4.0 }
 0x11f   :  { %4611 = vmatpush3.bf16.msra.mxu0 %v5121_v51  ;;  %v1662_v51 = vcvt.s32.f32 %v1654_v43  ;;  %v1715_v26 = vmul.f32 0.16666667, %v1707_v17  ;;  %vm5674_vm0 = vmand %vm1762_vm6, %vm1770_vm7 }
 0x120   :  { %vm5678_vm5 = vmand %vm1780_vm10, %vm1788_vm1 }
 0x121   :  { %v1670_v59 = vadd.f32 0.5, %v1662_v51  ;;  %v1723_v34 = vfloor.f32 %v1715_v26  ;;  %v6350_v56 = vsel %vm5678_vm5, 4294967295, %v6349_v56 }
 0x122   :  { %4613 = vmatmul.mubr.bf16.vlgmr.msra.gmra.mrb[0].mxu0 %v1475_v58  ;;  %v1680_v58 = vmul.f32 0.025, %v1672_v50 }
 0x123   :  { %4616 = vmatprep.mubr.bf16.mxu0 %v1484_v61  ;;  %v1663_v61 = vcvt.s32.f32 %v1655_v53  ;;  %v1678_v3 = vmul.f32 0.025, %v1670_v59  ;;  %vm1747_vm3 = vcmp.ge.f32.partialorder %v1723_v34, 1.0  ;;  %vm1755_vm2 = vcmp.le.f32.partialorder %v1723_v34, 4.0 }
 0x124   :  { %v1688_v2 = vfloor.f32 %v1680_v58  ;;  %v6347_v53 = vmov 0  ;;  %vm1763_vm14 = vmand %vm1747_vm3, %vm1755_vm2  ;;  %v6352_v59 = vmov 0 }
 0x125   :  { %v1671_v5 = vadd.f32 0.5, %v1663_v61  ;;  %v1686_v11 = vfloor.f32 %v1678_v3  ;;  %v6348_v53 = vsel %vm5674_vm0, 4294967295, %v6347_v53 }
 0x126   :  { %v1696_v10 = vmul.f32 40.0, %v1688_v2 }
 0x127   :  { %v1679_v13 = vmul.f32 0.025, %v1671_v5  ;;  %v1694_v20 = vmul.f32 40.0, %v1686_v11 }
 0x128   :  { %v1704_v19 = vsub.f32 %v1664_v42, %v1696_v10  ;;  %v1731_v42 = vmul.f32 6.0, %v1723_v34 }
 0x129   :  { %v1687_v22 = vfloor.f32 %v1679_v13  ;;  %v1702_v28 = vsub.f32 %v1662_v51, %v1694_v20  ;;  %v1729_v51 = vfloor.f32 %v1721_v45 }
 0x12a   :  { %4617 = vmatmul.mubr.bf16.gmra.mrb[4].mxu0 %v1493_v63  ;;  %v1693_v63 = vmul.f32 40.0, %v1685_v55  ;;  %v1712_v27 = vadd.f32 0.5, %v1704_v19  ;;  %v1739_v48 = vsub.f32 %v1699_v9, %v1731_v42 }
 0x12b   :  { %v1695_v30 = vmul.f32 40.0, %v1687_v22  ;;  %v1710_v36 = vadd.f32 0.5, %v1702_v28  ;;  %v1737_v57 = vmul.f32 6.0, %v1729_v51 }
 0x12c   :  { %v1701_v7 = vsub.f32 %v1661_v32, %v1693_v63  ;;  %v1720_v35 = vmul.f32 0.16666667, %v1712_v27  ;;  %vm1771_vm4 = vcmp.ge.f32.partialorder %v1739_v48, 1.0  ;;  %vm1787_vm3 = vcmp.le.f32.partialorder %v1739_v48, 4.0 }
 0x12d   :  { %v5671_v38 = vsub.f32 %v1663_v61, %v1695_v30  ;;  %v1718_v44 = vmul.f32 0.16666667, %v1710_v36  ;;  %vm1779_vm2 = vmand %vm1763_vm14, %vm1771_vm4  ;;  %v1745_v62 = vsub.f32 %v5668_v29, %v1737_v57 }
 0x12e   :  { %v1709_v15 = vadd.f32 0.5, %v1701_v7  ;;  %v1728_v43 = vfloor.f32 %v1720_v35 }
 0x12f   :  { %v1711_v46 = vadd.f32 0.5, %v5671_v38  ;;  %v1726_v50 = vfloor.f32 %v1718_v44 }
 0x130   :  { %v1717_v24 = vmul.f32 0.16666667, %v1709_v15  ;;  %v1736_v49 = vmul.f32 6.0, %v1728_v43  ;;  %vm1752_vm15 = vcmp.ge.f32.partialorder %v1728_v43, 1.0  ;;  %vm1760_vm6 = vcmp.le.f32.partialorder %v1728_v43, 4.0 }
 0x131   :  { %v1719_v52 = vmul.f32 0.16666667, %v1711_v46  ;;  %v1734_v55 = vmul.f32 6.0, %v1726_v50  ;;  %vm1768_vm1 = vmand %vm1752_vm15, %vm1760_vm6 }
 0x132   :  { %v1725_v32 = vfloor.f32 %v1717_v24  ;;  %v1744_v54 = vsub.f32 %v1704_v19, %v1736_v49 }
 0x133   :  { %v1727_v58 = vfloor.f32 %v1719_v52  ;;  %v1742_v60 = vsub.f32 %v1702_v28, %v1734_v55 }
 0x134   :  { %v1733_v40 = vmul.f32 6.0, %v1725_v32  ;;  %vm1749_vm8 = vcmp.ge.f32.partialorder %v1725_v32, 1.0  ;;  %vm1757_vm9 = vcmp.le.f32.partialorder %v1725_v32, 4.0  ;;  %vm1776_vm10 = vcmp.ge.f32.partialorder %v1744_v54, 1.0 }
 0x135   :  { %vm1765_vm11 = vmand %vm1749_vm8, %vm1757_vm9  ;;  %vm6351_vm8 = vnez %v6348_v53  ;;  %v1735_v63 = vmul.f32 6.0, %v1727_v58  ;;  %vm1792_vm4 = vcmp.le.f32.partialorder %v1744_v54, 4.0  ;;  %vm1774_vm15 = vcmp.ge.f32.partialorder %v1742_v60, 1.0 }
 0x136   :  { %v1741_v47 = vsub.f32 %v1701_v7, %v1733_v40  ;;  %vm5684_vm9 = vmand %vm6351_vm8, %vm1786_vm13  ;;  %vm1753_vm13 = vcmp.ge.f32.partialorder %v1729_v51, 1.0 }
 0x137   :  { %v6353_v59 = vsel %vm5684_vm9, 4294967295, %v6352_v59  ;;  %vm5693_vm8 = vmand %vm1779_vm2, %vm1787_vm3  ;;  %vm1761_vm9 = vcmp.le.f32.partialorder %v1729_v51, 4.0  ;;  %v1743_v4 = vsub.f32 %v5671_v38, %v1735_v63  ;;  %vm1751_vm3 = vcmp.ge.f32.partialorder %v1727_v58, 1.0 }
 0x138   :  { %vm1773_vm12 = vcmp.ge.f32.partialorder %v1741_v47, 1.0  ;;  %vm1789_vm0 = vcmp.le.f32.partialorder %v1741_v47, 4.0  ;;  %vm5702_vm6 = vmand %vm1753_vm13, %vm1761_vm9  ;;  %vm1790_vm9 = vcmp.le.f32.partialorder %v1742_v60, 4.0  ;;  %vm1793_vm13 = vcmp.le.f32.partialorder %v1745_v62, 4.0 }
 0x139   :  { %vm1781_vm7 = vmand %vm1765_vm11, %vm1773_vm12  ;;  %vm1750_vm11 = vcmp.ge.f32.partialorder %v1726_v50, 1.0  ;;  %vm1758_vm12 = vcmp.le.f32.partialorder %v1726_v50, 4.0  ;;  %v5738_v22 = vsel %vm5693_vm8, 1.0, %v5208_v12  ;;  %vm1791_vm8 = vcmp.le.f32.partialorder %v1743_v4, 4.0 }
 0x13a   :  { %vm5688_vm5 = vmand %vm1781_vm7, %vm1789_vm0  ;;  %vm1777_vm7 = vcmp.ge.f32.partialorder %v1745_v62, 1.0 }
 0x13b   :  { %vm1784_vm0 = vmand %vm1768_vm1, %vm1776_vm10  ;;  %vm1759_vm1 = vcmp.le.f32.partialorder %v1727_v58, 4.0  ;;  %v5727_v17 = vsel %vm5688_vm5, 1.0, %v5208_v12  ;;  %v1865_v58 = vld [vmem:[#allocation2] sm:$0xf8] }
 0x13c   :  { %vm1766_vm14 = vmand %vm1750_vm11, %vm1758_vm12  ;;  %vm6364_vm11 = vnez %v6350_v56 }
 0x13d   :  { %vm5708_vm2 = vmand %vm1784_vm0, %vm1792_vm4  ;;  %v5719_v13 = vsel %vm6364_vm11, 1.0, %v5208_v12  ;;  %vm1775_vm4 = vcmp.ge.f32.partialorder %v1743_v4, 1.0  ;;  %vm1872_vm11 = vsmask.f32 2304 }
 0x13e   :  { %vm5713_vm10 = vmand %vm1766_vm14, %vm1774_vm15  ;;  %vm6365_vm14 = vnez %v6353_v59  ;;  %v5762_v34 = vsel %vm5708_vm2, 1.0, %v5208_v12 }
 0x13f   :  { %vm1785_vm12 = vmand %vm5702_vm6, %vm1777_vm7  ;;  %v5734_v20 = vsel %vm6365_vm14, 1.0, %v5208_v12  ;;  %vm1862_vm7 = vcmask 1047555   ;;  %vm6377_vm14 = vsmask.f32 7424 }
 0x140   :  { %vm1767_vm0 = vmand %vm1751_vm3, %vm1759_vm1  ;;  %vm1863_vm3 = vsmask.f32 7950 }
 0x141   :  { %vm5743_vm5 = vmand %vm5713_vm10, %vm1790_vm9  ;;  %vm1871_vm10 = vcmask 1042432   ;;  %vm6372_vm9 = vsmask.f32 3328 }
 0x142   :  { %vm5747_vm15 = vmand %vm1785_vm12, %vm1793_vm13  ;;  %v5767_v38 = vsel %vm5743_vm5, 1.0, %v5208_v12  ;;  %vm6378_vm5 = vcmask 1044480  }
 0x143   :  { %vm5753_vm6 = vmand %vm1767_vm0, %vm1775_vm4  ;;  %v5771_v40 = vsel %vm5747_vm15, 1.0, %v5208_v12  ;;  %vm2225_vm4 = vcmask 1046528  }
 0x144   :  { %vm1799_vm1 = vmand %vm5753_vm6, %vm1791_vm8 }
 0x145   :  { %v5778_v53 = vsel %vm1799_vm1, 1.0, %v5208_v12  ;;  %vm1864_vm2 = vmand %vm1862_vm7, %vm1863_vm3  ;;  %vm6382_vm7 = vsmask.f32 4352 }
 0x146   :  { %vm5792_vm12 = vmand %vm1871_vm10, %vm1872_vm11  ;;  %vm3034_vm11 = vsmask.f32 1280 }
 0x147   :  { %vm6375_vm13 = vmmov %vm6372_vm9 }
 0x148   :  { %vm6376_vm0 = vmmov %vm6372_vm9 }
 0x149   :  { %vm6379_vm15 = vmmov %vm6377_vm14 }
 0x14a   :  { %vm6380_vm6 = vmmov %vm6377_vm14 }
 0x14b   :  { %vm6381_vm8 = vmmov %vm6378_vm5 }
 0x14c   :  { %vm6383_vm1 = vmmov %vm6382_vm7 }
 0x1f5   :  { %v4614_v2 = vpop.f32.mrb[0].mxu0 }
 0x1f6   :  { %v1627_v5 = vadd.f32 %v4614_v2, %v5700_v1  ;;  %v1580_v6 = vpop.f32.mrb[1].mxu0 }
 0x1f7   :  { %v1625_v8 = vadd.f32 %v5700_v1, %v1580_v6  ;;  %v4615_v9 = vpop.f32.mrb[2].mxu0 }
 0x1f8   :  { %v1635_v11 = vmax.f32 %v1627_v5, 0.0  ;;  %v1628_v14 = vadd.f32 %v4615_v9, %v5700_v1  ;;  %v1583_v15 = vpop.f32.mrb[3].mxu0 }
 0x1f9   :  { %v1633_v16 = vmax.f32 %v1625_v8, 0.0  ;;  %v1626_v19 = vadd.f32 %v5700_v1, %v1583_v15  ;;  %v1874_v15 = vld [vmem:[#allocation2 + $0x20] sm:$0x7] }
 0x1fa   :  { %v1636_v21 = vmax.f32 %v1628_v14, 0.0  ;;  %v1812_v26 = vmul.f32 %v5719_v13, %v1635_v11 }
 0x1fb   :  { %v1634_v24 = vmax.f32 %v1626_v19, 0.0  ;;  %v1810_v29 = vmul.f32 %v5734_v20, %v1633_v16 }
 0x1fc   :  { %v1813_v27 = vmul.f32 %v5727_v17, %v1636_v21 }
 0x1fd   :  { %v1811_v30 = vmul.f32 %v5738_v22, %v1634_v24  ;;  %v4618_v31 = vpop.f32.mrb[4].mxu0 }
 0x1fe   :  { %v1819_v32 = vpack.c.bf16 %v1813_v27, %v1812_v26  ;;  %v1631_v33 = vadd.f32 %v4618_v31, %v5700_v1  ;;  %v1596_v35 = vpop.f32.mrb[5].mxu0 }
 0x1ff   :  { %v1818_v36 = vpack.c.bf16 %v1811_v30, %v1810_v29  ;;  %v1629_v37 = vadd.f32 %v5700_v1, %v1596_v35  ;;  %v4619_v39 = vpop.f32.mrb[6].mxu0 }
 0x200   :  { %v1831_v41 = vshrl.u32 %v1819_v32, 16  ;;  %v1834_v42 = vshll.u32 %v1819_v32, 16  ;;  %v1639_v43 = vmax.f32 %v1631_v33, 0.0  ;;  %v1632_v44 = vadd.f32 %v4619_v39, %v5700_v1  ;;  %v1599_v45 = vpop.f32.mrb[7].mxu0 }
 0x201   :  { %v1823_v46 = vshrl.u32 %v1818_v36, 16  ;;  %v1826_v47 = vshll.u32 %v1818_v36, 16  ;;  %v1637_v48 = vmax.f32 %v1629_v37, 0.0  ;;  %v1630_v49 = vadd.f32 %v5700_v1, %v1599_v45 }
 0x202   :  { %v1833_v50 = vrot.slane %v1831_v41, 4  ;;  %v1836_v51 = vrot.slane %v1834_v42, 5  ;;  %v1640_v52 = vmax.f32 %v1632_v44, 0.0  ;;  %v1816_v59 = vmul.f32 %v5762_v34, %v1639_v43 }
 0x203   :  { %v1825_v54 = vrot.slane %v1823_v46, 4  ;;  %v1828_v55 = vrot.slane %v1826_v47, 5  ;;  %v1638_v56 = vmax.f32 %v1630_v49, 0.0  ;;  %v1814_v62 = vmul.f32 %v5767_v38, %v1637_v48 }
 0x204   :  { %v1837_v57 = vor.u32 %v1836_v51, %v1833_v50  ;;  %v1817_v60 = vmul.f32 %v5771_v40, %v1640_v52 }
 0x205   :  { %v1829_v61 = vor.u32 %v1828_v55, %v1825_v54  ;;  %v1815_v63 = vmul.f32 %v5778_v53, %v1638_v56 }
 0x206   :  { %v1821_v0 = vpack.c.bf16 %v1817_v60, %v1816_v59 }
 0x207   :  { %v5787_v1 = vsel %vm6372_vm9, %v1829_v61, %v1837_v57  ;;  %v1866_v2 = vsel %vm1864_vm2, %v1829_v61, %v1865_v58  ;;  %v1820_v3 = vpack.c.bf16 %v1815_v63, %v1814_v62  ;;  %v5132_v62 = vld [vmem:[%s6334_s3 + $0x8] sm:$0xff]   ;;  %vm6384_vm2 = vcmask 1043456  }
 0x208   :  { %1867 = vst [vmem:[#allocation2] sm:$0xf8] %v1866_v2  ;;  %v1849_v4 = vshrl.u32 %v1821_v0, 16  ;;  %v1852_v5 = vshll.u32 %v1821_v0, 16  ;;  %v1950_v6 = vshll.u32 %v5787_v1, 16  ;;  %v1954_v7 = vshrl.u32 %v5787_v1, 16  ;;  %vm6385_vm10 = vmmov %vm6384_vm2 }
 0x209   :  { %v1840_v8 = vshrl.u32 %v1820_v3, 16  ;;  %v1843_v9 = vshll.u32 %v1820_v3, 16  ;;  %v2227_v37 = vrot.slane %v5787_v1, 1  ;;  %v2386_v39 = vrot.slane %v5787_v1, 3 }
 0x20a   :  { %v1851_v10 = vrot.slane %v1849_v4, 4  ;;  %v1854_v11 = vrot.slane %v1852_v5, 5  ;;  %v2548_v12 = vrot.slane %v1954_v7, 3  ;;  %v2551_v21 = vrot.slane %v1950_v6, 4 }
 0x20b   :  { %v1842_v16 = vrot.slane %v1840_v8, 4  ;;  %v1845_v19 = vrot.slane %v1843_v9, 5  ;;  %v3043_v24 = vrot.slane %v1954_v7, 6  ;;  %v1952_v26 = vrot.slane %v1950_v6, 1 }
 0x20c   :  { %v1855_v23 = vor.u32 %v1854_v11, %v1851_v10  ;;  %v5796_v27 = vor.u32 %v2551_v21, %v2548_v12  ;;  %v3044_v28 = vrot.slane %v1950_v6, 7  ;;  %v5133_v6 = vld [vmem:[%s6334_s3 + $0x10] sm:$0xff]   ;;  %v2727_v8 = vrot.slane %v5787_v1, 4 }
 0x20d   :  { %v1846_v25 = vor.u32 %v1845_v19, %v1842_v16  ;;  %v1956_v42 = vor.u32 %v1954_v7, %v1952_v26  ;;  %vm2881_vm9 = vcmask 1041408   ;;  %v5134_v19 = vld [vmem:[%s6334_s3 + $0x18] sm:$0xff]   ;;  %v2883_v21 = vrot.slane %v5787_v1, 6 }
 0x20e   :  { %v1875_v29 = vsel %vm5792_vm12, %v1855_v23, %v1874_v15  ;;  %v5806_v33 = vor.u32 %v3044_v28, %v3043_v24 }
 0x20f   :  { %1876 = vst [vmem:[#allocation2 + $0x20] sm:$0x7] %v1875_v29  ;;  %v5801_v30 = vsel %vm6375_vm13, %v1837_v57, %v1846_v25  ;;  %v5804_v31 = vsel %vm6376_vm0, %v1846_v25, %v1855_v23  ;;  %v1904_v32 = vld [vmem:[#allocation2] sm:$0xff]  ;;  %vm3209_vm13 = vcmask 1040384   ;;  %vm6386_vm0 = vmmov %vm6378_vm5 }
 0x210   :  { %1870 = vst [vmem:[#allocation2 + $0x18] sm:$0xff] %v5804_v31  ;;  %v1945_v35 = vshll.u32 %v1904_v32, 16  ;;  %v5810_v36 = vshll.u32 %v5801_v30, 16  ;;  %v1943_v41 = vshrl.u32 %v1904_v32, 16  ;;  %v5815_v43 = vshll.u32 %v5804_v31, 16 }
 0x211   :  { %v2229_v44 = vrot.slane %v5801_v30, 1  ;;  %v1962_v47 = vshrl.u32 %v5801_v30, 16  ;;  %v2231_v48 = vrot.slane %v5804_v31, 1  ;;  %v1970_v50 = vshrl.u32 %v5804_v31, 16 }
 0x212   :  { %v1947_v45 = vrot.slane %v1945_v35, 1  ;;  %v1960_v46 = vrot.slane %v5810_v36, 1  ;;  %v1968_v49 = vrot.slane %v5815_v43, 1  ;;  %v2388_v52 = vrot.slane %v5801_v30, 3 }
 0x213   :  { %v5826_v51 = vsel %vm2225_vm4, %v2227_v37, %v2229_v44  ;;  %v5833_v57 = vsel %vm2225_vm4, %v2229_v44, %v2231_v48  ;;  %v2390_v59 = vrot.slane %v5804_v31, 3  ;;  %v2557_v0 = vrot.slane %v1962_v47, 3 }
 0x214   :  { %v1948_v54 = vor.u32 %v1947_v45, %v1943_v41  ;;  %v1961_v55 = vsel %vm6377_vm14, %v1956_v42, %v1960_v46  ;;  %v1964_v56 = vor.u32 %v1962_v47, %v1960_v46  ;;  %v5838_v58 = vsel %vm6378_vm5, %v2386_v39, %v2388_v52  ;;  %v5135_v41 = vld [vmem:[%s6334_s3 + $0x20] sm:$0xff]   ;;  %vm6388_vm14 = vmmov %vm6383_vm1 }
 0x215   :  { %v5849_v63 = vsel %vm6381_vm8, %v2388_v52, %v2390_v59  ;;  %v2560_v2 = vrot.slane %v5810_v36, 4  ;;  %v2566_v3 = vrot.slane %v1970_v50, 3  ;;  %v2569_v4 = vrot.slane %v5815_v43, 4  ;;  %vm6389_vm5 = vmmov %vm6383_vm1 }
 0x216   :  { %v1953_v60 = vsel %vm6379_vm15, %v1948_v54, %v1952_v26  ;;  %v1969_v61 = vsel %vm6380_vm6, %v1964_v56, %v1968_v49  ;;  %v2729_v9 = vrot.slane %v5801_v30, 4  ;;  %v2731_v11 = vrot.slane %v5804_v31, 4  ;;  %v5137_v54 = vld [vmem:[%s6334_s3 + $0x30] sm:$0xff]   ;;  %v5139_v56 = vld [vmem:[%s6334_s3 + $0x80] sm:$0xff]   ;;  %vm6390_vm15 = vmmov %vm6384_vm2 }
 0x217   :  { %4636 = vmatprep.mubr.bf16.mxu1 %v1953_v60  ;;  %v2561_v5 = vor.u32 %v2560_v2, %v2557_v0  ;;  %v5857_v7 = vor.u32 %v2569_v4, %v2566_v3  ;;  %v1972_v16 = vor.u32 %v1970_v50, %v1968_v49  ;;  %v2885_v23 = vrot.slane %v5801_v30, 6  ;;  %v5140_v60 = vld [vmem:[%s6334_s3 + $0x88] sm:$0xff]   ;;  %v5142_v2 = vld [vmem:[%s6334_s3 + $0x98] sm:$0xff]   ;;  %v5143_v4 = vld [vmem:[%s6334_s3 + $0xa0] sm:$0xff]  }
 0x218   :  { %4637 = vmatmul.mubr.bf16.vlgmr.msra.gmra.mrb[0].mxu1 %v1961_v55  ;;  %v5873_v12 = vsel %vm6384_vm2, %v2727_v8, %v2729_v9  ;;  %v5878_v15 = vsel %vm6385_vm10, %v2729_v9, %v2731_v11  ;;  %v2887_v24 = vrot.slane %v5804_v31, 6  ;;  %v3047_v28 = vrot.slane %v1962_v47, 6  ;;  %v5138_v55 = vld [vmem:[%s6334_s3 + $0x38] sm:$0xff]   ;;  %v5147_v9 = vld [vmem:[%s6334_s3 + $0xc0] sm:$0xff]   ;;  %vm6391_vm6 = vmmov %vm6384_vm2 }
 0x219   :  { %4645 = vmatpush3.bf16.msra.mxu1 %v5665_v18  ;;  %4640 = vmatprep.mubr.bf16.mxu1 %v1969_v61  ;;  %v5863_v10 = vsel %vm6382_vm7, %v5796_v27, %v2561_v5  ;;  %v5868_v18 = vsel %vm6383_vm1, %v2561_v5, %v5857_v7  ;;  %v5889_v25 = vsel %vm2881_vm9, %v2883_v21, %v2885_v23  ;;  %v3048_v29 = vrot.slane %v5810_v36, 7  ;;  %v2203_v61 = vld [vmem:[#allocation2] sm:$0xfe]  ;;  %v1907_v3 = vld [vmem:[#allocation2 + $0x18] sm:$0x7f]  ;;  %v5144_v5 = vld [vmem:[%s6334_s3 + $0xa8] sm:$0xff]  }
 0x21a   :  { %4646 = vmatprep.subr.bf16.mxu1 %v5132_v62  ;;  %v5894_v26 = vsel %vm2881_vm9, %v2885_v23, %v2887_v24  ;;  %v3051_v35 = vrot.slane %v1970_v50, 6  ;;  %v3052_v42 = vrot.slane %v5815_v43, 7  ;;  %v3211_v45 = vrot.slane %v5787_v1, 7  ;;  %v5136_v50 = vld [vmem:[%s6334_s3 + $0x28] sm:$0xff]   ;;  %v5149_v23 = vld [vmem:[%s6334_s3 + $0xd0] sm:$0xff]  }
 0x21b   :  { %v3049_v44 = vor.u32 %v3048_v29, %v3047_v28  ;;  %v3213_v46 = vrot.slane %v5801_v30, 7  ;;  %v2226_v0 = vrot.slane %v2203_v61, 1  ;;  %v5150_v29 = vld [vmem:[%s6334_s3 + $0xd8] sm:$0xff]   ;;  %v6007_v61 = vld [vmem:[%s6337_s5] sm:$0xff]   ;;  %vm3655_vm8 = vcmask 1043459  }
 0x21c   :  { %v5904_v47 = vor.u32 %v3052_v42, %v3051_v35  ;;  %v5152_v35 = vld [vmem:[%s6334_s3 + $0xe8] sm:$0xff]   ;;  %4836 = vmatprep.subr.bf16.mxu0 %v6007_v61  ;;  %vm3656_vm7 = vmand %vm3655_vm8, %vm1863_vm3  ;;  %vm3565_vm1 = vsmask.f32 7440  ;;  %vm6392_vm2 = vsmask.f32 3328 }
 0x21d   :  { %4647 = vmatpush3.bf16.msra.mxu1 %v5132_v62  ;;  %v5908_v36 = vsel %vm3034_vm11, %v5806_v33, %v3049_v44  ;;  %v5913_v49 = vsel %vm3209_vm13, %v3211_v45, %v3213_v46  ;;  %v5141_v62 = vld [vmem:[%s6334_s3 + $0x90] sm:$0xff]   ;;  %4837 = vmatpush3.bf16.msra.mxu0 %v6007_v61  ;;  %vm6270_vm10 = vmor %vm6392_vm2, %vm3565_vm1 }
 0x21e   :  { %4648 = vmatprep.subr.bf16.mxu1 %v5133_v6  ;;  %v5925_v52 = vsel %vm3034_vm11, %v3049_v44, %v5904_v47 }
 0x220   :  { %4641 = vmatmul.mubr.bf16.gmra.mrb[4].mxu1 %v1972_v16  ;;  %v5148_v16 = vld [vmem:[%s6334_s3 + $0xc8] sm:$0xff]  }
 0x221   :  { %4649 = vmatpush3.bf16.msra.mxu1 %v5133_v6  ;;  %4660 = vmatprep.mubr.bf16.mxu1 %v1904_v32  ;;  %v3215_v32 = vrot.slane %v5804_v31, 7  ;;  %v5145_v6 = vld [vmem:[%s6334_s3 + $0xb0] sm:$0xff]  }
 0x222   :  { %4650 = vmatprep.subr.bf16.mxu1 %v5134_v19  ;;  %v5206_v31 = vld [vmem:[%s6333_s0 + $0x90] sm:$0x7f]  }
 0x223   :  { %v5918_v43 = vsel %vm3209_vm13, %v3213_v46, %v3215_v32  ;;  %v5156_v46 = vld [vmem:[%s6334_s3 + $0x108] sm:$0xff]  }
 0x225   :  { %4651 = vmatpush3.bf16.msra.mxu1 %v5134_v19  ;;  %v2358_v19 = vld [vmem:[#allocation2] sm:$0xf8] }
 0x226   :  { %4652 = vmatprep.subr.bf16.mxu1 %v5135_v41  ;;  %v2385_v28 = vrot.slane %v2358_v19, 3  ;;  %v2538_v42 = vshrl.u32 %v2358_v19, 16  ;;  %v2541_v44 = vshll.u32 %v2358_v19, 16  ;;  %v5163_v19 = vld [vmem:[%s6334_s3 + $0x140] sm:$0xff]  }
 0x229   :  { %4653 = vmatpush3.bf16.msra.mxu1 %v5135_v41  ;;  %v5155_v41 = vld [vmem:[%s6334_s3 + $0x100] sm:$0xff]  }
 0x22a   :  { %4654 = vmatprep.subr.bf16.mxu1 %v5136_v50 }
 0x22d   :  { %4655 = vmatpush3.bf16.msra.mxu1 %v5136_v50  ;;  %v2362_v50 = vld [vmem:[#allocation2 + $0x20] sm:$0x3] }
 0x22e   :  { %4656 = vmatprep.subr.bf16.mxu1 %v5137_v54 }
 0x231   :  { %4657 = vmatpush3.bf16.msra.mxu1 %v5137_v54  ;;  %v2540_v54 = vrot.slane %v2538_v42, 3  ;;  %v5165_v42 = vld [vmem:[%s6334_s3 + $0x150] sm:$0xff]  }
 0x232   :  { %4658 = vmatprep.subr.bf16.mxu1 %v5138_v55 }
 0x235   :  { %4659 = vmatpush3.bf16.msra.mxu1 %v5138_v55  ;;  %v2543_v55 = vrot.slane %v2541_v44, 4  ;;  %v5166_v44 = vld [vmem:[%s6334_s3 + $0x158] sm:$0xff]  }
 0x236   :  { %4668 = vmatprep.subr.bf16.mxu1 %v5139_v56 }
 0x238   :  { %4661 = vmatmul.mubr.bf16.vlgmr.msra.gmra.mrb[0].mxu1 %v5787_v1  ;;  %v5199_v1 = vld [vmem:[%s6334_s3 + $0x230] sm:$0xff]  }
 0x239   :  { %4664 = vmatprep.mubr.bf16.mxu1 %v5801_v30  ;;  %4669 = vmatpush3.bf16.msra.mxu1 %v5139_v56  ;;  %v2228_v30 = vsel %vm2225_vm4, %v2226_v0, %v2227_v37  ;;  %v5146_v37 = vld [vmem:[%s6334_s3 + $0xb8] sm:$0xff]   ;;  %v5157_v56 = vld [vmem:[%s6334_s3 + $0x110] sm:$0xff]   ;;  %vm6387_vm4 = vmmov %vm6386_vm0 }
 0x23a   :  { %4670 = vmatprep.subr.bf16.mxu1 %v5140_v60 }
 0x23d   :  { %4671 = vmatpush3.bf16.msra.mxu1 %v5140_v60  ;;  %v2392_v60 = vrot.slane %v2362_v50, 3 }
 0x23e   :  { %4672 = vmatprep.subr.bf16.mxu1 %v5141_v62 }
 0x23f   :  { %v2393_v0 = vsel %vm6387_vm4, %v2390_v59, %v2392_v60  ;;  %v5160_v59 = vld [vmem:[%s6334_s3 + $0x128] sm:$0xff]  }
 0x240   :  { %4665 = vmatmul.mubr.bf16.gmra.mrb[4].mxu1 %v1907_v3  ;;  %v6028_v3 = vld [vmem:[%s6337_s5 + $0x10] sm:$0xff]   ;;  %v5172_v60 = vld [vmem:[%s6334_s3 + $0x188] sm:$0xff]  }
 0x241   :  { %4673 = vmatpush3.bf16.msra.mxu1 %v5141_v62  ;;  %4684 = vmatprep.mubr.bf16.mxu1 %v2228_v30  ;;  %v2544_v62 = vor.u32 %v2543_v55, %v2540_v54  ;;  %v5159_v30 = vld [vmem:[%s6334_s3 + $0x120] sm:$0xff]   ;;  %v5168_v55 = vld [vmem:[%s6334_s3 + $0x168] sm:$0xff]  }
 0x242   :  { %4674 = vmatprep.subr.bf16.mxu1 %v5142_v2  ;;  %v5167_v54 = vld [vmem:[%s6334_s3 + $0x160] sm:$0xff]  }
 0x245   :  { %4675 = vmatpush3.bf16.msra.mxu1 %v5142_v2  ;;  %v2553_v2 = vsel %vm6388_vm14, %v2544_v62, %v5796_v27  ;;  %v6038_v27 = vld [vmem:[%s6337_s5 + $0x18] sm:$0xff]   ;;  %v2860_v62 = vld [vmem:[#allocation2] sm:$0xc0] }
 0x246   :  { %4676 = vmatprep.subr.bf16.mxu1 %v5143_v4 }
 0x249   :  { %4677 = vmatpush3.bf16.msra.mxu1 %v5143_v4  ;;  %v6048_v4 = vld [vmem:[%s6337_s5 + $0x20] sm:$0xff]  }
 0x24a   :  { %4678 = vmatprep.subr.bf16.mxu1 %v5144_v5 }
 0x24d   :  { %4679 = vmatpush3.bf16.msra.mxu1 %v5144_v5  ;;  %v5161_v5 = vld [vmem:[%s6334_s3 + $0x130] sm:$0xff]  }
 0x24e   :  { %4680 = vmatprep.subr.bf16.mxu1 %v5145_v6 }
 0x251   :  { %4681 = vmatpush3.bf16.msra.mxu1 %v5145_v6  ;;  %v6058_v6 = vld [vmem:[%s6337_s5 + $0x28] sm:$0xff]  }
 0x252   :  { %4682 = vmatprep.subr.bf16.mxu1 %v5146_v37 }
 0x255   :  { %4683 = vmatpush3.bf16.msra.mxu1 %v5146_v37  ;;  %v5162_v37 = vld [vmem:[%s6334_s3 + $0x138] sm:$0xff]  }
 0x256   :  { %4692 = vmatprep.subr.bf16.mxu1 %v5147_v9 }
 0x258   :  { %4685 = vmatmul.mubr.bf16.vlgmr.msra.gmra.mrb[0].mxu1 %v5826_v51  ;;  %v2387_v51 = vsel %vm6386_vm0, %v2385_v28, %v2386_v39  ;;  %v5154_v39 = vld [vmem:[%s6334_s3 + $0xf8] sm:$0xff]  }
 0x259   :  { %4688 = vmatprep.mubr.bf16.mxu1 %v5833_v57  ;;  %4693 = vmatpush3.bf16.msra.mxu1 %v5147_v9  ;;  %v5151_v57 = vld [vmem:[%s6334_s3 + $0xe0] sm:$0xff]  }
 0x25a   :  { %4694 = vmatprep.subr.bf16.mxu1 %v5148_v16  ;;  %v6065_v9 = vld [vmem:[#allocation2 + $0x20] sm:$0x7] }
 0x25b   :  { %v2576_v28 = vshll.u32 %v6065_v9, 16 }
 0x25d   :  { %4695 = vmatpush3.bf16.msra.mxu1 %v5148_v16  ;;  %v6070_v16 = vld [vmem:[%s6337_s5 + $0x30] sm:$0xff]  }
 0x25e   :  { %4696 = vmatprep.subr.bf16.mxu1 %v5149_v23 }
 0x260   :  { %4689 = vmatmul.mubr.bf16.gmra.mrb[4].mxu1 %v2231_v48  ;;  %v5153_v48 = vld [vmem:[%s6334_s3 + $0xf0] sm:$0xff]  }
 0x261   :  { %4697 = vmatpush3.bf16.msra.mxu1 %v5149_v23  ;;  %4708 = vmatprep.mubr.bf16.mxu1 %v2387_v51  ;;  %v2573_v23 = vshrl.u32 %v6065_v9, 16  ;;  %v5164_v51 = vld [vmem:[%s6334_s3 + $0x148] sm:$0xff]  }
 0x262   :  { %4698 = vmatprep.subr.bf16.mxu1 %v5150_v29 }
 0x265   :  { %4699 = vmatpush3.bf16.msra.mxu1 %v5150_v29  ;;  %v6082_v29 = vld [vmem:[%s6337_s5 + $0x38] sm:$0xff]  }
 0x266   :  { %4700 = vmatprep.subr.bf16.mxu1 %v5151_v57 }
 0x269   :  { %4701 = vmatpush3.bf16.msra.mxu1 %v5151_v57  ;;  %v2575_v57 = vrot.slane %v2573_v23, 3  ;;  %v5180_v23 = vld [vmem:[%s6334_s3 + $0x1c8] sm:$0xff]  }
 0x26a   :  { %4702 = vmatprep.subr.bf16.mxu1 %v5152_v35 }
 0x26d   :  { %4703 = vmatpush3.bf16.msra.mxu1 %v5152_v35  ;;  %v2578_v35 = vrot.slane %v2576_v28, 4  ;;  %v2861_v28 = vld [vmem:[#allocation2 + $0x20] sm:$0x1f] }
 0x26e   :  { %4704 = vmatprep.subr.bf16.mxu1 %v5153_v48 }
 0x271   :  { %4705 = vmatpush3.bf16.msra.mxu1 %v5153_v48  ;;  %v2706_v48 = vld [vmem:[#allocation2] sm:$0xf0] }
 0x272   :  { %4706 = vmatprep.subr.bf16.mxu1 %v5154_v39 }
 0x275   :  { %4707 = vmatpush3.bf16.msra.mxu1 %v5154_v39  ;;  %v5203_v39 = vld [vmem:[%s6333_s0 + $0x78] sm:$0xff]  }
 0x276   :  { %4716 = vmatprep.subr.bf16.mxu1 %v5155_v41  ;;  %4852 = vmatprep.mubr.bf16.mxu0 %v5203_v39 }
 0x278   :  { %4709 = vmatmul.mubr.bf16.vlgmr.msra.gmra.mrb[0].mxu1 %v5838_v58  ;;  %v5158_v58 = vld [vmem:[%s6334_s3 + $0x118] sm:$0xff]  }
 0x279   :  { %4712 = vmatprep.mubr.bf16.mxu1 %v5849_v63  ;;  %4717 = vmatpush3.bf16.msra.mxu1 %v5155_v41  ;;  %v6017_v63 = vld [vmem:[%s6337_s5 + $0x8] sm:$0xff]   ;;  %v5204_v41 = vld [vmem:[%s6333_s0 + $0x80] sm:$0xff]  }
 0x27a   :  { %4718 = vmatprep.subr.bf16.mxu1 %v5156_v46  ;;  %4838 = vmatprep.subr.bf16.mxu0 %v6017_v63 }
 0x27b   :  { %4839 = vmatpush3.bf16.msra.mxu0 %v6017_v63 }
 0x27c   :  { %4840 = vmatprep.subr.bf16.mxu0 %v6028_v3 }
 0x27d   :  { %4719 = vmatpush3.bf16.msra.mxu1 %v5156_v46 }
 0x27e   :  { %4720 = vmatprep.subr.bf16.mxu1 %v5157_v56 }
 0x27f   :  { %4841 = vmatpush3.bf16.msra.mxu0 %v6028_v3 }
 0x280   :  { %4713 = vmatmul.mubr.bf16.gmra.mrb[4].mxu1 %v2393_v0  ;;  %4842 = vmatprep.subr.bf16.mxu0 %v6038_v27  ;;  %v2733_v0 = vrot.slane %v6065_v9, 4  ;;  %v3036_v9 = vshrl.u32 %v2860_v62, 16 }
 0x281   :  { %4721 = vmatpush3.bf16.msra.mxu1 %v5157_v56  ;;  %4732 = vmatprep.mubr.bf16.mxu1 %v2553_v2  ;;  %v5171_v56 = vld [vmem:[%s6334_s3 + $0x180] sm:$0xff]   ;;  %v2882_v2 = vrot.slane %v2860_v62, 6 }
 0x282   :  { %4722 = vmatprep.subr.bf16.mxu1 %v5158_v58 }
 0x283   :  { %4843 = vmatpush3.bf16.msra.mxu0 %v6038_v27 }
 0x284   :  { %4844 = vmatprep.subr.bf16.mxu0 %v6048_v4 }
 0x285   :  { %4723 = vmatpush3.bf16.msra.mxu1 %v5158_v58  ;;  %v5173_v58 = vld [vmem:[%s6334_s3 + $0x190] sm:$0xff]  }
 0x286   :  { %4724 = vmatprep.subr.bf16.mxu1 %v5159_v30 }
 0x287   :  { %4845 = vmatpush3.bf16.msra.mxu0 %v6048_v4 }
 0x288   :  { %4846 = vmatprep.subr.bf16.mxu0 %v6058_v6 }
 0x289   :  { %4725 = vmatpush3.bf16.msra.mxu1 %v5159_v30  ;;  %v5174_v30 = vld [vmem:[%s6334_s3 + $0x198] sm:$0xff]  }
 0x28a   :  { %4726 = vmatprep.subr.bf16.mxu1 %v5160_v59 }
 0x28b   :  { %4847 = vmatpush3.bf16.msra.mxu0 %v6058_v6 }
 0x28c   :  { %4848 = vmatprep.subr.bf16.mxu0 %v6070_v16 }
 0x28d   :  { %4727 = vmatpush3.bf16.msra.mxu1 %v5160_v59  ;;  %v5175_v59 = vld [vmem:[%s6334_s3 + $0x1a0] sm:$0xff]  }
 0x28e   :  { %4728 = vmatprep.subr.bf16.mxu1 %v5161_v5 }
 0x28f   :  { %4849 = vmatpush3.bf16.msra.mxu0 %v6070_v16 }
 0x290   :  { %4850 = vmatprep.subr.bf16.mxu0 %v6082_v29 }
 0x291   :  { %4729 = vmatpush3.bf16.msra.mxu1 %v5161_v5  ;;  %v5176_v5 = vld [vmem:[%s6334_s3 + $0x1a8] sm:$0xff]  }
 0x292   :  { %4730 = vmatprep.subr.bf16.mxu1 %v5162_v37 }
 0x293   :  { %4851 = vmatpush3.bf16.msra.mxu0 %v6082_v29 }
 0x295   :  { %4731 = vmatpush3.bf16.msra.mxu1 %v5162_v37  ;;  %v5179_v37 = vld [vmem:[%s6334_s3 + $0x1c0] sm:$0xff]  }
 0x296   :  { %4740 = vmatprep.subr.bf16.mxu1 %v5163_v19  ;;  %4853 = vmatmul.mubr.bf16.vlgmr.msra.gmra.mrb[8].mxu0 %v5204_v41  ;;  %v5182_v41 = vld [vmem:[%s6334_s3 + $0x1d8] sm:$0xff]  }
 0x298   :  { %4733 = vmatmul.mubr.bf16.vlgmr.msra.gmra.mrb[0].mxu1 %v5863_v10  ;;  %v2579_v10 = vor.u32 %v2578_v35, %v2575_v57  ;;  %v5181_v35 = vld [vmem:[%s6334_s3 + $0x1d0] sm:$0xff]  }
 0x299   :  { %4736 = vmatprep.mubr.bf16.mxu1 %v5868_v18  ;;  %4741 = vmatpush3.bf16.msra.mxu1 %v5163_v19  ;;  %v2726_v18 = vrot.slane %v2706_v48, 4  ;;  %v3039_v19 = vshll.u32 %v2860_v62, 16  ;;  %v2889_v48 = vrot.slane %v2861_v28, 6 }
 0x29a   :  { %4742 = vmatprep.subr.bf16.mxu1 %v5164_v51  ;;  %v2580_v46 = vsel %vm6389_vm5, %v5857_v7, %v2579_v10  ;;  %v5169_v7 = vld [vmem:[%s6334_s3 + $0x170] sm:$0xff]   ;;  %v5184_v10 = vld [vmem:[%s6334_s3 + $0x1e8] sm:$0xff]  }
 0x29b   :  { %v2728_v50 = vsel %vm6390_vm15, %v2726_v18, %v2727_v8  ;;  %v5170_v8 = vld [vmem:[%s6334_s3 + $0x178] sm:$0xff]   ;;  %v3041_v57 = vrot.slane %v3039_v19, 7  ;;  %v3016_v18 = vld [vmem:[#allocation2 + $0x20] sm:$0x3f] }
 0x29d   :  { %4743 = vmatpush3.bf16.msra.mxu1 %v5164_v51  ;;  %v3038_v51 = vrot.slane %v3036_v9, 6 }
 0x29e   :  { %4744 = vmatprep.subr.bf16.mxu1 %v5165_v42 }
 0x29f   :  { %v3042_v39 = vor.u32 %v3041_v57, %v3038_v51 }
 0x2a0   :  { %4737 = vmatmul.mubr.bf16.gmra.mrb[4].mxu1 %v2580_v46  ;;  %v3056_v46 = vshrl.u32 %v3016_v18, 16 }
 0x2a1   :  { %4745 = vmatpush3.bf16.msra.mxu1 %v5165_v42  ;;  %4756 = vmatprep.mubr.bf16.mxu1 %v2728_v50  ;;  %v5183_v42 = vld [vmem:[%s6334_s3 + $0x1e0] sm:$0xff]   ;;  %v3059_v50 = vshll.u32 %v3016_v18, 16 }
 0x2a2   :  { %4746 = vmatprep.subr.bf16.mxu1 %v5166_v44 }
 0x2a5   :  { %4747 = vmatpush3.bf16.msra.mxu1 %v5166_v44  ;;  %v5187_v44 = vld [vmem:[%s6334_s3 + $0x200] sm:$0xff]  }
 0x2a6   :  { %4748 = vmatprep.subr.bf16.mxu1 %v5167_v54 }
 0x2a9   :  { %4749 = vmatpush3.bf16.msra.mxu1 %v5167_v54  ;;  %v5189_v54 = vld [vmem:[%s6334_s3 + $0x208] sm:$0xff]  }
 0x2aa   :  { %4750 = vmatprep.subr.bf16.mxu1 %v5168_v55 }
 0x2ad   :  { %4751 = vmatpush3.bf16.msra.mxu1 %v5168_v55  ;;  %v3058_v55 = vrot.slane %v3056_v46, 6 }
 0x2ae   :  { %4752 = vmatprep.subr.bf16.mxu1 %v5169_v7 }
 0x2b1   :  { %4753 = vmatpush3.bf16.msra.mxu1 %v5169_v7  ;;  %v3061_v7 = vrot.slane %v3059_v50, 7 }
 0x2b2   :  { %4754 = vmatprep.subr.bf16.mxu1 %v5170_v8 }
 0x2b5   :  { %4755 = vmatpush3.bf16.msra.mxu1 %v5170_v8  ;;  %v3189_v8 = vld [vmem:[#allocation2] sm:$0x80] }
 0x2b6   :  { %4764 = vmatprep.subr.bf16.mxu1 %v5171_v56  ;;  %v3210_v62 = vrot.slane %v3189_v8, 7 }
 0x2b8   :  { %4757 = vmatmul.mubr.bf16.vlgmr.msra.gmra.mrb[0].mxu1 %v5873_v12  ;;  %v2734_v12 = vsel %vm6391_vm6, %v2731_v11, %v2733_v0  ;;  %v5177_v11 = vld [vmem:[%s6334_s3 + $0x1b0] sm:$0xff]   ;;  %v5195_v0 = vld [vmem:[%s6334_s3 + $0x220] sm:$0xff]  }
 0x2b9   :  { %4760 = vmatprep.mubr.bf16.mxu1 %v5878_v15  ;;  %4765 = vmatpush3.bf16.msra.mxu1 %v5171_v56  ;;  %v2884_v15 = vsel %vm2881_vm9, %v2882_v2, %v2883_v21  ;;  %v5178_v21 = vld [vmem:[%s6334_s3 + $0x1b8] sm:$0xff]   ;;  %v5191_v56 = vld [vmem:[%s6334_s3 + $0x210] sm:$0xff]   ;;  %v5197_v2 = vld [vmem:[%s6334_s3 + $0x228] sm:$0xff]  }
 0x2ba   :  { %4766 = vmatprep.subr.bf16.mxu1 %v5172_v60 }
 0x2bd   :  { %4767 = vmatpush3.bf16.msra.mxu1 %v5172_v60  ;;  %v3062_v60 = vor.u32 %v3061_v7, %v3058_v55 }
 0x2be   :  { %4768 = vmatprep.subr.bf16.mxu1 %v5173_v58 }
 0x2c0   :  { %4761 = vmatmul.mubr.bf16.gmra.mrb[4].mxu1 %v2734_v12 }
 0x2c1   :  { %4769 = vmatpush3.bf16.msra.mxu1 %v5173_v58  ;;  %4780 = vmatprep.mubr.bf16.mxu1 %v2884_v15  ;;  %v5193_v58 = vld [vmem:[%s6334_s3 + $0x218] sm:$0xff]  }
 0x2c2   :  { %4770 = vmatprep.subr.bf16.mxu1 %v5174_v30 }
 0x2c5   :  { %4771 = vmatpush3.bf16.msra.mxu1 %v5174_v30  ;;  %v5205_v30 = vld [vmem:[%s6333_s0 + $0x88] sm:$0xff]  }
 0x2c6   :  { %4772 = vmatprep.subr.bf16.mxu1 %v5175_v59 }
 0x2c9   :  { %4773 = vmatpush3.bf16.msra.mxu1 %v5175_v59 }
 0x2ca   :  { %4774 = vmatprep.subr.bf16.mxu1 %v5176_v5 }
 0x2cd   :  { %4775 = vmatpush3.bf16.msra.mxu1 %v5176_v5 }
 0x2ce   :  { %4776 = vmatprep.subr.bf16.mxu1 %v5177_v11 }
 0x2d1   :  { %4777 = vmatpush3.bf16.msra.mxu1 %v5177_v11 }
 0x2d2   :  { %4778 = vmatprep.subr.bf16.mxu1 %v5178_v21 }
 0x2d5   :  { %4779 = vmatpush3.bf16.msra.mxu1 %v5178_v21 }
 0x2d6   :  { %4788 = vmatprep.subr.bf16.mxu1 %v5179_v37 }
 0x2d8   :  { %4781 = vmatmul.mubr.bf16.vlgmr.msra.gmra.mrb[0].mxu1 %v5889_v25  ;;  %v2890_v25 = vsel %vm2881_vm9, %v2887_v24, %v2889_v48  ;;  %v5185_v24 = vld [vmem:[%s6334_s3 + $0x1f0] sm:$0xff]  }
 0x2d9   :  { %4784 = vmatprep.mubr.bf16.mxu1 %v5894_v26  ;;  %4789 = vmatpush3.bf16.msra.mxu1 %v5179_v37  ;;  %v3046_v26 = vsel %vm3034_vm11, %v3042_v39, %v5806_v33  ;;  %v5186_v33 = vld [vmem:[%s6334_s3 + $0x1f8] sm:$0xff]  }
 0x2da   :  { %4790 = vmatprep.subr.bf16.mxu1 %v5180_v23 }
 0x2dd   :  { %4791 = vmatpush3.bf16.msra.mxu1 %v5180_v23 }
 0x2de   :  { %4792 = vmatprep.subr.bf16.mxu1 %v5181_v35 }
 0x2e0   :  { %4785 = vmatmul.mubr.bf16.gmra.mrb[4].mxu1 %v2890_v25 }
 0x2e1   :  { %4793 = vmatpush3.bf16.msra.mxu1 %v5181_v35  ;;  %4804 = vmatprep.mubr.bf16.mxu1 %v3046_v26 }
 0x2e2   :  { %4794 = vmatprep.subr.bf16.mxu1 %v5182_v41 }
 0x2e5   :  { %4795 = vmatpush3.bf16.msra.mxu1 %v5182_v41 }
 0x2e6   :  { %4796 = vmatprep.subr.bf16.mxu1 %v5183_v42 }
 0x2e9   :  { %4797 = vmatpush3.bf16.msra.mxu1 %v5183_v42 }
 0x2ea   :  { %4798 = vmatprep.subr.bf16.mxu1 %v5184_v10 }
 0x2ed   :  { %4799 = vmatpush3.bf16.msra.mxu1 %v5184_v10 }
 0x2ee   :  { %4800 = vmatprep.subr.bf16.mxu1 %v5185_v24 }
 0x2f1   :  { %4801 = vmatpush3.bf16.msra.mxu1 %v5185_v24 }
 0x2f2   :  { %4802 = vmatprep.subr.bf16.mxu1 %v5186_v33 }
 0x2f5   :  { %4803 = vmatpush3.bf16.msra.mxu1 %v5186_v33 }
 0x2f6   :  { %4812 = vmatprep.subr.bf16.mxu1 %v5187_v44 }
 0x2f8   :  { %4805 = vmatmul.mubr.bf16.vlgmr.msra.gmra.mrb[0].mxu1 %v5908_v36  ;;  %v3063_v36 = vsel %vm3034_vm11, %v5904_v47, %v3062_v60  ;;  %v3217_v47 = vrot.slane %v3016_v18, 7 }
 0x2f9   :  { %4808 = vmatprep.mubr.bf16.mxu1 %v5925_v52  ;;  %4813 = vmatpush3.bf16.msra.mxu1 %v5187_v44  ;;  %v3212_v52 = vsel %vm3209_vm13, %v3210_v62, %v3211_v45  ;;  %v5201_v45 = vld [vmem:[%s6334_s3 + $0x238] sm:$0xff]  }
 0x2fa   :  { %4814 = vmatprep.subr.bf16.mxu1 %v5189_v54  ;;  %v3218_v12 = vsel %vm3209_vm13, %v3215_v32, %v3217_v47 }
 0x2fd   :  { %4815 = vmatpush3.bf16.msra.mxu1 %v5189_v54 }
 0x2fe   :  { %4816 = vmatprep.subr.bf16.mxu1 %v5191_v56 }
 0x300   :  { %4809 = vmatmul.mubr.bf16.gmra.mrb[4].mxu1 %v3063_v36 }
 0x301   :  { %4817 = vmatpush3.bf16.msra.mxu1 %v5191_v56  ;;  %4828 = vmatprep.mubr.bf16.mxu1 %v3212_v52 }
 0x302   :  { %4818 = vmatprep.subr.bf16.mxu1 %v5193_v58 }
 0x305   :  { %4819 = vmatpush3.bf16.msra.mxu1 %v5193_v58 }
 0x306   :  { %4820 = vmatprep.subr.bf16.mxu1 %v5195_v0 }
 0x309   :  { %4821 = vmatpush3.bf16.msra.mxu1 %v5195_v0 }
 0x30a   :  { %4822 = vmatprep.subr.bf16.mxu1 %v5197_v2 }
 0x30d   :  { %4823 = vmatpush3.bf16.msra.mxu1 %v5197_v2 }
 0x30e   :  { %4824 = vmatprep.subr.bf16.mxu1 %v5199_v1 }
 0x311   :  { %4825 = vmatpush3.bf16.msra.mxu1 %v5199_v1 }
 0x312   :  { %4826 = vmatprep.subr.bf16.mxu1 %v5201_v45 }
 0x315   :  { %4827 = vmatpush3.bf16.msra.mxu1 %v5201_v45 }
 0x316   :  { %4860 = vmatprep.subr.bf16.mxu1 %v6007_v61 }
 0x318   :  { %4829 = vmatmul.mubr.bf16.vlgmr.msra.gmra.mrb[0].mxu1 %v5913_v49 }
 0x319   :  { %4832 = vmatprep.mubr.bf16.mxu1 %v5918_v43  ;;  %4868 = vmatpush3.bf16.msra.mxu1 %v6007_v61 }
 0x31a   :  { %4861 = vmatprep.subr.bf16.mxu1 %v6017_v63 }
 0x31d   :  { %4869 = vmatpush3.bf16.msra.mxu1 %v6017_v63  ;;  %v6246_v63 = vld [vmem:[%s6338_s4] ss:$0 sm:$0xff] }
 0x31e   :  { %4862 = vmatprep.subr.bf16.mxu1 %v6028_v3 }
 0x320   :  { %4833 = vmatmul.mubr.bf16.gmra.mrb[4].mxu1 %v3218_v12 }
 0x321   :  { %4870 = vmatpush3.bf16.msra.mxu1 %v6028_v3  ;;  %4856 = vmatprep.mubr.bf16.mxu1 %v5205_v30 }
 0x322   :  { %4863 = vmatprep.subr.bf16.mxu1 %v6038_v27 }
 0x325   :  { %4871 = vmatpush3.bf16.msra.mxu1 %v6038_v27 }
 0x326   :  { %4864 = vmatprep.subr.bf16.mxu1 %v6048_v4 }
 0x329   :  { %4872 = vmatpush3.bf16.msra.mxu1 %v6048_v4 }
 0x32a   :  { %4865 = vmatprep.subr.bf16.mxu1 %v6058_v6 }
 0x32d   :  { %4873 = vmatpush3.bf16.msra.mxu1 %v6058_v6 }
 0x32e   :  { %4866 = vmatprep.subr.bf16.mxu1 %v6070_v16 }
 0x331   :  { %4874 = vmatpush3.bf16.msra.mxu1 %v6070_v16 }
 0x332   :  { %4867 = vmatprep.subr.bf16.mxu1 %v6082_v29 }
 0x335   :  { %4875 = vmatpush3.bf16.msra.mxu1 %v6082_v29  ;;  %v6253_v29 = vld [vmem:[%s6339_s6] ss:$0 sm:$0xff] }
 0x338   :  { %4857 = vmatmul.mubr.bf16.vlgmr.msra.gmra.mrb[4].mxu1 %v5206_v31 }
 0x369   :  { %v4854_v32 = vpop.f32.mrb[8].mxu0 }
 0x36a   :  { %v3458_v49 = vpop.f32.mrb[9].mxu0 }
 0x36b   :  { %v4855_v43 = vpop.f32.mrb[10].mxu0 }
 0x36c   :  { %v3461_v61 = vpop.f32.mrb[11].mxu0 }
 0x3eb   :  { %v4830_v3 = vpop.f32.mrb[0].mxu1 }
 0x3ec   :  { %v4876_v27 = vadd.f32 %v4830_v3, %v6246_v63  ;;  %v3305_v4 = vpop.f32.mrb[1].mxu1 }
 0x3ed   :  { %v4878_v6 = vadd.f32 %v6246_v63, %v3305_v4  ;;  %v4831_v16 = vpop.f32.mrb[2].mxu1 }
 0x3ee   :  { %v4880_v15 = vadd.f32 %v4831_v16, %v6246_v63  ;;  %v4877_v59 = vadd.f32 %v4876_v27, %v4854_v32  ;;  %v3308_v5 = vpop.f32.mrb[3].mxu1 }
 0x3ef   :  { %v4882_v11 = vadd.f32 %v6246_v63, %v3308_v5  ;;  %v4879_v21 = vadd.f32 %v4878_v6, %v3458_v49 }
 0x3f0   :  { %v3519_v37 = vadd.f32 %v4877_v59, %v6253_v29  ;;  %v4881_v9 = vadd.f32 %v4880_v15, %v4855_v43 }
 0x3f1   :  { %v3517_v19 = vadd.f32 %v4879_v21, %v6253_v29  ;;  %v4883_v23 = vadd.f32 %v4882_v11, %v3461_v61 }
 0x3f2   :  { %v3527_v28 = vmax.f32 %v3519_v37, 0.0  ;;  %v3520_v51 = vadd.f32 %v4881_v9, %v6253_v29 }
 0x3f3   :  { %v3525_v57 = vmax.f32 %v3517_v19, 0.0  ;;  %v3518_v35 = vadd.f32 %v4883_v23, %v6253_v29 }
 0x3f4   :  { %v3535_v48 = vmul.f32 %v3527_v28, %v5719_v13  ;;  %v3528_v39 = vmax.f32 %v3520_v51, 0.0  ;;  %v3657_v13 = vld [vmem:[%s6335_s7] sm:$0x8] }
 0x3f5   :  { %v3533_v41 = vmul.f32 %v3525_v57, %v5734_v20  ;;  %v3526_v25 = vmax.f32 %v3518_v35, 0.0 }
 0x3f6   :  { %v4170_v26 = vpack.c.bf16 %v3535_v48, %v3535_v48  ;;  %v3536_v42 = vmul.f32 %v3528_v39, %v5727_v17 }
 0x3f7   :  { %v4168_v10 = vpack.c.bf16 %v3533_v41, %v3533_v41  ;;  %v3534_v24 = vmul.f32 %v3526_v25, %v5738_v22 }
 0x3f8   :  { %v3587_v33 = vshll.u32 %v4170_v26, 16  ;;  %v3591_v18 = vshrl.u32 %v4170_v26, 16  ;;  %v4171_v44 = vpack.c.bf16 %v3536_v42, %v3536_v42 }
 0x3f9   :  { %v3568_v46 = vshll.u32 %v4168_v10, 16  ;;  %v3571_v50 = vshrl.u32 %v4168_v10, 16  ;;  %v4169_v54 = vpack.c.bf16 %v3534_v24, %v3534_v24 }
 0x3fa   :  { %v3589_v55 = vrot.slane %v3587_v33, 5  ;;  %v3593_v20 = vrot.slane %v3591_v18, 4  ;;  %v3597_v17 = vshll.u32 %v4171_v44, 16  ;;  %v3601_v49 = vshrl.u32 %v4171_v44, 16 }
 0x3fb   :  { %v3570_v7 = vrot.slane %v3568_v46, 5  ;;  %v3573_v8 = vrot.slane %v3571_v50, 4  ;;  %v3577_v56 = vshll.u32 %v4169_v54, 16  ;;  %v3581_v22 = vshrl.u32 %v4169_v54, 16 }
 0x3fc   :  { %v3594_v60 = vor.u32 %v3593_v20, %v3589_v55  ;;  %v3599_v1 = vrot.slane %v3597_v17, 5  ;;  %v3603_v59 = vrot.slane %v3601_v49, 4 }
 0x3fd   :  { %v3574_v62 = vor.u32 %v3573_v8, %v3570_v7  ;;  %v3658_v58 = vsel %vm3656_vm7, %v3570_v7, %v3657_v13  ;;  %v3579_v52 = vrot.slane %v3577_v56, 5  ;;  %v3583_v0 = vrot.slane %v3581_v22, 4 }
 0x3fe   :  { %v3595_v2 = vrot.slane %v3594_v60, 4  ;;  %3659 = vst [vmem:[%s6335_s7] sm:$0x8] %v3658_v58  ;;  %v3604_v51 = vor.u32 %v3603_v59, %v3599_v1 }
 0x3ff   :  { %v3575_v45 = vrot.slane %v3574_v62, 4  ;;  %v3584_v47 = vor.u32 %v3583_v0, %v3579_v52  ;;  %v3667_v62 = vld [vmem:[%s6335_s7 + $0x20] sm:$0x7] }
 0x400   :  { %v3600_v30 = vsel %vm6270_vm10, %v3595_v2, %v3599_v1  ;;  %v3605_v10 = vrot.slane %v3604_v51, 4 }
 0x401   :  { %3662 = vst [vmem:[%s6335_s7 + $0xc] sm:$0xf] %v3600_v30  ;;  %v3580_v12 = vsel %vm6270_vm10, %v3575_v45, %v3579_v52  ;;  %v3585_v31 = vrot.slane %v3584_v47, 4 }
 0x402   :  { %3660 = vst [vmem:[%s6335_s7 + $0x4] sm:$0xf] %v3580_v12 }
 0x403   :  { %v3590_v32 = vsel %vm6270_vm10, %v3585_v31, %v3589_v55 }
 0x404   :  { %3661 = vst [vmem:[%s6335_s7 + $0x8] sm:$0xf] %v3590_v32 }
 0x40b   :  { %v4858_v43 = vpop.f32.mrb[4].mxu1 }
 0x40c   :  { %v4884_v61 = vadd.f32 %v4858_v43, %v6246_v63  ;;  %v3474_v3 = vpop.f32.mrb[5].mxu1 }
 0x40d   :  { %v4885_v27 = vadd.f32 %v6246_v63, %v3474_v3  ;;  %v4859_v4 = vpop.f32.mrb[6].mxu1 }
 0x40e   :  { %v3523_v6 = vadd.f32 %v4884_v61, %v6253_v29  ;;  %v4886_v16 = vadd.f32 %v4859_v4, %v6246_v63  ;;  %v3477_v15 = vpop.f32.mrb[7].mxu1 }
 0x40f   :  { %v3521_v5 = vadd.f32 %v4885_v27, %v6253_v29  ;;  %v4887_v11 = vadd.f32 %v6246_v63, %v3477_v15 }
 0x410   :  { %v3531_v21 = vmax.f32 %v3523_v6, 0.0  ;;  %v3524_v37 = vadd.f32 %v4886_v16, %v6253_v29 }
 0x411   :  { %v3529_v9 = vmax.f32 %v3521_v5, 0.0  ;;  %v3522_v19 = vadd.f32 %v4887_v11, %v6253_v29 }
 0x412   :  { %v3539_v23 = vmul.f32 %v3531_v21, %v5762_v34  ;;  %v3532_v28 = vmax.f32 %v3524_v37, 0.0 }
 0x413   :  { %v3537_v57 = vmul.f32 %v3529_v9, %v5767_v38  ;;  %v3530_v35 = vmax.f32 %v3522_v19, 0.0 }
 0x414   :  { %v4174_v48 = vpack.c.bf16 %v3539_v23, %v3539_v23  ;;  %v3540_v39 = vmul.f32 %v3532_v28, %v5771_v40 }
 0x415   :  { %v4172_v41 = vpack.c.bf16 %v3537_v57, %v3537_v57  ;;  %v3538_v25 = vmul.f32 %v3530_v35, %v5778_v53 }
 0x416   :  { %v3627_v63 = vshll.u32 %v4174_v48, 16  ;;  %v3631_v26 = vshrl.u32 %v4174_v48, 16  ;;  %v4175_v42 = vpack.c.bf16 %v3540_v39, %v3540_v39 }
 0x417   :  { %v3607_v24 = vshll.u32 %v4172_v41, 16  ;;  %v3611_v33 = vshrl.u32 %v4172_v41, 16  ;;  %v4173_v29 = vpack.c.bf16 %v3538_v25, %v3538_v25 }
 0x418   :  { %v3629_v18 = vrot.slane %v3627_v63, 5  ;;  %v3633_v34 = vrot.slane %v3631_v26, 4  ;;  %v3637_v44 = vshll.u32 %v4175_v42, 16  ;;  %v3641_v46 = vshrl.u32 %v4175_v42, 16 }
 0x419   :  { %v3609_v50 = vrot.slane %v3607_v24, 5  ;;  %v3613_v38 = vrot.slane %v3611_v33, 4  ;;  %v3617_v13 = vshll.u32 %v4173_v29, 16  ;;  %v3621_v54 = vshrl.u32 %v4173_v29, 16 }
 0x41a   :  { %v3634_v55 = vor.u32 %v3633_v34, %v3629_v18  ;;  %v3639_v40 = vrot.slane %v3637_v44, 5  ;;  %v3643_v20 = vrot.slane %v3641_v46, 4 }
 0x41b   :  { %v3610_v53 = vsel %vm6270_vm10, %v3605_v10, %v3609_v50  ;;  %v3614_v17 = vor.u32 %v3613_v38, %v3609_v50  ;;  %v3619_v7 = vrot.slane %v3617_v13, 5  ;;  %v3623_v8 = vrot.slane %v3621_v54, 4 }
 0x41c   :  { %v3635_v56 = vrot.slane %v3634_v55, 4  ;;  %3663 = vst [vmem:[%s6335_s7 + $0x10] sm:$0xf] %v3610_v53  ;;  %v3644_v22 = vor.u32 %v3643_v20, %v3639_v40 }
 0x41d   :  { %v3615_v60 = vrot.slane %v3614_v17, 4  ;;  %v3624_v58 = vor.u32 %v3623_v8, %v3619_v7 }
 0x41e   :  { %v3640_v52 = vsel %vm6270_vm10, %v3635_v56, %v3639_v40  ;;  %v3645_v0 = vrot.slane %v3644_v22, 4 }
 0x41f   :  { %3666 = vst [vmem:[%s6335_s7 + $0x1c] sm:$0xf] %v3640_v52  ;;  %v3620_v2 = vsel %vm6270_vm10, %v3615_v60, %v3619_v7  ;;  %v3625_v1 = vrot.slane %v3624_v58, 4 }
 0x420   :  { %v3668_v45 = vsel %vm5792_vm12, %v3645_v0, %v3667_v62  ;;  %3664 = vst [vmem:[%s6335_s7 + $0x14] sm:$0xf] %v3620_v2 }
 0x421   :  { %3669 = vst [vmem:[%s6335_s7 + $0x20] sm:$0x7] %v3668_v45  ;;  %v3630_v47 = vsel %vm6270_vm10, %v3625_v1, %v3629_v18 }
 0x422   :  { %3665 = vst [vmem:[%s6335_s7 + $0x18] sm:$0xf] %v3630_v47 }

</bundles_post_ra>
